<compile_context>
chip_gen: v7x
topology: tpu7x:2x2x1
jax: 0.10.0
libtpu: 0.0.40
codegen_flags: <defaults>
</compile_context>

<pallas_src>
import functools

import jax
import jax.numpy as jnp
from jax.experimental import pallas as pl
from jax.experimental.pallas import tpu as pltpu

IN_FEATURES = 1536        # efficientnet-b3 _fc.in_features
HIDDEN = 256
NUM_CLASSES = 3
STEM_CH = 40              # efficientnet-b3 stem width
CIN = 3

BT = 8                    # batch tile (sublane aligned)
KPAD = 128                # padded im2col contraction dim (9*3=27 -> 128)
CPAD = 128                # padded stem channel dim (40 -> 128)
H2 = 2 * HIDDEN           # fused head hidden width (classifier + regressor)
OUT_PAD = 128             # padded fused output width (3 + 1 -> 128)


def _round_up(x, m):
    return ((x + m - 1) // m) * m


# ----------------------------------------------------------------------------
# Fused kernel. Grid = (batch_tiles, patch_tiles); the patch axis is a
# reduction (global average pool) accumulated in a VMEM scratch, the heads run
# once per batch tile on the last patch step.
# ----------------------------------------------------------------------------
def _fused_kernel(patches_ref, wstem_ref, bstem_ref, wproj_ref, bproj_ref,
                  w1_ref, b1_ref, w2_ref, b2_ref,
                  out_ref, pooled_acc, *, tp, p_real):
    p = pl.program_id(1)
    n_p = pl.num_programs(1)

    @pl.when(p == 0)
    def _():
        pooled_acc[...] = jnp.zeros_like(pooled_acc)

    # --- stem conv as one big 2D MXU matmul over this patch tile -----------
    tile = patches_ref[...]                                # [BT, TP, KPAD] bf16
    bt_, tp_, kpad_ = tile.shape
    h = jnp.dot(tile.reshape(bt_ * tp_, kpad_), wstem_ref[...],
                preferred_element_type=jnp.float32)        # [BT*TP, CPAD] f32
    h = h + bstem_ref[...]
    h = h * jax.nn.sigmoid(h)                              # swish (f32)

    # mask zero-padded patch rows so they don't corrupt the pooled mean
    row = p * tp + jax.lax.broadcasted_iota(jnp.int32, (tp_, 1), 0)  # [TP,1]
    valid = (row < p_real).astype(jnp.float32)                        # [TP,1]
    h3 = h.reshape(bt_, tp_, -1) * valid[None, :, :]       # [BT, TP, CPAD]
    pooled_acc[...] += jnp.sum(h3, axis=1)                 # [BT, CPAD]

    # --- finalize: pool -> projection -> fused heads ------------------------
    @pl.when(p == n_p - 1)
    def _():
        pooled = pooled_acc[...] * (1.0 / float(p_real))   # global avg pool
        f = jnp.dot(pooled.astype(jnp.bfloat16), wproj_ref[...],
                    preferred_element_type=jnp.float32) + bproj_ref[...]
        f = f * jax.nn.sigmoid(f)                          # swish -> shared feat
        h1 = jnp.dot(f.astype(jnp.bfloat16), w1_ref[...],
                     preferred_element_type=jnp.float32) + b1_ref[...]
        h1 = jnp.maximum(h1, 0.0)                          # ReLU (dropout = id)
        out_ref[...] = jnp.dot(h1.astype(jnp.bfloat16), w2_ref[...],
                               preferred_element_type=jnp.float32) + b2_ref[...]


def _im2col_3x3_s2(x_nhwc):
    """3x3 / stride-2 / pad-1 patches. Returns [B, Ho*Wo, 9*Cin] (even H, W)."""
    B, H, W, C = x_nhwc.shape
    xp = jnp.pad(x_nhwc, ((0, 0), (1, 1), (1, 1), (0, 0)))
    Ho, Wo = H // 2, W // 2
    cols = []
    for kh in range(3):
        for kw in range(3):
            cols.append(xp[:, kh:kh + H:2, kw:kw + W:2, :])   # [B, Ho, Wo, C]
    patches = jnp.concatenate(cols, axis=-1)                  # [B, Ho, Wo, 9C]
    return patches.reshape(B, Ho * Wo, 9 * C)


def init_params(key):
    ks = jax.random.split(key, 8)

    def w(k, shape, fan_in):
        return jax.random.normal(k, shape, jnp.float32) / jnp.sqrt(fan_in)

    return {
        "wstem": w(ks[0], (9 * CIN, STEM_CH), 9 * CIN),
        "bstem": jnp.zeros((1, STEM_CH), jnp.float32),
        "wproj": w(ks[1], (STEM_CH, IN_FEATURES), STEM_CH),
        "bproj": jnp.zeros((1, IN_FEATURES), jnp.float32),
        "wc1": w(ks[2], (IN_FEATURES, HIDDEN), IN_FEATURES),
        "bc1": jnp.zeros((1, HIDDEN), jnp.float32),
        "wc2": w(ks[3], (HIDDEN, NUM_CLASSES), HIDDEN),
        "bc2": jnp.zeros((1, NUM_CLASSES), jnp.float32),
        "wr1": w(ks[4], (IN_FEATURES, HIDDEN), IN_FEATURES),
        "br1": jnp.zeros((1, HIDDEN), jnp.float32),
        "wr2": w(ks[5], (HIDDEN, 1), HIDDEN),
        "br2": jnp.zeros((1, 1), jnp.float32),
    }


@jax.jit
def multitask_forward(x_nchw, params):
    """x_nchw: [B, 3, H, W] float32 (PyTorch NCHW). Returns (cls[B,3], reg[B,1])."""
    B = x_nchw.shape[0]
    x_nhwc = jnp.transpose(x_nchw, (0, 2, 3, 1))
    patches = _im2col_3x3_s2(x_nhwc)                     # [B, P, 27] f32
    _, P, K = patches.shape

    # --- pad to lane/sublane-friendly shapes --------------------------------
    TP = min(512, _round_up(P, 8))                       # patch tile (rows)
    P_pad = _round_up(P, TP)
    B_pad = _round_up(B, BT)
    patches = jnp.pad(patches, ((0, B_pad - B), (0, P_pad - P), (0, KPAD - K)))
    patches = patches.astype(jnp.bfloat16)               # [B_pad, P_pad, 128]

    # --- fuse / pad weights: bf16 matmul operands, f32 biases ---------------
    wstem = jnp.pad(params["wstem"],
                    ((0, KPAD - K), (0, CPAD - STEM_CH))).astype(jnp.bfloat16)
    bstem = jnp.pad(params["bstem"], ((0, 0), (0, CPAD - STEM_CH)))
    wproj = jnp.pad(params["wproj"],
                    ((0, CPAD - STEM_CH), (0, 0))).astype(jnp.bfloat16)
    bproj = params["bproj"]
    w1 = jnp.concatenate([params["wc1"], params["wr1"]], axis=1).astype(
        jnp.bfloat16)                                     # [1536, 512]
    b1 = jnp.concatenate([params["bc1"], params["br1"]], axis=1)   # [1, 512]
    w2 = jnp.zeros((H2, OUT_PAD), jnp.float32)
    w2 = w2.at[:HIDDEN, :NUM_CLASSES].set(params["wc2"])
    w2 = w2.at[HIDDEN:, NUM_CLASSES:NUM_CLASSES + 1].set(params["wr2"])
    w2 = w2.astype(jnp.bfloat16)                          # block-diag [512,128]
    b2 = jnp.zeros((1, OUT_PAD), jnp.float32)
    b2 = b2.at[:, :NUM_CLASSES].set(params["bc2"])
    b2 = b2.at[:, NUM_CLASSES:NUM_CLASSES + 1].set(params["br2"])

    n_bt = B_pad // BT
    n_pt = P_pad // TP

    const = lambda bt, p: (0, 0)
    flops = int(2 * B_pad * P_pad * KPAD * CPAD
                + 2 * B_pad * (CPAD * IN_FEATURES + IN_FEATURES * H2
                               + H2 * OUT_PAD))
    transcendentals = int(B_pad * P_pad * CPAD + B_pad * IN_FEATURES)
    bytes_accessed = int(
        patches.size * 2 + wstem.size * 2 + wproj.size * 2 + w1.size * 2
        + w2.size * 2 + (bstem.size + bproj.size + b1.size + b2.size) * 4
        + B_pad * OUT_PAD * 4)

    out = pl.pallas_call(
        functools.partial(_fused_kernel, tp=TP, p_real=P),
        out_shape=jax.ShapeDtypeStruct((B_pad, OUT_PAD), jnp.float32),
        grid_spec=pltpu.PrefetchScalarGridSpec(
            num_scalar_prefetch=0,
            grid=(n_bt, n_pt),
            in_specs=[
                pl.BlockSpec((BT, TP, KPAD), lambda bt, p: (bt, p, 0)),
                pl.BlockSpec((KPAD, CPAD), const),
                pl.BlockSpec((1, CPAD), const),
                pl.BlockSpec((CPAD, IN_FEATURES), const),
                pl.BlockSpec((1, IN_FEATURES), const),
                pl.BlockSpec((IN_FEATURES, H2), const),
                pl.BlockSpec((1, H2), const),
                pl.BlockSpec((H2, OUT_PAD), const),
                pl.BlockSpec((1, OUT_PAD), const),
            ],
            out_specs=pl.BlockSpec((BT, OUT_PAD), lambda bt, p: (bt, 0)),
            scratch_shapes=[pltpu.VMEM((BT, CPAD), jnp.float32)],
        ),
        compiler_params=pltpu.CompilerParams(
            dimension_semantics=("parallel", "arbitrary"),
            vmem_limit_bytes=32 * 1024 * 1024),
        cost_estimate=pl.CostEstimate(flops=flops,
                                      transcendentals=transcendentals,
                                      bytes_accessed=bytes_accessed),
    )(patches, wstem, bstem, wproj, bproj, w1, b1, w2, b2)

    fruit_output = out[:B, :NUM_CLASSES]
    freshness_output = out[:B, NUM_CLASSES:NUM_CLASSES + 1]
    return fruit_output, freshness_output


def _reference_forward(x_nchw, params):
    """Pure-JAX f32 reference of the same math (for validation)."""
    x = jnp.transpose(x_nchw, (0, 2, 3, 1))
    patches = _im2col_3x3_s2(x)
    h = jnp.einsum("bpk,kc->bpc", patches, params["wstem"]) + params["bstem"]
    h = h * jax.nn.sigmoid(h)
    pooled = jnp.mean(h, axis=1)
    f = pooled @ params["wproj"] + params["bproj"]
    f = f * jax.nn.sigmoid(f)
    hc = jnp.maximum(f @ params["wc1"] + params["bc1"], 0.0)
    cls = hc @ params["wc2"] + params["bc2"]
    hr = jnp.maximum(f @ params["wr1"] + params["br1"], 0.0)
    reg = hr @ params["wr2"] + params["br2"]
    return cls, reg


if __name__ == "__main__":
    key = jax.random.PRNGKey(0)
    k_x, k_p = jax.random.split(key)
    # Small, module-consistent shapes: batch=2, 3 input channels, 32x32 image.
    x = jax.random.normal(k_x, (2, CIN, 32, 32), jnp.float32)
    params = init_params(k_p)

    fruit_output, freshness_output = multitask_forward(x, params)
    jax.block_until_ready((fruit_output, freshness_output))

    assert fruit_output.shape == (2, NUM_CLASSES)
    assert freshness_output.shape == (2, 1)

    ref_cls, ref_reg = _reference_forward(x, params)
    assert bool(jnp.allclose(fruit_output, ref_cls, rtol=0.1, atol=0.03)), \
        "classifier output mismatch vs f32 reference"
    assert bool(jnp.allclose(freshness_output, ref_reg, rtol=0.1, atol=0.03)), \
        "regressor output mismatch vs f32 reference"

    print("KERNEL_OK")
</pallas_src>

<mosaic_0001>
module attributes {stable_mosaic.version = 11 : i64} {
  func.func @_fused_kernel(%arg0: i32, %arg1: i32, %arg2: memref<8x256x128xbf16, #tpu.memory_space<vmem>>, %arg3: memref<128x128xbf16, #tpu.memory_space<vmem>>, %arg4: memref<1x128xf32, #tpu.memory_space<vmem>>, %arg5: memref<128x1536xbf16, #tpu.memory_space<vmem>>, %arg6: memref<1x1536xf32, #tpu.memory_space<vmem>>, %arg7: memref<1536x512xbf16, #tpu.memory_space<vmem>>, %arg8: memref<1x512xf32, #tpu.memory_space<vmem>>, %arg9: memref<512x128xbf16, #tpu.memory_space<vmem>>, %arg10: memref<1x128xf32, #tpu.memory_space<vmem>>, %arg11: memref<8x128xf32, #tpu.memory_space<vmem>>, %arg12: memref<8x128xf32, #tpu.memory_space<vmem>>) attributes {dimension_semantics = [#tpu.dimension_semantics<parallel>, #tpu.dimension_semantics<arbitrary>], iteration_bounds = array<i64: 1, 1>, scalar_prefetch = 0 : i64, scratch_operands = 1 : i64, tpu.core_type = #tpu.core_type<tc>, window_params = [{transform_indices = @transform_0, window_bounds = array<i64: 8, 256, 128>}, {pipeline_mode = #tpu.pipeline_mode<synchronous>, transform_indices = @transform_1, window_bounds = array<i64: 128, 128>}, {pipeline_mode = #tpu.pipeline_mode<synchronous>, transform_indices = @transform_2, window_bounds = array<i64: 1, 128>}, {pipeline_mode = #tpu.pipeline_mode<synchronous>, transform_indices = @transform_3, window_bounds = array<i64: 128, 1536>}, {pipeline_mode = #tpu.pipeline_mode<synchronous>, transform_indices = @transform_4, window_bounds = array<i64: 1, 1536>}, {pipeline_mode = #tpu.pipeline_mode<synchronous>, transform_indices = @transform_5, window_bounds = array<i64: 1536, 512>}, {pipeline_mode = #tpu.pipeline_mode<synchronous>, transform_indices = @transform_6, window_bounds = array<i64: 1, 512>}, {pipeline_mode = #tpu.pipeline_mode<synchronous>, transform_indices = @transform_7, window_bounds = array<i64: 512, 128>}, {pipeline_mode = #tpu.pipeline_mode<synchronous>, transform_indices = @transform_8, window_bounds = array<i64: 1, 128>}, {transform_indices = @transform_9, window_bounds = array<i64: 8, 128>}]} {
    %c0_i32 = arith.constant 0 : i32
    %0 = arith.cmpi eq, %arg1, %c0_i32 : i32
    %1 = arith.extui %0 : i1 to i32
    %c0_i32_0 = arith.constant 0 : i32
    %2 = arith.cmpi ne, %1, %c0_i32_0 : i32
    scf.if %2 {
      %cst_16 = arith.constant 0.000000e+00 : f32
      %35 = vector.broadcast %cst_16 : f32 to vector<8x128xf32>
      %c0_17 = arith.constant 0 : index
      %c0_18 = arith.constant 0 : index
      %36 = vector.load %arg12[%c0_17, %c0_18] : memref<8x128xf32, #tpu.memory_space<vmem>>, vector<8x128xf32>
      tpu.vector_store %arg12[%c0_17, %c0_18], %35 {strides = array<i32>} : memref<8x128xf32, #tpu.memory_space<vmem>>, vector<8x128xf32>,
    } else {
    }
    %c0 = arith.constant 0 : index
    %c0_1 = arith.constant 0 : index
    %c0_2 = arith.constant 0 : index
    %3 = vector.load %arg2[%c0, %c0_1, %c0_2] : memref<8x256x128xbf16, #tpu.memory_space<vmem>>, vector<8x256x128xbf16>
    %4 = vector.shape_cast %3 : vector<8x256x128xbf16> to vector<2048x128xbf16>
    %c0_3 = arith.constant 0 : index
    %c0_4 = arith.constant 0 : index
    %5 = vector.load %arg3[%c0_3, %c0_4] : memref<128x128xbf16, #tpu.memory_space<vmem>>, vector<128x128xbf16>
    %cst = arith.constant dense<0.000000e+00> : vector<2048x128xf32>
    %6 = tpu.matmul %4, %5, %cst {dimension_numbers = #tpu.dot_dimension_numbers<[1], [0], [0], [1], [0, 0, 1, 1], [], []>} : vector<2048x128xbf16>, vector<128x128xbf16>, vector<2048x128xf32> -> vector<2048x128xf32>
    %c0_5 = arith.constant 0 : index
    %c0_6 = arith.constant 0 : index
    %7 = vector.load %arg4[%c0_5, %c0_6] : memref<1x128xf32, #tpu.memory_space<vmem>>, vector<1x128xf32>
    %8 = vector.broadcast %7 : vector<1x128xf32> to vector<2048x128xf32>
    %9 = arith.addf %6, %8 : vector<2048x128xf32>
    %10 = arith.negf %9 : vector<2048x128xf32>
    %11 = math.exp %10 : vector<2048x128xf32>
    %cst_7 = arith.constant 1.000000e+00 : f32
    %12 = vector.broadcast %cst_7 : f32 to vector<2048x128xf32>
    %13 = arith.addf %12, %11 : vector<2048x128xf32>
    %14 = arith.divf %12, %13 : vector<2048x128xf32>
    %15 = arith.mulf %9, %14 : vector<2048x128xf32>
    %c256_i32 = arith.constant 256 : i32
    %16 = arith.muli %arg1, %c256_i32 : i32
    %17 = tpu.iota {dimensions = array<i32: 0>} : vector<256x1xi32>
    %18 = vector.broadcast %16 : i32 to vector<256x1xi32>
    %19 = arith.addi %18, %17 : vector<256x1xi32>
    %c256_i32_8 = arith.constant 256 : i32
    %20 = vector.broadcast %c256_i32_8 : i32 to vector<256x1xi32>
    %21 = arith.cmpi slt, %19, %20 : vector<256x1xi32>
    %22 = arith.extui %21 : vector<256x1xi1> to vector<256x1xi32>
    %23 = arith.sitofp %22 : vector<256x1xi32> to vector<256x1xf32>
    %24 = vector.shape_cast %15 : vector<2048x128xf32> to vector<8x256x128xf32>
    %25 = vector.shape_cast %23 : vector<256x1xf32> to vector<1x256x1xf32>
    %26 = vector.broadcast %25 : vector<1x256x1xf32> to vector<8x256x128xf32>
    %27 = arith.mulf %24, %26 : vector<8x256x128xf32>
    %c0_9 = arith.constant 0 : index
    %c0_10 = arith.constant 0 : index
    %28 = vector.load %arg12[%c0_9, %c0_10] : memref<8x128xf32, #tpu.memory_space<vmem>>, vector<8x128xf32>
    %cst_11 = arith.constant dense<0.000000e+00> : vector<8x128xf32>
    %29 = vector.multi_reduction <add>, %27, %cst_11 [1] : vector<8x256x128xf32> to vector<8x128xf32>
    %30 = arith.addf %28, %29 : vector<8x128xf32>
    %c0_12 = arith.constant 0 : index
    %c0_13 = arith.constant 0 : index
    %31 = vector.load %arg12[%c0_12, %c0_13] : memref<8x128xf32, #tpu.memory_space<vmem>>, vector<8x128xf32>
    tpu.vector_store %arg12[%c0_12, %c0_13], %30 {strides = array<i32>} : memref<8x128xf32, #tpu.memory_space<vmem>>, vector<8x128xf32>,
    %c0_i32_14 = arith.constant 0 : i32
    %32 = arith.cmpi eq, %arg1, %c0_i32_14 : i32
    %33 = arith.extui %32 : i1 to i32
    %c0_i32_15 = arith.constant 0 : i32
    %34 = arith.cmpi ne, %33, %c0_i32_15 : i32
    scf.if %34 {
      %c0_16 = arith.constant 0 : index
      %c0_17 = arith.constant 0 : index
      %35 = vector.load %arg12[%c0_16, %c0_17] : memref<8x128xf32, #tpu.memory_space<vmem>>, vector<8x128xf32>
      %cst_18 = arith.constant 3.906250e-03 : f32
      %36 = vector.broadcast %cst_18 : f32 to vector<8x128xf32>
      %37 = arith.mulf %35, %36 : vector<8x128xf32>
      %38 = arith.truncf %37 : vector<8x128xf32> to vector<8x128xbf16>
      %c0_19 = arith.constant 0 : index
      %c0_20 = arith.constant 0 : index
      %39 = vector.load %arg5[%c0_19, %c0_20] : memref<128x1536xbf16, #tpu.memory_space<vmem>>, vector<128x1536xbf16>
      %cst_21 = arith.constant dense<0.000000e+00> : vector<8x1536xf32>
      %40 = tpu.matmul %38, %39, %cst_21 {dimension_numbers = #tpu.dot_dimension_numbers<[1], [0], [0], [1], [0, 0, 1, 1], [], []>} : vector<8x128xbf16>, vector<128x1536xbf16>, vector<8x1536xf32> -> vector<8x1536xf32>
      %c0_22 = arith.constant 0 : index
      %c0_23 = arith.constant 0 : index
      %41 = vector.load %arg6[%c0_22, %c0_23] : memref<1x1536xf32, #tpu.memory_space<vmem>>, vector<1x1536xf32>
      %42 = vector.broadcast %41 : vector<1x1536xf32> to vector<8x1536xf32>
      %43 = arith.addf %40, %42 : vector<8x1536xf32>
      %44 = arith.negf %43 : vector<8x1536xf32>
      %45 = math.exp %44 : vector<8x1536xf32>
      %cst_24 = arith.constant 1.000000e+00 : f32
      %46 = vector.broadcast %cst_24 : f32 to vector<8x1536xf32>
      %47 = arith.addf %46, %45 : vector<8x1536xf32>
      %48 = arith.divf %46, %47 : vector<8x1536xf32>
      %49 = arith.mulf %43, %48 : vector<8x1536xf32>
      %50 = arith.truncf %49 : vector<8x1536xf32> to vector<8x1536xbf16>
      %c0_25 = arith.constant 0 : index
      %c0_26 = arith.constant 0 : index
      %51 = vector.load %arg7[%c0_25, %c0_26] : memref<1536x512xbf16, #tpu.memory_space<vmem>>, vector<1536x512xbf16>
      %cst_27 = arith.constant dense<0.000000e+00> : vector<8x512xf32>
      %52 = tpu.matmul %50, %51, %cst_27 {dimension_numbers = #tpu.dot_dimension_numbers<[1], [0], [0], [1], [0, 0, 1, 1], [], []>} : vector<8x1536xbf16>, vector<1536x512xbf16>, vector<8x512xf32> -> vector<8x512xf32>
      %c0_28 = arith.constant 0 : index
      %c0_29 = arith.constant 0 : index
      %53 = vector.load %arg8[%c0_28, %c0_29] : memref<1x512xf32, #tpu.memory_space<vmem>>, vector<1x512xf32>
      %54 = vector.broadcast %53 : vector<1x512xf32> to vector<8x512xf32>
      %55 = arith.addf %52, %54 : vector<8x512xf32>
      %cst_30 = arith.constant 0.000000e+00 : f32
      %56 = vector.broadcast %cst_30 : f32 to vector<8x512xf32>
      %57 = arith.maximumf %55, %56 : vector<8x512xf32>
      %58 = arith.truncf %57 : vector<8x512xf32> to vector<8x512xbf16>
      %c0_31 = arith.constant 0 : index
      %c0_32 = arith.constant 0 : index
      %59 = vector.load %arg9[%c0_31, %c0_32] : memref<512x128xbf16, #tpu.memory_space<vmem>>, vector<512x128xbf16>
      %cst_33 = arith.constant dense<0.000000e+00> : vector<8x128xf32>
      %60 = tpu.matmul %58, %59, %cst_33 {dimension_numbers = #tpu.dot_dimension_numbers<[1], [0], [0], [1], [0, 0, 1, 1], [], []>} : vector<8x512xbf16>, vector<512x128xbf16>, vector<8x128xf32> -> vector<8x128xf32>
      %c0_34 = arith.constant 0 : index
      %c0_35 = arith.constant 0 : index
      %61 = vector.load %arg10[%c0_34, %c0_35] : memref<1x128xf32, #tpu.memory_space<vmem>>, vector<1x128xf32>
      %62 = vector.broadcast %61 : vector<1x128xf32> to vector<8x128xf32>
      %63 = arith.addf %60, %62 : vector<8x128xf32>
      %c0_36 = arith.constant 0 : index
      %c0_37 = arith.constant 0 : index
      %64 = vector.load %arg11[%c0_36, %c0_37] : memref<8x128xf32, #tpu.memory_space<vmem>>, vector<8x128xf32>
      tpu.vector_store %arg11[%c0_36, %c0_37], %63 {strides = array<i32>} : memref<8x128xf32, #tpu.memory_space<vmem>>, vector<8x128xf32>,
    } else {
    }
    return
  }
  func.func @transform_0(%arg0: i32, %arg1: i32) -> (i32, i32, i32) {
    %c0_i32 = arith.constant 0 : i32
    %c0_i32_0 = arith.constant 0 : i32
    return %arg0, %arg1, %c0_i32 : i32, i32, i32
  }
  func.func @transform_1(%arg0: i32, %arg1: i32) -> (i32, i32) {
    %c0_i32 = arith.constant 0 : i32
    %c0_i32_0 = arith.constant 0 : i32
    %c0_i32_1 = arith.constant 0 : i32
    return %c0_i32, %c0_i32_0 : i32, i32
  }
  func.func @transform_2(%arg0: i32, %arg1: i32) -> (i32, i32) {
    %c0_i32 = arith.constant 0 : i32
    %c0_i32_0 = arith.constant 0 : i32
    %c0_i32_1 = arith.constant 0 : i32
    return %c0_i32, %c0_i32_0 : i32, i32
  }
  func.func @transform_3(%arg0: i32, %arg1: i32) -> (i32, i32) {
    %c0_i32 = arith.constant 0 : i32
    %c0_i32_0 = arith.constant 0 : i32
    %c0_i32_1 = arith.constant 0 : i32
    return %c0_i32, %c0_i32_0 : i32, i32
  }
  func.func @transform_4(%arg0: i32, %arg1: i32) -> (i32, i32) {
    %c0_i32 = arith.constant 0 : i32
    %c0_i32_0 = arith.constant 0 : i32
    %c0_i32_1 = arith.constant 0 : i32
    return %c0_i32, %c0_i32_0 : i32, i32
  }
  func.func @transform_5(%arg0: i32, %arg1: i32) -> (i32, i32) {
    %c0_i32 = arith.constant 0 : i32
    %c0_i32_0 = arith.constant 0 : i32
    %c0_i32_1 = arith.constant 0 : i32
    return %c0_i32, %c0_i32_0 : i32, i32
  }
  func.func @transform_6(%arg0: i32, %arg1: i32) -> (i32, i32) {
    %c0_i32 = arith.constant 0 : i32
    %c0_i32_0 = arith.constant 0 : i32
    %c0_i32_1 = arith.constant 0 : i32
    return %c0_i32, %c0_i32_0 : i32, i32
  }
  func.func @transform_7(%arg0: i32, %arg1: i32) -> (i32, i32) {
    %c0_i32 = arith.constant 0 : i32
    %c0_i32_0 = arith.constant 0 : i32
    %c0_i32_1 = arith.constant 0 : i32
    return %c0_i32, %c0_i32_0 : i32, i32
  }
  func.func @transform_8(%arg0: i32, %arg1: i32) -> (i32, i32) {
    %c0_i32 = arith.constant 0 : i32
    %c0_i32_0 = arith.constant 0 : i32
    %c0_i32_1 = arith.constant 0 : i32
    return %c0_i32, %c0_i32_0 : i32, i32
  }
  func.func @transform_9(%arg0: i32, %arg1: i32) -> (i32, i32) {
    %c0_i32 = arith.constant 0 : i32
    %c0_i32_0 = arith.constant 0 : i32
    return %arg0, %c0_i32 : i32, i32
  }
}

</mosaic_0001>

<bundles_post_ra>
// kernel: multitask_forward.1
= control target key start
LH: loop header
LB: loop body
LE: loop exit
PB: predicated region body
PF: predicated region fallthrough
CT: control target
= control target key end

     0   :  { %vm4706_vm0 = vcmask 1041409   ;;  %vm4708_vm1 = vcmask 1042434   ;;  %vm4710_vm2 = vcmask 1043459   ;;  %vm4712_vm3 = vcmask 1044484   ;;  %s16086_s1 = inlined_call_operand.vmem [shape: bf16[128,128], index: 1, kind: input, shape index: {}]   ;;  %s16087_s0 = inlined_call_operand.vmem [shape: bf16[8,256,128], index: 0, kind: input, shape index: {}]   ;;  %s16088_s2 = inlined_call_operand.vmem [shape: f32[1,128], index: 2, kind: input, shape index: {}]   ;;  %s16089_s5 = inlined_call_operand.vmem [shape: bf16[1536,512], index: 5, kind: input, shape index: {}]   ;;  %s16090_s3 = inlined_call_operand.vmem [shape: bf16[128,1536], index: 3, kind: input, shape index: {}]   ;;  %s16091_s4 = inlined_call_operand.vmem [shape: f32[1,1536], index: 4, kind: input, shape index: {}]   ;;  %s16092_s7 = inlined_call_operand.vmem [shape: bf16[512,128], index: 7, kind: input, shape index: {}]   ;;  %s16093_s6 = inlined_call_operand.vmem [shape: f32[1,512], index: 6, kind: input, shape index: {}]   ;;  %s16094_s8 = inlined_call_operand.vmem [shape: f32[1,128], index: 8, kind: input, shape index: {}]   ;;  %s16095_s9 = inlined_call_operand.vmem [shape: f32[8,128], index: 9, kind: output, shape index: {}]  }
   0x1   :  { %v10316_v0 = vld [vmem:[%s16086_s1] sm:$0xff]   ;;  %v10317_v1 = vld [vmem:[%s16086_s1 + $0x8] sm:$0xff]   ;;  %v10318_v2 = vld [vmem:[%s16086_s1 + $0x10] sm:$0xff]   ;;  %vm4714_vm4 = vcmask 1045509   ;;  %vm4716_vm5 = vcmask 1046534   ;;  %vm4718_vm6 = vcmask 1047559  }
   0x2   :  { %9983 = vmatprep.subr.bf16.mxu0 %v10316_v0  ;;  %10255 = vmatprep.subr.bf16.mxu1 %v10316_v0  ;;  %v10319_v3 = vld [vmem:[%s16086_s1 + $0x18] sm:$0xff]   ;;  %v10324_v4 = vld [vmem:[%s16087_s0] sm:$0xff]   ;;  %v10321_v6 = vld [vmem:[%s16086_s1 + $0x28] sm:$0xff]  }
   0x3   :  { %9984 = vmatpush3.bf16.msra.mxu0 %v10316_v0  ;;  %10263 = vmatpush3.bf16.msra.mxu1 %v10316_v0  ;;  %v10320_v5 = vld [vmem:[%s16086_s1 + $0x20] sm:$0xff]   ;;  %v10322_v7 = vld [vmem:[%s16086_s1 + $0x30] sm:$0xff]   ;;  %v10323_v8 = vld [vmem:[%s16086_s1 + $0x38] sm:$0xff]  }
   0x4   :  { %9985 = vmatprep.subr.bf16.mxu0 %v10317_v1  ;;  %10256 = vmatprep.subr.bf16.mxu1 %v10317_v1  ;;  %v10325_v9 = vld [vmem:[%s16087_s0 + $0x8] sm:$0xff]   ;;  %v10326_v10 = vld [vmem:[%s16087_s0 + $0x10] sm:$0xff]   ;;  %v10327_v11 = vld [vmem:[%s16087_s0 + $0x18] sm:$0xff]  }
   0x5   :  { %9999 = vmatprep.mubr.bf16.mxu0 %v10324_v4  ;;  %v10328_v12 = vld [vmem:[%s16087_s0 + $0x20] sm:$0xff]   ;;  %v10329_v13 = vld [vmem:[%s16087_s0 + $0x28] sm:$0xff]   ;;  %v10330_v14 = vld [vmem:[%s16087_s0 + $0x30] sm:$0xff]  }
   0x6   :  { %v10331_v15 = vld [vmem:[%s16087_s0 + $0x38] sm:$0xff]   ;;  %v10332_v16 = vld [vmem:[%s16087_s0 + $0x40] sm:$0xff]   ;;  %v10333_v17 = vld [vmem:[%s16087_s0 + $0x48] sm:$0xff]  }
   0x7   :  { %9986 = vmatpush3.bf16.msra.mxu0 %v10317_v1  ;;  %10264 = vmatpush3.bf16.msra.mxu1 %v10317_v1  ;;  %v10334_v18 = vld [vmem:[%s16087_s0 + $0x50] sm:$0xff]   ;;  %v10335_v19 = vld [vmem:[%s16087_s0 + $0x58] sm:$0xff]   ;;  %v10336_v20 = vld [vmem:[%s16087_s0 + $0x60] sm:$0xff]  }
   0x8   :  { %9987 = vmatprep.subr.bf16.mxu0 %v10318_v2  ;;  %10257 = vmatprep.subr.bf16.mxu1 %v10318_v2  ;;  %v10337_v21 = vld [vmem:[%s16087_s0 + $0x68] sm:$0xff]   ;;  %v10338_v22 = vld [vmem:[%s16087_s0 + $0x70] sm:$0xff]   ;;  %v10339_v23 = vld [vmem:[%s16087_s0 + $0x78] sm:$0xff]  }
   0x9   :  { %v10340_v24 = vld [vmem:[%s16087_s0 + $0x80] sm:$0xff]   ;;  %v10341_v25 = vld [vmem:[%s16087_s0 + $0x88] sm:$0xff]   ;;  %v10342_v26 = vld [vmem:[%s16087_s0 + $0x90] sm:$0xff]  }
   0xa   :  { %v10343_v27 = vld [vmem:[%s16087_s0 + $0x98] sm:$0xff]   ;;  %v10344_v28 = vld [vmem:[%s16087_s0 + $0xa0] sm:$0xff]   ;;  %v10345_v29 = vld [vmem:[%s16087_s0 + $0xa8] sm:$0xff]  }
   0xb   :  { %9988 = vmatpush3.bf16.msra.mxu0 %v10318_v2  ;;  %10265 = vmatpush3.bf16.msra.mxu1 %v10318_v2  ;;  %v10346_v30 = vld [vmem:[%s16087_s0 + $0xb0] sm:$0xff]   ;;  %v10347_v31 = vld [vmem:[%s16087_s0 + $0xb8] sm:$0xff]   ;;  %v10348_v32 = vld [vmem:[%s16087_s0 + $0xc0] sm:$0xff]  }
   0xc   :  { %9989 = vmatprep.subr.bf16.mxu0 %v10319_v3  ;;  %10258 = vmatprep.subr.bf16.mxu1 %v10319_v3  ;;  %v10349_v33 = vld [vmem:[%s16087_s0 + $0xc8] sm:$0xff]   ;;  %v10350_v34 = vld [vmem:[%s16087_s0 + $0xd0] sm:$0xff]   ;;  %v10351_v35 = vld [vmem:[%s16087_s0 + $0xd8] sm:$0xff]  }
   0xd   :  { %v10352_v36 = vld [vmem:[%s16087_s0 + $0xe0] sm:$0xff]   ;;  %v10353_v37 = vld [vmem:[%s16087_s0 + $0xe8] sm:$0xff]   ;;  %v10354_v38 = vld [vmem:[%s16087_s0 + $0xf0] sm:$0xff]  }
   0xe   :  { %v10355_v39 = vld [vmem:[%s16087_s0 + $0xf8] sm:$0xff]   ;;  %v10356_v40 = vld [vmem:[%s16087_s0 + $0x100] sm:$0xff]   ;;  %v10357_v41 = vld [vmem:[%s16087_s0 + $0x108] sm:$0xff]  }
   0xf   :  { %9990 = vmatpush3.bf16.msra.mxu0 %v10319_v3  ;;  %10266 = vmatpush3.bf16.msra.mxu1 %v10319_v3  ;;  %v10358_v42 = vld [vmem:[%s16087_s0 + $0x110] sm:$0xff]   ;;  %v10359_v43 = vld [vmem:[%s16087_s0 + $0x118] sm:$0xff]   ;;  %v10360_v44 = vld [vmem:[%s16087_s0 + $0x120] sm:$0xff]  }
  0x10   :  { %9991 = vmatprep.subr.bf16.mxu0 %v10320_v5  ;;  %10259 = vmatprep.subr.bf16.mxu1 %v10320_v5  ;;  %v10361_v45 = vld [vmem:[%s16087_s0 + $0x128] sm:$0xff]   ;;  %v10362_v46 = vld [vmem:[%s16087_s0 + $0x130] sm:$0xff]   ;;  %v10363_v47 = vld [vmem:[%s16087_s0 + $0x138] sm:$0xff]  }
  0x11   :  { %v10364_v48 = vld [vmem:[%s16087_s0 + $0x140] sm:$0xff]   ;;  %v10365_v49 = vld [vmem:[%s16087_s0 + $0x148] sm:$0xff]   ;;  %v10366_v50 = vld [vmem:[%s16087_s0 + $0x150] sm:$0xff]  }
  0x12   :  { %v10367_v51 = vld [vmem:[%s16087_s0 + $0x158] sm:$0xff]   ;;  %v10368_v52 = vld [vmem:[%s16087_s0 + $0x160] sm:$0xff]   ;;  %v10369_v54 = vld [vmem:[%s16087_s0 + $0x168] sm:$0xff]  }
  0x13   :  { %9992 = vmatpush3.bf16.msra.mxu0 %v10320_v5  ;;  %10267 = vmatpush3.bf16.msra.mxu1 %v10320_v5  ;;  %v10400_v53 = vld [vmem:[%s16087_s0 + $0x320] sm:$0xff]   ;;  %v10401_v55 = vld [vmem:[%s16087_s0 + $0x328] sm:$0xff]   ;;  %v10370_v56 = vld [vmem:[%s16087_s0 + $0x170] sm:$0xff]  }
  0x14   :  { %9993 = vmatprep.subr.bf16.mxu0 %v10321_v6  ;;  %10260 = vmatprep.subr.bf16.mxu1 %v10321_v6  ;;  %v10371_v57 = vld [vmem:[%s16087_s0 + $0x178] sm:$0xff]   ;;  %v10404_v58 = vld [vmem:[%s16087_s0 + $0x330] sm:$0xff]   ;;  %v10372_v59 = vld [vmem:[%s16087_s0 + $0x180] sm:$0xff]  }
  0x15   :  { %10199 = vmatprep.mubr.bf16.mxu1 %v10400_v53  ;;  %v10405_v60 = vld [vmem:[%s16087_s0 + $0x338] sm:$0xff]   ;;  %v10373_v61 = vld [vmem:[%s16087_s0 + $0x188] sm:$0xff]   ;;  %v10408_v62 = vld [vmem:[%s16087_s0 + $0x340] sm:$0xff]  }
  0x16   :  { %v10374_v63 = vld [vmem:[%s16087_s0 + $0x190] sm:$0xff]   ;;  %v10409_v0 = vld [vmem:[%s16087_s0 + $0x348] sm:$0xff]   ;;  %v10375_v1 = vld [vmem:[%s16087_s0 + $0x198] sm:$0xff]  }
  0x17   :  { %9994 = vmatpush3.bf16.msra.mxu0 %v10321_v6  ;;  %10268 = vmatpush3.bf16.msra.mxu1 %v10321_v6  ;;  %v10412_v2 = vld [vmem:[%s16087_s0 + $0x350] sm:$0xff]   ;;  %v10376_v3 = vld [vmem:[%s16087_s0 + $0x1a0] sm:$0xff]   ;;  %v10413_v4 = vld [vmem:[%s16087_s0 + $0x358] sm:$0xff]  }
  0x18   :  { %9995 = vmatprep.subr.bf16.mxu0 %v10322_v7  ;;  %10261 = vmatprep.subr.bf16.mxu1 %v10322_v7  ;;  %v10377_v5 = vld [vmem:[%s16087_s0 + $0x1a8] sm:$0xff]   ;;  %v10378_v6 = vld [vmem:[%s16087_s0 + $0x1b0] sm:$0xff]  }
  0x1b   :  { %9996 = vmatpush3.bf16.msra.mxu0 %v10322_v7  ;;  %10269 = vmatpush3.bf16.msra.mxu1 %v10322_v7  ;;  %v10416_v7 = vld [vmem:[%s16087_s0 + $0x360] sm:$0xff]  }
  0x1c   :  { %9997 = vmatprep.subr.bf16.mxu0 %v10323_v8  ;;  %10262 = vmatprep.subr.bf16.mxu1 %v10323_v8 }
  0x1f   :  { %9998 = vmatpush3.bf16.msra.mxu0 %v10323_v8  ;;  %10270 = vmatpush3.bf16.msra.mxu1 %v10323_v8  ;;  %v10417_v8 = vld [vmem:[%s16087_s0 + $0x368] sm:$0xff]  }
  0x22   :  { %10000 = vmatmul.mubr.bf16.vlgmr.msra.gmra.mrb[0].mxu0 %v10325_v9  ;;  %10200 = vmatmul.mubr.bf16.vlgmr.msra.gmra.mrb[0].mxu1 %v10401_v55  ;;  %v12555_v9 = vld [vmem:[%s16088_s2] ss:$0 sm:$0xff] }
  0x23   :  { %10003 = vmatprep.mubr.bf16.mxu0 %v10326_v10  ;;  %10203 = vmatprep.mubr.bf16.mxu1 %v10404_v58  ;;  %v10384_v55 = vld [vmem:[%s16087_s0 + $0x1e0] sm:$0xff]  }
  0x2a   :  { %10004 = vmatmul.mubr.bf16.gmra.mrb[4].mxu0 %v10327_v11  ;;  %10204 = vmatmul.mubr.bf16.gmra.mrb[4].mxu1 %v10405_v60  ;;  %v10428_v60 = vld [vmem:[%s16087_s0 + $0x390] sm:$0xff]  }
  0x2b   :  { %10007 = vmatprep.mubr.bf16.mxu0 %v10328_v12  ;;  %10207 = vmatprep.mubr.bf16.mxu1 %v10408_v62 }
  0x32   :  { %10008 = vmatmul.mubr.bf16.gmra.mrb[8].mxu0 %v10329_v13  ;;  %10208 = vmatmul.mubr.bf16.gmra.mrb[8].mxu1 %v10409_v0  ;;  %v10379_v13 = vld [vmem:[%s16087_s0 + $0x1b8] sm:$0xff]  }
  0x33   :  { %10011 = vmatprep.mubr.bf16.mxu0 %v10330_v14  ;;  %10211 = vmatprep.mubr.bf16.mxu1 %v10412_v2 }
  0x3a   :  { %10012 = vmatmul.mubr.bf16.gmra.mrb[12].mxu0 %v10331_v15  ;;  %10212 = vmatmul.mubr.bf16.gmra.mrb[12].mxu1 %v10413_v4 }
  0x3b   :  { %10015 = vmatprep.mubr.bf16.mxu0 %v10332_v16  ;;  %10215 = vmatprep.mubr.bf16.mxu1 %v10416_v7  ;;  %v10380_v16 = vld [vmem:[%s16087_s0 + $0x1c0] sm:$0xff]  }
  0x42   :  { %10016 = vmatmul.mubr.bf16.gmra.mrb[16].mxu0 %v10333_v17  ;;  %10216 = vmatmul.mubr.bf16.gmra.mrb[16].mxu1 %v10417_v8  ;;  %v10420_v17 = vld [vmem:[%s16087_s0 + $0x370] sm:$0xff]  }
  0x43   :  { %10019 = vmatprep.mubr.bf16.mxu0 %v10334_v18  ;;  %10219 = vmatprep.mubr.bf16.mxu1 %v10420_v17 }
  0x4a   :  { %10020 = vmatmul.mubr.bf16.gmra.mrb[20].mxu0 %v10335_v19 }
  0x4b   :  { %10023 = vmatprep.mubr.bf16.mxu0 %v10336_v20 }
  0x52   :  { %10024 = vmatmul.mubr.bf16.gmra.mrb[24].mxu0 %v10337_v21  ;;  %v10421_v21 = vld [vmem:[%s16087_s0 + $0x378] sm:$0xff]  }
  0x53   :  { %10027 = vmatprep.mubr.bf16.mxu0 %v10338_v22  ;;  %10220 = vmatmul.mubr.bf16.gmra.mrb[20].mxu1 %v10421_v21 }
  0x5a   :  { %10028 = vmatmul.mubr.bf16.gmra.mrb[28].mxu0 %v10339_v23 }
  0x5b   :  { %10031 = vmatprep.mubr.bf16.mxu0 %v10340_v24 }
  0x62   :  { %10032 = vmatmul.mubr.bf16.gmra.mrb[32].mxu0 %v10341_v25 }
  0x63   :  { %10035 = vmatprep.mubr.bf16.mxu0 %v10342_v26 }
  0x6a   :  { %10036 = vmatmul.mubr.bf16.gmra.mrb[36].mxu0 %v10343_v27 }
  0x6b   :  { %10039 = vmatprep.mubr.bf16.mxu0 %v10344_v28 }
  0x72   :  { %10040 = vmatmul.mubr.bf16.gmra.mrb[40].mxu0 %v10345_v29  ;;  %v10381_v29 = vld [vmem:[%s16087_s0 + $0x1c8] sm:$0xff]  }
  0x73   :  { %10043 = vmatprep.mubr.bf16.mxu0 %v10346_v30 }
  0x7a   :  { %10044 = vmatmul.mubr.bf16.gmra.mrb[44].mxu0 %v10347_v31 }
  0x7b   :  { %10047 = vmatprep.mubr.bf16.mxu0 %v10348_v32  ;;  %v10382_v32 = vld [vmem:[%s16087_s0 + $0x1d0] sm:$0xff]  }
  0x82   :  { %10048 = vmatmul.mubr.bf16.gmra.mrb[48].mxu0 %v10349_v33  ;;  %v10424_v33 = vld [vmem:[%s16087_s0 + $0x380] sm:$0xff]  }
  0x83   :  { %10051 = vmatprep.mubr.bf16.mxu0 %v10350_v34  ;;  %10223 = vmatprep.mubr.bf16.mxu1 %v10424_v33 }
  0x8a   :  { %10052 = vmatmul.mubr.bf16.gmra.mrb[52].mxu0 %v10351_v35 }
  0x8b   :  { %10055 = vmatprep.mubr.bf16.mxu0 %v10352_v36 }
  0x92   :  { %10056 = vmatmul.mubr.bf16.gmra.mrb[56].mxu0 %v10353_v37  ;;  %v10425_v37 = vld [vmem:[%s16087_s0 + $0x388] sm:$0xff]  }
  0x93   :  { %10059 = vmatprep.mubr.bf16.mxu0 %v10354_v38  ;;  %10224 = vmatmul.mubr.bf16.gmra.mrb[24].mxu1 %v10425_v37 }
  0x94   :  { %10227 = vmatprep.mubr.bf16.mxu1 %v10428_v60 }
  0x9a   :  { %10060 = vmatmul.mubr.bf16.gmra.mrb[60].mxu0 %v10355_v39 }
  0x9b   :  { %10063 = vmatprep.mubr.bf16.mxu0 %v10356_v40 }
  0xa2   :  { %10064 = vmatmul.mubr.bf16.gmra.mrb[64].mxu0 %v10357_v41 }
  0xa3   :  { %10067 = vmatprep.mubr.bf16.mxu0 %v10358_v42 }
  0xaa   :  { %10068 = vmatmul.mubr.bf16.gmra.mrb[68].mxu0 %v10359_v43 }
  0xab   :  { %10071 = vmatprep.mubr.bf16.mxu0 %v10360_v44 }
  0xb2   :  { %10072 = vmatmul.mubr.bf16.gmra.mrb[72].mxu0 %v10361_v45 }
  0xb3   :  { %10075 = vmatprep.mubr.bf16.mxu0 %v10362_v46 }
  0xba   :  { %10076 = vmatmul.mubr.bf16.gmra.mrb[76].mxu0 %v10363_v47 }
  0xbb   :  { %10079 = vmatprep.mubr.bf16.mxu0 %v10364_v48 }
  0xc2   :  { %10080 = vmatmul.mubr.bf16.gmra.mrb[80].mxu0 %v10365_v49 }
  0xc3   :  { %10083 = vmatprep.mubr.bf16.mxu0 %v10366_v50  ;;  %v10383_v50 = vld [vmem:[%s16087_s0 + $0x1d8] sm:$0xff]  }
  0xca   :  { %10084 = vmatmul.mubr.bf16.gmra.mrb[84].mxu0 %v10367_v51 }
  0xcb   :  { %10087 = vmatprep.mubr.bf16.mxu0 %v10368_v52 }
  0xd2   :  { %10088 = vmatmul.mubr.bf16.gmra.mrb[88].mxu0 %v10369_v54 }
  0xd3   :  { %10091 = vmatprep.mubr.bf16.mxu0 %v10370_v56 }
  0xda   :  { %10092 = vmatmul.mubr.bf16.gmra.mrb[92].mxu0 %v10371_v57 }
  0xdb   :  { %10095 = vmatprep.mubr.bf16.mxu0 %v10372_v59 }
  0xe2   :  { %10096 = vmatmul.mubr.bf16.gmra.mrb[96].mxu0 %v10373_v61 }
  0xe3   :  { %10099 = vmatprep.mubr.bf16.mxu0 %v10374_v63  ;;  %v10429_v63 = vld [vmem:[%s16087_s0 + $0x398] sm:$0xff]  }
  0xe4   :  { %10228 = vmatmul.mubr.bf16.gmra.mrb[28].mxu1 %v10429_v63 }
  0xea   :  { %10100 = vmatmul.mubr.bf16.gmra.mrb[100].mxu0 %v10375_v1 }
  0xeb   :  { %10103 = vmatprep.mubr.bf16.mxu0 %v10376_v3 }
  0xf2   :  { %10104 = vmatmul.mubr.bf16.gmra.mrb[104].mxu0 %v10377_v5 }
  0xf3   :  { %10107 = vmatprep.mubr.bf16.mxu0 %v10378_v6 }
  0xf5   :  { %v10001_v10 = vpop.f32.mrb[0].mxu0 }
  0xf6   :  { %v12558_v11 = vadd.f32 %v10001_v10, %v12555_v9  ;;  %v1167_v12 = vpop.f32.mrb[1].mxu0 }
  0xf7   :  { %v12564_v14 = vadd.f32 %v12555_v9, %v1167_v12  ;;  %v10002_v15 = vpop.f32.mrb[2].mxu0  ;;  %v10385_v12 = vld [vmem:[%s16087_s0 + $0x1e8] sm:$0xff]  }
  0xf8   :  { %v9024_v18 = vmul.f32 -1.442695, %v12558_v11  ;;  %v12574_v19 = vadd.f32 %v10002_v15, %v12555_v9  ;;  %v1170_v20 = vpop.f32.mrb[3].mxu0 }
  0xf9   :  { %v9022_v22 = vmul.f32 -1.442695, %v12564_v14  ;;  %v12581_v23 = vadd.f32 %v12555_v9, %v1170_v20 }
  0xfa   :  { %11204 = vpow2.f32 %v9024_v18  ;;  %v9025_v24 = vmul.f32 -1.442695, %v12574_v19  ;;  %10108 = vmatmul.mubr.bf16.gmra.mrb[108].mxu0 %v10379_v13  ;;  %v10386_v18 = vld [vmem:[%s16087_s0 + $0x1f0] sm:$0xff]  }
  0xfb   :  { %11206 = vpow2.f32 %v9022_v22  ;;  %v9023_v25 = vmul.f32 -1.442695, %v12581_v23  ;;  %10111 = vmatprep.mubr.bf16.mxu0 %v10380_v16 }
  0xfc   :  { %11208 = vpow2.f32 %v9025_v24 }
  0xfd   :  { %11210 = vpow2.f32 %v9023_v25  ;;  %v10005_v26 = vpop.f32.mrb[4].mxu0  ;;  %v10432_v25 = vld [vmem:[%s16087_s0 + $0x3a0] sm:$0xff]  }
  0xfe   :  { %v12586_v27 = vadd.f32 %v10005_v26, %v12555_v9  ;;  %v1183_v28 = vpop.f32.mrb[5].mxu0  ;;  %10231 = vmatprep.mubr.bf16.mxu1 %v10432_v25 }
  0xff   :  { %v12592_v30 = vadd.f32 %v12555_v9, %v1183_v28  ;;  %v10006_v31 = vpop.f32.mrb[6].mxu0 }
 0x100   :  { %v9028_v34 = vmul.f32 -1.442695, %v12586_v27  ;;  %v12602_v35 = vadd.f32 %v10006_v31, %v12555_v9  ;;  %v1186_v36 = vpop.f32.mrb[7].mxu0  ;;  %v10433_v31 = vld [vmem:[%s16087_s0 + $0x3a8] sm:$0xff]  }
 0x101   :  { %v9026_v38 = vmul.f32 -1.442695, %v12592_v30  ;;  %v12609_v39 = vadd.f32 %v12555_v9, %v1186_v36  ;;  %10232 = vmatmul.mubr.bf16.gmra.mrb[32].mxu1 %v10433_v31  ;;  %v10389_v31 = vld [vmem:[%s16087_s0 + $0x208] sm:$0xff]  }
 0x102   :  { %11212 = vpow2.f32 %v9028_v34  ;;  %v9029_v40 = vmul.f32 -1.442695, %v12602_v35  ;;  %10112 = vmatmul.mubr.bf16.gmra.mrb[112].mxu0 %v10381_v29 }
 0x103   :  { %11214 = vpow2.f32 %v9026_v38  ;;  %v9027_v41 = vmul.f32 -1.442695, %v12609_v39  ;;  %10115 = vmatprep.mubr.bf16.mxu0 %v10382_v32 }
 0x104   :  { %v11205_v42 = vpop.eup %11204  ;;  %11216 = vpow2.f32 %v9029_v40 }
 0x105   :  { %v11207_v43 = vpop.eup %11206  ;;  %v2960_v44 = vadd.f32 1.0, %v11205_v42  ;;  %11218 = vpow2.f32 %v9027_v41  ;;  %v10009_v45 = vpop.f32.mrb[8].mxu0 }
 0x106   :  { %v11209_v46 = vpop.eup %11208  ;;  %v2958_v47 = vadd.f32 1.0, %v11207_v43  ;;  %v12614_v48 = vadd.f32 %v10009_v45, %v12555_v9  ;;  %v1199_v49 = vpop.f32.mrb[9].mxu0 }
 0x107   :  { %v11211_v51 = vpop.eup %11210  ;;  %11220 = vrcp.f32 %v2960_v44  ;;  %v2961_v52 = vadd.f32 1.0, %v11209_v46  ;;  %v12620_v53 = vadd.f32 %v12555_v9, %v1199_v49  ;;  %v10010_v54 = vpop.f32.mrb[10].mxu0  ;;  %v10387_v49 = vld [vmem:[%s16087_s0 + $0x1f8] sm:$0xff]  }
 0x108   :  { %11222 = vrcp.f32 %v2958_v47  ;;  %v2959_v56 = vadd.f32 1.0, %v11211_v51  ;;  %v9032_v57 = vmul.f32 -1.442695, %v12614_v48  ;;  %v12627_v58 = vadd.f32 %v10010_v54, %v12555_v9  ;;  %v1202_v59 = vpop.f32.mrb[11].mxu0 }
 0x109   :  { %11224 = vrcp.f32 %v2961_v52  ;;  %v9030_v61 = vmul.f32 -1.442695, %v12620_v53  ;;  %v12634_v62 = vadd.f32 %v12555_v9, %v1202_v59 }
 0x10a   :  { %11226 = vrcp.f32 %v2959_v56  ;;  %v9033_v0 = vmul.f32 -1.442695, %v12627_v58  ;;  %10116 = vmatmul.mubr.bf16.gmra.mrb[116].mxu0 %v10383_v50 }
 0x10b   :  { %11228 = vpow2.f32 %v9032_v57  ;;  %v9031_v1 = vmul.f32 -1.442695, %v12634_v62  ;;  %10119 = vmatprep.mubr.bf16.mxu0 %v10384_v55 }
 0x10c   :  { %v11213_v2 = vpop.eup %11212  ;;  %11230 = vpow2.f32 %v9030_v61 }
 0x10d   :  { %v11215_v3 = vpop.eup %11214  ;;  %v2964_v4 = vadd.f32 1.0, %v11213_v2  ;;  %11232 = vpow2.f32 %v9033_v0  ;;  %v10013_v5 = vpop.f32.mrb[12].mxu0  ;;  %v10437_v2 = vld [vmem:[%s16087_s0 + $0x3b8] sm:$0xff]  }
 0x10e   :  { %v11217_v6 = vpop.eup %11216  ;;  %v2962_v7 = vadd.f32 1.0, %v11215_v3  ;;  %11234 = vpow2.f32 %v9031_v1  ;;  %v12642_v8 = vadd.f32 %v10013_v5, %v12555_v9  ;;  %v1215_v10 = vpop.f32.mrb[13].mxu0 }
 0x10f   :  { %v11219_v13 = vpop.eup %11218  ;;  %11236 = vrcp.f32 %v2964_v4  ;;  %v2965_v15 = vadd.f32 1.0, %v11217_v6  ;;  %v12648_v16 = vadd.f32 %v12555_v9, %v1215_v10  ;;  %v10014_v17 = vpop.f32.mrb[14].mxu0 }
 0x110   :  { %11238 = vrcp.f32 %v2962_v7  ;;  %v2963_v20 = vadd.f32 1.0, %v11219_v13  ;;  %v9036_v21 = vmul.f32 -1.442695, %v12642_v8  ;;  %v12655_v22 = vadd.f32 %v10014_v17, %v12555_v9  ;;  %v1218_v24 = vpop.f32.mrb[15].mxu0 }
 0x111   :  { %v11221_v26 = vpop.eup %11220  ;;  %11240 = vrcp.f32 %v2965_v15  ;;  %v9034_v28 = vmul.f32 -1.442695, %v12648_v16  ;;  %v12662_v29 = vadd.f32 %v12555_v9, %v1218_v24 }
 0x112   :  { %v11223_v32 = vpop.eup %11222  ;;  %11242 = vrcp.f32 %v2963_v20  ;;  %v9037_v33 = vmul.f32 -1.442695, %v12655_v22  ;;  %10120 = vmatmul.mubr.bf16.gmra.mrb[120].mxu0 %v10385_v12  ;;  %v3728_v44 = vmul.f32 %v11221_v26, %v12558_v11  ;;  %v10388_v11 = vld [vmem:[%s16087_s0 + $0x200] sm:$0xff]  }
 0x113   :  { %v11225_v34 = vpop.eup %11224  ;;  %11244 = vpow2.f32 %v9036_v21  ;;  %v9035_v36 = vmul.f32 -1.442695, %v12662_v29  ;;  %10123 = vmatprep.mubr.bf16.mxu0 %v10386_v18  ;;  %v3726_v40 = vmul.f32 %v11223_v32, %v12564_v14 }
 0x114   :  { %v11227_v37 = vpop.eup %11226  ;;  %11246 = vpow2.f32 %v9034_v28  ;;  %v3729_v14 = vmul.f32 %v11225_v34, %v12574_v19  ;;  %v10436_v19 = vld [vmem:[%s16087_s0 + $0x3b0] sm:$0xff]  }
 0x115   :  { %v11229_v38 = vpop.eup %11228  ;;  %v3727_v41 = vmul.f32 %v11227_v37, %v12581_v23  ;;  %11248 = vpow2.f32 %v9037_v33  ;;  %v10017_v42 = vpop.f32.mrb[16].mxu0  ;;  %10235 = vmatprep.mubr.bf16.mxu1 %v10436_v19 }
 0x116   :  { %v11231_v43 = vpop.eup %11230  ;;  %v2968_v45 = vadd.f32 1.0, %v11229_v38  ;;  %11250 = vpow2.f32 %v9035_v36  ;;  %v12673_v46 = vadd.f32 %v10017_v42, %v12555_v9  ;;  %v1231_v47 = vpop.f32.mrb[17].mxu0  ;;  %10236 = vmatmul.mubr.bf16.gmra.mrb[36].mxu1 %v10437_v2  ;;  %v10440_v42 = vld [vmem:[%s16087_s0 + $0x3c0] sm:$0xff]  }
 0x117   :  { %v11233_v50 = vpop.eup %11232  ;;  %v4402_v51 = vadd.f32 %v3727_v41, %v3726_v40  ;;  %v2966_v23 = vadd.f32 1.0, %v11231_v43  ;;  %v12680_v52 = vadd.f32 %v12555_v9, %v1231_v47  ;;  %v10018_v54 = vpop.f32.mrb[18].mxu0  ;;  %v10441_v47 = vld [vmem:[%s16087_s0 + $0x3c8] sm:$0xff]   ;;  %10239 = vmatprep.mubr.bf16.mxu1 %v10440_v42 }
 0x118   :  { %v11235_v55 = vpop.eup %11234  ;;  %11252 = vrcp.f32 %v2968_v45  ;;  %v2969_v56 = vadd.f32 1.0, %v11233_v50  ;;  %v9040_v57 = vmul.f32 -1.442695, %v12673_v46  ;;  %v12687_v59 = vadd.f32 %v10018_v54, %v12555_v9  ;;  %v1234_v60 = vpop.f32.mrb[19].mxu0 }
 0x119   :  { %v11237_v61 = vpop.eup %11236  ;;  %v4403_v63 = vadd.f32 %v4402_v51, %v3728_v44  ;;  %11254 = vrcp.f32 %v2966_v23  ;;  %v2967_v0 = vadd.f32 1.0, %v11235_v55  ;;  %v9038_v1 = vmul.f32 -1.442695, %v12680_v52 }
 0x11a   :  { %v11239_v3 = vpop.eup %11238  ;;  %11256 = vrcp.f32 %v2969_v56  ;;  %v9041_v4 = vmul.f32 -1.442695, %v12687_v59  ;;  %v12698_v5 = vadd.f32 %v12555_v9, %v1234_v60  ;;  %10124 = vmatmul.mubr.bf16.gmra.mrb[124].mxu0 %v10387_v49  ;;  %v3732_v17 = vmul.f32 %v11237_v61, %v12586_v27 }
 0x11b   :  { %v11241_v6 = vpop.eup %11240  ;;  %v3730_v7 = vmul.f32 %v11239_v3, %v12592_v30  ;;  %v4404_v10 = vadd.f32 %v4403_v63, %v3729_v14  ;;  %11258 = vrcp.f32 %v2967_v0  ;;  %10127 = vmatprep.mubr.bf16.mxu0 %v10388_v11 }
 0x11c   :  { %v11243_v12 = vpop.eup %11242  ;;  %11260 = vpow2.f32 %v9040_v57  ;;  %v9039_v13 = vmul.f32 -1.442695, %v12698_v5  ;;  %v3733_v25 = vmul.f32 %v11241_v6, %v12602_v35  ;;  %v10390_v35 = vld [vmem:[%s16087_s0 + $0x210] sm:$0xff]  }
 0x11d   :  { %v11245_v15 = vpop.eup %11244  ;;  %v4405_v18 = vadd.f32 %v4404_v10, %v3730_v7  ;;  %v3731_v20 = vmul.f32 %v11243_v12, %v12609_v39  ;;  %11262 = vpow2.f32 %v9038_v1  ;;  %v10021_v21 = vpop.f32.mrb[20].mxu0  ;;  %v10391_v1 = vld [vmem:[%s16087_s0 + $0x218] sm:$0xff]  }
 0x11e   :  { %v11247_v24 = vpop.eup %11246  ;;  %v2972_v30 = vadd.f32 1.0, %v11245_v15  ;;  %11264 = vpow2.f32 %v9041_v4  ;;  %v12706_v26 = vadd.f32 %v10021_v21, %v12555_v9  ;;  %v1247_v28 = vpop.f32.mrb[21].mxu0  ;;  %10240 = vmatmul.mubr.bf16.gmra.mrb[40].mxu1 %v10441_v47 }
 0x11f   :  { %v11249_v32 = vpop.eup %11248  ;;  %v4406_v27 = vadd.f32 %v4405_v18, %v3731_v20  ;;  %v2970_v33 = vadd.f32 1.0, %v11247_v24  ;;  %11266 = vpow2.f32 %v9039_v13  ;;  %v12712_v39 = vadd.f32 %v12555_v9, %v1247_v28  ;;  %v10022_v34 = vpop.f32.mrb[22].mxu0 }
 0x120   :  { %v11251_v36 = vpop.eup %11250  ;;  %11268 = vrcp.f32 %v2972_v30  ;;  %v2973_v37 = vadd.f32 1.0, %v11249_v32  ;;  %v9044_v38 = vmul.f32 -1.442695, %v12706_v26  ;;  %v12719_v40 = vadd.f32 %v10022_v34, %v12555_v9  ;;  %v1250_v41 = vpop.f32.mrb[23].mxu0 }
 0x121   :  { %v4407_v43 = vadd.f32 %v4406_v27, %v3732_v17  ;;  %11270 = vrcp.f32 %v2970_v33  ;;  %v2971_v44 = vadd.f32 1.0, %v11251_v36  ;;  %v9042_v45 = vmul.f32 -1.442695, %v12712_v39 }
 0x122   :  { %v11253_v49 = vpop.eup %11252  ;;  %11272 = vrcp.f32 %v2973_v37  ;;  %v9045_v50 = vmul.f32 -1.442695, %v12719_v40  ;;  %v12730_v14 = vadd.f32 %v12555_v9, %v1250_v41  ;;  %10128 = vmatmul.mubr.bf16.gmra.mrb[128].mxu0 %v10389_v31 }
 0x123   :  { %v11255_v51 = vpop.eup %11254  ;;  %v4408_v23 = vadd.f32 %v4407_v43, %v3733_v25  ;;  %11274 = vrcp.f32 %v2971_v44  ;;  %10131 = vmatprep.mubr.bf16.mxu0 %v10390_v35  ;;  %v3736_v2 = vmul.f32 %v11253_v49, %v12614_v48  ;;  %v10444_v48 = vld [vmem:[%s16087_s0 + $0x3d0] sm:$0xff]  }
 0x124   :  { %v11257_v54 = vpop.eup %11256  ;;  %v3734_v11 = vmul.f32 %v11255_v51, %v12620_v53  ;;  %11276 = vpow2.f32 %v9044_v38  ;;  %v9043_v55 = vmul.f32 -1.442695, %v12730_v14  ;;  %10243 = vmatprep.mubr.bf16.mxu1 %v10444_v48 }
 0x125   :  { %v11259_v56 = vpop.eup %11258  ;;  %11278 = vpow2.f32 %v9042_v45  ;;  %v10025_v57 = vpop.f32.mrb[24].mxu0  ;;  %v3737_v10 = vmul.f32 %v11257_v54, %v12627_v58  ;;  %v10445_v58 = vld [vmem:[%s16087_s0 + $0x3d8] sm:$0xff]  }
 0x126   :  { %v11261_v60 = vpop.eup %11260  ;;  %v4409_v19 = vadd.f32 %v4408_v23, %v3734_v11  ;;  %v3735_v61 = vmul.f32 %v11259_v56, %v12634_v62  ;;  %11280 = vpow2.f32 %v9045_v50  ;;  %v12736_v63 = vadd.f32 %v10025_v57, %v12555_v9  ;;  %v1263_v0 = vpop.f32.mrb[25].mxu0  ;;  %v10392_v62 = vld [vmem:[%s16087_s0 + $0x220] sm:$0xff]   ;;  %10244 = vmatmul.mubr.bf16.gmra.mrb[44].mxu1 %v10445_v58  ;;  %v10395_v58 = vld [vmem:[%s16087_s0 + $0x238] sm:$0xff]  }
 0x127   :  { %v11263_v53 = vpop.eup %11262  ;;  %v2976_v3 = vadd.f32 1.0, %v11261_v60  ;;  %11282 = vpow2.f32 %v9043_v55  ;;  %v12743_v4 = vadd.f32 %v12555_v9, %v1263_v0  ;;  %v10026_v6 = vpop.f32.mrb[26].mxu0 }
 0x128   :  { %v11265_v7 = vpop.eup %11264  ;;  %v4410_v12 = vadd.f32 %v4409_v19, %v3735_v61  ;;  %v2974_v13 = vadd.f32 1.0, %v11263_v53  ;;  %v12750_v15 = vadd.f32 %v10026_v6, %v12555_v9  ;;  %v1266_v17 = vpop.f32.mrb[27].mxu0  ;;  %v9048_v21 = vmul.f32 -1.442695, %v12736_v63 }
 0x129   :  { %v11267_v18 = vpop.eup %11266  ;;  %11284 = vrcp.f32 %v2976_v3  ;;  %v2977_v20 = vadd.f32 1.0, %v11265_v7  ;;  %v12757_v24 = vadd.f32 %v12555_v9, %v1266_v17  ;;  %v9046_v31 = vmul.f32 -1.442695, %v12743_v4 }
 0x12a   :  { %v11269_v25 = vpop.eup %11268  ;;  %v4411_v30 = vadd.f32 %v4410_v12, %v3736_v2  ;;  %11286 = vrcp.f32 %v2974_v13  ;;  %v2975_v28 = vadd.f32 1.0, %v11267_v18  ;;  %10132 = vmatmul.mubr.bf16.gmra.mrb[132].mxu0 %v10391_v1  ;;  %v9049_v27 = vmul.f32 -1.442695, %v12750_v15  ;;  %v10449_v1 = vld [vmem:[%s16087_s0 + $0x3e8] sm:$0xff]  }
 0x12b   :  { %v11271_v32 = vpop.eup %11270  ;;  %11288 = vrcp.f32 %v2977_v20  ;;  %10135 = vmatprep.mubr.bf16.mxu0 %v10392_v62  ;;  %v9047_v36 = vmul.f32 -1.442695, %v12757_v24  ;;  %v3740_v38 = vmul.f32 %v11269_v25, %v12642_v8 }
 0x12c   :  { %v11273_v33 = vpop.eup %11272  ;;  %v3738_v34 = vmul.f32 %v11271_v32, %v12648_v16  ;;  %v4412_v35 = vadd.f32 %v4411_v30, %v3737_v10  ;;  %11290 = vrcp.f32 %v2975_v28  ;;  %v10393_v16 = vld [vmem:[%s16087_s0 + $0x228] sm:$0xff]   ;;  %v10396_v32 = vld [vmem:[%s16087_s0 + $0x240] sm:$0xff]  }
 0x12d   :  { %v11275_v37 = vpop.eup %11274  ;;  %11292 = vpow2.f32 %v9048_v21  ;;  %v10029_v41 = vpop.f32.mrb[28].mxu0  ;;  %v3741_v50 = vmul.f32 %v11273_v33, %v12655_v22  ;;  %v10448_v22 = vld [vmem:[%s16087_s0 + $0x3e0] sm:$0xff]  }
 0x12e   :  { %v11277_v42 = vpop.eup %11276  ;;  %v4413_v43 = vadd.f32 %v4412_v35, %v3738_v34  ;;  %v3739_v44 = vmul.f32 %v11275_v37, %v12662_v29  ;;  %11294 = vpow2.f32 %v9046_v31  ;;  %v12769_v45 = vadd.f32 %v10029_v41, %v12555_v9  ;;  %v1279_v47 = vpop.f32.mrb[29].mxu0  ;;  %v10394_v29 = vld [vmem:[%s16087_s0 + $0x230] sm:$0xff]   ;;  %10247 = vmatprep.mubr.bf16.mxu1 %v10448_v22 }
 0x12f   :  { %v11279_v49 = vpop.eup %11278  ;;  %v2980_v51 = vadd.f32 1.0, %v11277_v42  ;;  %11296 = vpow2.f32 %v9049_v27  ;;  %v12776_v8 = vadd.f32 %v12555_v9, %v1279_v47  ;;  %v10030_v23 = vpop.f32.mrb[30].mxu0  ;;  %10248 = vmatmul.mubr.bf16.gmra.mrb[48].mxu1 %v10449_v1 }
 0x130   :  { %v11281_v54 = vpop.eup %11280  ;;  %v4414_v11 = vadd.f32 %v4413_v43, %v3739_v44  ;;  %v2978_v55 = vadd.f32 1.0, %v11279_v49  ;;  %11298 = vpow2.f32 %v9047_v36  ;;  %v9052_v56 = vmul.f32 -1.442695, %v12769_v45  ;;  %v1282_v57 = vpop.f32.mrb[31].mxu0  ;;  %v10451_v43 = vld [vmem:[%s16087_s0 + $0x3f8] sm:$0xff]  }
 0x131   :  { %v11283_v60 = vpop.eup %11282  ;;  %11300 = vrcp.f32 %v2980_v51  ;;  %v2981_v19 = vadd.f32 1.0, %v11281_v54  ;;  %v9050_v61 = vmul.f32 -1.442695, %v12776_v8  ;;  %v12787_v0 = vadd.f32 %v10030_v23, %v12555_v9 }
 0x132   :  { %v4415_v53 = vadd.f32 %v4414_v11, %v3740_v38  ;;  %11302 = vrcp.f32 %v2978_v55  ;;  %v2979_v2 = vadd.f32 1.0, %v11283_v60  ;;  %v12793_v3 = vadd.f32 %v12555_v9, %v1282_v57  ;;  %10136 = vmatmul.mubr.bf16.gmra.mrb[136].mxu0 %v10393_v16 }
 0x133   :  { %v11285_v6 = vpop.eup %11284  ;;  %11304 = vrcp.f32 %v2981_v19  ;;  %v9053_v62 = vmul.f32 -1.442695, %v12787_v0  ;;  %10139 = vmatprep.mubr.bf16.mxu0 %v10394_v29 }
 0x134   :  { %v11287_v7 = vpop.eup %11286  ;;  %v4416_v10 = vadd.f32 %v4415_v53, %v3741_v50  ;;  %11306 = vrcp.f32 %v2979_v2  ;;  %v9051_v12 = vmul.f32 -1.442695, %v12793_v3  ;;  %v3744_v37 = vmul.f32 %v11285_v6, %v12673_v46 }
 0x135   :  { %v11289_v13 = vpop.eup %11288  ;;  %v3742_v17 = vmul.f32 %v11287_v7, %v12680_v52  ;;  %11308 = vpow2.f32 %v9052_v56  ;;  %v10033_v48 = vpop.f32.mrb[32].mxu0 }
 0x136   :  { %v11291_v18 = vpop.eup %11290  ;;  %11310 = vpow2.f32 %v9050_v61  ;;  %v12799_v20 = vadd.f32 %v10033_v48, %v12555_v9  ;;  %v1295_v21 = vpop.f32.mrb[33].mxu0  ;;  %v3745_v47 = vmul.f32 %v11289_v13, %v12687_v59  ;;  %v10397_v61 = vld [vmem:[%s16087_s0 + $0x248] sm:$0xff]  }
 0x137   :  { %v11293_v25 = vpop.eup %11292  ;;  %v4417_v30 = vadd.f32 %v4416_v10, %v3742_v17  ;;  %v3743_v28 = vmul.f32 %v11291_v18, %v12698_v5  ;;  %11312 = vpow2.f32 %v9053_v62  ;;  %v12806_v31 = vadd.f32 %v12555_v9, %v1295_v21  ;;  %v10034_v52 = vpop.f32.mrb[34].mxu0  ;;  %v10450_v5 = vld [vmem:[%s16087_s0 + $0x3f0] sm:$0xff]  }
 0x138   :  { %v11295_v27 = vpop.eup %11294  ;;  %v2984_v33 = vadd.f32 1.0, %v11293_v25  ;;  %11314 = vpow2.f32 %v9051_v12  ;;  %v12812_v34 = vadd.f32 %v10034_v52, %v12555_v9  ;;  %v1298_v35 = vpop.f32.mrb[35].mxu0  ;;  %v9056_v49 = vmul.f32 -1.442695, %v12799_v20  ;;  %10251 = vmatprep.mubr.bf16.mxu1 %v10450_v5  ;;  %v10398_v62 = vld [vmem:[%s16087_s0 + $0x250] sm:$0xff]  }
 0x139   :  { %v11297_v36 = vpop.eup %11296  ;;  %v4418_v38 = vadd.f32 %v4417_v30, %v3743_v28  ;;  %v2982_v41 = vadd.f32 1.0, %v11295_v27  ;;  %v12819_v42 = vadd.f32 %v12555_v9, %v1298_v35  ;;  %v9054_v23 = vmul.f32 -1.442695, %v12806_v31  ;;  %10252 = vmatmul.mubr.bf16.gmra.mrb[52].mxu1 %v10451_v43 }
 0x13a   :  { %v11299_v44 = vpop.eup %11298  ;;  %11316 = vrcp.f32 %v2984_v33  ;;  %v2985_v16 = vadd.f32 1.0, %v11297_v36  ;;  %10140 = vmatmul.mubr.bf16.gmra.mrb[140].mxu0 %v10395_v58  ;;  %v9057_v54 = vmul.f32 -1.442695, %v12812_v34 }
 0x13b   :  { %v11301_v50 = vpop.eup %11300  ;;  %v4419_v46 = vadd.f32 %v4418_v38, %v3744_v37  ;;  %11318 = vrcp.f32 %v2982_v41  ;;  %v2983_v51 = vadd.f32 1.0, %v11299_v44  ;;  %10143 = vmatprep.mubr.bf16.mxu0 %v10396_v32  ;;  %v9055_v56 = vmul.f32 -1.442695, %v12819_v42  ;;  %v10399_v44 = vld [vmem:[%s16087_s0 + $0x258] sm:$0xff]  }
 0x13c   :  { %v11303_v29 = vpop.eup %11302  ;;  %11320 = vrcp.f32 %v2985_v16  ;;  %v3748_v10 = vmul.f32 %v11301_v50, %v12706_v26  ;;  %v10402_v50 = vld [vmem:[%s16087_s0 + $0x260] sm:$0xff]  }
 0x13d   :  { %v11305_v11 = vpop.eup %11304  ;;  %v3746_v59 = vmul.f32 %v11303_v29, %v12712_v39  ;;  %v4420_v55 = vadd.f32 %v4419_v46, %v3745_v47  ;;  %11322 = vrcp.f32 %v2983_v51  ;;  %v10037_v57 = vpop.f32.mrb[36].mxu0 }
 0x13e   :  { %v11307_v22 = vpop.eup %11306  ;;  %11324 = vpow2.f32 %v9056_v49  ;;  %v12831_v60 = vadd.f32 %v10037_v57, %v12555_v9  ;;  %v1311_v19 = vpop.f32.mrb[37].mxu0 }
 0x13f   :  { %v11309_v1 = vpop.eup %11308  ;;  %v4421_v53 = vadd.f32 %v4420_v55, %v3746_v59  ;;  %v3747_v2 = vmul.f32 %v11307_v22, %v12730_v14  ;;  %11326 = vpow2.f32 %v9054_v23  ;;  %v12838_v39 = vadd.f32 %v12555_v9, %v1311_v19  ;;  %v10038_v6 = vpop.f32.mrb[38].mxu0 }
 0x140   :  { %v11311_v7 = vpop.eup %11310  ;;  %v2988_v12 = vadd.f32 1.0, %v11309_v1  ;;  %11328 = vpow2.f32 %v9057_v54  ;;  %v12845_v13 = vadd.f32 %v10038_v6, %v12555_v9  ;;  %v1314_v17 = vpop.f32.mrb[39].mxu0  ;;  %v3749_v14 = vmul.f32 %v11305_v11, %v12719_v40 }
 0x141   :  { %v11313_v48 = vpop.eup %11312  ;;  %v4422_v18 = vadd.f32 %v4421_v53, %v3747_v2  ;;  %v2986_v21 = vadd.f32 1.0, %v11311_v7  ;;  %11330 = vpow2.f32 %v9055_v56  ;;  %v9060_v30 = vmul.f32 -1.442695, %v12831_v60 }
 0x142   :  { %v11315_v58 = vpop.eup %11314  ;;  %11332 = vrcp.f32 %v2988_v12  ;;  %v2989_v25 = vadd.f32 1.0, %v11313_v48  ;;  %v12850_v28 = vadd.f32 %v12555_v9, %v1314_v17  ;;  %10144 = vmatmul.mubr.bf16.gmra.mrb[144].mxu0 %v10397_v61  ;;  %v9058_v32 = vmul.f32 -1.442695, %v12838_v39 }
 0x143   :  { %v4423_v26 = vadd.f32 %v4422_v18, %v3748_v10  ;;  %11334 = vrcp.f32 %v2986_v21  ;;  %v2987_v52 = vadd.f32 1.0, %v11315_v58  ;;  %10147 = vmatprep.mubr.bf16.mxu0 %v10398_v62  ;;  %v9061_v40 = vmul.f32 -1.442695, %v12845_v13  ;;  %v10403_v21 = vld [vmem:[%s16087_s0 + $0x268] sm:$0xff]  }
 0x144   :  { %v11317_v27 = vpop.eup %11316  ;;  %11336 = vrcp.f32 %v2989_v25  ;;  %v9059_v5 = vmul.f32 -1.442695, %v12850_v28 }
 0x145   :  { %v11319_v33 = vpop.eup %11318  ;;  %v4424_v35 = vadd.f32 %v4423_v26, %v3749_v14  ;;  %11338 = vrcp.f32 %v2987_v52  ;;  %v10041_v36 = vpop.f32.mrb[40].mxu0  ;;  %v3752_v11 = vmul.f32 %v11317_v27, %v12736_v63 }
 0x146   :  { %v11321_v37 = vpop.eup %11320  ;;  %v3750_v38 = vmul.f32 %v11319_v33, %v12743_v4  ;;  %11340 = vpow2.f32 %v9060_v30  ;;  %v12857_v41 = vadd.f32 %v10041_v36, %v12555_v9  ;;  %v1327_v43 = vpop.f32.mrb[41].mxu0 }
 0x147   :  { %v11323_v47 = vpop.eup %11322  ;;  %11342 = vpow2.f32 %v9058_v32  ;;  %v12863_v16 = vadd.f32 %v12555_v9, %v1327_v43  ;;  %v10042_v49 = vpop.f32.mrb[42].mxu0  ;;  %v3753_v61 = vmul.f32 %v11321_v37, %v12750_v15 }
 0x148   :  { %v11325_v4 = vpop.eup %11324  ;;  %v4425_v46 = vadd.f32 %v4424_v35, %v3750_v38  ;;  %v3751_v51 = vmul.f32 %v11323_v47, %v12757_v24  ;;  %11344 = vpow2.f32 %v9061_v40  ;;  %v9064_v23 = vmul.f32 -1.442695, %v12857_v41  ;;  %v1330_v29 = vpop.f32.mrb[43].mxu0 }
 0x149   :  { %v11327_v54 = vpop.eup %11326  ;;  %v2992_v59 = vadd.f32 1.0, %v11325_v4  ;;  %11346 = vpow2.f32 %v9059_v5  ;;  %v12872_v55 = vadd.f32 %v10042_v49, %v12555_v9  ;;  %v12875_v19 = vadd.f32 %v12555_v9, %v1330_v29 }
 0x14a   :  { %v11329_v56 = vpop.eup %11328  ;;  %v4426_v57 = vadd.f32 %v4425_v46, %v3751_v51  ;;  %v2990_v22 = vadd.f32 1.0, %v11327_v54  ;;  %11348 = vpow2.f32 %v9064_v23  ;;  %10148 = vmatmul.mubr.bf16.gmra.mrb[148].mxu0 %v10399_v44  ;;  %v9062_v63 = vmul.f32 -1.442695, %v12863_v16 }
 0x14b   :  { %v11331_v24 = vpop.eup %11330  ;;  %11350 = vrcp.f32 %v2992_v59  ;;  %v2993_v1 = vadd.f32 1.0, %v11329_v56  ;;  %10151 = vmatprep.mubr.bf16.mxu0 %v10402_v50  ;;  %v9065_v62 = vmul.f32 -1.442695, %v12872_v55  ;;  %v9063_v10 = vmul.f32 -1.442695, %v12875_v19 }
 0x14c   :  { %v11333_v53 = vpop.eup %11332  ;;  %v4427_v2 = vadd.f32 %v4426_v57, %v3752_v11  ;;  %11352 = vrcp.f32 %v2990_v22  ;;  %v2991_v6 = vadd.f32 1.0, %v11331_v24  ;;  %v10407_v22 = vld [vmem:[%s16087_s0 + $0x278] sm:$0xff]  }
 0x14d   :  { %v11335_v7 = vpop.eup %11334  ;;  %11354 = vrcp.f32 %v2993_v1  ;;  %v10045_v12 = vpop.f32.mrb[44].mxu0  ;;  %v3756_v35 = vmul.f32 %v11333_v53, %v12769_v45  ;;  %v10410_v1 = vld [vmem:[%s16087_s0 + $0x280] sm:$0xff]  }
 0x14e   :  { %v11337_v17 = vpop.eup %11336  ;;  %v3754_v48 = vmul.f32 %v11335_v7, %v12776_v8  ;;  %v4428_v15 = vadd.f32 %v4427_v2, %v3753_v61  ;;  %11356 = vrcp.f32 %v2991_v6  ;;  %v12883_v14 = vadd.f32 %v10045_v12, %v12555_v9  ;;  %v1343_v18 = vpop.f32.mrb[45].mxu0  ;;  %v10406_v8 = vld [vmem:[%s16087_s0 + $0x270] sm:$0xff]  }
 0x14f   :  { %v11339_v58 = vpop.eup %11338  ;;  %11358 = vpow2.f32 %v9062_v63  ;;  %v12889_v25 = vadd.f32 %v12555_v9, %v1343_v18  ;;  %v10046_v30 = vpop.f32.mrb[46].mxu0  ;;  %v3757_v47 = vmul.f32 %v11337_v17, %v12787_v0 }
 0x150   :  { %v11341_v26 = vpop.eup %11340  ;;  %v4429_v52 = vadd.f32 %v4428_v15, %v3754_v48  ;;  %v3755_v32 = vmul.f32 %v11339_v58, %v12793_v3  ;;  %11360 = vpow2.f32 %v9065_v62  ;;  %v9068_v27 = vmul.f32 -1.442695, %v12883_v14  ;;  %v1346_v40 = vpop.f32.mrb[47].mxu0  ;;  %v12930_v15 = vld [vmem:[%s16088_s2] ss:$0 sm:$0xff] }
 0x151   :  { %v11343_v33 = vpop.eup %11342  ;;  %v2996_v5 = vadd.f32 1.0, %v11341_v26  ;;  %11362 = vpow2.f32 %v9063_v10  ;;  %v12898_v36 = vadd.f32 %v10046_v30, %v12555_v9  ;;  %v12901_v44 = vadd.f32 %v12555_v9, %v1346_v40 }
 0x152   :  { %v11345_v37 = vpop.eup %11344  ;;  %v4430_v38 = vadd.f32 %v4429_v52, %v3755_v32  ;;  %v2994_v43 = vadd.f32 1.0, %v11343_v33  ;;  %11364 = vpow2.f32 %v9068_v27  ;;  %10152 = vmatmul.mubr.bf16.gmra.mrb[152].mxu0 %v10403_v21  ;;  %v9066_v46 = vmul.f32 -1.442695, %v12889_v25 }
 0x153   :  { %v11347_v3 = vpop.eup %11346  ;;  %11366 = vrcp.f32 %v2996_v5  ;;  %v2997_v49 = vadd.f32 1.0, %v11345_v37  ;;  %10155 = vmatprep.mubr.bf16.mxu0 %v10406_v8  ;;  %v9069_v29 = vmul.f32 -1.442695, %v12898_v36  ;;  %v9067_v0 = vmul.f32 -1.442695, %v12901_v44 }
 0x154   :  { %v11349_v45 = vpop.eup %11348  ;;  %v4431_v50 = vadd.f32 %v4430_v38, %v3756_v35  ;;  %11368 = vrcp.f32 %v2994_v43  ;;  %v2995_v4 = vadd.f32 1.0, %v11347_v3 }
 0x155   :  { %v11351_v51 = vpop.eup %11350  ;;  %11370 = vrcp.f32 %v2997_v49  ;;  %v3000_v23 = vadd.f32 1.0, %v11349_v45  ;;  %v10049_v54 = vpop.f32.mrb[48].mxu0  ;;  %v10414_v45 = vld [vmem:[%s16087_s0 + $0x290] sm:$0xff]  }
 0x156   :  { %v11353_v11 = vpop.eup %11352  ;;  %v12906_v59 = vadd.f32 %v4431_v50, %v3757_v47  ;;  %11372 = vrcp.f32 %v2995_v4  ;;  %v12910_v56 = vadd.f32 %v10049_v54, %v12555_v9  ;;  %v1359_v57 = vpop.f32.mrb[49].mxu0 }
 0x157   :  { %v11355_v24 = vpop.eup %11354  ;;  %11374 = vrcp.f32 %v3000_v23  ;;  %v10050_v61 = vpop.f32.mrb[50].mxu0  ;;  %v12920_v2 = vadd.f32 %v12555_v9, %v1359_v57  ;;  %v3758_v7 = vmul.f32 %v11353_v11, %v12806_v31  ;;  %v3760_v31 = vmul.f32 %v11351_v51, %v12799_v20 }
 0x158   :  { %v11357_v63 = vpop.eup %11356  ;;  %11376 = vpow2.f32 %v9066_v46  ;;  %v9072_v53 = vmul.f32 -1.442695, %v12910_v56  ;;  %v1362_v6 = vpop.f32.mrb[51].mxu0  ;;  %v12925_v12 = vadd.f32 %v10050_v61, %v12555_v9  ;;  %v3761_v30 = vmul.f32 %v11355_v24, %v12812_v34  ;;  %v10411_v34 = vld [vmem:[%s16087_s0 + $0x288] sm:$0xff]  }
 0x159   :  { %v11359_v62 = vpop.eup %11358  ;;  %v3759_v10 = vmul.f32 %v11357_v63, %v12819_v42  ;;  %11378 = vpow2.f32 %v9069_v29  ;;  %v12933_v18 = vadd.f32 %v12930_v15, %v1362_v6  ;;  %v9070_v26 = vmul.f32 -1.442695, %v12920_v2 }
 0x15a   :  { %v11361_v17 = vpop.eup %11360  ;;  %v2998_v48 = vadd.f32 1.0, %v11359_v62  ;;  %11380 = vpow2.f32 %v9067_v0  ;;  %10156 = vmatmul.mubr.bf16.gmra.mrb[156].mxu0 %v10407_v22  ;;  %v9073_v40 = vmul.f32 -1.442695, %v12925_v12 }
 0x15b   :  { %v11363_v21 = vpop.eup %11362  ;;  %v4439_v42 = vadd.f32 %v3759_v10, %v3758_v7  ;;  %v3001_v58 = vadd.f32 1.0, %v11361_v17  ;;  %11382 = vpow2.f32 %v9072_v53  ;;  %10159 = vmatprep.mubr.bf16.mxu0 %v10410_v1  ;;  %v9071_v20 = vmul.f32 -1.442695, %v12933_v18 }
 0x15c   :  { %v11365_v9 = vpop.eup %11364  ;;  %11384 = vrcp.f32 %v2998_v48  ;;  %v2999_v8 = vadd.f32 1.0, %v11363_v21 }
 0x15d   :  { %v11367_v52 = vpop.eup %11366  ;;  %v4440_v32 = vadd.f32 %v4439_v42, %v3760_v31  ;;  %11386 = vrcp.f32 %v3001_v58  ;;  %v3004_v27 = vadd.f32 1.0, %v11365_v9  ;;  %v10053_v33 = vpop.f32.mrb[52].mxu0 }
 0x15e   :  { %v11369_v35 = vpop.eup %11368  ;;  %11388 = vrcp.f32 %v2999_v8  ;;  %v12941_v5 = vadd.f32 %v12930_v15, %v10053_v33  ;;  %v1375_v37 = vpop.f32.mrb[53].mxu0  ;;  %v3764_v11 = vmul.f32 %v11367_v52, %v12831_v60 }
 0x15f   :  { %v11371_v38 = vpop.eup %11370  ;;  %v3762_v43 = vmul.f32 %v11369_v35, %v12838_v39  ;;  %v4441_v3 = vadd.f32 %v4440_v32, %v3761_v30  ;;  %11390 = vrcp.f32 %v3004_v27  ;;  %v12948_v47 = vadd.f32 %v12930_v15, %v1375_v37  ;;  %v10054_v49 = vpop.f32.mrb[54].mxu0 }
 0x160   :  { %v11373_v50 = vpop.eup %11372  ;;  %11392 = vpow2.f32 %v9070_v26  ;;  %v9076_v4 = vmul.f32 -1.442695, %v12941_v5  ;;  %v1378_v46 = vpop.f32.mrb[55].mxu0  ;;  %v12958_v0 = vadd.f32 %v12930_v15, %v10054_v49  ;;  %v3765_v1 = vmul.f32 %v11371_v38, %v12845_v13  ;;  %v10415_v13 = vld [vmem:[%s16087_s0 + $0x298] sm:$0xff]   ;;  %v10418_v26 = vld [vmem:[%s16087_s0 + $0x2a0] sm:$0xff]  }
 0x161   :  { %v11375_v51 = vpop.eup %11374  ;;  %v4442_v23 = vadd.f32 %v4441_v3, %v3762_v43  ;;  %v3763_v29 = vmul.f32 %v11373_v50, %v12850_v28  ;;  %11394 = vpow2.f32 %v9073_v40  ;;  %v9074_v39 = vmul.f32 -1.442695, %v12948_v47 }
 0x162   :  { %v11377_v54 = vpop.eup %11376  ;;  %11396 = vpow2.f32 %v9071_v20  ;;  %10160 = vmatmul.mubr.bf16.gmra.mrb[160].mxu0 %v10411_v34  ;;  %v12961_v61 = vadd.f32 %v12930_v15, %v1378_v46  ;;  %v9077_v62 = vmul.f32 -1.442695, %v12958_v0  ;;  %v3768_v43 = vmul.f32 %v11375_v51, %v12857_v41 }
 0x163   :  { %v11379_v57 = vpop.eup %11378  ;;  %v4443_v22 = vadd.f32 %v4442_v23, %v3763_v29  ;;  %v3002_v24 = vadd.f32 1.0, %v11377_v54  ;;  %11398 = vpow2.f32 %v9076_v4  ;;  %10163 = vmatprep.mubr.bf16.mxu0 %v10414_v45 }
 0x164   :  { %v11381_v28 = vpop.eup %11380  ;;  %v3005_v63 = vadd.f32 1.0, %v11379_v57  ;;  %11400 = vpow2.f32 %v9074_v39  ;;  %v9075_v48 = vmul.f32 -1.442695, %v12961_v61 }
 0x165   :  { %v11383_v53 = vpop.eup %11382  ;;  %v4444_v60 = vadd.f32 %v4443_v22, %v3764_v11  ;;  %11402 = vrcp.f32 %v3002_v24  ;;  %v3003_v6 = vadd.f32 1.0, %v11381_v28  ;;  %v10057_v7 = vpop.f32.mrb[56].mxu0 }
 0x166   :  { %v11385_v10 = vpop.eup %11384  ;;  %11404 = vrcp.f32 %v3005_v63  ;;  %v3008_v17 = vadd.f32 1.0, %v11383_v53  ;;  %v12967_v21 = vadd.f32 %v12930_v15, %v10057_v7  ;;  %v1391_v31 = vpop.f32.mrb[57].mxu0  ;;  %v10422_v53 = vld [vmem:[%s16087_s0 + $0x2b0] sm:$0xff]  }
 0x167   :  { %v11387_v42 = vpop.eup %11386  ;;  %v3766_v58 = vmul.f32 %v11385_v10, %v12863_v16  ;;  %v4445_v9 = vadd.f32 %v4444_v60, %v3765_v1  ;;  %11406 = vrcp.f32 %v3003_v6  ;;  %v12974_v30 = vadd.f32 %v12930_v15, %v1391_v31  ;;  %v10058_v8 = vpop.f32.mrb[58].mxu0 }
 0x168   :  { %v11389_v52 = vpop.eup %11388  ;;  %11408 = vrcp.f32 %v3008_v17  ;;  %v9080_v32 = vmul.f32 -1.442695, %v12967_v21  ;;  %v12981_v27 = vadd.f32 %v12930_v15, %v10058_v8  ;;  %v1394_v40 = vpop.f32.mrb[59].mxu0  ;;  %v3769_v50 = vmul.f32 %v11387_v42, %v12872_v55  ;;  %v10419_v55 = vld [vmem:[%s16087_s0 + $0x2a8] sm:$0xff]  }
 0x169   :  { %v11391_v33 = vpop.eup %11390  ;;  %v4446_v16 = vadd.f32 %v4445_v9, %v3766_v58  ;;  %v3767_v35 = vmul.f32 %v11389_v52, %v12875_v19  ;;  %11410 = vpow2.f32 %v9077_v62  ;;  %v9078_v20 = vmul.f32 -1.442695, %v12974_v30 }
 0x16a   :  { %v11393_v37 = vpop.eup %11392  ;;  %11412 = vpow2.f32 %v9075_v48  ;;  %v12986_v34 = vadd.f32 %v12930_v15, %v1394_v40  ;;  %10164 = vmatmul.mubr.bf16.gmra.mrb[164].mxu0 %v10415_v13  ;;  %v9081_v29 = vmul.f32 -1.442695, %v12981_v27  ;;  %v3772_v8 = vmul.f32 %v11391_v33, %v12883_v14  ;;  %v10423_v14 = vld [vmem:[%s16087_s0 + $0x2b8] sm:$0xff]  }
 0x16b   :  { %v11395_v38 = vpop.eup %11394  ;;  %v4447_v3 = vadd.f32 %v4446_v16, %v3767_v35  ;;  %v3006_v49 = vadd.f32 1.0, %v11393_v37  ;;  %11414 = vpow2.f32 %v9080_v32  ;;  %10167 = vmatprep.mubr.bf16.mxu0 %v10418_v26 }
 0x16c   :  { %v11397_v45 = vpop.eup %11396  ;;  %v3009_v19 = vadd.f32 1.0, %v11395_v38  ;;  %11416 = vpow2.f32 %v9078_v20  ;;  %v9079_v41 = vmul.f32 -1.442695, %v12986_v34 }
 0x16d   :  { %v11399_v4 = vpop.eup %11398  ;;  %v4448_v46 = vadd.f32 %v4447_v3, %v3768_v43  ;;  %11418 = vrcp.f32 %v3006_v49  ;;  %v3007_v23 = vadd.f32 1.0, %v11397_v45  ;;  %v10061_v39 = vpop.f32.mrb[60].mxu0 }
 0x16e   :  { %v11401_v54 = vpop.eup %11400  ;;  %11420 = vrcp.f32 %v3009_v19  ;;  %v3012_v11 = vadd.f32 1.0, %v11399_v4  ;;  %v12993_v51 = vadd.f32 %v12930_v15, %v10061_v39  ;;  %v1407_v57 = vpop.f32.mrb[61].mxu0  ;;  %v10426_v19 = vld [vmem:[%s16087_s0 + $0x2c0] sm:$0xff]  }
 0x16f   :  { %v11403_v22 = vpop.eup %11402  ;;  %v4449_v24 = vadd.f32 %v4448_v46, %v3769_v50  ;;  %11422 = vrcp.f32 %v3007_v23  ;;  %v3010_v28 = vadd.f32 1.0, %v11401_v54  ;;  %v12999_v1 = vadd.f32 %v12930_v15, %v1407_v57  ;;  %v10062_v63 = vpop.f32.mrb[62].mxu0 }
 0x170   :  { %v11405_v60 = vpop.eup %11404  ;;  %v3770_v6 = vmul.f32 %v11403_v22, %v12889_v25  ;;  %11424 = vrcp.f32 %v3012_v11  ;;  %v9084_v62 = vmul.f32 -1.442695, %v12993_v51  ;;  %v1410_v7 = vpop.f32.mrb[63].mxu0  ;;  %v13008_v48 = vadd.f32 %v12930_v15, %v10062_v63 }
 0x171   :  { %v11407_v10 = vpop.eup %11406  ;;  %11426 = vrcp.f32 %v3010_v28  ;;  %v9082_v17 = vmul.f32 -1.442695, %v12999_v1  ;;  %v13012_v25 = vadd.f32 %v12930_v15, %v1410_v7  ;;  %v3773_v40 = vmul.f32 %v11405_v60, %v12898_v36 }
 0x172   :  { %v11409_v31 = vpop.eup %11408  ;;  %v4450_v13 = vadd.f32 %v4449_v24, %v3770_v6  ;;  %v3771_v42 = vmul.f32 %v11407_v10, %v12901_v44  ;;  %11428 = vpow2.f32 %v9081_v29  ;;  %10168 = vmatmul.mubr.bf16.gmra.mrb[168].mxu0 %v10419_v55  ;;  %v9085_v44 = vmul.f32 -1.442695, %v13008_v48 }
 0x173   :  { %v11411_v58 = vpop.eup %11410  ;;  %11430 = vpow2.f32 %v9079_v41  ;;  %10171 = vmatprep.mubr.bf16.mxu0 %v10422_v53  ;;  %v9083_v49 = vmul.f32 -1.442695, %v13012_v25  ;;  %v3776_v53 = vmul.f32 %v11409_v31, %v12910_v56  ;;  %v10427_v56 = vld [vmem:[%s16087_s0 + $0x2c8] sm:$0xff]  }
 0x174   :  { %v11413_v9 = vpop.eup %11412  ;;  %v4451_v26 = vadd.f32 %v4450_v13, %v3771_v42  ;;  %v3013_v52 = vadd.f32 1.0, %v11411_v58  ;;  %11432 = vpow2.f32 %v9084_v62 }
 0x175   :  { %v11415_v32 = vpop.eup %11414  ;;  %v3011_v16 = vadd.f32 1.0, %v11413_v9  ;;  %11434 = vpow2.f32 %v9082_v17  ;;  %v10065_v35 = vpop.f32.mrb[64].mxu0 }
 0x176   :  { %v11417_v20 = vpop.eup %11416  ;;  %v4452_v37 = vadd.f32 %v4451_v26, %v3772_v8  ;;  %11436 = vrcp.f32 %v3013_v52  ;;  %v3016_v38 = vadd.f32 1.0, %v11415_v32  ;;  %v13018_v43 = vadd.f32 %v12930_v15, %v10065_v35  ;;  %v1423_v3 = vpop.f32.mrb[65].mxu0  ;;  %v10430_v52 = vld [vmem:[%s16087_s0 + $0x2d0] sm:$0xff]  }
 0x177   :  { %v11419_v33 = vpop.eup %11418  ;;  %11438 = vrcp.f32 %v3011_v16  ;;  %v3014_v36 = vadd.f32 1.0, %v11417_v20  ;;  %v13025_v45 = vadd.f32 %v12930_v15, %v1423_v3  ;;  %v10066_v50 = vpop.f32.mrb[66].mxu0 }
 0x178   :  { %v11421_v4 = vpop.eup %11420  ;;  %v3774_v46 = vmul.f32 %v11419_v33, %v12920_v2  ;;  %v4453_v23 = vadd.f32 %v4452_v37, %v3773_v40  ;;  %11440 = vrcp.f32 %v3016_v38  ;;  %v9088_v29 = vmul.f32 -1.442695, %v13018_v43  ;;  %v1426_v39 = vpop.f32.mrb[67].mxu0 }
 0x179   :  { %v11423_v54 = vpop.eup %11422  ;;  %11442 = vrcp.f32 %v3014_v36  ;;  %v9086_v11 = vmul.f32 -1.442695, %v13025_v45  ;;  %v13034_v41 = vadd.f32 %v12930_v15, %v10066_v50  ;;  %v13039_v28 = vadd.f32 %v12930_v15, %v1426_v39 }
 0x17a   :  { %v11425_v57 = vpop.eup %11424  ;;  %v4454_v55 = vadd.f32 %v4453_v23, %v3774_v46  ;;  %v3775_v22 = vmul.f32 %v11423_v54, %v12933_v18  ;;  %11444 = vpow2.f32 %v9085_v44  ;;  %10172 = vmatmul.mubr.bf16.gmra.mrb[172].mxu0 %v10423_v14  ;;  %v3777_v62 = vmul.f32 %v11421_v4, %v12925_v12 }
 0x17b   :  { %v11427_v24 = vpop.eup %11426  ;;  %11446 = vpow2.f32 %v9083_v49  ;;  %v9089_v2 = vmul.f32 -1.442695, %v13034_v41  ;;  %10175 = vmatprep.mubr.bf16.mxu0 %v10426_v19  ;;  %v3780_v19 = vmul.f32 %v11425_v57, %v12941_v5  ;;  %v10431_v57 = vld [vmem:[%s16087_s0 + $0x2d8] sm:$0xff]  }
 0x17c   :  { %v11429_v63 = vpop.eup %11428  ;;  %v4455_v60 = vadd.f32 %v4454_v55, %v3775_v22  ;;  %11448 = vpow2.f32 %v9088_v29  ;;  %v3778_v18 = vmul.f32 %v11427_v24, %v12948_v47  ;;  %v9087_v47 = vmul.f32 -1.442695, %v13039_v28 }
 0x17d   :  { %v11431_v6 = vpop.eup %11430  ;;  %v3017_v7 = vadd.f32 1.0, %v11429_v63  ;;  %11450 = vpow2.f32 %v9086_v11  ;;  %v10069_v10 = vpop.f32.mrb[68].mxu0 }
 0x17e   :  { %v11433_v17 = vpop.eup %11432  ;;  %v4456_v13 = vadd.f32 %v4455_v60, %v3776_v53  ;;  %v3015_v42 = vadd.f32 1.0, %v11431_v6  ;;  %11452 = vpow2.f32 %v9089_v2  ;;  %v13045_v58 = vadd.f32 %v12930_v15, %v10069_v10  ;;  %v1439_v9 = vpop.f32.mrb[69].mxu0  ;;  %v10434_v60 = vld [vmem:[%s16087_s0 + $0x2e0] sm:$0xff]  }
 0x17f   :  { %v11435_v31 = vpop.eup %11434  ;;  %11454 = vrcp.f32 %v3017_v7  ;;  %v3020_v12 = vadd.f32 1.0, %v11433_v17  ;;  %v13052_v8 = vadd.f32 %v12930_v15, %v1439_v9  ;;  %v10070_v26 = vpop.f32.mrb[70].mxu0 }
 0x180   :  { %v11437_v32 = vpop.eup %11436  ;;  %v4457_v40 = vadd.f32 %v4456_v13, %v3777_v62  ;;  %11456 = vrcp.f32 %v3015_v42  ;;  %v3018_v16 = vadd.f32 1.0, %v11435_v31  ;;  %v9092_v44 = vmul.f32 -1.442695, %v13045_v58  ;;  %v1442_v35 = vpop.f32.mrb[71].mxu0 }
 0x181   :  { %v11439_v20 = vpop.eup %11438  ;;  %11458 = vrcp.f32 %v3020_v12  ;;  %v9090_v37 = vmul.f32 -1.442695, %v13052_v8  ;;  %v13060_v38 = vadd.f32 %v12930_v15, %v10070_v26  ;;  %v13066_v46 = vadd.f32 %v12930_v15, %v1442_v35 }
 0x182   :  { %v11441_v3 = vpop.eup %11440  ;;  %v4458_v14 = vadd.f32 %v4457_v40, %v3778_v18  ;;  %v3779_v33 = vmul.f32 %v11439_v20, %v12961_v61  ;;  %11460 = vrcp.f32 %v3018_v16  ;;  %10176 = vmatmul.mubr.bf16.gmra.mrb[176].mxu0 %v10427_v56  ;;  %v3781_v29 = vmul.f32 %v11437_v32, %v12958_v0 }
 0x183   :  { %v11443_v36 = vpop.eup %11442  ;;  %11462 = vpow2.f32 %v9087_v47  ;;  %v9093_v49 = vmul.f32 -1.442695, %v13060_v38  ;;  %10179 = vmatprep.mubr.bf16.mxu0 %v10430_v52  ;;  %v4433_v0 = vrot.slane %v12906_v59, 4  ;;  %v9091_v7 = vmul.f32 -1.442695, %v13066_v46 }
 0x184   :  { %v11445_v50 = vpop.eup %11444  ;;  %v4459_v4 = vadd.f32 %v4458_v14, %v3779_v33  ;;  %11464 = vpow2.f32 %v9092_v44  ;;  %v3782_v61 = vmul.f32 %v11443_v36, %v12974_v30  ;;  %v3784_v35 = vmul.f32 %v11441_v3, %v12967_v21 }
 0x185   :  { %v11447_v23 = vpop.eup %11446  ;;  %v3021_v39 = vadd.f32 1.0, %v11445_v50  ;;  %11466 = vpow2.f32 %v9090_v37  ;;  %v10073_v54 = vpop.f32.mrb[72].mxu0  ;;  %v4434_v40 = vadd.f32 %v4433_v0, %v12906_v59  ;;  %v10435_v50 = vld [vmem:[%s16087_s0 + $0x2e8] sm:$0xff]  }
 0x186   :  { %v11449_v11 = vpop.eup %11448  ;;  %v4460_v55 = vadd.f32 %v4459_v4, %v3780_v19  ;;  %v3019_v22 = vadd.f32 1.0, %v11447_v23  ;;  %11468 = vpow2.f32 %v9093_v49  ;;  %v13071_v24 = vadd.f32 %v12930_v15, %v10073_v54  ;;  %v1455_v5 = vpop.f32.mrb[73].mxu0 }
 0x187   :  { %v11451_v2 = vpop.eup %11450  ;;  %11470 = vrcp.f32 %v3021_v39  ;;  %v3024_v30 = vadd.f32 1.0, %v11449_v11  ;;  %v13078_v63 = vadd.f32 %v12930_v15, %v1455_v5  ;;  %v10074_v53 = vpop.f32.mrb[74].mxu0 }
 0x188   :  { %v11453_v6 = vpop.eup %11452  ;;  %v4461_v62 = vadd.f32 %v4460_v55, %v3781_v29  ;;  %11472 = vrcp.f32 %v3019_v22  ;;  %v3022_v18 = vadd.f32 1.0, %v11451_v2  ;;  %v1458_v10 = vpop.f32.mrb[75].mxu0  ;;  %v9096_v42 = vmul.f32 -1.442695, %v13071_v24 }
 0x189   :  { %v11455_v17 = vpop.eup %11454  ;;  %11474 = vrcp.f32 %v3024_v30  ;;  %v3025_v13 = vadd.f32 1.0, %v11453_v6  ;;  %v13086_v9 = vadd.f32 %v12930_v15, %v10074_v53  ;;  %v9094_v12 = vmul.f32 -1.442695, %v13078_v63 }
 0x18a   :  { %v11457_v56 = vpop.eup %11456  ;;  %v4462_v31 = vadd.f32 %v4461_v62, %v3782_v61  ;;  %11476 = vrcp.f32 %v3022_v18  ;;  %10180 = vmatmul.mubr.bf16.gmra.mrb[180].mxu0 %v10431_v57  ;;  %v13093_v16 = vadd.f32 %v12930_v15, %v1458_v10  ;;  %v3785_v20 = vmul.f32 %v11455_v17, %v12981_v27 }
 0x18b   :  { %v11459_v47 = vpop.eup %11458  ;;  %v3783_v26 = vmul.f32 %v11457_v56, %v12986_v34  ;;  %11478 = vrcp.f32 %v3025_v13  ;;  %v9097_v52 = vmul.f32 -1.442695, %v13086_v9  ;;  %10183 = vmatprep.mubr.bf16.mxu0 %v10434_v60  ;;  %v4435_v2 = vrot.slane %v4434_v40, 2 }
 0x18c   :  { %v11461_v32 = vpop.eup %11460  ;;  %11480 = vpow2.f32 %v9091_v7  ;;  %v9095_v61 = vmul.f32 -1.442695, %v13093_v16  ;;  %v3788_v17 = vmul.f32 %v11459_v47, %v12993_v51 }
 0x18d   :  { %v11463_v44 = vpop.eup %11462  ;;  %v4463_v37 = vadd.f32 %v4462_v31, %v3783_v26  ;;  %11482 = vpow2.f32 %v9096_v42  ;;  %v10077_v14 = vpop.f32.mrb[76].mxu0  ;;  %v3786_v33 = vmul.f32 %v11461_v32, %v12999_v1  ;;  %v10438_v1 = vld [vmem:[%s16087_s0 + $0x2f0] sm:$0xff]   ;;  %v13123_v31 = vadd.f32 %v4435_v2, %v4434_v40 }
 0x18e   :  { %v11465_v34 = vpop.eup %11464  ;;  %v3023_v36 = vadd.f32 1.0, %v11463_v44  ;;  %11484 = vpow2.f32 %v9094_v12  ;;  %v13099_v49 = vadd.f32 %v12930_v15, %v10077_v14  ;;  %v1471_v59 = vpop.f32.mrb[77].mxu0 }
 0x18f   :  { %v11467_v19 = vpop.eup %11466  ;;  %v4464_v21 = vadd.f32 %v4463_v37, %v3784_v35  ;;  %v3028_v3 = vadd.f32 1.0, %v11465_v34  ;;  %11486 = vpow2.f32 %v9097_v52  ;;  %v13105_v27 = vadd.f32 %v12930_v15, %v1471_v59  ;;  %v10078_v4 = vpop.f32.mrb[78].mxu0  ;;  %v10439_v52 = vld [vmem:[%s16087_s0 + $0x2f8] sm:$0xff]  }
 0x190   :  { %v11469_v23 = vpop.eup %11468  ;;  %11488 = vrcp.f32 %v3023_v36  ;;  %v3026_v29 = vadd.f32 1.0, %v11467_v19  ;;  %v13112_v39 = vadd.f32 %v12930_v15, %v10078_v4  ;;  %v1474_v54 = vpop.f32.mrb[79].mxu0  ;;  %v9100_v5 = vmul.f32 -1.442695, %v13099_v49 }
 0x191   :  { %v11471_v11 = vpop.eup %11470  ;;  %v4465_v55 = vadd.f32 %v4464_v21, %v3785_v20  ;;  %11490 = vrcp.f32 %v3028_v3  ;;  %v3029_v22 = vadd.f32 1.0, %v11469_v23  ;;  %v9098_v0 = vmul.f32 -1.442695, %v13105_v27 }
 0x192   :  { %v11473_v57 = vpop.eup %11472  ;;  %11492 = vrcp.f32 %v3026_v29  ;;  %v13117_v30 = vadd.f32 %v12930_v15, %v1474_v54  ;;  %10184 = vmatmul.mubr.bf16.gmra.mrb[184].mxu0 %v10435_v50  ;;  %v9101_v62 = vmul.f32 -1.442695, %v13112_v39  ;;  %v3789_v12 = vmul.f32 %v11471_v11, %v13008_v48  ;;  %v10442_v48 = vld [vmem:[%s16087_s0 + $0x300] sm:$0xff]  }
 0x193   :  { %v11475_v53 = vpop.eup %11474  ;;  %v4466_v60 = vadd.f32 %v4465_v55, %v3786_v33  ;;  %v3787_v6 = vmul.f32 %v11473_v57, %v13012_v25  ;;  %11494 = vrcp.f32 %v3029_v22  ;;  %10187 = vmatprep.mubr.bf16.mxu0 %v10438_v1  ;;  %v4437_v54 = vrot.slane %v13123_v31, 1 }
 0x194   :  { %v11477_v18 = vpop.eup %11476  ;;  %11496 = vpow2.f32 %v9095_v61  ;;  %v9099_v7 = vmul.f32 -1.442695, %v13117_v30 }
 0x195   :  { %v11479_v10 = vpop.eup %11478  ;;  %v4467_v13 = vadd.f32 %v4466_v60, %v3787_v6  ;;  %11498 = vpow2.f32 %v9100_v5  ;;  %v10081_v42 = vpop.f32.mrb[80].mxu0  ;;  %v3790_v20 = vmul.f32 %v11477_v18, %v13025_v45  ;;  %v3792_v5 = vmul.f32 %v11475_v53, %v13018_v43  ;;  %v10443_v18 = vld [vmem:[%s16087_s0 + $0x308] sm:$0xff]  }
 0x196   :  { %v11481_v56 = vpop.eup %11480  ;;  %11500 = vpow2.f32 %v9098_v0  ;;  %v13127_v25 = vadd.f32 %v12930_v15, %v10081_v42  ;;  %v1487_v26 = vpop.f32.mrb[81].mxu0 }
 0x197   :  { %v11483_v32 = vpop.eup %11482  ;;  %v4468_v44 = vadd.f32 %v4467_v13, %v3788_v17  ;;  %v3027_v51 = vadd.f32 1.0, %v11481_v56  ;;  %11502 = vpow2.f32 %v9101_v62  ;;  %v13133_v47 = vadd.f32 %v12930_v15, %v1487_v26  ;;  %v10082_v40 = vpop.f32.mrb[82].mxu0 }
 0x198   :  { %v11485_v35 = vpop.eup %11484  ;;  %v3032_v37 = vadd.f32 1.0, %v11483_v32  ;;  %11504 = vpow2.f32 %v9099_v7  ;;  %v13140_v14 = vadd.f32 %v12930_v15, %v10082_v40  ;;  %v1490_v34 = vpop.f32.mrb[83].mxu0  ;;  %v9104_v50 = vmul.f32 -1.442695, %v13127_v25 }
 0x199   :  { %v11487_v33 = vpop.eup %11486  ;;  %v4469_v36 = vadd.f32 %v4468_v44, %v3789_v12  ;;  %11506 = vrcp.f32 %v3027_v51  ;;  %v3030_v59 = vadd.f32 1.0, %v11485_v35  ;;  %v9102_v3 = vmul.f32 -1.442695, %v13133_v47 }
 0x19a   :  { %v11489_v19 = vpop.eup %11488  ;;  %11508 = vrcp.f32 %v3032_v37  ;;  %v3033_v21 = vadd.f32 1.0, %v11487_v33  ;;  %v13145_v4 = vadd.f32 %v12930_v15, %v1490_v34  ;;  %10188 = vmatmul.mubr.bf16.gmra.mrb[188].mxu0 %v10439_v52  ;;  %v9105_v29 = vmul.f32 -1.442695, %v13140_v14 }
 0x19b   :  { %v11491_v45 = vpop.eup %11490  ;;  %v4470_v1 = vrot.slane %v4469_v36, 4  ;;  %v3791_v23 = vmul.f32 %v11489_v19, %v13039_v28  ;;  %11510 = vrcp.f32 %v3030_v59  ;;  %10191 = vmatprep.mubr.bf16.mxu0 %v10442_v48  ;;  %v3793_v28 = vmul.f32 %v11479_v10, %v13034_v41  ;;  %v10446_v41 = vld [vmem:[%s16087_s0 + $0x310] sm:$0xff]  }
 0x19c   :  { %v11493_v61 = vpop.eup %11492  ;;  %11512 = vrcp.f32 %v3033_v21  ;;  %v9103_v11 = vmul.f32 -1.442695, %v13145_v4 }
 0x19d   :  { %v11495_v55 = vpop.eup %11494  ;;  %v4471_v22 = vadd.f32 %v4470_v1, %v4469_v36  ;;  %v4476_v57 = vadd.f32 %v3791_v23, %v3790_v20  ;;  %11514 = vpow2.f32 %v9104_v50  ;;  %v10085_v2 = vpop.f32.mrb[84].mxu0  ;;  %v3794_v60 = vmul.f32 %v11493_v61, %v13052_v8 }
 0x19e   :  { %v11497_v0 = vpop.eup %11496  ;;  %11516 = vpow2.f32 %v9102_v3  ;;  %v13155_v6 = vadd.f32 %v12930_v15, %v10085_v2  ;;  %v1503_v62 = vpop.f32.mrb[85].mxu0  ;;  %v4438_v3 = vadd.f32 %v4437_v54, %v13123_v31  ;;  %v3796_v23 = vmul.f32 %v11491_v45, %v13045_v58 }
 0x19f   :  { %v11499_v7 = vpop.eup %11498  ;;  %v4472_v17 = vrot.slane %v4471_v22, 2  ;;  %v4477_v43 = vadd.f32 %v4476_v57, %v3792_v5  ;;  %v3031_v53 = vadd.f32 1.0, %v11497_v0  ;;  %11518 = vpow2.f32 %v9105_v29  ;;  %v10086_v13 = vpop.f32.mrb[86].mxu0  ;;  %v10447_v57 = vld [vmem:[%s16087_s0 + $0x318] sm:$0xff]  }
 0x1a0   :  { %v11501_v8 = vpop.eup %11500  ;;  %v3036_v10 = vadd.f32 1.0, %v11499_v7  ;;  %11520 = vpow2.f32 %v9103_v11  ;;  %v9108_v42 = vmul.f32 -1.442695, %v13155_v6  ;;  %v13165_v56 = vadd.f32 %v12930_v15, %v1503_v62  ;;  %v1506_v12 = vpop.f32.mrb[87].mxu0 }
 0x1a1   :  { %v11503_v26 = vpop.eup %11502  ;;  %v4473_v52 = vadd.f32 %v4472_v17, %v4471_v22  ;;  %v4478_v32 = vadd.f32 %v4477_v43, %v3793_v28  ;;  %11522 = vrcp.f32 %v3031_v53  ;;  %v3034_v44 = vadd.f32 1.0, %v11501_v8 }
 0x1a2   :  { %v11505_v51 = vpop.eup %11504  ;;  %11524 = vrcp.f32 %v3036_v10  ;;  %v3037_v40 = vadd.f32 1.0, %v11503_v26  ;;  %v9106_v48 = vmul.f32 -1.442695, %v13165_v56  ;;  %v13169_v35 = vadd.f32 %v12930_v15, %v10086_v13  ;;  %10192 = vmatmul.mubr.bf16.gmra.mrb[192].mxu0 %v10443_v18 }
 0x1a3   :  { %v11507_v20 = vpop.eup %11506  ;;  %v4474_v37 = vrot.slane %v4473_v52, 1  ;;  %v4479_v34 = vadd.f32 %v4478_v32, %v3794_v60  ;;  %11526 = vrcp.f32 %v3034_v44  ;;  %v3035_v33 = vadd.f32 1.0, %v11505_v51  ;;  %10195 = vmatprep.mubr.bf16.mxu0 %v10446_v41 }
 0x1a4   :  { %v11509_v36 = vpop.eup %11508  ;;  %v3795_v59 = vmul.f32 %v11507_v20, %v13066_v46  ;;  %11528 = vrcp.f32 %v3037_v40  ;;  %v9109_v50 = vmul.f32 -1.442695, %v13169_v35  ;;  %v13174_v19 = vadd.f32 %v12930_v15, %v1506_v12 }
 0x1a5   :  { %v11511_v21 = vpop.eup %11510  ;;  %v4475_v1 = vadd.f32 %v4474_v37, %v4473_v52  ;;  %11530 = vrcp.f32 %v3035_v33  ;;  %v10089_v29 = vpop.f32.mrb[88].mxu0  ;;  %v3797_v11 = vmul.f32 %v11495_v55, %v13060_v38 }
 0x1a6   :  { %v11513_v61 = vpop.eup %11512  ;;  %v4480_v22 = vadd.f32 %v4479_v34, %v3795_v59  ;;  %11532 = vpow2.f32 %v9108_v42  ;;  %v9107_v46 = vmul.f32 -1.442695, %v13174_v19  ;;  %v1519_v5 = vpop.f32.mrb[89].mxu0  ;;  %v3798_v58 = vmul.f32 %v11511_v21, %v13078_v63 }
 0x1a7   :  { %v11515_v2 = vpop.eup %11514  ;;  %v13184_v31 = vsel %vm4706_vm0, %v4475_v1, %v4438_v3  ;;  %11534 = vpow2.f32 %v9106_v48  ;;  %v13188_v45 = vadd.f32 %v12930_v15, %v10089_v29  ;;  %v10090_v38 = vpop.f32.mrb[90].mxu0  ;;  %v13191_v28 = vadd.f32 %v12930_v15, %v1519_v5 }
 0x1a8   :  { %v11517_v54 = vpop.eup %11516  ;;  %v4481_v55 = vadd.f32 %v4480_v22, %v3796_v23  ;;  %v3040_v0 = vadd.f32 1.0, %v11515_v2  ;;  %11536 = vpow2.f32 %v9109_v50  ;;  %v1522_v60 = vpop.f32.mrb[91].mxu0  ;;  %v13194_v7 = vadd.f32 %v12930_v15, %v10090_v38 }
 0x1a9   :  { %v11519_v62 = vpop.eup %11518  ;;  %v3038_v18 = vadd.f32 1.0, %v11517_v54  ;;  %11538 = vpow2.f32 %v9107_v46  ;;  %v9112_v53 = vmul.f32 -1.442695, %v13188_v45  ;;  %v9110_v8 = vmul.f32 -1.442695, %v13191_v28 }
 0x1aa   :  { %v11521_v63 = vpop.eup %11520  ;;  %v4482_v17 = vadd.f32 %v4481_v55, %v3797_v11  ;;  %11540 = vrcp.f32 %v3040_v0  ;;  %v3041_v43 = vadd.f32 1.0, %v11519_v62  ;;  %10196 = vmatmul.mubr.bf16.gmra.mrb[196].mxu0 %v10447_v57  ;;  %v13199_v10 = vadd.f32 %v12930_v15, %v1522_v60 }
 0x1ab   :  { %v11523_v13 = vpop.eup %11522  ;;  %11542 = vrcp.f32 %v3038_v18  ;;  %v3039_v41 = vadd.f32 1.0, %v11521_v63  ;;  %v9113_v52 = vmul.f32 -1.442695, %v13194_v7  ;;  %v3800_v48 = vmul.f32 %v11509_v36, %v13071_v24 }
 0x1ac   :  { %v11525_v42 = vpop.eup %11524  ;;  %v4483_v12 = vadd.f32 %v4482_v17, %v3798_v58  ;;  %v3799_v26 = vmul.f32 %v11523_v13, %v13093_v16  ;;  %11544 = vrcp.f32 %v3041_v43  ;;  %v9111_v44 = vmul.f32 -1.442695, %v13199_v10  ;;  %v13236_v13 = vld [vmem:[%s16088_s2] ss:$0 sm:$0xff] }
 0x1ad   :  { %v11527_v32 = vpop.eup %11526  ;;  %11546 = vrcp.f32 %v3039_v41  ;;  %v10093_v51 = vpop.f32.mrb[92].mxu0  ;;  %v3801_v16 = vmul.f32 %v11513_v61, %v13086_v9  ;;  %v3804_v43 = vmul.f32 %v11525_v42, %v13099_v49 }
 0x1ae   :  { %v11529_v40 = vpop.eup %11528  ;;  %v4484_v20 = vadd.f32 %v4483_v12, %v3799_v26  ;;  %11548 = vpow2.f32 %v9112_v53  ;;  %v13206_v37 = vadd.f32 %v12930_v15, %v10093_v51  ;;  %v1535_v34 = vpop.f32.mrb[93].mxu0  ;;  %v3802_v1 = vmul.f32 %v11527_v32, %v13105_v27 }
 0x1af   :  { %v11531_v33 = vpop.eup %11530  ;;  %11550 = vpow2.f32 %v9110_v8  ;;  %v13210_v59 = vadd.f32 %v12930_v15, %v1535_v34  ;;  %v10094_v50 = vpop.f32.mrb[94].mxu0  ;;  %v3805_v26 = vmul.f32 %v11529_v40, %v13112_v39 }
 0x1b0   :  { %v11533_v21 = vpop.eup %11532  ;;  %v4485_v3 = vadd.f32 %v4484_v20, %v3800_v48  ;;  %11552 = vpow2.f32 %v9113_v52  ;;  %v9116_v24 = vmul.f32 -1.442695, %v13206_v37  ;;  %v1538_v36 = vpop.f32.mrb[95].mxu0  ;;  %v3803_v29 = vmul.f32 %v11531_v33, %v13117_v30 }
 0x1b1   :  { %v11535_v23 = vpop.eup %11534  ;;  %v3044_v11 = vadd.f32 1.0, %v11533_v21  ;;  %11554 = vpow2.f32 %v9111_v44  ;;  %v13216_v9 = vadd.f32 %v12930_v15, %v10094_v50  ;;  %v13218_v61 = vpop.f32.mrb[0].mxu1  ;;  %v13221_v27 = vadd.f32 %v12930_v15, %v1538_v36 }
 0x1b2   :  { %v11537_v22 = vpop.eup %11536  ;;  %v4486_v46 = vadd.f32 %v4485_v3, %v3801_v16  ;;  %v3042_v5 = vadd.f32 1.0, %v11535_v23  ;;  %11556 = vpow2.f32 %v9116_v24  ;;  %v13223_v57 = vpop.f32.mrb[1].mxu1  ;;  %v9114_v30 = vmul.f32 -1.442695, %v13210_v59 }
 0x1b3   :  { %v11539_v2 = vpop.eup %11538  ;;  %11558 = vrcp.f32 %v3044_v11  ;;  %v3045_v58 = vadd.f32 1.0, %v11537_v22  ;;  %v13226_v38 = vpop.f32.mrb[2].mxu1  ;;  %v9117_v60 = vmul.f32 -1.442695, %v13216_v9  ;;  %v9115_v15 = vmul.f32 -1.442695, %v13221_v27 }
 0x1b4   :  { %v11541_v54 = vpop.eup %11540  ;;  %v4487_v55 = vadd.f32 %v4486_v46, %v3802_v1  ;;  %11560 = vrcp.f32 %v3042_v5  ;;  %v3043_v0 = vadd.f32 1.0, %v11539_v2  ;;  %v13230_v63 = vpop.f32.mrb[3].mxu1 }
 0x1b5   :  { %v11543_v62 = vpop.eup %11542  ;;  %11562 = vrcp.f32 %v3045_v58  ;;  %v10097_v18 = vpop.f32.mrb[96].mxu0 }
 0x1b6   :  { %v11545_v17 = vpop.eup %11544  ;;  %v4488_v53 = vadd.f32 %v4487_v55, %v3803_v29  ;;  %11564 = vrcp.f32 %v3043_v0  ;;  %v13239_v41 = vadd.f32 %v13236_v13, %v10097_v18  ;;  %v1551_v8 = vpop.f32.mrb[97].mxu0  ;;  %v3806_v52 = vmul.f32 %v11543_v62, %v13133_v47 }
 0x1b7   :  { %v11547_v12 = vpop.eup %11546  ;;  %11566 = vpow2.f32 %v9114_v30  ;;  %v10098_v32 = vpop.f32.mrb[98].mxu0  ;;  %v13245_v51 = vadd.f32 %v13236_v13, %v1551_v8  ;;  %v3808_v29 = vmul.f32 %v11541_v54, %v13127_v25 }
 0x1b8   :  { %v11549_v44 = vpop.eup %11548  ;;  %v4489_v49 = vadd.f32 %v4488_v53, %v3804_v43  ;;  %11568 = vpow2.f32 %v9117_v60  ;;  %v9120_v42 = vmul.f32 -1.442695, %v13239_v41  ;;  %v1554_v48 = vpop.f32.mrb[99].mxu0  ;;  %v3807_v34 = vmul.f32 %v11547_v12, %v13145_v4 }
 0x1b9   :  { %v11551_v20 = vpop.eup %11550  ;;  %v3048_v33 = vadd.f32 1.0, %v11549_v44  ;;  %11570 = vpow2.f32 %v9115_v15  ;;  %v13249_v39 = vadd.f32 %v13236_v13, %v10098_v32  ;;  %v13252_v50 = vadd.f32 %v13236_v13, %v1554_v48  ;;  %v13263_v54 = vpop.f32.mrb[4].mxu1 }
 0x1ba   :  { %v11553_v47 = vpop.eup %11552  ;;  %v4490_v40 = vadd.f32 %v4489_v49, %v3805_v26  ;;  %v3046_v16 = vadd.f32 1.0, %v11551_v20  ;;  %11572 = vpow2.f32 %v9120_v42  ;;  %v9118_v4 = vmul.f32 -1.442695, %v13245_v51  ;;  %v13269_v12 = vpop.f32.mrb[5].mxu1 }
 0x1bb   :  { %v11555_v21 = vpop.eup %11554  ;;  %11574 = vrcp.f32 %v3048_v33  ;;  %v3049_v3 = vadd.f32 1.0, %v11553_v47  ;;  %v9121_v22 = vmul.f32 -1.442695, %v13249_v39  ;;  %v9119_v58 = vmul.f32 -1.442695, %v13252_v50 }
 0x1bc   :  { %v11557_v1 = vpop.eup %11556  ;;  %v4491_v24 = vadd.f32 %v4490_v40, %v3806_v52  ;;  %11576 = vrcp.f32 %v3046_v16  ;;  %v3047_v36 = vadd.f32 1.0, %v11555_v21  ;;  %v3809_v60 = vmul.f32 %v11545_v17, %v13140_v14  ;;  %v13275_v17 = vpop.f32.mrb[6].mxu1 }
 0x1bd   :  { %v11559_v23 = vpop.eup %11558  ;;  %11578 = vrcp.f32 %v3049_v3  ;;  %v3052_v11 = vadd.f32 1.0, %v11557_v1  ;;  %v10101_v46 = vpop.f32.mrb[100].mxu0 }
 0x1be   :  { %v11561_v5 = vpop.eup %11560  ;;  %v4492_v2 = vadd.f32 %v4491_v24, %v3807_v34  ;;  %11580 = vrcp.f32 %v3047_v36  ;;  %v13259_v30 = vadd.f32 %v13236_v13, %v10101_v46  ;;  %v1567_v55 = vpop.f32.mrb[101].mxu0  ;;  %v3812_v40 = vmul.f32 %v11559_v23, %v13155_v6 }
 0x1bf   :  { %v11563_v0 = vpop.eup %11562  ;;  %v3810_v62 = vmul.f32 %v11561_v5, %v13165_v56  ;;  %11582 = vrcp.f32 %v3052_v11  ;;  %v10102_v25 = vpop.f32.mrb[102].mxu0  ;;  %v13267_v53 = vadd.f32 %v13236_v13, %v1567_v55 }
 0x1c0   :  { %v11565_v15 = vpop.eup %11564  ;;  %v4493_v18 = vadd.f32 %v4492_v2, %v3808_v29  ;;  %11584 = vpow2.f32 %v9118_v4  ;;  %v9124_v43 = vmul.f32 -1.442695, %v13259_v30  ;;  %v1570_v8 = vpop.f32.mrb[103].mxu0  ;;  %v13273_v56 = vadd.f32 %v13236_v13, %v10102_v25 }
 0x1c1   :  { %v11567_v26 = vpop.eup %11566  ;;  %v3811_v14 = vmul.f32 %v11565_v15, %v13174_v19  ;;  %11586 = vpow2.f32 %v9121_v22  ;;  %v13278_v49 = vadd.f32 %v13236_v13, %v1570_v8  ;;  %v9122_v33 = vmul.f32 -1.442695, %v13267_v53  ;;  %v13283_v1 = vpop.f32.mrb[7].mxu1 }
 0x1c2   :  { %v11569_v52 = vpop.eup %11568  ;;  %v4494_v32 = vadd.f32 %v4493_v18, %v3809_v60  ;;  %v3050_v44 = vadd.f32 1.0, %v11567_v26  ;;  %11588 = vpow2.f32 %v9119_v58  ;;  %v9125_v21 = vmul.f32 -1.442695, %v13273_v56 }
 0x1c3   :  { %v11571_v42 = vpop.eup %11570  ;;  %v3053_v48 = vadd.f32 1.0, %v11569_v52  ;;  %11590 = vpow2.f32 %v9124_v43  ;;  %v9123_v4 = vmul.f32 -1.442695, %v13278_v49  ;;  %v3813_v46 = vmul.f32 %v11563_v0, %v13169_v35 }
 0x1c4   :  { %v11573_v20 = vpop.eup %11572  ;;  %v4495_v34 = vadd.f32 %v4494_v32, %v3810_v62  ;;  %11592 = vrcp.f32 %v3050_v44  ;;  %v3051_v19 = vadd.f32 1.0, %v11571_v42 }
 0x1c5   :  { %v11575_v47 = vpop.eup %11574  ;;  %11594 = vrcp.f32 %v3053_v48  ;;  %v3056_v16 = vadd.f32 1.0, %v11573_v20  ;;  %v10105_v3 = vpop.f32.mrb[104].mxu0 }
 0x1c6   :  { %v11577_v24 = vpop.eup %11576  ;;  %v4496_v36 = vadd.f32 %v4495_v34, %v3811_v14  ;;  %11596 = vrcp.f32 %v3051_v19  ;;  %v13287_v29 = vadd.f32 %v13236_v13, %v10105_v3  ;;  %v1583_v11 = vpop.f32.mrb[105].mxu0  ;;  %v3816_v14 = vmul.f32 %v11575_v47, %v13188_v45 }
 0x1c7   :  { %v11579_v22 = vpop.eup %11578  ;;  %11598 = vrcp.f32 %v3056_v16  ;;  %v13291_v6 = vadd.f32 %v13236_v13, %v1583_v11  ;;  %v10106_v23 = vpop.f32.mrb[106].mxu0  ;;  %v3814_v58 = vmul.f32 %v11577_v24, %v13191_v28 }
 0x1c8   :  { %v11581_v5 = vpop.eup %11580  ;;  %v4497_v2 = vadd.f32 %v4496_v36, %v3812_v40  ;;  %11600 = vpow2.f32 %v9122_v33  ;;  %v9128_v55 = vmul.f32 -1.442695, %v13287_v29  ;;  %v1586_v60 = vpop.f32.mrb[107].mxu0  ;;  %v13297_v15 = vadd.f32 %v13236_v13, %v10106_v23 }
 0x1c9   :  { %v11583_v62 = vpop.eup %11582  ;;  %11602 = vpow2.f32 %v9125_v21  ;;  %v9126_v25 = vmul.f32 -1.442695, %v13291_v6  ;;  %v3815_v18 = vmul.f32 %v11581_v5, %v13199_v10  ;;  %v13301_v43 = vadd.f32 %v13236_v13, %v1586_v60  ;;  %v13315_v23 = vpop.f32.mrb[8].mxu1 }
 0x1ca   :  { %v11585_v35 = vpop.eup %11584  ;;  %v4498_v0 = vadd.f32 %v4497_v2, %v3813_v46  ;;  %11604 = vpow2.f32 %v9123_v4  ;;  %v9129_v48 = vmul.f32 -1.442695, %v13297_v15  ;;  %v3817_v47 = vmul.f32 %v11579_v22, %v13194_v7  ;;  %16105 = vst [vmem:[#allocation3_spill] sm:$0xff] %v13315_v23  ;;  %v13321_v22 = vpop.f32.mrb[9].mxu1 }
 0x1cb   :  { %v11587_v28 = vpop.eup %11586  ;;  %v3054_v8 = vadd.f32 1.0, %v11585_v35  ;;  %11606 = vpow2.f32 %v9128_v55  ;;  %v9127_v10 = vmul.f32 -1.442695, %v13301_v43 }
 0x1cc   :  { %v11589_v26 = vpop.eup %11588  ;;  %v4499_v52 = vadd.f32 %v4498_v0, %v3814_v58  ;;  %v3057_v32 = vadd.f32 1.0, %v11587_v28  ;;  %11608 = vpow2.f32 %v9126_v25 }
 0x1cd   :  { %v11591_v44 = vpop.eup %11590  ;;  %11610 = vrcp.f32 %v3054_v8  ;;  %v3055_v42 = vadd.f32 1.0, %v11589_v26  ;;  %v10109_v20 = vpop.f32.mrb[108].mxu0 }
 0x1ce   :  { %v11593_v34 = vpop.eup %11592  ;;  %v4500_v19 = vadd.f32 %v4499_v52, %v3815_v18  ;;  %11612 = vrcp.f32 %v3057_v32  ;;  %v3060_v33 = vadd.f32 1.0, %v11591_v44  ;;  %v13307_v40 = vadd.f32 %v13236_v13, %v10109_v20  ;;  %v1599_v16 = vpop.f32.mrb[109].mxu0 }
 0x1cf   :  { %v11595_v45 = vpop.eup %11594  ;;  %11614 = vrcp.f32 %v3055_v42  ;;  %v13311_v21 = vadd.f32 %v13236_v13, %v1599_v16  ;;  %v10110_v3 = vpop.f32.mrb[110].mxu0  ;;  %v3818_v4 = vmul.f32 %v11593_v34, %v13210_v59 }
 0x1d0   :  { %v11597_v24 = vpop.eup %11596  ;;  %v4501_v36 = vadd.f32 %v4500_v19, %v3816_v14  ;;  %11616 = vrcp.f32 %v3060_v33  ;;  %v9132_v11 = vmul.f32 -1.442695, %v13307_v40  ;;  %v1602_v46 = vpop.f32.mrb[111].mxu0  ;;  %v13319_v7 = vadd.f32 %v13236_v13, %v10110_v3 }
 0x1d1   :  { %v11599_v5 = vpop.eup %11598  ;;  %11618 = vpow2.f32 %v9129_v48  ;;  %v9130_v2 = vmul.f32 -1.442695, %v13311_v21  ;;  %v3819_v60 = vmul.f32 %v11597_v24, %v13221_v27  ;;  %v13324_v59 = vpop.f32.mrb[10].mxu1  ;;  %v13327_v0 = vadd.f32 %v13236_v13, %v1602_v46 }
 0x1d2   :  { %v11601_v58 = vpop.eup %11600  ;;  %v4502_v55 = vadd.f32 %v4501_v36, %v3817_v47  ;;  %11620 = vpow2.f32 %v9127_v10  ;;  %16106 = vst [vmem:[#allocation4_spill] sm:$0xff] %v13324_v59  ;;  %v3820_v14 = vmul.f32 %v11583_v62, %v13206_v37  ;;  %v9133_v27 = vmul.f32 -1.442695, %v13319_v7  ;;  %v13334_v34 = vpop.f32.mrb[11].mxu1 }
 0x1d3   :  { %v11603_v25 = vpop.eup %11602  ;;  %v3058_v35 = vadd.f32 1.0, %v11601_v58  ;;  %11622 = vpow2.f32 %v9132_v11  ;;  %16107 = vst [vmem:[#allocation5_spill] sm:$0xff] %v13334_v34  ;;  %v9131_v37 = vmul.f32 -1.442695, %v13327_v0  ;;  %v3821_v3 = vmul.f32 %v11595_v45, %v13216_v9 }
 0x1d4   :  { %v11605_v18 = vpop.eup %11604  ;;  %v4503_v28 = vadd.f32 %v4502_v55, %v3818_v4  ;;  %v3061_v8 = vadd.f32 1.0, %v11603_v25  ;;  %11624 = vpow2.f32 %v9130_v2 }
 0x1d5   :  { %v11607_v26 = vpop.eup %11606  ;;  %11626 = vrcp.f32 %v3058_v35  ;;  %v3059_v52 = vadd.f32 1.0, %v11605_v18  ;;  %v10113_v32 = vpop.f32.mrb[112].mxu0  ;;  %v3824_v35 = vmul.f32 %v11599_v5, %v13239_v41 }
 0x1d6   :  { %v11609_v44 = vpop.eup %11608  ;;  %v4504_v42 = vadd.f32 %v4503_v28, %v3819_v60  ;;  %11628 = vrcp.f32 %v3061_v8  ;;  %v3064_v48 = vadd.f32 1.0, %v11607_v26  ;;  %v13332_v10 = vadd.f32 %v13236_v13, %v10113_v32  ;;  %v1615_v20 = vpop.f32.mrb[113].mxu0 }
 0x1d7   :  { %v11611_v19 = vpop.eup %11610  ;;  %11630 = vrcp.f32 %v3059_v52  ;;  %v3062_v33 = vadd.f32 1.0, %v11609_v44  ;;  %v13338_v62 = vadd.f32 %v13236_v13, %v1615_v20  ;;  %v10114_v16 = vpop.f32.mrb[114].mxu0 }
 0x1d8   :  { %v11613_v47 = vpop.eup %11612  ;;  %v4505_v24 = vadd.f32 %v4504_v42, %v3820_v14  ;;  %11632 = vrcp.f32 %v3064_v48  ;;  %v9136_v36 = vmul.f32 -1.442695, %v13332_v10  ;;  %v1618_v4 = vpop.f32.mrb[115].mxu0  ;;  %v3822_v46 = vmul.f32 %v11611_v19, %v13245_v51 }
 0x1d9   :  { %v11615_v11 = vpop.eup %11614  ;;  %11634 = vrcp.f32 %v3062_v33  ;;  %v9134_v2 = vmul.f32 -1.442695, %v13338_v62  ;;  %v13345_v58 = vadd.f32 %v13236_v13, %v10114_v16  ;;  %v13349_v9 = vadd.f32 %v13236_v13, %v1618_v4  ;;  %v13362_v4 = vpop.f32.mrb[12].mxu1 }
 0x1da   :  { %v11617_v55 = vpop.eup %11616  ;;  %v4506_v60 = vadd.f32 %v4505_v24, %v3821_v3  ;;  %v3823_v25 = vmul.f32 %v11615_v11, %v13252_v50  ;;  %11636 = vpow2.f32 %v9133_v27  ;;  %v3825_v18 = vmul.f32 %v11613_v47, %v13249_v39  ;;  %16108 = vst [vmem:[#allocation6_spill] sm:$0xff] %v13362_v4 }
 0x1db   :  { %v11619_v45 = vpop.eup %11618  ;;  %11638 = vpow2.f32 %v9131_v37  ;;  %v9137_v50 = vmul.f32 -1.442695, %v13345_v58  ;;  %v9135_v27 = vmul.f32 -1.442695, %v13349_v9 }
 0x1dc   :  { %v11621_v51 = vpop.eup %11620  ;;  %v4507_v28 = vrot.slane %v4506_v60, 4  ;;  %v4513_v8 = vadd.f32 %v3823_v25, %v3822_v46  ;;  %v3065_v26 = vadd.f32 1.0, %v11619_v45  ;;  %11640 = vpow2.f32 %v9136_v36 }
 0x1dd   :  { %v11623_v14 = vpop.eup %11622  ;;  %v3063_v52 = vadd.f32 1.0, %v11621_v51  ;;  %11642 = vpow2.f32 %v9134_v2  ;;  %v10117_v32 = vpop.f32.mrb[116].mxu0 }
 0x1de   :  { %v11625_v44 = vpop.eup %11624  ;;  %v4508_v42 = vadd.f32 %v4507_v28, %v4506_v60  ;;  %v4514_v48 = vadd.f32 %v4513_v8, %v3824_v35  ;;  %11644 = vrcp.f32 %v3065_v26  ;;  %v3068_v41 = vadd.f32 1.0, %v11623_v14  ;;  %v1631_v39 = vpop.f32.mrb[117].mxu0 }
 0x1df   :  { %v11627_v5 = vpop.eup %11626  ;;  %11646 = vrcp.f32 %v3063_v52  ;;  %v3066_v20 = vadd.f32 1.0, %v11625_v44  ;;  %v13356_v19 = vadd.f32 %v13236_v13, %v10117_v32  ;;  %v13359_v33 = vadd.f32 %v13236_v13, %v1631_v39  ;;  %v10118_v37 = vpop.f32.mrb[118].mxu0 }
 0x1e0   :  { %v11629_v16 = vpop.eup %11628  ;;  %v4509_v47 = vrot.slane %v4508_v42, 2  ;;  %v3826_v3 = vmul.f32 %v11627_v5, %v13267_v53  ;;  %v4515_v24 = vadd.f32 %v4514_v48, %v3825_v18  ;;  %11648 = vrcp.f32 %v3068_v41  ;;  %v1634_v36 = vpop.f32.mrb[119].mxu0 }
 0x1e1   :  { %v11631_v11 = vpop.eup %11630  ;;  %11650 = vrcp.f32 %v3066_v20  ;;  %v9140_v46 = vmul.f32 -1.442695, %v13356_v19  ;;  %v9138_v2 = vmul.f32 -1.442695, %v13359_v33  ;;  %v13366_v60 = vpop.f32.mrb[13].mxu1  ;;  %v3828_v28 = vmul.f32 %v11617_v55, %v13259_v30 }
 0x1e2   :  { %16109 = vst [vmem:[#allocation7_spill] sm:$0xff] %v13366_v60  ;;  %v11633_v25 = vpop.eup %11632  ;;  %v4510_v45 = vadd.f32 %v4509_v47, %v4508_v42  ;;  %v4516_v35 = vadd.f32 %v4515_v24, %v3826_v3  ;;  %v3827_v51 = vmul.f32 %v11631_v11, %v13278_v49  ;;  %11652 = vpow2.f32 %v9137_v50  ;;  %v13369_v53 = vpop.f32.mrb[14].mxu1 }
 0x1e3   :  { %16110 = vst [vmem:[#allocation8_spill] sm:$0xff] %v13369_v53  ;;  %v11635_v18 = vpop.eup %11634  ;;  %11654 = vpow2.f32 %v9135_v27  ;;  %v13373_v8 = vadd.f32 %v13236_v13, %v10118_v37  ;;  %v13376_v26 = vadd.f32 %v13236_v13, %v1634_v36  ;;  %v13378_v14 = vpop.f32.mrb[15].mxu1  ;;  %v3829_v44 = vmul.f32 %v11629_v16, %v13273_v56 }
 0x1e4   :  { %16111 = vst [vmem:[#allocation9_spill] sm:$0xff] %v13378_v14  ;;  %v11637_v52 = vpop.eup %11636  ;;  %v4511_v32 = vrot.slane %v4510_v45, 1  ;;  %v4517_v49 = vadd.f32 %v4516_v35, %v3827_v51  ;;  %11656 = vpow2.f32 %v9140_v46  ;;  %v3830_v42 = vmul.f32 %v11635_v18, %v13291_v6 }
 0x1e5   :  { %v11639_v50 = vpop.eup %11638  ;;  %v3069_v48 = vadd.f32 1.0, %v11637_v52  ;;  %11658 = vpow2.f32 %v9138_v2  ;;  %v9141_v30 = vmul.f32 -1.442695, %v13373_v8  ;;  %v10121_v55 = vpop.f32.mrb[120].mxu0  ;;  %v9139_v16 = vmul.f32 -1.442695, %v13376_v26 }
 0x1e6   :  { %v11641_v27 = vpop.eup %11640  ;;  %v4512_v41 = vadd.f32 %v4511_v32, %v4510_v45  ;;  %v4518_v39 = vadd.f32 %v4517_v49, %v3828_v28  ;;  %v3067_v5 = vadd.f32 1.0, %v11639_v50  ;;  %v13384_v20 = vadd.f32 %v13236_v13, %v10121_v55  ;;  %v1647_v37 = vpop.f32.mrb[121].mxu0 }
 0x1e7   :  { %v11643_v47 = vpop.eup %11642  ;;  %11660 = vrcp.f32 %v3069_v48  ;;  %v3072_v56 = vadd.f32 1.0, %v11641_v27  ;;  %v13388_v6 = vadd.f32 %v13236_v13, %v1647_v37  ;;  %v10122_v3 = vpop.f32.mrb[122].mxu0  ;;  %v3832_v50 = vmul.f32 %v11633_v25, %v13287_v29 }
 0x1e8   :  { %v11645_v24 = vpop.eup %11644  ;;  %v13392_v36 = vsel %vm4708_vm1, %v4512_v41, %v13184_v31  ;;  %v4519_v11 = vadd.f32 %v4518_v39, %v3829_v44  ;;  %11662 = vrcp.f32 %v3067_v5  ;;  %v3070_v46 = vadd.f32 1.0, %v11643_v47  ;;  %v1650_v2 = vpop.f32.mrb[123].mxu0 }
 0x1e9   :  { %v11647_v45 = vpop.eup %11646  ;;  %11664 = vrcp.f32 %v3072_v56  ;;  %v9144_v35 = vmul.f32 -1.442695, %v13384_v20  ;;  %v9142_v52 = vmul.f32 -1.442695, %v13388_v6  ;;  %v13398_v31 = vadd.f32 %v13236_v13, %v10122_v3  ;;  %v13400_v44 = vpop.f32.mrb[16].mxu1 }
 0x1ea   :  { %v11649_v51 = vpop.eup %11648  ;;  %v4520_v18 = vadd.f32 %v4519_v11, %v3830_v42  ;;  %v3831_v28 = vmul.f32 %v11647_v45, %v13301_v43  ;;  %11666 = vrcp.f32 %v3070_v46  ;;  %16112 = vst [vmem:[#allocation10_spill] sm:$0xff] %v13400_v44  ;;  %v13404_v55 = vadd.f32 %v13236_v13, %v1650_v2 }
 0x1eb   :  { %v11651_v32 = vpop.eup %11650  ;;  %11668 = vpow2.f32 %v9141_v30  ;;  %v3833_v43 = vmul.f32 %v11645_v24, %v13297_v15 }
 0x1ec   :  { %v11653_v49 = vpop.eup %11652  ;;  %v4521_v48 = vadd.f32 %v4520_v18, %v3831_v28  ;;  %11670 = vpow2.f32 %v9139_v16  ;;  %v3834_v27 = vmul.f32 %v11651_v32, %v13311_v21  ;;  %v9145_v16 = vmul.f32 -1.442695, %v13398_v31  ;;  %v13420_v18 = vpop.f32.mrb[17].mxu1 }
 0x1ed   :  { %v11655_v42 = vpop.eup %11654  ;;  %v3073_v41 = vadd.f32 1.0, %v11653_v49  ;;  %11672 = vpow2.f32 %v9144_v35  ;;  %v10125_v30 = vpop.f32.mrb[124].mxu0  ;;  %v9143_v11 = vmul.f32 -1.442695, %v13404_v55  ;;  %16113 = vst [vmem:[#allocation11_spill] sm:$0xff] %v13420_v18 }
 0x1ee   :  { %v11657_v39 = vpop.eup %11656  ;;  %v4522_v5 = vadd.f32 %v4521_v48, %v3832_v50  ;;  %v3071_v37 = vadd.f32 1.0, %v11655_v42  ;;  %11674 = vpow2.f32 %v9142_v52  ;;  %v13409_v47 = vadd.f32 %v13236_v13, %v10125_v30  ;;  %v1663_v29 = vpop.f32.mrb[125].mxu0 }
 0x1ef   :  { %v11659_v25 = vpop.eup %11658  ;;  %11676 = vrcp.f32 %v3073_v41  ;;  %v3076_v56 = vadd.f32 1.0, %v11657_v39  ;;  %v13413_v15 = vadd.f32 %v13236_v13, %v1663_v29  ;;  %v10126_v21 = vpop.f32.mrb[126].mxu0 }
 0x1f0   :  { %v4523_v3 = vadd.f32 %v4522_v5, %v3833_v43  ;;  %11678 = vrcp.f32 %v3071_v37  ;;  %v3074_v24 = vadd.f32 1.0, %v11659_v25  ;;  %v1666_v46 = vpop.f32.mrb[127].mxu0  ;;  %v9148_v45 = vmul.f32 -1.442695, %v13409_v47  ;;  %v13423_v49 = vpop.f32.mrb[18].mxu1 }
 0x1f1   :  { %v11661_v2 = vpop.eup %11660  ;;  %11680 = vrcp.f32 %v3076_v56  ;;  %v13418_v35 = vadd.f32 %v13236_v13, %v10126_v21  ;;  %v9146_v32 = vmul.f32 -1.442695, %v13413_v15  ;;  %16114 = vst [vmem:[#allocation12_spill] sm:$0xff] %v13423_v49  ;;  %v13427_v43 = vpop.f32.mrb[19].mxu1  ;;  %v13430_v30 = vadd.f32 %v13236_v13, %v1666_v46 }
 0x1f2   :  { %v11663_v28 = vpop.eup %11662  ;;  %v4524_v52 = vadd.f32 %v4523_v3, %v3834_v27  ;;  %11682 = vrcp.f32 %v3074_v24  ;;  %16115 = vst [vmem:[#allocation13_spill] sm:$0xff] %v13427_v43  ;;  %v13432_v39 = vpop.f32.mrb[20].mxu1  ;;  %v3836_v5 = vmul.f32 %v11649_v51, %v13307_v40  ;;  %v3837_v37 = vmul.f32 %v11661_v2, %v13319_v7 }
 0x1f3   :  { %v11665_v50 = vpop.eup %11664  ;;  %v3835_v48 = vmul.f32 %v11663_v28, %v13327_v0  ;;  %11684 = vpow2.f32 %v9145_v16  ;;  %v9149_v42 = vmul.f32 -1.442695, %v13418_v35  ;;  %16116 = vst [vmem:[#allocation14_spill] sm:$0xff] %v13432_v39  ;;  %v13436_v25 = vpop.f32.mrb[21].mxu1 }
 0x1f4   :  { %v11667_v41 = vpop.eup %11666  ;;  %11686 = vpow2.f32 %v9143_v11  ;;  %16117 = vst [vmem:[#allocation15_spill] sm:$0xff] %v13436_v25 }
 0x1f5   :  { %v11669_v27 = vpop.eup %11668  ;;  %v4525_v29 = vadd.f32 %v4524_v52, %v3835_v48  ;;  %11688 = vpow2.f32 %v9148_v45  ;;  %v10129_v0 = vpop.f32.mrb[128].mxu0  ;;  %v3838_v16 = vmul.f32 %v11667_v41, %v13338_v62  ;;  %v9147_v45 = vmul.f32 -1.442695, %v13430_v30 }
 0x1f6   :  { %v11671_v56 = vpop.eup %11670  ;;  %v3077_v21 = vadd.f32 1.0, %v11669_v27  ;;  %11690 = vpow2.f32 %v9146_v32  ;;  %v13440_v3 = vadd.f32 %v13236_v13, %v10129_v0  ;;  %v1679_v24 = vpop.f32.mrb[129].mxu0 }
 0x1f7   :  { %v11673_v11 = vpop.eup %11672  ;;  %v4526_v46 = vadd.f32 %v4525_v29, %v3836_v5  ;;  %v3075_v28 = vadd.f32 1.0, %v11671_v56  ;;  %11692 = vpow2.f32 %v9149_v42  ;;  %v13443_v40 = vadd.f32 %v13236_v13, %v1679_v24  ;;  %v10130_v7 = vpop.f32.mrb[130].mxu0 }
 0x1f8   :  { %v11675_v51 = vpop.eup %11674  ;;  %11694 = vrcp.f32 %v3077_v21  ;;  %v3080_v2 = vadd.f32 1.0, %v11673_v11  ;;  %v13447_v62 = vadd.f32 %v13236_v13, %v10130_v7  ;;  %v1682_v52 = vpop.f32.mrb[131].mxu0  ;;  %v9152_v27 = vmul.f32 -1.442695, %v13440_v3 }
 0x1f9   :  { %v11677_v32 = vpop.eup %11676  ;;  %v4527_v48 = vadd.f32 %v4526_v46, %v3837_v37  ;;  %11696 = vrcp.f32 %v3075_v28  ;;  %v3078_v41 = vadd.f32 1.0, %v11675_v51  ;;  %v9150_v5 = vmul.f32 -1.442695, %v13443_v40  ;;  %v13452_v21 = vpop.f32.mrb[22].mxu1 }
 0x1fa   :  { %v11679_v42 = vpop.eup %11678  ;;  %11698 = vrcp.f32 %v3080_v2  ;;  %16118 = vst [vmem:[#allocation16_spill] sm:$0xff] %v13452_v21  ;;  %v9153_v11 = vmul.f32 -1.442695, %v13447_v62  ;;  %v3840_v46 = vmul.f32 %v11665_v50, %v13332_v10  ;;  %v13457_v7 = vadd.f32 %v13236_v13, %v1682_v52 }
 0x1fb   :  { %v11681_v29 = vpop.eup %11680  ;;  %v4528_v0 = vadd.f32 %v4527_v48, %v3838_v16  ;;  %v3839_v56 = vmul.f32 %v11679_v42, %v13349_v9  ;;  %11700 = vrcp.f32 %v3078_v41  ;;  %v3841_v16 = vmul.f32 %v11677_v32, %v13345_v58 }
 0x1fc   :  { %v11683_v24 = vpop.eup %11682  ;;  %11702 = vpow2.f32 %v9147_v45 }
 0x1fd   :  { %v11685_v37 = vpop.eup %11684  ;;  %v4529_v28 = vadd.f32 %v4528_v0, %v3839_v56  ;;  %11704 = vpow2.f32 %v9152_v27  ;;  %v10133_v51 = vpop.f32.mrb[132].mxu0  ;;  %v3842_v21 = vmul.f32 %v11683_v24, %v13359_v33 }
 0x1fe   :  { %v11687_v2 = vpop.eup %11686  ;;  %v3081_v9 = vadd.f32 1.0, %v11685_v37  ;;  %11706 = vpow2.f32 %v9150_v5  ;;  %v13461_v48 = vadd.f32 %v13236_v13, %v10133_v51  ;;  %v1695_v45 = vpop.f32.mrb[133].mxu0 }
 0x1ff   :  { %v11689_v41 = vpop.eup %11688  ;;  %v4530_v42 = vadd.f32 %v4529_v28, %v3840_v46  ;;  %v3079_v10 = vadd.f32 1.0, %v11687_v2  ;;  %v13465_v50 = vadd.f32 %v13236_v13, %v1695_v45  ;;  %v10134_v52 = vpop.f32.mrb[134].mxu0  ;;  %11708 = vpow2.f32 %v9153_v11 }
 0x200   :  { %v11691_v27 = vpop.eup %11690  ;;  %v3084_v0 = vadd.f32 1.0, %v11689_v41  ;;  %v13468_v58 = vadd.f32 %v13236_v13, %v10134_v52  ;;  %v1698_v32 = vpop.f32.mrb[135].mxu0  ;;  %v9151_v46 = vmul.f32 -1.442695, %v13457_v7  ;;  %v9156_v33 = vmul.f32 -1.442695, %v13461_v48 }
 0x201   :  { %v11693_v5 = vpop.eup %11692  ;;  %v4531_v56 = vadd.f32 %v4530_v42, %v3841_v16  ;;  %11710 = vrcp.f32 %v3079_v10  ;;  %v3082_v37 = vadd.f32 1.0, %v11691_v27  ;;  %v13472_v24 = vpop.f32.mrb[23].mxu1  ;;  %v9154_v11 = vmul.f32 -1.442695, %v13465_v50 }
 0x202   :  { %v11695_v28 = vpop.eup %11694  ;;  %11712 = vrcp.f32 %v3081_v9  ;;  %16119 = vst [vmem:[#allocation17_spill] sm:$0xff] %v13472_v24  ;;  %v9157_v16 = vmul.f32 -1.442695, %v13468_v58  ;;  %v13477_v42 = vpop.f32.mrb[24].mxu1  ;;  %v3844_v9 = vmul.f32 %v11681_v29, %v13356_v19  ;;  %v13481_v52 = vadd.f32 %v13236_v13, %v1698_v32 }
 0x203   :  { %v11697_v51 = vpop.eup %11696  ;;  %v4532_v2 = vadd.f32 %v4531_v56, %v3842_v21  ;;  %11714 = vrcp.f32 %v3082_v37  ;;  %v3085_v37 = vadd.f32 1.0, %v11693_v5 }
 0x204   :  { %v11699_v45 = vpop.eup %11698  ;;  %v3843_v41 = vmul.f32 %v11697_v51, %v13376_v26  ;;  %11716 = vrcp.f32 %v3084_v0  ;;  %v3845_v51 = vmul.f32 %v11695_v28, %v13373_v8 }
 0x205   :  { %v11701_v10 = vpop.eup %11700  ;;  %11718 = vpow2.f32 %v9151_v46  ;;  %v10137_v27 = vpop.f32.mrb[136].mxu0 }
 0x206   :  { %v11703_v21 = vpop.eup %11702  ;;  %v4533_v56 = vadd.f32 %v4532_v2, %v3843_v41  ;;  %11720 = vpow2.f32 %v9156_v33  ;;  %v13484_v24 = vadd.f32 %v13236_v13, %v10137_v27  ;;  %v1711_v26 = vpop.f32.mrb[137].mxu0  ;;  %v3846_v25 = vmul.f32 %v11701_v10, %v13388_v6 }
 0x207   :  { %v11705_v0 = vpop.eup %11704  ;;  %v3083_v39 = vadd.f32 1.0, %v11703_v21  ;;  %11722 = vpow2.f32 %v9154_v11  ;;  %v13488_v19 = vadd.f32 %v13236_v13, %v1711_v26  ;;  %v10138_v29 = vpop.f32.mrb[138].mxu0  ;;  %v9155_v41 = vmul.f32 -1.442695, %v13481_v52 }
 0x208   :  { %v11707_v32 = vpop.eup %11706  ;;  %v4534_v46 = vadd.f32 %v4533_v56, %v3844_v9  ;;  %v3088_v2 = vadd.f32 1.0, %v11705_v0  ;;  %11724 = vpow2.f32 %v9157_v16  ;;  %v1714_v5 = vpop.f32.mrb[139].mxu0  ;;  %v13493_v27 = vadd.f32 %v13236_v13, %v10138_v29 }
 0x209   :  { %11726 = vrcp.f32 %v3083_v39  ;;  %v3086_v33 = vadd.f32 1.0, %v11707_v32  ;;  %v11709_v8 = vpop.eup %11708  ;;  %v9160_v11 = vmul.f32 -1.442695, %v13484_v24  ;;  %v13497_v21 = vadd.f32 %v13236_v13, %v1714_v5  ;;  %v13499_v9 = vpop.f32.mrb[25].mxu1 }
 0x20a   :  { %v4535_v28 = vadd.f32 %v4534_v46, %v3845_v51  ;;  %11728 = vrcp.f32 %v3085_v37  ;;  %v9158_v39 = vmul.f32 -1.442695, %v13488_v19  ;;  %v13502_v16 = vpop.f32.mrb[26].mxu1  ;;  %v9161_v37 = vmul.f32 -1.442695, %v13493_v27 }
 0x20b   :  { %v11711_v6 = vpop.eup %11710  ;;  %11730 = vrcp.f32 %v3088_v2  ;;  %v13506_v0 = vpop.f32.mrb[27].mxu1  ;;  %v9159_v29 = vmul.f32 -1.442695, %v13497_v21  ;;  %v3848_v2 = vmul.f32 %v11699_v45, %v13384_v20 }
 0x20c   :  { %v11713_v10 = vpop.eup %11712  ;;  %v4536_v56 = vadd.f32 %v4535_v28, %v3846_v25  ;;  %v3847_v26 = vmul.f32 %v11711_v6, %v13404_v55  ;;  %11732 = vrcp.f32 %v3086_v33  ;;  %v3089_v28 = vadd.f32 1.0, %v11709_v8 }
 0x20d   :  { %v11715_v51 = vpop.eup %11714  ;;  %11734 = vpow2.f32 %v9155_v41  ;;  %v10141_v32 = vpop.f32.mrb[140].mxu0  ;;  %v3849_v33 = vmul.f32 %v11713_v10, %v13398_v31 }
 0x20e   :  { %v11717_v46 = vpop.eup %11716  ;;  %v4537_v5 = vadd.f32 %v4536_v56, %v3847_v26  ;;  %11736 = vpow2.f32 %v9160_v11  ;;  %v13511_v43 = vadd.f32 %v13236_v13, %v10141_v32  ;;  %v1727_v25 = vpop.f32.mrb[141].mxu0  ;;  %v3850_v44 = vmul.f32 %v11715_v51, %v13413_v15 }
 0x20f   :  { %v11719_v55 = vpop.eup %11718  ;;  %11738 = vpow2.f32 %v9158_v39  ;;  %v13515_v6 = vadd.f32 %v13236_v13, %v1727_v25  ;;  %v10142_v41 = vpop.f32.mrb[142].mxu0 }
 0x210   :  { %v11721_v49 = vpop.eup %11720  ;;  %v4538_v18 = vadd.f32 %v4537_v5, %v3848_v2  ;;  %v3087_v20 = vadd.f32 1.0, %v11719_v55  ;;  %11740 = vpow2.f32 %v9161_v37  ;;  %v1730_v45 = vpop.f32.mrb[143].mxu0  ;;  %v9164_v26 = vmul.f32 -1.442695, %v13511_v43 }
 0x211   :  { %v11723_v11 = vpop.eup %11722  ;;  %v3092_v56 = vadd.f32 1.0, %v11721_v49  ;;  %11742 = vpow2.f32 %v9159_v29  ;;  %v13520_v39 = vadd.f32 %v13236_v13, %v1730_v45  ;;  %v9162_v2 = vmul.f32 -1.442695, %v13515_v6  ;;  %v13527_v5 = vpop.f32.mrb[28].mxu1 }
 0x212   :  { %v11725_v32 = vpop.eup %11724  ;;  %v4539_v31 = vadd.f32 %v4538_v18, %v3849_v33  ;;  %11744 = vrcp.f32 %v3087_v20  ;;  %v3090_v8 = vadd.f32 1.0, %v11723_v11  ;;  %v13524_v15 = vadd.f32 %v13236_v13, %v10142_v41  ;;  %v13531_v41 = vpop.f32.mrb[29].mxu1  ;;  %v13538_v11 = vld [vmem:[%s16088_s2] ss:$0 sm:$0xff] }
 0x213   :  { %v11727_v10 = vpop.eup %11726  ;;  %11746 = vrcp.f32 %v3089_v28  ;;  %v3093_v29 = vadd.f32 1.0, %v11725_v32  ;;  %v9163_v25 = vmul.f32 -1.442695, %v13520_v39  ;;  %v3852_v28 = vmul.f32 %v11717_v46, %v13409_v47 }
 0x214   :  { %v11729_v37 = vpop.eup %11728  ;;  %v4540_v51 = vadd.f32 %v4539_v31, %v3850_v44  ;;  %v3851_v49 = vmul.f32 %v11727_v10, %v13430_v30  ;;  %11748 = vrcp.f32 %v3090_v8  ;;  %v9165_v45 = vmul.f32 -1.442695, %v13524_v15 }
 0x215   :  { %v11731_v18 = vpop.eup %11730  ;;  %11750 = vrcp.f32 %v3092_v56  ;;  %v10145_v55 = vpop.f32.mrb[144].mxu0  ;;  %v3853_v30 = vmul.f32 %v11729_v37, %v13418_v35 }
 0x216   :  { %v11733_v33 = vpop.eup %11732  ;;  %v4541_v20 = vadd.f32 %v4540_v51, %v3851_v49  ;;  %11752 = vpow2.f32 %v9164_v26  ;;  %v1743_v13 = vpop.f32.mrb[145].mxu0  ;;  %v13541_v56 = vadd.f32 %v13538_v11, %v10145_v55  ;;  %v3856_v14 = vmul.f32 %v11731_v18, %v13440_v3 }
 0x217   :  { %v11735_v44 = vpop.eup %11734  ;;  %11754 = vpow2.f32 %v9162_v2  ;;  %v10146_v47 = vpop.f32.mrb[146].mxu0  ;;  %v13544_v31 = vadd.f32 %v13538_v11, %v1743_v13 }
 0x218   :  { %v11737_v46 = vpop.eup %11736  ;;  %v4542_v26 = vadd.f32 %v4541_v20, %v3852_v28  ;;  %11756 = vrcp.f32 %v3093_v29  ;;  %v3091_v32 = vadd.f32 1.0, %v11735_v44  ;;  %v1746_v35 = vpop.f32.mrb[147].mxu0  ;;  %v9168_v28 = vmul.f32 -1.442695, %v13541_v56 }
 0x219   :  { %v11739_v8 = vpop.eup %11738  ;;  %v3096_v10 = vadd.f32 1.0, %v11737_v46  ;;  %11758 = vpow2.f32 %v9163_v25  ;;  %v13547_v49 = vadd.f32 %v13538_v11, %v1746_v35  ;;  %v13551_v29 = vadd.f32 %v13538_v11, %v10146_v47  ;;  %v13556_v35 = vpop.f32.mrb[30].mxu1 }
 0x21a   :  { %v11741_v2 = vpop.eup %11740  ;;  %v4543_v37 = vadd.f32 %v4542_v26, %v3853_v30  ;;  %11760 = vrcp.f32 %v3091_v32  ;;  %v3094_v51 = vadd.f32 1.0, %v11739_v8  ;;  %v9166_v25 = vmul.f32 -1.442695, %v13544_v31  ;;  %v13560_v53 = vpop.f32.mrb[31].mxu1 }
 0x21b   :  { %v11743_v55 = vpop.eup %11742  ;;  %11762 = vpow2.f32 %v9165_v45  ;;  %v3854_v30 = vmul.f32 %v11733_v33, %v13443_v40  ;;  %v3097_v32 = vadd.f32 1.0, %v11741_v2  ;;  %v9169_v40 = vmul.f32 -1.442695, %v13551_v29 }
 0x21c   :  { %v11745_v20 = vpop.eup %11744  ;;  %v4544_v13 = vrot.slane %v4543_v37, 4  ;;  %11764 = vrcp.f32 %v3094_v51  ;;  %v3095_v44 = vadd.f32 1.0, %v11743_v55  ;;  %v9167_v51 = vmul.f32 -1.442695, %v13547_v49 }
 0x21d   :  { %v11747_v46 = vpop.eup %11746  ;;  %v3855_v26 = vmul.f32 %v11745_v20, %v13457_v7  ;;  %11766 = vrcp.f32 %v3096_v10  ;;  %v10149_v45 = vpop.f32.mrb[148].mxu0 }
 0x21e   :  { %v11749_v8 = vpop.eup %11748  ;;  %v4545_v47 = vadd.f32 %v4544_v13, %v4543_v37  ;;  %11768 = vrcp.f32 %v3095_v44  ;;  %v1759_v55 = vpop.f32.mrb[149].mxu0  ;;  %v13564_v7 = vadd.f32 %v13538_v11, %v10149_v45  ;;  %v3857_v37 = vmul.f32 %v11747_v46, %v13447_v62 }
 0x21f   :  { %v11751_v4 = vpop.eup %11750  ;;  %v4550_v60 = vadd.f32 %v3855_v26, %v3854_v30  ;;  %11770 = vpow2.f32 %v9168_v28  ;;  %v10150_v33 = vpop.f32.mrb[150].mxu0  ;;  %v13568_v3 = vadd.f32 %v13538_v11, %v1759_v55  ;;  %v3858_v44 = vmul.f32 %v11749_v8, %v13465_v50 }
 0x220   :  { %v11753_v10 = vpop.eup %11752  ;;  %v4546_v2 = vrot.slane %v4545_v47, 2  ;;  %11772 = vpow2.f32 %v9166_v25  ;;  %v1762_v18 = vpop.f32.mrb[151].mxu0  ;;  %v13572_v59 = vadd.f32 %v13538_v11, %v10150_v33  ;;  %v9172_v25 = vmul.f32 -1.442695, %v13564_v7 }
 0x221   :  { %v11755_v20 = vpop.eup %11754  ;;  %v4551_v13 = vadd.f32 %v4550_v60, %v3856_v14  ;;  %11774 = vrcp.f32 %v3097_v32  ;;  %v3100_v28 = vadd.f32 1.0, %v11753_v10  ;;  %v13576_v46 = vadd.f32 %v13538_v11, %v1762_v18 }
 0x222   :  { %v11757_v30 = vpop.eup %11756  ;;  %v4547_v26 = vadd.f32 %v4546_v2, %v4545_v47  ;;  %v3098_v45 = vadd.f32 1.0, %v11755_v20  ;;  %11776 = vpow2.f32 %v9167_v51  ;;  %v9170_v32 = vmul.f32 -1.442695, %v13568_v3 }
 0x223   :  { %v11759_v34 = vpop.eup %11758  ;;  %v4552_v62 = vadd.f32 %v4551_v13, %v3857_v37  ;;  %11778 = vpow2.f32 %v9169_v40  ;;  %v9173_v55 = vmul.f32 -1.442695, %v13572_v59  ;;  %v13581_v40 = vpop.f32.mrb[32].mxu1  ;;  %v9171_v37 = vmul.f32 -1.442695, %v13576_v46 }
 0x224   :  { %v11761_v60 = vpop.eup %11760  ;;  %v4548_v14 = vrot.slane %v4547_v26, 1  ;;  %11780 = vrcp.f32 %v3098_v45  ;;  %v3099_v50 = vadd.f32 1.0, %v11759_v34  ;;  %v3860_v13 = vmul.f32 %v11751_v4, %v13461_v48 }
 0x225   :  { %v11763_v8 = vpop.eup %11762  ;;  %v4553_v47 = vadd.f32 %v4552_v62, %v3858_v44  ;;  %v3859_v51 = vmul.f32 %v11761_v60, %v13481_v52  ;;  %11782 = vrcp.f32 %v3100_v28  ;;  %v10153_v33 = vpop.f32.mrb[152].mxu0 }
 0x226   :  { %v11765_v10 = vpop.eup %11764  ;;  %v4549_v2 = vadd.f32 %v4548_v14, %v4547_v26  ;;  %11784 = vrcp.f32 %v3099_v50  ;;  %v13585_v18 = vadd.f32 %v13538_v11, %v10153_v33  ;;  %v1775_v34 = vpop.f32.mrb[153].mxu0  ;;  %v3101_v26 = vadd.f32 1.0, %v11763_v8 }
 0x227   :  { %v11767_v20 = vpop.eup %11766  ;;  %v4554_v44 = vadd.f32 %v4553_v47, %v3859_v51  ;;  %11786 = vpow2.f32 %v9172_v25  ;;  %v10154_v52 = vpop.f32.mrb[154].mxu0  ;;  %v13595_v60 = vadd.f32 %v13538_v11, %v1775_v34  ;;  %v3861_v33 = vmul.f32 %v11757_v30, %v13468_v58 }
 0x228   :  { %v13588_v28 = vpop.f32.mrb[33].mxu1  ;;  %v11769_v45 = vpop.eup %11768  ;;  %v13592_v62 = vsel %vm4710_vm2, %v4549_v2, %v13392_v36  ;;  %11788 = vpow2.f32 %v9170_v32  ;;  %v3862_v48 = vmul.f32 %v11765_v10, %v13488_v19  ;;  %v9176_v36 = vmul.f32 -1.442695, %v13585_v18 }
 0x229   :  { %16120 = vst [vmem:[#allocation18_spill] sm:$0xff] %v13588_v28  ;;  %v1778_v14 = vpop.f32.mrb[155].mxu0  ;;  %v11771_v50 = vpop.eup %11770  ;;  %v4555_v4 = vadd.f32 %v4554_v44, %v3860_v13  ;;  %11790 = vpow2.f32 %v9173_v55  ;;  %v3863_v34 = vmul.f32 %v11769_v45, %v13497_v21  ;;  %v13609_v30 = vadd.f32 %v13538_v11, %v10154_v52 }
 0x22a   :  { %v13599_v25 = vpop.f32.mrb[34].mxu1  ;;  %v11773_v47 = vpop.eup %11772  ;;  %11792 = vpow2.f32 %v9171_v37  ;;  %v13603_v8 = vadd.f32 %v13538_v11, %v1778_v14  ;;  %v9174_v55 = vmul.f32 -1.442695, %v13595_v60  ;;  %v3104_v13 = vadd.f32 1.0, %v11771_v50 }
 0x22b   :  { %16121 = vst [vmem:[#allocation19_spill] sm:$0xff] %v13599_v25  ;;  %v13605_v32 = vpop.f32.mrb[35].mxu1  ;;  %v11775_v51 = vpop.eup %11774  ;;  %v4556_v2 = vadd.f32 %v4555_v4, %v3861_v33  ;;  %v3102_v58 = vadd.f32 1.0, %v11773_v47  ;;  %11794 = vrcp.f32 %v3101_v26  ;;  %v3864_v45 = vmul.f32 %v11767_v20, %v13484_v24 }
 0x22c   :  { %16122 = vst [vmem:[#allocation20_spill] sm:$0xff] %v13605_v32  ;;  %v11777_v19 = vpop.eup %11776  ;;  %v9175_v33 = vmul.f32 -1.442695, %v13603_v8  ;;  %v9177_v26 = vmul.f32 -1.442695, %v13609_v30 }
 0x22d   :  { %v11779_v10 = vpop.eup %11778  ;;  %v4557_v37 = vadd.f32 %v4556_v2, %v3862_v48  ;;  %11796 = vrcp.f32 %v3102_v58  ;;  %v3103_v44 = vadd.f32 1.0, %v11777_v19  ;;  %v10157_v14 = vpop.f32.mrb[156].mxu0  ;;  %v3865_v2 = vmul.f32 %v11775_v51, %v13493_v27 }
 0x22e   :  { %v11781_v23 = vpop.eup %11780  ;;  %11798 = vpow2.f32 %v9176_v36  ;;  %v1791_v4 = vpop.f32.mrb[157].mxu0  ;;  %v3105_v25 = vadd.f32 1.0, %v11779_v10 }
 0x22f   :  { %v11783_v21 = vpop.eup %11782  ;;  %v4558_v52 = vadd.f32 %v4557_v37, %v3863_v34  ;;  %11800 = vrcp.f32 %v3103_v44  ;;  %v10158_v47 = vpop.f32.mrb[158].mxu0  ;;  %v3866_v36 = vmul.f32 %v11781_v23, %v13515_v6 }
 0x230   :  { %v11785_v32 = vpop.eup %11784  ;;  %11802 = vpow2.f32 %v9174_v55  ;;  %v1794_v50 = vpop.f32.mrb[159].mxu0  ;;  %v13619_v55 = vadd.f32 %v13538_v11, %v10157_v14 }
 0x231   :  { %v11787_v48 = vpop.eup %11786  ;;  %v4559_v58 = vadd.f32 %v4558_v52, %v3864_v45  ;;  %11804 = vrcp.f32 %v3104_v13  ;;  %v3867_v20 = vmul.f32 %v11785_v32, %v13520_v39  ;;  %v13625_v44 = vpop.f32.mrb[36].mxu1  ;;  %v3868_v39 = vmul.f32 %v11783_v21, %v13511_v43 }
 0x232   :  { %v11789_v19 = vpop.eup %11788  ;;  %11806 = vpow2.f32 %v9175_v33  ;;  %v3108_v6 = vadd.f32 1.0, %v11787_v48  ;;  %16123 = vst [vmem:[#allocation21_spill] sm:$0xff] %v13625_v44  ;;  %v9180_v52 = vmul.f32 -1.442695, %v13619_v55  ;;  %v13638_v43 = vadd.f32 %v13538_v11, %v1791_v4 }
 0x233   :  { %v11791_v28 = vpop.eup %11790  ;;  %v4560_v24 = vadd.f32 %v4559_v58, %v3865_v2  ;;  %v3106_v34 = vadd.f32 1.0, %v11789_v19  ;;  %11808 = vpow2.f32 %v9177_v26  ;;  %v13633_v2 = vpop.f32.mrb[37].mxu1  ;;  %v13641_v21 = vadd.f32 %v13538_v11, %v10158_v47 }
 0x234   :  { %v11793_v37 = vpop.eup %11792  ;;  %11810 = vrcp.f32 %v3105_v25  ;;  %v3109_v45 = vadd.f32 1.0, %v11791_v28  ;;  %16124 = vst [vmem:[#allocation22_spill] sm:$0xff] %v13633_v2 }
 0x235   :  { %v4561_v10 = vadd.f32 %v4560_v24, %v3866_v36  ;;  %11812 = vrcp.f32 %v3106_v34  ;;  %v3107_v27 = vadd.f32 1.0, %v11793_v37  ;;  %v13621_v51 = vpop.f32.mrb[160].mxu0  ;;  %v11795_v23 = vpop.eup %11794  ;;  %v13644_v24 = vadd.f32 %v13538_v11, %v1794_v50 }
 0x236   :  { %v13623_v13 = vpop.f32.mrb[161].mxu0  ;;  %v3869_v58 = vmul.f32 %v11795_v23, %v13524_v15  ;;  %v9178_v50 = vmul.f32 -1.442695, %v13638_v43 }
 0x237   :  { %v11797_v33 = vpop.eup %11796  ;;  %v4562_v32 = vadd.f32 %v4561_v10, %v3867_v20  ;;  %11814 = vrcp.f32 %v3107_v27  ;;  %v13628_v25 = vpop.f32.mrb[162].mxu0 }
 0x238   :  { %v11799_v14 = vpop.eup %11798  ;;  %v13631_v26 = vpop.f32.mrb[163].mxu0  ;;  %v3870_v19 = vmul.f32 %v11797_v33, %v13544_v31  ;;  %11816 = vrcp.f32 %v3108_v6 }
 0x239   :  { %v11801_v48 = vpop.eup %11800  ;;  %v4563_v36 = vadd.f32 %v4562_v32, %v3868_v39  ;;  %v13646_v20 = vpop.f32.mrb[38].mxu1  ;;  %11818 = vrcp.f32 %v3109_v45  ;;  %v3112_v27 = vadd.f32 1.0, %v11799_v14  ;;  %v9181_v32 = vmul.f32 -1.442695, %v13641_v21 }
 0x23a   :  { %v11803_v28 = vpop.eup %11802  ;;  %16125 = vst [vmem:[#allocation23_spill] sm:$0xff] %v13646_v20  ;;  %v3871_v15 = vmul.f32 %v11801_v48, %v13547_v49  ;;  %v13649_v31 = vpop.f32.mrb[39].mxu1  ;;  %11820 = vpow2.f32 %v9180_v52  ;;  %v9179_v14 = vmul.f32 -1.442695, %v13644_v24 }
 0x23b   :  { %v11805_v34 = vpop.eup %11804  ;;  %v4564_v37 = vadd.f32 %v4563_v36, %v3869_v58  ;;  %v3110_v10 = vadd.f32 1.0, %v11803_v28  ;;  %16126 = vst [vmem:[#allocation24_spill] sm:$0xff] %v13649_v31 }
 0x23c   :  { %v11807_v4 = vpop.eup %11806  ;;  %v3872_v45 = vmul.f32 %v11805_v34, %v13541_v56 }
 0x23d   :  { %v11809_v23 = vpop.eup %11808  ;;  %v4565_v6 = vadd.f32 %v4564_v37, %v3870_v19  ;;  %11822 = vrcp.f32 %v3110_v10  ;;  %v3111_v47 = vadd.f32 1.0, %v11807_v4  ;;  %v13652_v33 = vpop.f32.mrb[164].mxu0 }
 0x23e   :  { %v11811_v39 = vpop.eup %11810  ;;  %v13655_v58 = vpop.f32.mrb[165].mxu0  ;;  %v3113_v36 = vadd.f32 1.0, %v11809_v23 }
 0x23f   :  { %v11813_v49 = vpop.eup %11812  ;;  %v4566_v48 = vadd.f32 %v4565_v6, %v3871_v15  ;;  %11824 = vrcp.f32 %v3111_v47  ;;  %v13659_v52 = vpop.f32.mrb[166].mxu0  ;;  %v3873_v37 = vmul.f32 %v11811_v39, %v13551_v29  ;;  %v13670_v6 = vadd.f32 %v13538_v11, %v13623_v13 }
 0x240   :  { %11826 = vrcp.f32 %v3112_v27  ;;  %v13661_v19 = vpop.f32.mrb[167].mxu0  ;;  %v3874_v4 = vmul.f32 %v11813_v49, %v13568_v3  ;;  %v13666_v15 = vpop.f32.mrb[40].mxu1 }
 0x241   :  { %v11815_v28 = vpop.eup %11814  ;;  %v4567_v10 = vadd.f32 %v4566_v48, %v3872_v45  ;;  %11828 = vpow2.f32 %v9178_v50  ;;  %16127 = vst [vmem:[#allocation25_spill] sm:$0xff] %v13666_v15  ;;  %v13685_v13 = vpop.f32.mrb[41].mxu1 }
 0x242   :  { %11830 = vpow2.f32 %v9181_v32  ;;  %v3875_v56 = vmul.f32 %v11815_v28, %v13576_v46  ;;  %v11817_v34 = vpop.eup %11816  ;;  %v13679_v32 = vadd.f32 %v13538_v11, %v13621_v51  ;;  %16128 = vst [vmem:[#allocation26_spill] sm:$0xff] %v13685_v13 }
 0x243   :  { %v4568_v31 = vadd.f32 %v4567_v10, %v3873_v37  ;;  %11832 = vpow2.f32 %v9179_v14  ;;  %v11819_v27 = vpop.eup %11818  ;;  %v3876_v39 = vmul.f32 %v11817_v34, %v13564_v7  ;;  %v9182_v7 = vmul.f32 -1.442695, %v13670_v6  ;;  %v13690_v10 = vpop.f32.mrb[42].mxu1 }
 0x244   :  { %11834 = vrcp.f32 %v3113_v36  ;;  %v11821_v47 = vpop.eup %11820  ;;  %v3877_v14 = vmul.f32 %v11819_v27, %v13572_v59  ;;  %16129 = vst [vmem:[#allocation27_spill] sm:$0xff] %v13690_v10  ;;  %v9184_v34 = vmul.f32 -1.442695, %v13679_v32  ;;  %v13702_v27 = vadd.f32 %v13538_v11, %v13631_v26 }
 0x245   :  { %v4569_v23 = vadd.f32 %v4568_v31, %v3874_v4  ;;  %v13672_v29 = vpop.f32.mrb[168].mxu0  ;;  %v3116_v31 = vadd.f32 1.0, %v11821_v47  ;;  %v13698_v47 = vpop.f32.mrb[43].mxu1 }
 0x246   :  { %v13674_v3 = vpop.f32.mrb[169].mxu0  ;;  %16130 = vst [vmem:[#allocation28_spill] sm:$0xff] %v13698_v47  ;;  %v9183_v26 = vmul.f32 -1.442695, %v13702_v27 }
 0x247   :  { %v11823_v50 = vpop.eup %11822  ;;  %v4570_v46 = vadd.f32 %v4569_v23, %v3875_v56  ;;  %v13681_v49 = vpop.f32.mrb[170].mxu0  ;;  %v13696_v23 = vadd.f32 %v13538_v11, %v13628_v25  ;;  %11836 = vrcp.f32 %v3116_v31 }
 0x248   :  { %v13683_v45 = vpop.f32.mrb[171].mxu0  ;;  %v3878_v28 = vmul.f32 %v11823_v50, %v13595_v60  ;;  %11838 = vpow2.f32 %v9182_v7 }
 0x249   :  { %v11825_v48 = vpop.eup %11824  ;;  %v4571_v36 = vadd.f32 %v4570_v46, %v3876_v39  ;;  %v9185_v31 = vmul.f32 -1.442695, %v13696_v23 }
 0x24a   :  { %v11827_v37 = vpop.eup %11826  ;;  %v3879_v56 = vmul.f32 %v11825_v48, %v13603_v8 }
 0x24b   :  { %v11829_v51 = vpop.eup %11828  ;;  %v4572_v4 = vadd.f32 %v4571_v36, %v3877_v14  ;;  %v3880_v36 = vmul.f32 %v11827_v37, %v13585_v18  ;;  %v13718_v18 = vadd.f32 %v13538_v11, %v13652_v33 }
 0x24c   :  { %v11831_v59 = vpop.eup %11830  ;;  %v3114_v60 = vadd.f32 1.0, %v11829_v51 }
 0x24d   :  { %v11833_v50 = vpop.eup %11832  ;;  %v4573_v39 = vadd.f32 %v4572_v4, %v3878_v28  ;;  %v3117_v46 = vadd.f32 1.0, %v11831_v59  ;;  %v13704_v8 = vpop.f32.mrb[172].mxu0 }
 0x24e   :  { %v11835_v48 = vpop.eup %11834  ;;  %11840 = vrcp.f32 %v3114_v60  ;;  %v3115_v14 = vadd.f32 1.0, %v11833_v50  ;;  %v13706_v25 = vpop.f32.mrb[173].mxu0  ;;  %v13726_v60 = vadd.f32 %v13538_v11, %v13655_v58  ;;  %v13741_v58 = vadd.f32 %v13538_v11, %v13659_v52 }
 0x24f   :  { %v4574_v47 = vadd.f32 %v4573_v39, %v3879_v56  ;;  %11842 = vpow2.f32 %v9184_v34  ;;  %v13710_v51 = vpop.f32.mrb[174].mxu0  ;;  %v3881_v7 = vmul.f32 %v11835_v48, %v13609_v30  ;;  %v13722_v56 = vpop.f32.mrb[44].mxu1 }
 0x250   :  { %11844 = vrcp.f32 %v3115_v14  ;;  %v13713_v28 = vpop.f32.mrb[175].mxu0  ;;  %16131 = vst [vmem:[#allocation29_spill] sm:$0xff] %v13722_v56  ;;  %v9188_v14 = vmul.f32 -1.442695, %v13718_v18 }
 0x251   :  { %v4575_v4 = vadd.f32 %v4574_v47, %v3880_v36  ;;  %11846 = vrcp.f32 %v3117_v46  ;;  %v11837_v34 = vpop.eup %11836  ;;  %v13736_v36 = vpop.f32.mrb[45].mxu1 }
 0x252   :  { %11848 = vpow2.f32 %v9185_v31  ;;  %v11839_v30 = vpop.eup %11838  ;;  %16132 = vst [vmem:[#allocation30_spill] sm:$0xff] %v13736_v36  ;;  %v13744_v13 = vpop.f32.mrb[46].mxu1  ;;  %v3884_v20 = vmul.f32 %v11837_v34, %v13619_v55 }
 0x253   :  { %v4576_v59 = vadd.f32 %v4575_v4, %v3881_v7  ;;  %11850 = vpow2.f32 %v9183_v26  ;;  %v9186_v26 = vmul.f32 -1.442695, %v13726_v60  ;;  %v3118_v10 = vadd.f32 1.0, %v11839_v30  ;;  %16133 = vst [vmem:[#allocation31_spill] sm:$0xff] %v13744_v13 }
 0x254   :  { %11852 = vpow2.f32 %v9188_v14  ;;  %v9189_v30 = vmul.f32 -1.442695, %v13741_v58 }
 0x255   :  { %v13720_v37 = vpop.f32.mrb[176].mxu0  ;;  %11854 = vpow2.f32 %v9186_v26 }
 0x256   :  { %v13728_v50 = vpop.f32.mrb[177].mxu0  ;;  %11856 = vrcp.f32 %v3118_v10 }
 0x257   :  { %v13730_v47 = vpop.f32.mrb[178].mxu0 }
 0x258   :  { %v11841_v39 = vpop.eup %11840  ;;  %v13732_v46 = vpop.f32.mrb[179].mxu0 }
 0x259   :  { %v11843_v48 = vpop.eup %11842  ;;  %v3882_v33 = vmul.f32 %v11841_v39, %v13638_v43  ;;  %v13748_v43 = vadd.f32 %v13538_v11, %v13661_v19  ;;  %v13750_v39 = vpop.f32.mrb[47].mxu1 }
 0x25a   :  { %v11845_v31 = vpop.eup %11844  ;;  %v3120_v15 = vadd.f32 1.0, %v11843_v48  ;;  %16134 = vst [vmem:[#allocation32_spill] sm:$0xff] %v13750_v39  ;;  %v13770_v10 = vpop.f32.mrb[48].mxu1 }
 0x25b   :  { %v11847_v7 = vpop.eup %11846  ;;  %v4577_v4 = vadd.f32 %v4576_v59, %v3882_v33  ;;  %v3883_v56 = vmul.f32 %v11845_v31, %v13644_v24  ;;  %v9187_v55 = vmul.f32 -1.442695, %v13748_v43  ;;  %16135 = vst [vmem:[#allocation33_spill] sm:$0xff] %v13770_v10 }
 0x25c   :  { %v11849_v36 = vpop.eup %11848  ;;  %v3885_v24 = vmul.f32 %v11847_v7, %v13641_v21  ;;  %11858 = vrcp.f32 %v3120_v15  ;;  %v10452_v21 = vld [vmem:[%s16089_s5 + $0x8] ss:$16 sps:$4 sm:$0xff]   ;;  %v13774_v15 = vadd.f32 %v13538_v11, %v13218_v61 }
 0x25d   :  { %v4578_v2 = vadd.f32 %v4577_v4, %v3883_v56  ;;  %v13753_v52 = vpop.f32.mrb[180].mxu0  ;;  %v11851_v59 = vpop.eup %11850  ;;  %v3121_v19 = vadd.f32 1.0, %v11849_v36 }
 0x25e   :  { %v13757_v48 = vpop.f32.mrb[181].mxu0  ;;  %v3119_v31 = vadd.f32 1.0, %v11851_v59  ;;  %16136 = vst [vmem:[#allocation34_spill] sm:$0xff] %v13774_v15  ;;  %v11853_v7 = vpop.eup %11852  ;;  %v13782_v59 = vadd.f32 %v13538_v11, %v13674_v3 }
 0x25f   :  { %v4579_v33 = vadd.f32 %v4578_v2, %v3884_v20  ;;  %v13759_v39 = vpop.f32.mrb[182].mxu0  ;;  %v10454_v2 = vld [vmem:[%s16089_s5 + $0xc] ss:$16 sps:$4 sm:$0xff]  }
 0x260   :  { %v13762_v56 = vpop.f32.mrb[183].mxu0  ;;  %11860 = vrcp.f32 %v3119_v31  ;;  %8283 = vmatprep.subr.bf16.mxu0 %v10454_v2  ;;  %v9224_v31 = vmul.f32 -1.442695, %v13774_v15  ;;  %v3124_v2 = vadd.f32 1.0, %v11853_v7  ;;  %v9190_v13 = vmul.f32 -1.442695, %v13782_v59 }
 0x261   :  { %v4580_v34 = vadd.f32 %v4579_v33, %v3885_v24  ;;  %11862 = vpow2.f32 %v9189_v30  ;;  %8284 = vmatpush1.bf16.msra.mxu0 %v10452_v21  ;;  %v11855_v30 = vpop.eup %11854  ;;  %v13788_v33 = vadd.f32 %v13538_v11, %v13672_v29 }
 0x262   :  { %11864 = vrcp.f32 %v3121_v19  ;;  %v11857_v19 = vpop.eup %11856 }
 0x263   :  { %v4581_v20 = vrot.slane %v4580_v34, 4  ;;  %11866 = vpow2.f32 %v9187_v55  ;;  %v3886_v29 = vmul.f32 %v11857_v19, %v13670_v6  ;;  %v9192_v44 = vmul.f32 -1.442695, %v13788_v33 }
 0x265   :  { %v4582_v14 = vadd.f32 %v4581_v20, %v4580_v34  ;;  %v13776_v36 = vpop.f32.mrb[184].mxu0  ;;  %v3122_v34 = vadd.f32 1.0, %v11855_v30  ;;  %v13793_v20 = vpop.f32.mrb[49].mxu1  ;;  %v13807_v30 = vadd.f32 %v13538_v11, %v13223_v57 }
 0x266   :  { %v13778_v26 = vpop.f32.mrb[185].mxu0  ;;  %v11859_v21 = vpop.eup %11858 }
 0x267   :  { %v4583_v4 = vrot.slane %v4582_v14, 2  ;;  %v13784_v24 = vpop.f32.mrb[186].mxu0  ;;  %11868 = vrcp.f32 %v3122_v34  ;;  %16140 = vst [vmem:[#allocation38_spill] sm:$0xff] %v13807_v30  ;;  %v13811_v34 = vadd.f32 %v13538_v11, %v13226_v38 }
 0x268   :  { %16137 = vst [vmem:[#allocation35_spill] sm:$0xff] %v13784_v24  ;;  %v13790_v61 = vpop.f32.mrb[187].mxu0  ;;  %11870 = vpow2.f32 %v9224_v31  ;;  %v13820_v31 = vadd.f32 %v13538_v11, %v13683_v45  ;;  %v9222_v45 = vmul.f32 -1.442695, %v13807_v30 }
 0x269   :  { %16138 = vst [vmem:[#allocation36_spill] sm:$0xff] %v13790_v61  ;;  %v4584_v55 = vadd.f32 %v4583_v4, %v4582_v14  ;;  %v13801_v14 = vadd.f32 %v13538_v11, %v13681_v49  ;;  %v13803_v4 = vpop.f32.mrb[50].mxu1  ;;  %16141 = vst [vmem:[#allocation39_spill] sm:$0xff] %v13811_v34  ;;  %v3888_v49 = vmul.f32 %v11859_v21, %v13679_v32  ;;  %11872 = vrcp.f32 %v3124_v2 }
 0x26a   :  { %v11861_v3 = vpop.eup %11860  ;;  %16139 = vst [vmem:[#allocation37_spill] sm:$0xff] %v13803_v4  ;;  %v13815_v19 = vpop.f32.mrb[51].mxu1  ;;  %11874 = vpow2.f32 %v9190_v13  ;;  %v9191_v13 = vmul.f32 -1.442695, %v13820_v31 }
 0x26b   :  { %v4585_v10 = vrot.slane %v4584_v55, 1  ;;  %v11863_v24 = vpop.eup %11862  ;;  %v3887_v61 = vmul.f32 %v11861_v3, %v13702_v27  ;;  %16142 = vst [vmem:[#allocation40_spill] sm:$0xff] %v13815_v19  ;;  %11876 = vpow2.f32 %v9192_v44  ;;  %v13840_v2 = vpop.f32.mrb[52].mxu1 }
 0x26c   :  { %v11865_v7 = vpop.eup %11864  ;;  %v13843_v44 = vpop.f32.mrb[53].mxu1 }
 0x26d   :  { %v4586_v6 = vadd.f32 %v4585_v10, %v4584_v55  ;;  %v13813_v27 = vpop.f32.mrb[188].mxu0  ;;  %v11867_v3 = vpop.eup %11866  ;;  %v4587_v15 = vadd.f32 %v3887_v61, %v3886_v29  ;;  %v3125_v10 = vadd.f32 1.0, %v11863_v24  ;;  %v3889_v19 = vmul.f32 %v11865_v7, %v13696_v23  ;;  %16145 = vst [vmem:[#allocation43_spill] sm:$0xff] %v13843_v44 }
 0x26e   :  { %v13822_v57 = vpop.f32.mrb[189].mxu0  ;;  %v3123_v55 = vadd.f32 1.0, %v11867_v3  ;;  %v9193_v61 = vmul.f32 -1.442695, %v13801_v14  ;;  %v9225_v23 = vmul.f32 -1.442695, %v13811_v34 }
 0x26f   :  { %v13826_v38 = vsel %vm4712_vm3, %v4586_v6, %v13592_v62  ;;  %v13828_v4 = vpop.f32.mrb[190].mxu0  ;;  %v4588_v32 = vadd.f32 %v4587_v15, %v3888_v49  ;;  %v13837_v62 = vadd.f32 %v13538_v11, %v13230_v63  ;;  %v13845_v15 = vpop.f32.mrb[54].mxu1 }
 0x270   :  { %16143 = vst [vmem:[#allocation41_spill] sm:$0xff] %v13826_v38  ;;  %v13832_v21 = vpop.f32.mrb[191].mxu0  ;;  %11878 = vrcp.f32 %v3123_v55  ;;  %16146 = vst [vmem:[#allocation44_spill] sm:$0xff] %v13845_v15  ;;  %v13849_v6 = vpop.f32.mrb[55].mxu1 }
 0x271   :  { %16144 = vst [vmem:[#allocation42_spill] sm:$0xff] %v13837_v62  ;;  %v4589_v24 = vadd.f32 %v4588_v32, %v3889_v19  ;;  %11880 = vrcp.f32 %v3125_v10  ;;  %v11869_v29 = vpop.eup %11868  ;;  %16147 = vst [vmem:[#allocation45_spill] sm:$0xff] %v13849_v6  ;;  %v9223_v63 = vmul.f32 -1.442695, %v13837_v62  ;;  %v13859_v32 = vadd.f32 %v13538_v11, %v13263_v54  ;;  %v10457_v54 = vld [vmem:[%s16090_s3 + $0x4] ss:$48 sps:$4 sm:$0xff]  }
 0x272   :  { %11882 = vpow2.f32 %v9193_v61  ;;  %v3890_v19 = vmul.f32 %v11869_v29, %v13726_v60  ;;  %v11871_v49 = vpop.eup %11870  ;;  %v13865_v62 = vadd.f32 %v13538_v11, %v13269_v12  ;;  %v13877_v12 = vadd.f32 %v13538_v11, %v13704_v8  ;;  %5369 = vmatprep.subr.bf16.mxu1 %v10457_v54 }
 0x273   :  { %11884 = vpow2.f32 %v9222_v45  ;;  %v11873_v55 = vpop.eup %11872  ;;  %16148 = vst [vmem:[#allocation46_spill] sm:$0xff] %v13859_v32  ;;  %v3160_v30 = vadd.f32 1.0, %v11871_v49  ;;  %v13887_v8 = vadd.f32 %v13538_v11, %v13706_v25  ;;  %v13898_v11 = vld [vmem:[%s16088_s2] ss:$0 sm:$0xff] }
 0x274   :  { %11886 = vpow2.f32 %v9191_v13  ;;  %v4590_v61 = vadd.f32 %v4589_v24, %v3890_v19  ;;  %v11875_v34 = vpop.eup %11874  ;;  %16149 = vst [vmem:[#allocation47_spill] sm:$0xff] %v13865_v62  ;;  %v9228_v24 = vmul.f32 -1.442695, %v13859_v32  ;;  %v3892_v6 = vmul.f32 %v11873_v55, %v13718_v18 }
 0x275   :  { %v13847_v7 = vpop.f32.mrb[192].mxu0  ;;  %11888 = vpow2.f32 %v9225_v23  ;;  %v11877_v60 = vpop.eup %11876  ;;  %v3126_v13 = vadd.f32 1.0, %v11875_v34  ;;  %v10455_v23 = vld [vmem:[%s16090_s3] ss:$48 sps:$4 sm:$0xff]   ;;  %v9196_v18 = vmul.f32 -1.442695, %v13877_v12  ;;  %v13902_v25 = vadd.f32 %v13898_v11, %v13710_v51 }
 0x276   :  { %v13853_v3 = vpop.f32.mrb[193].mxu0  ;;  %11890 = vpow2.f32 %v9223_v63  ;;  %v9226_v63 = vmul.f32 -1.442695, %v13865_v62  ;;  %v3128_v44 = vadd.f32 1.0, %v11877_v60  ;;  %5370 = vmatpush1.bf16.msra.mxu1 %v10455_v23  ;;  %v13915_v51 = vadd.f32 %v13898_v11, %v13283_v1 }
 0x277   :  { %v13855_v10 = vpop.f32.mrb[194].mxu0  ;;  %11892 = vrcp.f32 %v3126_v13 }
 0x278   :  { %v13861_v45 = vpop.f32.mrb[195].mxu0  ;;  %11894 = vrcp.f32 %v3160_v30  ;;  %16151 = vst [vmem:[#allocation49_spill] sm:$0xff] %v13915_v51 }
 0x279   :  { %11896 = vpow2.f32 %v9228_v24 }
 0x27a   :  { %v11879_v29 = vpop.eup %11878  ;;  %11898 = vpow2.f32 %v9226_v63 }
 0x27b   :  { %v3891_v19 = vmul.f32 %v11879_v29, %v13748_v43  ;;  %v11881_v34 = vpop.eup %11880  ;;  %11900 = vrcp.f32 %v3128_v44 }
 0x27c   :  { %v11883_v49 = vpop.eup %11882  ;;  %v3893_v54 = vmul.f32 %v11881_v34, %v13741_v58  ;;  %v13911_v34 = vadd.f32 %v13898_v11, %v13275_v17 }
 0x27d   :  { %v13880_v38 = vpop.f32.mrb[196].mxu0  ;;  %v4591_v15 = vadd.f32 %v4590_v61, %v3891_v19  ;;  %v11885_v43 = vpop.eup %11884  ;;  %v3129_v60 = vadd.f32 1.0, %v11883_v49 }
 0x27e   :  { %v13883_v32 = vpop.f32.mrb[197].mxu0  ;;  %v11887_v29 = vpop.eup %11886  ;;  %v3158_v30 = vadd.f32 1.0, %v11885_v43  ;;  %16150 = vst [vmem:[#allocation48_spill] sm:$0xff] %v13911_v34  ;;  %v13926_v43 = vadd.f32 %v13898_v11, %v13713_v28  ;;  %v9229_v1 = vmul.f32 -1.442695, %v13911_v34 }
 0x27f   :  { %v13889_v13 = vpop.f32.mrb[198].mxu0  ;;  %v4592_v62 = vadd.f32 %v4591_v15, %v3892_v6  ;;  %v11889_v61 = vpop.eup %11888  ;;  %v3127_v23 = vadd.f32 1.0, %v11887_v29  ;;  %v13906_v15 = vadd.f32 %v13898_v11, %v13477_v42  ;;  %v9194_v6 = vmul.f32 -1.442695, %v13887_v8 }
 0x280   :  { %v13893_v55 = vpop.f32.mrb[199].mxu0  ;;  %v11891_v24 = vpop.eup %11890  ;;  %v3161_v19 = vadd.f32 1.0, %v11889_v61  ;;  %v13920_v42 = vadd.f32 %v13898_v11, %v13321_v22  ;;  %v13931_v29 = vadd.f32 %v13898_v11, %v13499_v9  ;;  %v9227_v22 = vmul.f32 -1.442695, %v13915_v51 }
 0x281   :  { %v4593_v58 = vadd.f32 %v4592_v62, %v3893_v54  ;;  %11902 = vrcp.f32 %v3127_v23  ;;  %v9197_v62 = vmul.f32 -1.442695, %v13902_v25  ;;  %v11893_v44 = vpop.eup %11892  ;;  %v9248_v63 = vmul.f32 -1.442695, %v13906_v15 }
 0x282   :  { %11904 = vpow2.f32 %v9196_v18  ;;  %16152 = vst [vmem:[#allocation50_spill] sm:$0xff] %v13920_v42  ;;  %v3159_v49 = vadd.f32 1.0, %v11891_v24  ;;  %v3894_v17 = vmul.f32 %v11893_v44, %v13782_v59  ;;  %v13933_v54 = vpop.eup %11894  ;;  %v13938_v59 = vadd.f32 %v13898_v11, %v13502_v16 }
 0x283   :  { %11906 = vrcp.f32 %v3129_v60  ;;  %16153 = vst [vmem:[#allocation51_spill] sm:$0xff] %v13933_v54  ;;  %v13940_v61 = vpop.eup %11896  ;;  %v9230_v28 = vmul.f32 -1.442695, %v13920_v42  ;;  %v13945_v60 = vadd.f32 %v13898_v11, %v13506_v0  ;;  %v9195_v23 = vmul.f32 -1.442695, %v13926_v43 }
 0x284   :  { %11908 = vrcp.f32 %v3158_v30  ;;  %v4594_v18 = vadd.f32 %v4593_v58, %v3894_v17  ;;  %v13947_v9 = vpop.eup %11898  ;;  %v13952_v30 = vadd.f32 %v13898_v11, %v13720_v37  ;;  %v9246_v58 = vmul.f32 -1.442695, %v13931_v29 }
 0x285   :  { %11910 = vpow2.f32 %v9194_v6  ;;  %v11901_v16 = vpop.eup %11900  ;;  %v9249_v24 = vmul.f32 -1.442695, %v13938_v59 }
 0x286   :  { %11912 = vrcp.f32 %v3161_v19 }
 0x287   :  { %11914 = vpow2.f32 %v9197_v62  ;;  %v9247_v62 = vmul.f32 -1.442695, %v13945_v60 }
 0x288   :  { %11916 = vpow2.f32 %v9248_v63  ;;  %v9200_v63 = vmul.f32 -1.442695, %v13952_v30 }
 0x289   :  { %11918 = vrcp.f32 %v3159_v49  ;;  %v3896_v49 = vmul.f32 %v11901_v16, %v13788_v33 }
 0x28a   :  { %11920 = vpow2.f32 %v9229_v1  ;;  %v13964_v1 = vadd.f32 %v13898_v11, %v13728_v50 }
 0x28b   :  { %v11903_v6 = vpop.eup %11902  ;;  %11922 = vpow2.f32 %v9227_v22 }
 0x28c   :  { %v11905_v19 = vpop.eup %11904  ;;  %11924 = vpow2.f32 %v9230_v28  ;;  %v3895_v0 = vmul.f32 %v11903_v6, %v13820_v31  ;;  %v13968_v31 = vadd.f32 %v13898_v11, %v13730_v47 }
 0x28d   :  { %v11907_v44 = vpop.eup %11906  ;;  %11926 = vpow2.f32 %v9195_v23  ;;  %v3132_v28 = vadd.f32 1.0, %v11905_v19  ;;  %v13972_v23 = vadd.f32 %v13898_v11, %v13527_v5  ;;  %v9198_v5 = vmul.f32 -1.442695, %v13964_v1 }
 0x28e   :  { %v13959_v37 = vpop.eup %11908  ;;  %v4595_v17 = vadd.f32 %v4594_v18, %v3895_v0  ;;  %11928 = vpow2.f32 %v9246_v58  ;;  %v3897_v33 = vmul.f32 %v11907_v44, %v13801_v14  ;;  %v13979_v58 = vadd.f32 %v13898_v11, %v13732_v46 }
 0x28f   :  { %16154 = vst [vmem:[#allocation52_spill] sm:$0xff] %v13959_v37  ;;  %v11911_v22 = vpop.eup %11910  ;;  %11930 = vpow2.f32 %v9249_v24  ;;  %v9201_v14 = vmul.f32 -1.442695, %v13968_v31 }
 0x290   :  { %v13974_v6 = vpop.eup %11912  ;;  %v4596_v18 = vadd.f32 %v4595_v17, %v3896_v49  ;;  %v3130_v16 = vadd.f32 1.0, %v11911_v22  ;;  %11932 = vpow2.f32 %v9247_v62  ;;  %v9252_v62 = vmul.f32 -1.442695, %v13972_v23 }
 0x291   :  { %16155 = vst [vmem:[#allocation53_spill] sm:$0xff] %v13974_v6  ;;  %v11915_v50 = vpop.eup %11914  ;;  %11934 = vpow2.f32 %v9200_v63  ;;  %v9199_v46 = vmul.f32 -1.442695, %v13979_v58  ;;  %v13995_v22 = vadd.f32 %v13898_v11, %v13531_v41  ;;  %v14007_v41 = vadd.f32 %v13898_v11, %v13753_v52 }
 0x292   :  { %v11917_v24 = vpop.eup %11916  ;;  %11936 = vrcp.f32 %v3130_v16  ;;  %v4597_v47 = vadd.f32 %v4596_v18, %v3897_v33  ;;  %v3133_v19 = vadd.f32 1.0, %v11915_v50  ;;  %v13999_v18 = vadd.f32 %v13898_v11, %v13556_v35 }
 0x293   :  { %v13982_v0 = vpop.eup %11918  ;;  %11938 = vrcp.f32 %v3132_v28  ;;  %v3184_v42 = vadd.f32 1.0, %v11917_v24  ;;  %v14003_v50 = vadd.f32 %v13898_v11, %v13560_v53  ;;  %v9250_v35 = vmul.f32 -1.442695, %v13995_v22 }
 0x294   :  { %16156 = vst [vmem:[#allocation54_spill] sm:$0xff] %v13982_v0  ;;  %v13985_v44 = vpop.eup %11920  ;;  %11940 = vrcp.f32 %v3133_v19  ;;  %v9204_v52 = vmul.f32 -1.442695, %v14007_v41 }
 0x295   :  { %16157 = vst [vmem:[#allocation55_spill] sm:$0xff] %v13985_v44  ;;  %v13988_v63 = vpop.eup %11922  ;;  %11942 = vrcp.f32 %v3184_v42 }
 0x296   :  { %v13991_v49 = vpop.eup %11924  ;;  %11944 = vpow2.f32 %v9198_v5 }
 0x297   :  { %16158 = vst [vmem:[#allocation56_spill] sm:$0xff] %v13991_v49  ;;  %v11927_v17 = vpop.eup %11926  ;;  %11946 = vpow2.f32 %v9201_v14 }
 0x298   :  { %v11929_v28 = vpop.eup %11928  ;;  %v3131_v33 = vadd.f32 1.0, %v11927_v17  ;;  %11948 = vpow2.f32 %v9252_v62 }
 0x299   :  { %v11931_v16 = vpop.eup %11930  ;;  %v3182_v42 = vadd.f32 1.0, %v11929_v28  ;;  %11950 = vpow2.f32 %v9199_v46  ;;  %v9253_v46 = vmul.f32 -1.442695, %v13999_v18 }
 0x29a   :  { %v11933_v24 = vpop.eup %11932  ;;  %11952 = vrcp.f32 %v3131_v33  ;;  %v3185_v19 = vadd.f32 1.0, %v11931_v16  ;;  %v9251_v33 = vmul.f32 -1.442695, %v14003_v50 }
 0x29b   :  { %v11935_v5 = vpop.eup %11934  ;;  %11954 = vrcp.f32 %v3182_v42  ;;  %v3183_v14 = vadd.f32 1.0, %v11933_v24  ;;  %v14016_v42 = vadd.f32 %v13898_v11, %v13581_v40 }
 0x29c   :  { %v11937_v62 = vpop.eup %11936  ;;  %11956 = vrcp.f32 %v3185_v19  ;;  %v3136_v17 = vadd.f32 1.0, %v11935_v5  ;;  %v14020_v19 = vadd.f32 %v13898_v11, %v13757_v48  ;;  %v14033_v48 = vadd.f32 %v13898_v11, %v13762_v56 }
 0x29d   :  { %v11939_v28 = vpop.eup %11938  ;;  %v3898_v53 = vmul.f32 %v11937_v62, %v13887_v8  ;;  %11958 = vrcp.f32 %v3183_v14  ;;  %v14024_v8 = vadd.f32 %v13898_v11, %v13759_v39 }
 0x29e   :  { %v11941_v16 = vpop.eup %11940  ;;  %11960 = vrcp.f32 %v3136_v17  ;;  %v16159_v17 = vld [vmem:[#allocation18_spill] sm:$0xff] }
 0x29f   :  { %v11943_v24 = vpop.eup %11942  ;;  %v4598_v34 = vadd.f32 %v4597_v47, %v3898_v53  ;;  %11962 = vpow2.f32 %v9250_v35  ;;  %v14028_v40 = vadd.f32 %v13898_v11, %v16159_v17  ;;  %v9256_v35 = vmul.f32 -1.442695, %v14016_v42 }
 0x2a0   :  { %v11945_v5 = vpop.eup %11944  ;;  %11964 = vpow2.f32 %v9253_v46  ;;  %v9202_v53 = vmul.f32 -1.442695, %v14020_v19 }
 0x2a1   :  { %v11947_v14 = vpop.eup %11946  ;;  %v3134_v62 = vadd.f32 1.0, %v11945_v5  ;;  %11966 = vpow2.f32 %v9251_v33  ;;  %v16160_v5 = vld [vmem:[#allocation19_spill] sm:$0xff]  ;;  %v9254_v56 = vmul.f32 -1.442695, %v14028_v40 }
 0x2a2   :  { %v11949_v51 = vpop.eup %11948  ;;  %v3137_v47 = vadd.f32 1.0, %v11947_v14  ;;  %11968 = vpow2.f32 %v9204_v52  ;;  %v14038_v33 = vadd.f32 %v13898_v11, %v16160_v5  ;;  %v9205_v52 = vmul.f32 -1.442695, %v14024_v8 }
 0x2a3   :  { %v11951_v46 = vpop.eup %11950  ;;  %11970 = vrcp.f32 %v3134_v62  ;;  %v3188_v39 = vadd.f32 1.0, %v11949_v51  ;;  %v9203_v62 = vmul.f32 -1.442695, %v14033_v48  ;;  %v3900_v5 = vmul.f32 %v11939_v28, %v13877_v12 }
 0x2a4   :  { %v11953_v17 = vpop.eup %11952  ;;  %11972 = vrcp.f32 %v3137_v47  ;;  %v3135_v6 = vadd.f32 1.0, %v11951_v46  ;;  %v9257_v47 = vmul.f32 -1.442695, %v14038_v33  ;;  %v14058_v12 = vadd.f32 %v13898_v11, %v13776_v36 }
 0x2a5   :  { %v11955_v14 = vpop.eup %11954  ;;  %v3899_v54 = vmul.f32 %v11953_v17, %v13926_v43  ;;  %11974 = vrcp.f32 %v3188_v39  ;;  %v3952_v43 = vmul.f32 %v11943_v24, %v13906_v15  ;;  %v16161_v17 = vld [vmem:[#allocation20_spill] sm:$0xff] }
 0x2a6   :  { %v11957_v0 = vpop.eup %11956  ;;  %v3950_v51 = vmul.f32 %v11955_v14, %v13931_v29  ;;  %11976 = vrcp.f32 %v3135_v6  ;;  %v14053_v29 = vadd.f32 %v13898_v11, %v16161_v17  ;;  %v3901_v14 = vmul.f32 %v11941_v16, %v13902_v25 }
 0x2a7   :  { %v11959_v37 = vpop.eup %11958  ;;  %v4599_v49 = vadd.f32 %v4598_v34, %v3899_v54  ;;  %11978 = vpow2.f32 %v9202_v53  ;;  %v3953_v54 = vmul.f32 %v11957_v0, %v13938_v59  ;;  %v14063_v53 = vadd.f32 %v13898_v11, %v13778_v26  ;;  %v16162_v0 = vld [vmem:[#allocation21_spill] sm:$0xff] }
 0x2a8   :  { %v14047_v46 = vpop.eup %11960  ;;  %v3951_v39 = vmul.f32 %v11959_v37, %v13945_v60  ;;  %11980 = vpow2.f32 %v9205_v52  ;;  %v9255_v36 = vmul.f32 -1.442695, %v14053_v29  ;;  %v14068_v52 = vadd.f32 %v13898_v11, %v16162_v0  ;;  %v10460_v26 = vld [vmem:[%s16090_s3 + $0x64] ss:$48 sps:$4 sm:$0xff]   ;;  %v16164_v0 = vld [vmem:[#allocation36_spill] sm:$0xff] }
 0x2a9   :  { %v11963_v6 = vpop.eup %11962  ;;  %v4600_v44 = vadd.f32 %v4599_v49, %v3900_v5  ;;  %11982 = vpow2.f32 %v9256_v35  ;;  %v9208_v5 = vmul.f32 -1.442695, %v14058_v12  ;;  %v12282_v17 = vmov 0   ;;  %5371 = vmatprep.subr.bf16.mxu1 %v10460_v26 }
 0x2aa   :  { %v11965_v34 = vpop.eup %11964  ;;  %v4661_v15 = vadd.f32 %v3951_v39, %v3950_v51  ;;  %v3186_v28 = vadd.f32 1.0, %v11963_v6  ;;  %11984 = vpow2.f32 %v9203_v62  ;;  %v10463_v39 = vld [vmem:[%s16089_s5 + $0x2c] ss:$16 sps:$4 sm:$0xff]   ;;  %5401 = vmatprep.mubr.bf16.mxu1 %v12282_v17  ;;  %v3904_v26 = vmul.f32 %v14047_v46, %v13952_v30 }
 0x2ab   :  { %v11967_v60 = vpop.eup %11966  ;;  %v4601_v37 = vadd.f32 %v4600_v44, %v3901_v14  ;;  %v3189_v24 = vadd.f32 1.0, %v11965_v34  ;;  %11986 = vpow2.f32 %v9254_v56  ;;  %v10458_v44 = vld [vmem:[%s16090_s3 + $0x60] ss:$48 sps:$4 sm:$0xff]   ;;  %v10466_v14 = vld [vmem:[%s16090_s3 + $0xc4] ss:$48 sps:$4 sm:$0xff]   ;;  %8285 = vmatprep.subr.bf16.mxu0 %v10463_v39 }
 0x2ac   :  { %v11969_v25 = vpop.eup %11968  ;;  %v4662_v49 = vadd.f32 %v4661_v15, %v3952_v43  ;;  %11988 = vrcp.f32 %v3186_v28  ;;  %v3187_v16 = vadd.f32 1.0, %v11967_v60  ;;  %v10461_v43 = vld [vmem:[%s16089_s5 + $0x28] ss:$16 sps:$4 sm:$0xff]   ;;  %v10469_v34 = vld [vmem:[%s16089_s5 + $0x4c] ss:$16 sps:$4 sm:$0xff]   ;;  %v16163_v28 = vld [vmem:[#allocation35_spill] sm:$0xff]  ;;  %5372 = vmatpush1.bf16.msra.mxu1 %v10458_v44  ;;  %v14113_v44 = vadd.f32 %v13898_v11, %v16164_v0 }
 0x2ad   :  { %v11971_v35 = vpop.eup %11970  ;;  %11990 = vrcp.f32 %v3189_v24  ;;  %v3140_v59 = vadd.f32 1.0, %v11969_v25  ;;  %v14098_v60 = vadd.f32 %v13898_v11, %v16163_v28  ;;  %v10464_v24 = vld [vmem:[%s16090_s3 + $0xc0] ss:$48 sps:$4 sm:$0xff]   ;;  %8286 = vmatpush1.bf16.msra.mxu0 %v10461_v43  ;;  %5373 = vmatprep.subr.bf16.mxu1 %v10466_v14 }
 0x2ae   :  { %v11973_v56 = vpop.eup %11972  ;;  %v3902_v51 = vmul.f32 %v11971_v35, %v13964_v1  ;;  %v14077_v62 = vadd.f32 %v4662_v49, %v3953_v54  ;;  %11992 = vrcp.f32 %v3187_v16  ;;  %v9206_v1 = vmul.f32 -1.442695, %v14063_v53  ;;  %8287 = vmatprep.subr.bf16.mxu0 %v10469_v34  ;;  %v10470_v34 = vld [vmem:[%s16090_s3 + $0x120] ss:$48 sps:$4 sm:$0xff]  }
 0x2af   :  { %v14087_v6 = vpop.eup %11974  ;;  %11994 = vrcp.f32 %v3140_v59  ;;  %v9260_v59 = vmul.f32 -1.442695, %v14068_v52  ;;  %v9209_v14 = vmul.f32 -1.442695, %v14098_v60  ;;  %v3905_v30 = vmul.f32 %v11973_v56, %v13968_v31  ;;  %v10473_v31 = vld [vmem:[%s16090_s3 + $0x180] ss:$48 sps:$4 sm:$0xff]  }
 0x2b0   :  { %v11977_v54 = vpop.eup %11976  ;;  %v4602_v15 = vadd.f32 %v4601_v37, %v3902_v51  ;;  %11996 = vpow2.f32 %v9257_v47  ;;  %v10467_v47 = vld [vmem:[%s16089_s5 + $0x48] ss:$16 sps:$4 sm:$0xff]   ;;  %v10472_v37 = vld [vmem:[%s16090_s3 + $0x124] ss:$48 sps:$4 sm:$0xff]   ;;  %5374 = vmatpush1.bf16.msra.mxu1 %v10464_v24  ;;  %v10487_v56 = vld [vmem:[%s16089_s5 + $0x8c] ss:$16 sps:$4 sm:$0xff]  }
 0x2b1   :  { %v11979_v25 = vpop.eup %11978  ;;  %v3903_v49 = vmul.f32 %v11977_v54, %v13979_v58  ;;  %11998 = vpow2.f32 %v9255_v36  ;;  %v10478_v58 = vld [vmem:[%s16089_s5 + $0x6c] ss:$16 sps:$4 sm:$0xff]   ;;  %8288 = vmatpush1.bf16.msra.mxu0 %v10467_v47  ;;  %5375 = vmatprep.subr.bf16.mxu1 %v10472_v37  ;;  %v10476_v24 = vld [vmem:[%s16089_s5 + $0x68] ss:$16 sps:$4 sm:$0xff]   ;;  %v9207_v0 = vmul.f32 -1.442695, %v14113_v44 }
 0x2b2   :  { %v11981_v16 = vpop.eup %11980  ;;  %v3138_v35 = vadd.f32 1.0, %v11979_v25  ;;  %12000 = vpow2.f32 %v9208_v5  ;;  %v16165_v54 = vld [vmem:[#allocation22_spill] sm:$0xff]  ;;  %8289 = vmatprep.subr.bf16.mxu0 %v10478_v58 }
 0x2b3   :  { %v11983_v36 = vpop.eup %11982  ;;  %v4603_v51 = vadd.f32 %v4602_v15, %v3903_v49  ;;  %v3141_v43 = vadd.f32 1.0, %v11981_v16  ;;  %12002 = vpow2.f32 %v9206_v1  ;;  %v14123_v28 = vadd.f32 %v13898_v11, %v16165_v54  ;;  %v10475_v15 = vld [vmem:[%s16090_s3 + $0x184] ss:$48 sps:$4 sm:$0xff]  }
 0x2b4   :  { %v11985_v39 = vpop.eup %11984  ;;  %12004 = vrcp.f32 %v3138_v35  ;;  %v3192_v5 = vadd.f32 1.0, %v11983_v36  ;;  %v10481_v36 = vld [vmem:[%s16090_s3 + $0x1e4] ss:$48 sps:$4 sm:$0xff]   ;;  %5376 = vmatpush1.bf16.msra.mxu1 %v10470_v34  ;;  %v14166_v34 = vadd.f32 %v13898_v11, %v13813_v27 }
 0x2b5   :  { %v11987_v25 = vpop.eup %11986  ;;  %v4604_v46 = vadd.f32 %v4603_v51, %v3904_v26  ;;  %12006 = vrcp.f32 %v3141_v43  ;;  %v3139_v1 = vadd.f32 1.0, %v11985_v39  ;;  %v10485_v26 = vld [vmem:[%s16089_s5 + $0x88] ss:$16 sps:$4 sm:$0xff]   ;;  %v9258_v51 = vmul.f32 -1.442695, %v14123_v28  ;;  %v16166_v43 = vld [vmem:[#allocation23_spill] sm:$0xff]  ;;  %5377 = vmatprep.subr.bf16.mxu1 %v10475_v15  ;;  %8290 = vmatpush1.bf16.msra.mxu0 %v10476_v24 }
 0x2b6   :  { %v11989_v49 = vpop.eup %11988  ;;  %12008 = vrcp.f32 %v3192_v5  ;;  %v3190_v16 = vadd.f32 1.0, %v11987_v25  ;;  %v14152_v39 = vadd.f32 %v13898_v11, %v16166_v43  ;;  %v3956_v5 = vmul.f32 %v14087_v6, %v13972_v23  ;;  %v10479_v23 = vld [vmem:[%s16090_s3 + $0x1e0] ss:$48 sps:$4 sm:$0xff]   ;;  %8291 = vmatprep.subr.bf16.mxu0 %v10487_v56 }
 0x2b7   :  { %v11991_v47 = vpop.eup %11990  ;;  %v3954_v37 = vmul.f32 %v11989_v49, %v13995_v22  ;;  %v4605_v35 = vadd.f32 %v4604_v46, %v3905_v30  ;;  %12010 = vrcp.f32 %v3139_v1  ;;  %v16167_v46 = vld [vmem:[#allocation24_spill] sm:$0xff]  ;;  %v14178_v49 = vadd.f32 %v13898_v11, %v13822_v57 }
 0x2b8   :  { %v11993_v58 = vpop.eup %11992  ;;  %12012 = vrcp.f32 %v3190_v16  ;;  %v14162_v1 = vadd.f32 %v13898_v11, %v16167_v46  ;;  %v9261_v27 = vmul.f32 -1.442695, %v14152_v39  ;;  %5378 = vmatpush1.bf16.msra.mxu1 %v10473_v31  ;;  %v10482_v31 = vld [vmem:[%s16090_s3 + $0x240] ss:$48 sps:$4 sm:$0xff]  }
 0x2b9   :  { %v14154_v22 = vpop.eup %11994  ;;  %v4664_v54 = vadd.f32 %v14077_v62, %v3954_v37  ;;  %v3955_v25 = vmul.f32 %v11993_v58, %v14003_v50  ;;  %12014 = vpow2.f32 %v9209_v14  ;;  %v3957_v50 = vmul.f32 %v11991_v47, %v13999_v18  ;;  %5379 = vmatprep.subr.bf16.mxu1 %v10481_v36  ;;  %8292 = vmatpush1.bf16.msra.mxu0 %v10485_v26  ;;  %v10490_v26 = vld [vmem:[%s16090_s3 + $0x2a4] ss:$48 sps:$4 sm:$0xff]  }
 0x2ba   :  { %v11997_v30 = vpop.eup %11996  ;;  %12016 = vpow2.f32 %v9260_v59  ;;  %v10484_v59 = vld [vmem:[%s16090_s3 + $0x244] ss:$48 sps:$4 sm:$0xff]   ;;  %v14182_v47 = vadd.f32 %v13898_v11, %v13828_v4  ;;  %v9259_v58 = vmul.f32 -1.442695, %v14162_v1  ;;  %v9212_v36 = vmul.f32 -1.442695, %v14166_v34 }
 0x2bb   :  { %v11999_v62 = vpop.eup %11998  ;;  %v4665_v6 = vadd.f32 %v4664_v54, %v3955_v25  ;;  %v3193_v14 = vadd.f32 1.0, %v11997_v30  ;;  %12018 = vpow2.f32 %v9207_v0  ;;  %v9210_v25 = vmul.f32 -1.442695, %v14178_v49 }
 0x2bc   :  { %v12001_v15 = vpop.eup %12000  ;;  %v3191_v24 = vadd.f32 1.0, %v11999_v62  ;;  %12020 = vpow2.f32 %v9258_v51  ;;  %v16168_v51 = vld [vmem:[#allocation25_spill] sm:$0xff]  ;;  %5380 = vmatpush1.bf16.msra.mxu1 %v10479_v23  ;;  %v9213_v62 = vmul.f32 -1.442695, %v14182_v47 }
 0x2bd   :  { %v12003_v16 = vpop.eup %12002  ;;  %v4666_v56 = vadd.f32 %v4665_v6, %v3956_v5  ;;  %12022 = vrcp.f32 %v3193_v14  ;;  %v3144_v18 = vadd.f32 1.0, %v12001_v15  ;;  %v14187_v57 = vadd.f32 %v13898_v11, %v16168_v51  ;;  %5381 = vmatprep.subr.bf16.mxu1 %v10484_v59  ;;  %v16169_v6 = vld [vmem:[#allocation26_spill] sm:$0xff]  ;;  %v10488_v15 = vld [vmem:[%s16090_s3 + $0x2a0] ss:$48 sps:$4 sm:$0xff]  }
 0x2be   :  { %v12005_v37 = vpop.eup %12004  ;;  %12024 = vrcp.f32 %v3191_v24  ;;  %v3142_v0 = vadd.f32 1.0, %v12003_v16  ;;  %v14202_v14 = vadd.f32 %v13898_v11, %v16169_v6  ;;  %v14211_v59 = vadd.f32 %v13898_v11, %v13832_v21  ;;  %v14221_v21 = vld [vmem:[%s16088_s2] ss:$0 sm:$0xff] }
 0x2bf   :  { %v12007_v43 = vpop.eup %12006  ;;  %v3906_v5 = vmul.f32 %v12005_v37, %v14020_v19  ;;  %v4667_v4 = vadd.f32 %v4666_v56, %v3957_v50  ;;  %12026 = vrcp.f32 %v3144_v18  ;;  %v3908_v16 = vmul.f32 %v14154_v22, %v14007_v41  ;;  %v16170_v11 = vld [vmem:[#allocation27_spill] sm:$0xff] }
 0x2c0   :  { %v12009_v54 = vpop.eup %12008  ;;  %12028 = vrcp.f32 %v3142_v0  ;;  %5382 = vmatpush1.bf16.msra.mxu1 %v10482_v31  ;;  %v3909_v41 = vmul.f32 %v12007_v43, %v14024_v8 }
 0x2c1   :  { %v12011_v30 = vpop.eup %12010  ;;  %v4606_v46 = vadd.f32 %v4605_v35, %v3906_v5  ;;  %12030 = vpow2.f32 %v9261_v27  ;;  %v9264_v35 = vmul.f32 -1.442695, %v14187_v57  ;;  %5383 = vmatprep.subr.bf16.mxu1 %v10490_v26  ;;  %v3960_v26 = vmul.f32 %v12009_v54, %v14016_v42 }
 0x2c2   :  { %v12013_v19 = vpop.eup %12012  ;;  %v3907_v50 = vmul.f32 %v12011_v30, %v14033_v48  ;;  %12032 = vpow2.f32 %v9259_v58  ;;  %v10493_v48 = vld [vmem:[%s16090_s3 + $0xc] ss:$48 sps:$4 sm:$0xff]   ;;  %v14225_v58 = vadd.f32 %v14221_v21, %v16170_v11 }
 0x2c3   :  { %v12015_v24 = vpop.eup %12014  ;;  %v3958_v23 = vmul.f32 %v12013_v19, %v14028_v40  ;;  %12034 = vpow2.f32 %v9212_v36  ;;  %v9211_v36 = vmul.f32 -1.442695, %v14211_v59 }
 0x2c4   :  { %v12017_v27 = vpop.eup %12016  ;;  %v4607_v56 = vadd.f32 %v4606_v46, %v3907_v50  ;;  %v3145_v18 = vadd.f32 1.0, %v12015_v24  ;;  %12036 = vpow2.f32 %v9210_v25  ;;  %v9262_v46 = vmul.f32 -1.442695, %v14202_v14  ;;  %5384 = vmatpush1.bf16.msra.mxu1 %v10488_v15  ;;  %v16171_v50 = vld [vmem:[#allocation28_spill] sm:$0xff] }
 0x2c5   :  { %v12019_v40 = vpop.eup %12018  ;;  %v4668_v37 = vadd.f32 %v4667_v4, %v3958_v23  ;;  %v3196_v0 = vadd.f32 1.0, %v12017_v27  ;;  %12038 = vpow2.f32 %v9213_v62  ;;  %v9265_v8 = vmul.f32 -1.442695, %v14225_v58  ;;  %5410 = vmatprep.subr.bf16.mxu1 %v10493_v48 }
 0x2c6   :  { %v12021_v51 = vpop.eup %12020  ;;  %v4608_v22 = vadd.f32 %v4607_v56, %v3908_v16  ;;  %12040 = vrcp.f32 %v3145_v18  ;;  %v3143_v31 = vadd.f32 1.0, %v12019_v40  ;;  %v14235_v6 = vadd.f32 %v14221_v21, %v16171_v50 }
 0x2c7   :  { %v12023_v5 = vpop.eup %12022  ;;  %12042 = vrcp.f32 %v3196_v0  ;;  %v3194_v4 = vadd.f32 1.0, %v12021_v51  ;;  %v14239_v24 = vadd.f32 %v14221_v21, %v13847_v7 }
 0x2c8   :  { %v12025_v25 = vpop.eup %12024  ;;  %v4609_v30 = vadd.f32 %v4608_v22, %v3909_v41  ;;  %12044 = vrcp.f32 %v3143_v31  ;;  %v3961_v23 = vmul.f32 %v12023_v5, %v14038_v33  ;;  %v9263_v33 = vmul.f32 -1.442695, %v14235_v6  ;;  %v10494_v22 = vld [vmem:[%s16089_s5 + $0xa8] ss:$16 sps:$4 sm:$0xff]   ;;  %v10496_v31 = vld [vmem:[%s16089_s5 + $0xac] ss:$16 sps:$4 sm:$0xff]  }
 0x2c9   :  { %v12027_v62 = vpop.eup %12026  ;;  %v3959_v19 = vmul.f32 %v12025_v25, %v14053_v29  ;;  %12046 = vrcp.f32 %v3194_v4  ;;  %v16172_v25 = vld [vmem:[#allocation29_spill] sm:$0xff]  ;;  %8293 = vmatprep.subr.bf16.mxu0 %v10496_v31 }
 0x2ca   :  { %v12029_v43 = vpop.eup %12028  ;;  %12048 = vpow2.f32 %v9264_v35  ;;  %v14245_v35 = vadd.f32 %v14221_v21, %v13853_v3  ;;  %v9216_v3 = vmul.f32 -1.442695, %v14239_v24  ;;  %8294 = vmatpush1.bf16.msra.mxu0 %v10494_v22 }
 0x2cb   :  { %v12031_v15 = vpop.eup %12030  ;;  %v4669_v42 = vadd.f32 %v4668_v37, %v3959_v19  ;;  %v3910_v29 = vmul.f32 %v12029_v43, %v14063_v53  ;;  %12050 = vpow2.f32 %v9211_v36  ;;  %v14250_v53 = vadd.f32 %v14221_v21, %v13855_v10  ;;  %v16173_v19 = vld [vmem:[#allocation30_spill] sm:$0xff]  ;;  %v16174_v43 = vld [vmem:[#allocation31_spill] sm:$0xff] }
 0x2cc   :  { %v12033_v54 = vpop.eup %12032  ;;  %v3197_v27 = vadd.f32 1.0, %v12031_v15  ;;  %12052 = vpow2.f32 %v9262_v46  ;;  %v9214_v10 = vmul.f32 -1.442695, %v14245_v35  ;;  %v14272_v50 = vadd.f32 %v14221_v21, %v16174_v43 }
 0x2cd   :  { %v12035_v48 = vpop.eup %12034  ;;  %v4670_v16 = vadd.f32 %v4669_v42, %v3960_v26  ;;  %v4610_v56 = vadd.f32 %v4609_v30, %v3910_v29  ;;  %v3195_v18 = vadd.f32 1.0, %v12033_v54  ;;  %12054 = vpow2.f32 %v9265_v8  ;;  %v16175_v29 = vld [vmem:[#allocation32_spill] sm:$0xff] }
 0x2ce   :  { %v12037_v7 = vpop.eup %12036  ;;  %12056 = vrcp.f32 %v3197_v27  ;;  %v3148_v40 = vadd.f32 1.0, %v12035_v48  ;;  %v9217_v36 = vmul.f32 -1.442695, %v14250_v53  ;;  %v14263_v30 = vadd.f32 %v14221_v21, %v16172_v25 }
 0x2cf   :  { %v12039_v37 = vpop.eup %12038  ;;  %v4671_v0 = vadd.f32 %v4670_v16, %v3961_v23  ;;  %12058 = vrcp.f32 %v3195_v18  ;;  %v3146_v11 = vadd.f32 1.0, %v12037_v7  ;;  %v14268_v8 = vadd.f32 %v14221_v21, %v16173_v19 }
 0x2d0   :  { %v12041_v51 = vpop.eup %12040  ;;  %12060 = vrcp.f32 %v3148_v40  ;;  %v3149_v41 = vadd.f32 1.0, %v12039_v37  ;;  %v14277_v42 = vadd.f32 %v14221_v21, %v13861_v45  ;;  %v3912_v27 = vmul.f32 %v12027_v62, %v14058_v12 }
 0x2d1   :  { %v12043_v5 = vpop.eup %12042  ;;  %12062 = vrcp.f32 %v3146_v11  ;;  %v3913_v45 = vmul.f32 %v12041_v51, %v14098_v60  ;;  %v9269_v60 = vmul.f32 -1.442695, %v14272_v50 }
 0x2d2   :  { %v12045_v4 = vpop.eup %12044  ;;  %12064 = vrcp.f32 %v3149_v41  ;;  %v9215_v12 = vmul.f32 -1.442695, %v14277_v42  ;;  %v3964_v31 = vmul.f32 %v12043_v5, %v14068_v52  ;;  %v14304_v5 = vadd.f32 %v14221_v21, %v13889_v13 }
 0x2d3   :  { %v12047_v46 = vpop.eup %12046  ;;  %v3911_v26 = vmul.f32 %v12045_v4, %v14113_v44  ;;  %12066 = vpow2.f32 %v9263_v33  ;;  %v14281_v44 = vadd.f32 %v14221_v21, %v16175_v29 }
 0x2d4   :  { %v12049_v15 = vpop.eup %12048  ;;  %v3962_v23 = vmul.f32 %v12047_v46, %v14123_v28  ;;  %12068 = vpow2.f32 %v9216_v3  ;;  %v9268_v28 = vmul.f32 -1.442695, %v14263_v30 }
 0x2d5   :  { %v12051_v54 = vpop.eup %12050  ;;  %v4611_v48 = vadd.f32 %v4610_v56, %v3911_v26  ;;  %v3200_v16 = vadd.f32 1.0, %v12049_v15  ;;  %12070 = vpow2.f32 %v9214_v10  ;;  %v9267_v4 = vmul.f32 -1.442695, %v14281_v44 }
 0x2d6   :  { %v12053_v18 = vpop.eup %12052  ;;  %v4672_v7 = vadd.f32 %v4671_v0, %v3962_v23  ;;  %v3147_v40 = vadd.f32 1.0, %v12051_v54  ;;  %12072 = vpow2.f32 %v9217_v36  ;;  %v9266_v0 = vmul.f32 -1.442695, %v14268_v8 }
 0x2d7   :  { %v12055_v33 = vpop.eup %12054  ;;  %v4612_v37 = vadd.f32 %v4611_v48, %v3912_v27  ;;  %12074 = vrcp.f32 %v3200_v16  ;;  %v3198_v11 = vadd.f32 1.0, %v12053_v18  ;;  %v14294_v36 = vadd.f32 %v14221_v21, %v13880_v38 }
 0x2d8   :  { %v12057_v3 = vpop.eup %12056  ;;  %12076 = vrcp.f32 %v3147_v40  ;;  %v3201_v41 = vadd.f32 1.0, %v12055_v33  ;;  %v14315_v33 = vadd.f32 %v14221_v21, %v13893_v55  ;;  %v16177_v55 = vld [vmem:[#allocation37_spill] sm:$0xff] }
 0x2d9   :  { %v12059_v62 = vpop.eup %12058  ;;  %v4613_v56 = vadd.f32 %v4612_v37, %v3913_v45  ;;  %12078 = vrcp.f32 %v3198_v11  ;;  %v3965_v46 = vmul.f32 %v12057_v3, %v14152_v39  ;;  %v9220_v16 = vmul.f32 -1.442695, %v14294_v36 }
 0x2da   :  { %v12061_v22 = vpop.eup %12060  ;;  %v3963_v10 = vmul.f32 %v12059_v62, %v14162_v1  ;;  %12080 = vrcp.f32 %v3201_v41  ;;  %v14300_v1 = vadd.f32 %v14221_v21, %v13883_v32 }
 0x2db   :  { %v12063_v51 = vpop.eup %12062  ;;  %12082 = vpow2.f32 %v9268_v28  ;;  %v9221_v28 = vmul.f32 -1.442695, %v14304_v5 }
 0x2dc   :  { %v12065_v25 = vpop.eup %12064  ;;  %v4673_v26 = vadd.f32 %v4672_v7, %v3963_v10  ;;  %v3914_v19 = vmul.f32 %v12063_v51, %v14178_v49  ;;  %12084 = vpow2.f32 %v9215_v12  ;;  %v16176_v49 = vld [vmem:[#allocation33_spill] sm:$0xff]  ;;  %v9218_v7 = vmul.f32 -1.442695, %v14300_v1 }
 0x2dd   :  { %v12067_v52 = vpop.eup %12066  ;;  %12086 = vpow2.f32 %v9266_v0  ;;  %v14308_v54 = vadd.f32 %v14221_v21, %v16176_v49  ;;  %v14322_v12 = vadd.f32 %v14221_v21, %v13793_v20 }
 0x2de   :  { %v12069_v43 = vpop.eup %12068  ;;  %v4674_v38 = vadd.f32 %v4673_v26, %v3964_v31  ;;  %v4614_v15 = vadd.f32 %v4613_v56, %v3914_v19  ;;  %v3199_v23 = vadd.f32 1.0, %v12067_v52  ;;  %12088 = vpow2.f32 %v9269_v60  ;;  %v10515_v52 = vld [vmem:[%s16089_s5 + $0xc8] ss:$16 sps:$4 sm:$0xff]  }
 0x2df   :  { %v12071_v39 = vpop.eup %12070  ;;  %v3152_v29 = vadd.f32 1.0, %v12069_v43  ;;  %12090 = vpow2.f32 %v9267_v4  ;;  %v9272_v11 = vmul.f32 -1.442695, %v14308_v54  ;;  %v3916_v56 = vmul.f32 %v12061_v22, %v14166_v34  ;;  %v16178_v22 = vld [vmem:[#allocation40_spill] sm:$0xff] }
 0x2e0   :  { %v12073_v27 = vpop.eup %12072  ;;  %v4675_v48 = vadd.f32 %v4674_v38, %v3965_v46  ;;  %12092 = vrcp.f32 %v3199_v23  ;;  %v3150_v32 = vadd.f32 1.0, %v12071_v39  ;;  %v14327_v31 = vadd.f32 %v14221_v21, %v16177_v55  ;;  %v10517_v43 = vld [vmem:[%s16089_s5 + $0xcc] ss:$16 sps:$4 sm:$0xff]   ;;  %v16179_v39 = vld [vmem:[#allocation3_spill] sm:$0xff] }
 0x2e1   :  { %v12075_v13 = vpop.eup %12074  ;;  %12094 = vrcp.f32 %v3152_v29  ;;  %v3153_v18 = vadd.f32 1.0, %v12073_v27  ;;  %v3917_v4 = vmul.f32 %v12065_v25, %v14182_v47  ;;  %v14333_v19 = vadd.f32 %v14221_v21, %v16178_v22  ;;  %8295 = vmatprep.subr.bf16.mxu0 %v10517_v43  ;;  %v16182_v55 = vld [vmem:[#allocation44_spill] sm:$0xff] }
 0x2e2   :  { %v12077_v40 = vpop.eup %12076  ;;  %12096 = vrcp.f32 %v3150_v32  ;;  %v14344_v29 = vadd.f32 %v14221_v21, %v16179_v39  ;;  %v9273_v27 = vmul.f32 -1.442695, %v14327_v31  ;;  %v3968_v32 = vmul.f32 %v12075_v13, %v14187_v57  ;;  %8296 = vmatpush1.bf16.msra.mxu0 %v10515_v52 }
 0x2e3   :  { %v12079_v45 = vpop.eup %12078  ;;  %v3915_v37 = vmul.f32 %v12077_v40, %v14211_v59  ;;  %12098 = vrcp.f32 %v3153_v18  ;;  %v16180_v40 = vld [vmem:[#allocation5_spill] sm:$0xff] }
 0x2e4   :  { %v12081_v3 = vpop.eup %12080  ;;  %v3966_v41 = vmul.f32 %v12079_v45, %v14202_v14  ;;  %12100 = vpow2.f32 %v9220_v16  ;;  %v9219_v14 = vmul.f32 -1.442695, %v14315_v33  ;;  %v9271_v45 = vmul.f32 -1.442695, %v14333_v19 }
 0x2e5   :  { %v12083_v62 = vpop.eup %12082  ;;  %v4615_v0 = vadd.f32 %v4614_v15, %v3915_v37  ;;  %12102 = vpow2.f32 %v9218_v7  ;;  %v9270_v15 = vmul.f32 -1.442695, %v14322_v12  ;;  %v14356_v37 = vadd.f32 %v14221_v21, %v13840_v2 }
 0x2e6   :  { %v12085_v59 = vpop.eup %12084  ;;  %v4676_v10 = vadd.f32 %v4675_v48, %v3966_v41  ;;  %v3204_v60 = vadd.f32 1.0, %v12083_v62  ;;  %12104 = vpow2.f32 %v9221_v28  ;;  %v14351_v28 = vadd.f32 %v14221_v21, %v16180_v40 }
 0x2e7   :  { %v12087_v51 = vpop.eup %12086  ;;  %v4616_v20 = vadd.f32 %v4615_v0, %v3916_v56  ;;  %v3151_v46 = vadd.f32 1.0, %v12085_v59  ;;  %12106 = vpow2.f32 %v9272_v11  ;;  %v3969_v57 = vmul.f32 %v12081_v3, %v14225_v58  ;;  %v16181_v56 = vld [vmem:[#allocation43_spill] sm:$0xff] }
 0x2e8   :  { %v12089_v26 = vpop.eup %12088  ;;  %12108 = vrcp.f32 %v3204_v60  ;;  %v3202_v34 = vadd.f32 1.0, %v12087_v51  ;;  %v14360_v62 = vmul.f32 -1.442695, %v14344_v29  ;;  %v14364_v0 = vadd.f32 %v14221_v21, %v16181_v56 }
 0x2e9   :  { %v12091_v38 = vpop.eup %12090  ;;  %v4617_v47 = vadd.f32 %v4616_v20, %v3917_v4  ;;  %12110 = vrcp.f32 %v3151_v46  ;;  %v3205_v25 = vadd.f32 1.0, %v12089_v26  ;;  %v14368_v59 = vadd.f32 %v14221_v21, %v16182_v55 }
 0x2ea   :  { %v12093_v23 = vpop.eup %12092  ;;  %12112 = vrcp.f32 %v3202_v34  ;;  %v3203_v49 = vadd.f32 1.0, %v12091_v38  ;;  %v14371_v3 = vmul.f32 -1.442695, %v14351_v28  ;;  %v9276_v52 = vmul.f32 -1.442695, %v14356_v37  ;;  %v16184_v38 = vld [vmem:[#allocation4_spill] sm:$0xff] }
 0x2eb   :  { %v12095_v48 = vpop.eup %12094  ;;  %v4618_v16 = vrot.slane %v4617_v47, 4  ;;  %v3967_v18 = vmul.f32 %v12093_v23, %v14235_v6  ;;  %12114 = vrcp.f32 %v3205_v25  ;;  %v9274_v25 = vmul.f32 -1.442695, %v14364_v0  ;;  %v16185_v23 = vld [vmem:[#allocation7_spill] sm:$0xff] }
 0x2ec   :  { %v12097_v7 = vpop.eup %12096  ;;  %12116 = vrcp.f32 %v3203_v49  ;;  %v14385_v39 = vadd.f32 %v14221_v21, %v16185_v23  ;;  %v3920_v56 = vmul.f32 %v12095_v48, %v14239_v24 }
 0x2ed   :  { %v12099_v11 = vpop.eup %12098  ;;  %v4619_v41 = vadd.f32 %v4618_v16, %v4617_v47  ;;  %v4677_v13 = vadd.f32 %v4676_v10, %v3967_v18  ;;  %12118 = vpow2.f32 %v9219_v14  ;;  %v16183_v14 = vld [vmem:[#allocation45_spill] sm:$0xff]  ;;  %v14380_v47 = vadd.f32 %v14221_v21, %v16184_v38 }
 0x2ee   :  { %v12101_v6 = vpop.eup %12100  ;;  %12120 = vpow2.f32 %v9270_v15  ;;  %v14375_v20 = vadd.f32 %v14221_v21, %v16183_v14  ;;  %v3918_v16 = vmul.f32 %v12097_v7, %v14245_v35  ;;  %v16186_v35 = vld [vmem:[#allocation41_spill] sm:$0xff] }
 0x2ef   :  { %v12103_v2 = vpop.eup %12102  ;;  %v4620_v60 = vrot.slane %v4619_v41, 2  ;;  %v4678_v51 = vadd.f32 %v4677_v13, %v3968_v32  ;;  %v3156_v4 = vadd.f32 1.0, %v12101_v6  ;;  %12122 = vpow2.f32 %v9273_v27 }
 0x2f0   :  { %v12105_v58 = vpop.eup %12104  ;;  %v3154_v10 = vadd.f32 1.0, %v12103_v2  ;;  %12124 = vpow2.f32 %v9271_v45  ;;  %v9277_v27 = vmul.f32 -1.442695, %v14368_v59  ;;  %v9275_v40 = vmul.f32 -1.442695, %v14375_v20 }
 0x2f1   :  { %v12107_v46 = vpop.eup %12106  ;;  %v4621_v26 = vadd.f32 %v4620_v60, %v4619_v41  ;;  %v4679_v34 = vadd.f32 %v4678_v51, %v3969_v57  ;;  %v3157_v22 = vadd.f32 1.0, %v12105_v58 }
 0x2f2   :  { %v12109_v43 = vpop.eup %12108  ;;  %12126 = vrcp.f32 %v3154_v10  ;;  %v3208_v13 = vadd.f32 1.0, %v12107_v46 }
 0x2f3   :  { %v12111_v15 = vpop.eup %12110  ;;  %v4622_v49 = vrot.slane %v4621_v26, 1  ;;  %12128 = vrcp.f32 %v3156_v4  ;;  %v3972_v55 = vmul.f32 %v12109_v43, %v14263_v30 }
 0x2f4   :  { %v12113_v32 = vpop.eup %12112  ;;  %v3919_v18 = vmul.f32 %v12111_v15, %v14277_v42  ;;  %12130 = vrcp.f32 %v3157_v22  ;;  %v9234_v15 = vmul.f32 -1.442695, %v14385_v39 }
 0x2f5   :  { %v12115_v45 = vpop.eup %12114  ;;  %v4623_v41 = vadd.f32 %v4622_v49, %v4621_v26  ;;  %v3970_v57 = vmul.f32 %v12113_v32, %v14268_v8  ;;  %12132 = vpow2.f32 %v9276_v52  ;;  %v3921_v8 = vmul.f32 %v12099_v11, %v14250_v53  ;;  %v16187_v26 = vld [vmem:[#allocation6_spill] sm:$0xff]  ;;  %v16188_v52 = vld [vmem:[#allocation8_spill] sm:$0xff] }
 0x2f6   :  { %v12117_v6 = vpop.eup %12116  ;;  %v4624_v2 = vadd.f32 %v3919_v18, %v3918_v16  ;;  %12134 = vpow2.f32 %v9274_v25  ;;  %v3973_v30 = vmul.f32 %v12115_v45, %v14272_v50  ;;  %v14403_v22 = vadd.f32 %v14221_v21, %v16187_v26 }
 0x2f7   :  { %v12119_v60 = vpop.eup %12118  ;;  %v14396_v42 = vsel %vm4714_vm4, %v4623_v41, %v16186_v35  ;;  %v4680_v7 = vadd.f32 %v4679_v34, %v3970_v57  ;;  %v3971_v51 = vmul.f32 %v12117_v6, %v14281_v44  ;;  %12136 = vpow2.f32 %v9277_v27  ;;  %v16191_v6 = vld [vmem:[#allocation11_spill] sm:$0xff]  ;;  %v10539_v35 = vld [vmem:[%s16089_s5 + $0xe8] ss:$16 sps:$4 sm:$0xff]  }
 0x2f8   :  { %v12121_v4 = vpop.eup %12120  ;;  %v4625_v58 = vadd.f32 %v4624_v2, %v3920_v56  ;;  %v3155_v10 = vadd.f32 1.0, %v12119_v60  ;;  %12138 = vpow2.f32 %v9275_v40  ;;  %v14407_v53 = vadd.f32 %v14221_v21, %v16188_v52  ;;  %v16189_v40 = vld [vmem:[#allocation9_spill] sm:$0xff] }
 0x2f9   :  { %v12123_v24 = vpop.eup %12122  ;;  %v4681_v48 = vadd.f32 %v4680_v7, %v3971_v51  ;;  %12140 = vrcp.f32 %v3208_v13  ;;  %v3206_v14 = vadd.f32 1.0, %v12121_v4  ;;  %v9233_v50 = vmul.f32 -1.442695, %v14380_v47  ;;  %v10541_v7 = vld [vmem:[%s16089_s5 + $0xec] ss:$16 sps:$4 sm:$0xff]  }
 0x2fa   :  { %v12125_v46 = vpop.eup %12124  ;;  %v4626_v34 = vadd.f32 %v4625_v58, %v3921_v8  ;;  %12142 = vrcp.f32 %v3155_v10  ;;  %v3209_v44 = vadd.f32 1.0, %v12123_v24  ;;  %v9236_v32 = vmul.f32 -1.442695, %v14403_v22  ;;  %8297 = vmatprep.subr.bf16.mxu0 %v10541_v7 }
 0x2fb   :  { %v4682_v11 = vadd.f32 %v4681_v48, %v3972_v55  ;;  %12144 = vrcp.f32 %v3206_v14  ;;  %v3207_v43 = vadd.f32 1.0, %v12125_v46  ;;  %v9237_v18 = vmul.f32 -1.442695, %v14407_v53  ;;  %8298 = vmatpush1.bf16.msra.mxu0 %v10539_v35  ;;  %v16196_v35 = vld [vmem:[#allocation56_spill] sm:$0xff] }
 0x2fc   :  { %v12127_v38 = vpop.eup %12126  ;;  %12146 = vrcp.f32 %v3209_v44  ;;  %v14418_v45 = vadd.f32 %v14221_v21, %v16189_v40  ;;  %v3162_v4 = vadd.f32 1.0, %v13947_v9  ;;  %v3163_v48 = vadd.f32 1.0, %v13988_v63 }
 0x2fd   :  { %v12129_v25 = vpop.eup %12128  ;;  %v3922_v23 = vmul.f32 %v12127_v38, %v14300_v1  ;;  %v4683_v49 = vadd.f32 %v4682_v11, %v3973_v30  ;;  %12148 = vrcp.f32 %v3207_v43  ;;  %v16190_v1 = vld [vmem:[#allocation10_spill] sm:$0xff]  ;;  %v3164_v63 = vadd.f32 1.0, %v13940_v61  ;;  %v16194_v43 = vld [vmem:[#allocation15_spill] sm:$0xff] }
 0x2fe   :  { %v12131_v27 = vpop.eup %12130  ;;  %12150 = vpow2.f32 %v14360_v62  ;;  %v14422_v13 = vadd.f32 %v14221_v21, %v16190_v1  ;;  %v14426_v62 = vadd.f32 %v14221_v21, %v16191_v6  ;;  %v9235_v10 = vmul.f32 -1.442695, %v14418_v45 }
 0x2ff   :  { %v12133_v16 = vpop.eup %12132  ;;  %12152 = vpow2.f32 %v14371_v3  ;;  %v4627_v41 = vadd.f32 %v4626_v34, %v3922_v23  ;;  %v16192_v3 = vld [vmem:[#allocation12_spill] sm:$0xff]  ;;  %v16193_v34 = vld [vmem:[#allocation13_spill] sm:$0xff]  ;;  %v14456_v38 = vadd.f32 %v14221_v21, %v16194_v43  ;;  %v16195_v23 = vld [vmem:[#allocation55_spill] sm:$0xff]  ;;  %v3924_v40 = vmul.f32 %v12129_v25, %v14294_v36 }
 0x300   :  { %v12135_v57 = vpop.eup %12134  ;;  %12154 = vpow2.f32 %v9233_v50  ;;  %v3212_v56 = vadd.f32 1.0, %v12133_v16  ;;  %v14430_v2 = vadd.f32 %v14221_v21, %v16192_v3  ;;  %v14442_v14 = vmul.f32 -1.442695, %v14422_v13 }
 0x301   :  { %v12137_v55 = vpop.eup %12136  ;;  %12156 = vpow2.f32 %v9234_v15  ;;  %v3210_v60 = vadd.f32 1.0, %v12135_v57  ;;  %v9238_v46 = vmul.f32 -1.442695, %v14426_v62  ;;  %v14450_v44 = vadd.f32 %v14221_v21, %v16193_v34 }
 0x302   :  { %v12139_v51 = vpop.eup %12138  ;;  %12158 = vrcp.f32 %v3212_v56  ;;  %v3213_v8 = vadd.f32 1.0, %v12137_v55  ;;  %v14446_v9 = vmul.f32 -1.442695, %v14430_v2  ;;  %v3165_v16 = vadd.f32 1.0, %v16195_v23 }
 0x303   :  { %v12141_v58 = vpop.eup %12140  ;;  %12160 = vrcp.f32 %v3210_v60  ;;  %v3211_v24 = vadd.f32 1.0, %v12139_v51  ;;  %v9239_v55 = vmul.f32 -1.442695, %v14450_v44  ;;  %v3166_v7 = vadd.f32 1.0, %v16196_v35  ;;  %v16197_v51 = vld [vmem:[#allocation38_spill] sm:$0xff] }
 0x304   :  { %v12143_v30 = vpop.eup %12142  ;;  %12162 = vrcp.f32 %v3213_v8 }
 0x305   :  { %v12145_v26 = vpop.eup %12144  ;;  %v3923_v52 = vmul.f32 %v12143_v30, %v14315_v33  ;;  %12164 = vrcp.f32 %v3211_v24  ;;  %v3976_v33 = vmul.f32 %v12141_v58, %v14308_v54  ;;  %v16198_v54 = vld [vmem:[#allocation52_spill] sm:$0xff]  ;;  %v16200_v24 = vld [vmem:[#allocation42_spill] sm:$0xff] }
 0x306   :  { %v12147_v11 = vpop.eup %12146  ;;  %12166 = vrcp.f32 %v3162_v4  ;;  %v3974_v50 = vmul.f32 %v12145_v26, %v14322_v12  ;;  %v3925_v12 = vmul.f32 %v12131_v27, %v14304_v5  ;;  %v9242_v27 = vmul.f32 -1.442695, %v14456_v38 }
 0x307   :  { %v12149_v15 = vpop.eup %12148  ;;  %12168 = vpow2.f32 %v9235_v10  ;;  %v4628_v57 = vadd.f32 %v4627_v41, %v3923_v52  ;;  %v3977_v36 = vmul.f32 %v12147_v11, %v14327_v31  ;;  %v16201_v31 = vld [vmem:[#allocation54_spill] sm:$0xff] }
 0x308   :  { %v12151_v1 = vpop.eup %12150  ;;  %12170 = vrcp.f32 %v3163_v48  ;;  %v4684_v6 = vadd.f32 %v4683_v49, %v3974_v50  ;;  %v3975_v61 = vmul.f32 %v12149_v15, %v14333_v19  ;;  %v3926_v49 = vmul.f32 %v16198_v54, %v16197_v51  ;;  %v16199_v19 = vld [vmem:[#allocation14_spill] sm:$0xff]  ;;  %v16202_v48 = vld [vmem:[#allocation17_spill] sm:$0xff]  ;;  %v16204_v15 = vld [vmem:[#allocation51_spill] sm:$0xff] }
 0x309   :  { %v12153_v56 = vpop.eup %12152  ;;  %12172 = vpow2.f32 %v9236_v32  ;;  %v4629_v3 = vadd.f32 %v4628_v57, %v3924_v40  ;;  %v14471_v32 = vadd.f32 %v14221_v21, %v16199_v19  ;;  %v3927_v30 = vmul.f32 %v16201_v31, %v16200_v24  ;;  %v16203_v50 = vld [vmem:[#allocation34_spill] sm:$0xff] }
 0x30a   :  { %v12155_v60 = vpop.eup %12154  ;;  %12174 = vrcp.f32 %v3164_v63  ;;  %v4685_v25 = vadd.f32 %v4684_v6, %v3975_v61  ;;  %v3167_v5 = vadd.f32 1.0, %v12153_v56  ;;  %v3168_v52 = vadd.f32 1.0, %v12151_v1  ;;  %v16205_v1 = vld [vmem:[#allocation39_spill] sm:$0xff]  ;;  %v16206_v56 = vld [vmem:[#allocation53_spill] sm:$0xff]  ;;  %v16210_v31 = vld [vmem:[#allocation46_spill] sm:$0xff] }
 0x30b   :  { %v12157_v41 = vpop.eup %12156  ;;  %12176 = vpow2.f32 %v9237_v18  ;;  %v4630_v4 = vadd.f32 %v4629_v3, %v3925_v12  ;;  %v12281_v18 = vld [vmem:[%s16088_s2] ss:$0 sm:$0xff]  ;;  %v3928_v23 = vmul.f32 %v16204_v15, %v16203_v50  ;;  %v3929_v12 = vmul.f32 %v16206_v56, %v16205_v1 }
 0x30c   :  { %v12159_v8 = vpop.eup %12158  ;;  %12178 = vrcp.f32 %v3165_v16  ;;  %v4686_v58 = vadd.f32 %v4685_v25, %v3976_v33  ;;  %v14480_v26 = vadd.f32 %v12281_v18, %v16202_v48  ;;  %v3169_v16 = vadd.f32 1.0, %v12155_v60  ;;  %v16208_v25 = vld [vmem:[#allocation47_spill] sm:$0xff] }
 0x30d   :  { %v12161_v10 = vpop.eup %12160  ;;  %12180 = vpow2.f32 %v9238_v46  ;;  %v4631_v21 = vadd.f32 %v4630_v4, %v3926_v49  ;;  %v3980_v57 = vmul.f32 %v12159_v8, %v14356_v37  ;;  %v16209_v8 = vld [vmem:[#allocation49_spill] sm:$0xff] }
 0x30e   :  { %v12163_v34 = vpop.eup %12162  ;;  %12182 = vrcp.f32 %v3166_v7  ;;  %v3978_v11 = vmul.f32 %v12161_v10, %v14364_v0  ;;  %v4687_v63 = vadd.f32 %v4686_v58, %v3977_v36  ;;  %v16207_v0 = vld [vmem:[#allocation16_spill] sm:$0xff] }
 0x30f   :  { %v12165_v43 = vpop.eup %12164  ;;  %12184 = vpow2.f32 %v9239_v55  ;;  %v4632_v46 = vadd.f32 %v4631_v21, %v3927_v30  ;;  %v14491_v3 = vadd.f32 %v12281_v18, %v16207_v0  ;;  %v3170_v55 = vadd.f32 1.0, %v12157_v41 }
 0x310   :  { %v12167_v40 = vpop.eup %12166  ;;  %12186 = vrcp.f32 %v3167_v5  ;;  %v4688_v33 = vadd.f32 %v4687_v63, %v3978_v11  ;;  %v3979_v6 = vmul.f32 %v12165_v43, %v14375_v20  ;;  %v3981_v7 = vmul.f32 %v12163_v34, %v14368_v59  ;;  %v16211_v11 = vld [vmem:[#allocation48_spill] sm:$0xff] }
 0x311   :  { %v12169_v61 = vpop.eup %12168  ;;  %12188 = vpow2.f32 %v14442_v14  ;;  %v4633_v35 = vadd.f32 %v4632_v46, %v3928_v23  ;;  %v3930_v51 = vmul.f32 %v12167_v40, %v16208_v25  ;;  %v9243_v20 = vmul.f32 -1.442695, %v14480_v26  ;;  %v16212_v23 = vld [vmem:[#allocation50_spill] sm:$0xff] }
 0x312   :  { %v12171_v60 = vpop.eup %12170  ;;  %12190 = vrcp.f32 %v3168_v52  ;;  %v4689_v36 = vadd.f32 %v4688_v33, %v3979_v6  ;;  %v3171_v14 = vadd.f32 1.0, %v12169_v61  ;;  %v9244_v41 = vmul.f32 -1.442695, %v14471_v32  ;;  %v10560_v33 = vld [vmem:[%s16089_s5 + $0x108] ss:$16 sps:$4 sm:$0xff]  }
 0x313   :  { %v12173_v37 = vpop.eup %12172  ;;  %12192 = vpow2.f32 %v14446_v9  ;;  %v4634_v54 = vadd.f32 %v4633_v35, %v3929_v12  ;;  %v3931_v5 = vmul.f32 %v12171_v60, %v16209_v8  ;;  %v9245_v18 = vmul.f32 -1.442695, %v14491_v3  ;;  %v10562_v6 = vld [vmem:[%s16089_s5 + $0x10c] ss:$16 sps:$4 sm:$0xff]  }
 0x314   :  { %v12175_v49 = vpop.eup %12174  ;;  %12194 = vrcp.f32 %v3169_v16  ;;  %v4690_v19 = vadd.f32 %v4689_v36, %v3980_v57  ;;  %v3172_v10 = vadd.f32 1.0, %v12173_v37  ;;  %8299 = vmatprep.subr.bf16.mxu0 %v10562_v6 }
 0x315   :  { %v12177_v4 = vpop.eup %12176  ;;  %12196 = vpow2.f32 %v9242_v27  ;;  %v4635_v59 = vadd.f32 %v4634_v54, %v3930_v51  ;;  %v3932_v30 = vmul.f32 %v12175_v49, %v16210_v31  ;;  %8300 = vmatpush1.bf16.msra.mxu0 %v10560_v33 }
 0x316   :  { %v12179_v58 = vpop.eup %12178  ;;  %12198 = vrcp.f32 %v3170_v55  ;;  %v14499_v24 = vadd.f32 %v4690_v19, %v3981_v7  ;;  %v3173_v34 = vadd.f32 1.0, %v12177_v4 }
 0x317   :  { %v12181_v9 = vpop.eup %12180  ;;  %12200 = vpow2.f32 %v9243_v20  ;;  %v4636_v48 = vadd.f32 %v4635_v59, %v3931_v5  ;;  %v3933_v63 = vmul.f32 %v12179_v58, %v16211_v11 }
 0x318   :  { %v12183_v21 = vpop.eup %12182  ;;  %12202 = vrcp.f32 %v3171_v14  ;;  %v3174_v50 = vadd.f32 1.0, %v12181_v9 }
 0x319   :  { %v12185_v52 = vpop.eup %12184  ;;  %12204 = vpow2.f32 %v9244_v41  ;;  %v4637_v27 = vadd.f32 %v4636_v48, %v3932_v30  ;;  %v3934_v16 = vmul.f32 %v12183_v21, %v16212_v23 }
 0x31a   :  { %v12187_v43 = vpop.eup %12186  ;;  %12206 = vrcp.f32 %v3172_v10  ;;  %v3175_v57 = vadd.f32 1.0, %v12185_v52 }
 0x31b   :  { %v12189_v15 = vpop.eup %12188  ;;  %12208 = vpow2.f32 %v9245_v18  ;;  %v4638_v46 = vadd.f32 %v4637_v27, %v3933_v63  ;;  %v3935_v1 = vmul.f32 %v12187_v43, %v14351_v28 }
 0x31c   :  { %v12191_v40 = vpop.eup %12190  ;;  %12210 = vrcp.f32 %v3173_v34  ;;  %v3176_v0 = vadd.f32 1.0, %v12189_v15 }
 0x31d   :  { %v12193_v61 = vpop.eup %12192  ;;  %v4639_v56 = vadd.f32 %v4638_v46, %v3934_v16  ;;  %12212 = vrcp.f32 %v3174_v50  ;;  %v3936_v60 = vmul.f32 %v12191_v40, %v14344_v29 }
 0x31e   :  { %v12195_v12 = vpop.eup %12194  ;;  %v3177_v36 = vadd.f32 1.0, %v12193_v61  ;;  %12214 = vrcp.f32 %v3175_v57 }
 0x31f   :  { %v12197_v35 = vpop.eup %12196  ;;  %v4640_v55 = vadd.f32 %v4639_v56, %v3935_v1  ;;  %v3937_v25 = vmul.f32 %v12195_v12, %v14380_v47  ;;  %12216 = vrcp.f32 %v3176_v0 }
 0x320   :  { %v12199_v7 = vpop.eup %12198  ;;  %v3178_v28 = vadd.f32 1.0, %v12197_v35  ;;  %12218 = vrcp.f32 %v3177_v36 }
 0x321   :  { %v12201_v37 = vpop.eup %12200  ;;  %v4641_v51 = vadd.f32 %v4640_v55, %v3936_v60  ;;  %v3938_v49 = vmul.f32 %v12199_v7, %v14385_v39 }
 0x322   :  { %v12203_v20 = vpop.eup %12202  ;;  %v3179_v4 = vadd.f32 1.0, %v12201_v37  ;;  %12220 = vrcp.f32 %v3178_v28  ;;  %v10497_v28 = vld [vmem:[%s16090_s3 + $0x68] ss:$48 sps:$4 sm:$0xff]  }
 0x323   :  { %v12205_v54 = vpop.eup %12204  ;;  %v4642_v14 = vadd.f32 %v4641_v51, %v3937_v25  ;;  %v3939_v8 = vmul.f32 %v12203_v20, %v14418_v45  ;;  %v10602_v25 = vld [vmem:[%s16089_s5 + $0x148] ss:$16 sps:$4 sm:$0xff]   ;;  %v10604_v51 = vld [vmem:[%s16089_s5 + $0x14c] ss:$16 sps:$4 sm:$0xff]  }
 0x324   :  { %v12207_v19 = vpop.eup %12206  ;;  %v3180_v59 = vadd.f32 1.0, %v12205_v54  ;;  %12222 = vrcp.f32 %v3179_v4  ;;  %v10502_v54 = vld [vmem:[%s16090_s3 + $0xcc] ss:$48 sps:$4 sm:$0xff]  }
 0x325   :  { %v12209_v29 = vpop.eup %12208  ;;  %v4643_v5 = vadd.f32 %v4642_v14, %v3938_v49  ;;  %v3940_v47 = vmul.f32 %v12207_v19, %v14403_v22  ;;  %v10500_v49 = vld [vmem:[%s16090_s3 + $0xc8] ss:$48 sps:$4 sm:$0xff]   ;;  %v10505_v14 = vld [vmem:[%s16090_s3 + $0x12c] ss:$48 sps:$4 sm:$0xff]  }
 0x326   :  { %v12211_v41 = vpop.eup %12210  ;;  %v3181_v9 = vadd.f32 1.0, %v12209_v29  ;;  %12224 = vrcp.f32 %v3180_v59  ;;  %v10503_v19 = vld [vmem:[%s16090_s3 + $0x128] ss:$48 sps:$4 sm:$0xff]   ;;  %v10508_v4 = vld [vmem:[%s16090_s3 + $0x18c] ss:$48 sps:$4 sm:$0xff]  }
 0x327   :  { %v4644_v58 = vadd.f32 %v4643_v5, %v3939_v8  ;;  %v12213_v10 = vpop.eup %12212  ;;  %v3941_v31 = vmul.f32 %v12211_v41, %v14407_v53  ;;  %v10506_v29 = vld [vmem:[%s16090_s3 + $0x188] ss:$48 sps:$4 sm:$0xff]   ;;  %v10511_v8 = vld [vmem:[%s16090_s3 + $0x1ec] ss:$48 sps:$4 sm:$0xff]  }
 0x328   :  { %v12215_v30 = vpop.eup %12214  ;;  %v3942_v18 = vmul.f32 %v12213_v10, %v14426_v62  ;;  %12226 = vrcp.f32 %v3181_v9  ;;  %v4692_v62 = vrot.slane %v14499_v24, 4  ;;  %v10509_v5 = vld [vmem:[%s16090_s3 + $0x1e8] ss:$48 sps:$4 sm:$0xff]   ;;  %v10514_v41 = vld [vmem:[%s16090_s3 + $0x24c] ss:$48 sps:$4 sm:$0xff]  }
 0x329   :  { %v4645_v39 = vadd.f32 %v4644_v58, %v3940_v47  ;;  %v12217_v21 = vpop.eup %12216  ;;  %v3943_v45 = vmul.f32 %v12215_v30, %v14450_v44  ;;  %v10581_v44 = vld [vmem:[%s16089_s5 + $0x128] ss:$16 sps:$4 sm:$0xff]   ;;  %v10520_v47 = vld [vmem:[%s16090_s3 + $0x2ac] ss:$48 sps:$4 sm:$0xff]   ;;  %v10526_v30 = vld [vmem:[%s16090_s3 + $0x74] ss:$48 sps:$4 sm:$0xff]  }
 0x32a   :  { %v12219_v52 = vpop.eup %12218  ;;  %v3944_v22 = vmul.f32 %v12217_v21, %v14422_v13  ;;  %v10583_v13 = vld [vmem:[%s16089_s5 + $0x12c] ss:$16 sps:$4 sm:$0xff]   ;;  %v4693_v57 = vadd.f32 %v4692_v62, %v14499_v24  ;;  %v10512_v59 = vld [vmem:[%s16090_s3 + $0x248] ss:$48 sps:$4 sm:$0xff]   ;;  %v10524_v21 = vld [vmem:[%s16090_s3 + $0x70] ss:$48 sps:$4 sm:$0xff]  }
 0x32b   :  { %v4646_v48 = vadd.f32 %v4645_v39, %v3941_v31  ;;  %v3945_v27 = vmul.f32 %v12219_v52, %v14430_v2  ;;  %8301 = vmatprep.subr.bf16.mxu0 %v10583_v13  ;;  %v10626_v58 = vld [vmem:[%s16089_s5 + $0x168] ss:$16 sps:$4 sm:$0xff]   ;;  %v10628_v10 = vld [vmem:[%s16089_s5 + $0x16c] ss:$16 sps:$4 sm:$0xff]   ;;  %v10523_v31 = vld [vmem:[%s16090_s3 + $0x14] ss:$48 sps:$4 sm:$0xff]  }
 0x32c   :  { %v12221_v63 = vpop.eup %12220  ;;  %8302 = vmatpush1.bf16.msra.mxu0 %v10581_v44  ;;  %v4694_v1 = vrot.slane %v4693_v57, 2  ;;  %v10518_v9 = vld [vmem:[%s16090_s3 + $0x2a8] ss:$48 sps:$4 sm:$0xff]   ;;  %v10521_v39 = vld [vmem:[%s16090_s3 + $0x10] ss:$48 sps:$4 sm:$0xff]  }
 0x32d   :  { %v4647_v34 = vadd.f32 %v4646_v48, %v3942_v18  ;;  %v3946_v50 = vmul.f32 %v12221_v63, %v14456_v38  ;;  %8303 = vmatprep.subr.bf16.mxu0 %v10604_v51  ;;  %v10632_v18 = vld [vmem:[%s16089_s5 + $0x188] ss:$16 sps:$4 sm:$0xff]   ;;  %v10634_v48 = vld [vmem:[%s16089_s5 + $0x18c] ss:$16 sps:$4 sm:$0xff]   ;;  %v10532_v52 = vld [vmem:[%s16090_s3 + $0x134] ss:$48 sps:$4 sm:$0xff]  }
 0x32e   :  { %v12223_v53 = vpop.eup %12222  ;;  %v4695_v0 = vadd.f32 %v4694_v1, %v4693_v57  ;;  %v10533_v63 = vld [vmem:[%s16090_s3 + $0x190] ss:$48 sps:$4 sm:$0xff]   ;;  %v10547_v62 = vld [vmem:[%s16090_s3 + $0x2b4] ss:$48 sps:$4 sm:$0xff]   ;;  %v10550_v13 = vld [vmem:[%s16090_s3 + $0x1c] ss:$48 sps:$4 sm:$0xff]  }
 0x32f   :  { %v4648_v11 = vadd.f32 %v4647_v34, %v3943_v45  ;;  %v3947_v16 = vmul.f32 %v12223_v53, %v14480_v26  ;;  %v10529_v45 = vld [vmem:[%s16090_s3 + $0xd4] ss:$48 sps:$4 sm:$0xff]   ;;  %v10527_v34 = vld [vmem:[%s16090_s3 + $0xd0] ss:$48 sps:$4 sm:$0xff]   ;;  %v10559_v57 = vld [vmem:[%s16090_s3 + $0x13c] ss:$48 sps:$4 sm:$0xff]  }
 0x330   :  { %v12225_v23 = vpop.eup %12224  ;;  %v4696_v26 = vrot.slane %v4695_v0, 1  ;;  %8304 = vmatpush1.bf16.msra.mxu0 %v10602_v25  ;;  %v10544_v53 = vld [vmem:[%s16090_s3 + $0x254] ss:$48 sps:$4 sm:$0xff]   ;;  %v10545_v44 = vld [vmem:[%s16090_s3 + $0x2b0] ss:$48 sps:$4 sm:$0xff]  }
 0x331   :  { %v4649_v43 = vadd.f32 %v4648_v11, %v3944_v22  ;;  %v3948_v40 = vmul.f32 %v12225_v23, %v14471_v32  ;;  %8305 = vmatprep.subr.bf16.mxu0 %v10628_v10  ;;  %v10530_v22 = vld [vmem:[%s16090_s3 + $0x130] ss:$48 sps:$4 sm:$0xff]   ;;  %v10535_v11 = vld [vmem:[%s16090_s3 + $0x194] ss:$48 sps:$4 sm:$0xff]   ;;  %v10568_v1 = vld [vmem:[%s16090_s3 + $0x1fc] ss:$48 sps:$4 sm:$0xff]  }
 0x332   :  { %v12227_v2 = vpop.eup %12226  ;;  %v4697_v32 = vadd.f32 %v4696_v26, %v4695_v0  ;;  %v10542_v23 = vld [vmem:[%s16090_s3 + $0x250] ss:$48 sps:$4 sm:$0xff]   ;;  %v10569_v0 = vld [vmem:[%s16090_s3 + $0x258] ss:$48 sps:$4 sm:$0xff]   ;;  %v10577_v26 = vld [vmem:[%s16090_s3 + $0x24] ss:$48 sps:$4 sm:$0xff]  }
 0x333   :  { %v4650_v15 = vadd.f32 %v4649_v43, %v3945_v27  ;;  %v3949_v33 = vmul.f32 %v12227_v2, %v14491_v3  ;;  %v10491_v3 = vld [vmem:[%s16090_s3 + $0x8] ss:$48 sps:$4 sm:$0xff]   ;;  %v10538_v27 = vld [vmem:[%s16090_s3 + $0x1f4] ss:$48 sps:$4 sm:$0xff]   ;;  %v10536_v43 = vld [vmem:[%s16090_s3 + $0x1f0] ss:$48 sps:$4 sm:$0xff]  }
 0x334   :  { %8306 = vmatpush1.bf16.msra.mxu0 %v10626_v58  ;;  %v10551_v2 = vld [vmem:[%s16090_s3 + $0x78] ss:$48 sps:$4 sm:$0xff]   ;;  %v10592_v25 = vld [vmem:[%s16090_s3 + $0x1a4] ss:$48 sps:$4 sm:$0xff]   ;;  %v10676_v51 = vld [vmem:[%s16089_s5 + $0x1cc] ss:$16 sps:$4 sm:$0xff]  }
 0x335   :  { %v4651_v46 = vadd.f32 %v4650_v15, %v3946_v50  ;;  %8307 = vmatprep.subr.bf16.mxu0 %v10634_v48  ;;  %v10653_v50 = vld [vmem:[%s16089_s5 + $0x1a8] ss:$16 sps:$4 sm:$0xff]   ;;  %v10655_v15 = vld [vmem:[%s16089_s5 + $0x1ac] ss:$16 sps:$4 sm:$0xff]  }
 0x336   :  { %v10610_v58 = vld [vmem:[%s16090_s3 + $0x8c] ss:$48 sps:$4 sm:$0xff]   ;;  %v10608_v10 = vld [vmem:[%s16090_s3 + $0x88] ss:$48 sps:$4 sm:$0xff]  }
 0x337   :  { %v4652_v38 = vadd.f32 %v4651_v46, %v3947_v16  ;;  %v10548_v16 = vld [vmem:[%s16090_s3 + $0x18] ss:$48 sps:$4 sm:$0xff]   ;;  %v10553_v46 = vld [vmem:[%s16090_s3 + $0x7c] ss:$48 sps:$4 sm:$0xff]  }
 0x338   :  { %8308 = vmatpush1.bf16.msra.mxu0 %v10632_v18  ;;  %v10617_v18 = vld [vmem:[%s16090_s3 + $0x1a8] ss:$48 sps:$4 sm:$0xff]   ;;  %v10622_v48 = vld [vmem:[%s16090_s3 + $0x20c] ss:$48 sps:$4 sm:$0xff]  }
 0x339   :  { %v4653_v6 = vadd.f32 %v4652_v38, %v3948_v40  ;;  %8309 = vmatprep.subr.bf16.mxu0 %v10655_v15  ;;  %v10556_v40 = vld [vmem:[%s16090_s3 + $0xdc] ss:$48 sps:$4 sm:$0xff]   ;;  %v10554_v38 = vld [vmem:[%s16090_s3 + $0xd8] ss:$48 sps:$4 sm:$0xff]   ;;  %v10644_v15 = vld [vmem:[%s16089_s5 + $0x60] ss:$16 sps:$4 sm:$0xff]  }
 0x33b   :  { %v4654_v61 = vadd.f32 %v4653_v6, %v3949_v33  ;;  %v10557_v33 = vld [vmem:[%s16090_s3 + $0x138] ss:$48 sps:$4 sm:$0xff]   ;;  %v10565_v6 = vld [vmem:[%s16090_s3 + $0x19c] ss:$48 sps:$4 sm:$0xff]  }
 0x33c   :  { %8310 = vmatpush1.bf16.msra.mxu0 %v10653_v50  ;;  %v10641_v50 = vld [vmem:[%s16089_s5 + $0x40] ss:$16 sps:$4 sm:$0xff]  }
 0x33d   :  { %v4655_v56 = vrot.slane %v4654_v61, 4  ;;  %8311 = vmatprep.subr.bf16.mxu0 %v10676_v51 }
 0x33f   :  { %v4656_v12 = vadd.f32 %v4655_v56, %v4654_v61  ;;  %v10563_v61 = vld [vmem:[%s16090_s3 + $0x198] ss:$48 sps:$4 sm:$0xff]  }
 0x340   :  { %v10566_v56 = vld [vmem:[%s16090_s3 + $0x1f8] ss:$48 sps:$4 sm:$0xff]  }
 0x341   :  { %v4657_v35 = vrot.slane %v4656_v12, 2 }
 0x343   :  { %v4658_v60 = vadd.f32 %v4657_v35, %v4656_v12  ;;  %v10571_v12 = vld [vmem:[%s16090_s3 + $0x25c] ss:$48 sps:$4 sm:$0xff]  }
 0x344   :  { %v10574_v35 = vld [vmem:[%s16090_s3 + $0x2bc] ss:$48 sps:$4 sm:$0xff]  }
 0x345   :  { %v4659_v55 = vrot.slane %v4658_v60, 1 }
 0x347   :  { %v4660_v7 = vadd.f32 %v4659_v55, %v4658_v60  ;;  %v10572_v60 = vld [vmem:[%s16090_s3 + $0x2b8] ss:$48 sps:$4 sm:$0xff]   ;;  %v10575_v55 = vld [vmem:[%s16090_s3 + $0x20] ss:$48 sps:$4 sm:$0xff]  }
 0x349   :  { %v4717_v36 = vsel %vm4716_vm5, %v4660_v7, %v14396_v42  ;;  %v10499_v42 = vld [vmem:[%s16090_s3 + $0x6c] ss:$48 sps:$4 sm:$0xff]   ;;  %v10580_v7 = vld [vmem:[%s16090_s3 + $0x84] ss:$48 sps:$4 sm:$0xff]  }
 0x34a   :  { %v4719_v37 = vsel %vm4718_vm6, %v4697_v32, %v4717_v36  ;;  %v10578_v32 = vld [vmem:[%s16090_s3 + $0x80] ss:$48 sps:$4 sm:$0xff]   ;;  %v10586_v36 = vld [vmem:[%s16090_s3 + $0xe4] ss:$48 sps:$4 sm:$0xff]  }
 0x34b   :  { %v4727_v24 = vmul.f32 0.00390625, %v4719_v37  ;;  %v10584_v37 = vld [vmem:[%s16090_s3 + $0xe0] ss:$48 sps:$4 sm:$0xff]  }
 0x34d   :  { %v14544_v20 = vpack.c.bf16 %v4727_v24, %v4727_v24  ;;  %v10589_v24 = vld [vmem:[%s16090_s3 + $0x144] ss:$48 sps:$4 sm:$0xff]  }
 0x34f   :  { %5402 = vmatmul.mubr.bf16.vlgmr.msra.gmra.mrb[56].mxu1 %v14544_v20 }
 0x350   :  { %5411 = vmatpush1.bf16.msra.mxu1 %v10491_v3  ;;  %5442 = vmatprep.mubr.bf16.mxu1 %v12282_v17  ;;  %v10587_v3 = vld [vmem:[%s16090_s3 + $0x140] ss:$48 sps:$4 sm:$0xff]  }
 0x351   :  { %5412 = vmatprep.subr.bf16.mxu1 %v10499_v42  ;;  %v10590_v42 = vld [vmem:[%s16090_s3 + $0x1a0] ss:$48 sps:$4 sm:$0xff]  }
 0x354   :  { %5413 = vmatpush1.bf16.msra.mxu1 %v10497_v28  ;;  %v10674_v28 = vld [vmem:[%s16089_s5 + $0x1c8] ss:$16 sps:$4 sm:$0xff]  }
 0x355   :  { %5414 = vmatprep.subr.bf16.mxu1 %v10502_v54  ;;  %v10595_v54 = vld [vmem:[%s16090_s3 + $0x204] ss:$48 sps:$4 sm:$0xff]   ;;  %8312 = vmatpush1.bf16.msra.mxu0 %v10674_v28 }
 0x358   :  { %5415 = vmatpush1.bf16.msra.mxu1 %v10500_v49  ;;  %v10691_v49 = vld [vmem:[%s16089_s5 + $0x1ec] ss:$16 sps:$4 sm:$0xff]  }
 0x359   :  { %5416 = vmatprep.subr.bf16.mxu1 %v10505_v14  ;;  %v10593_v14 = vld [vmem:[%s16090_s3 + $0x200] ss:$48 sps:$4 sm:$0xff]   ;;  %8313 = vmatprep.subr.bf16.mxu0 %v10691_v49 }
 0x35c   :  { %5417 = vmatpush1.bf16.msra.mxu1 %v10503_v19  ;;  %v10689_v19 = vld [vmem:[%s16089_s5 + $0x1e8] ss:$16 sps:$4 sm:$0xff]  }
 0x35d   :  { %5418 = vmatprep.subr.bf16.mxu1 %v10508_v4  ;;  %v10598_v4 = vld [vmem:[%s16090_s3 + $0x264] ss:$48 sps:$4 sm:$0xff]   ;;  %8314 = vmatpush1.bf16.msra.mxu0 %v10689_v19 }
 0x360   :  { %5419 = vmatpush1.bf16.msra.mxu1 %v10506_v29  ;;  %v10697_v29 = vld [vmem:[%s16089_s5 + $0x20c] ss:$16 sps:$4 sm:$0xff]  }
 0x361   :  { %5420 = vmatprep.subr.bf16.mxu1 %v10511_v8  ;;  %v10596_v8 = vld [vmem:[%s16090_s3 + $0x260] ss:$48 sps:$4 sm:$0xff]   ;;  %8324 = vmatprep.subr.bf16.mxu0 %v10697_v29  ;;  %v10688_v29 = vld [vmem:[%s16089_s5 + $0x1e4] ss:$16 sps:$4 sm:$0xff]  }
 0x364   :  { %5421 = vmatpush1.bf16.msra.mxu1 %v10509_v5  ;;  %v10601_v5 = vld [vmem:[%s16090_s3 + $0x2c4] ss:$48 sps:$4 sm:$0xff]  }
 0x365   :  { %5422 = vmatprep.subr.bf16.mxu1 %v10514_v41  ;;  %v10599_v41 = vld [vmem:[%s16090_s3 + $0x2c0] ss:$48 sps:$4 sm:$0xff]  }
 0x368   :  { %5423 = vmatpush1.bf16.msra.mxu1 %v10512_v59  ;;  %v10607_v59 = vld [vmem:[%s16090_s3 + $0x2c] ss:$48 sps:$4 sm:$0xff]  }
 0x369   :  { %5424 = vmatprep.subr.bf16.mxu1 %v10520_v47  ;;  %v10605_v47 = vld [vmem:[%s16090_s3 + $0x28] ss:$48 sps:$4 sm:$0xff]  }
 0x36c   :  { %5425 = vmatpush1.bf16.msra.mxu1 %v10518_v9  ;;  %v10613_v9 = vld [vmem:[%s16090_s3 + $0xec] ss:$48 sps:$4 sm:$0xff]  }
 0x36d   :  { %5451 = vmatprep.subr.bf16.mxu1 %v10523_v31  ;;  %v10611_v31 = vld [vmem:[%s16090_s3 + $0xe8] ss:$48 sps:$4 sm:$0xff]  }
 0x36f   :  { %5443 = vmatmul.mubr.bf16.vlgmr.msra.gmra.mrb[60].mxu1 %v14544_v20 }
 0x370   :  { %5452 = vmatpush1.bf16.msra.mxu1 %v10521_v39  ;;  %5483 = vmatprep.mubr.bf16.mxu1 %v12282_v17  ;;  %v10616_v39 = vld [vmem:[%s16090_s3 + $0x14c] ss:$48 sps:$4 sm:$0xff]  }
 0x371   :  { %5453 = vmatprep.subr.bf16.mxu1 %v10526_v30  ;;  %v10619_v30 = vld [vmem:[%s16090_s3 + $0x1ac] ss:$48 sps:$4 sm:$0xff]  }
 0x374   :  { %5454 = vmatpush1.bf16.msra.mxu1 %v10524_v21  ;;  %v10620_v21 = vld [vmem:[%s16090_s3 + $0x208] ss:$48 sps:$4 sm:$0xff]  }
 0x375   :  { %5455 = vmatprep.subr.bf16.mxu1 %v10529_v45  ;;  %v10625_v45 = vld [vmem:[%s16090_s3 + $0x26c] ss:$48 sps:$4 sm:$0xff]  }
 0x378   :  { %5456 = vmatpush1.bf16.msra.mxu1 %v10527_v34  ;;  %v10623_v34 = vld [vmem:[%s16090_s3 + $0x268] ss:$48 sps:$4 sm:$0xff]  }
 0x379   :  { %5457 = vmatprep.subr.bf16.mxu1 %v10532_v52  ;;  %v10631_v52 = vld [vmem:[%s16090_s3 + $0x2cc] ss:$48 sps:$4 sm:$0xff]  }
 0x37c   :  { %5458 = vmatpush1.bf16.msra.mxu1 %v10530_v22  ;;  %v10629_v22 = vld [vmem:[%s16090_s3 + $0x2c8] ss:$48 sps:$4 sm:$0xff]  }
 0x37d   :  { %5459 = vmatprep.subr.bf16.mxu1 %v10535_v11  ;;  %v10637_v11 = vld [vmem:[%s16089_s5 + $0x4] ss:$16 sps:$4 sm:$0xff]  }
 0x380   :  { %5460 = vmatpush1.bf16.msra.mxu1 %v10533_v63  ;;  %v10635_v63 = vld [vmem:[%s16089_s5] ss:$16 sps:$4 sm:$0xff]  }
 0x381   :  { %5461 = vmatprep.subr.bf16.mxu1 %v10538_v27  ;;  %v10640_v27 = vld [vmem:[%s16089_s5 + $0x24] ss:$16 sps:$4 sm:$0xff]  }
 0x384   :  { %5462 = vmatpush1.bf16.msra.mxu1 %v10536_v43  ;;  %v10638_v43 = vld [vmem:[%s16089_s5 + $0x20] ss:$16 sps:$4 sm:$0xff]  }
 0x385   :  { %5463 = vmatprep.subr.bf16.mxu1 %v10544_v53  ;;  %v10643_v53 = vld [vmem:[%s16089_s5 + $0x44] ss:$16 sps:$4 sm:$0xff]  }
 0x388   :  { %5464 = vmatpush1.bf16.msra.mxu1 %v10542_v23  ;;  %v10649_v23 = vld [vmem:[%s16089_s5 + $0x84] ss:$16 sps:$4 sm:$0xff]  }
 0x389   :  { %5465 = vmatprep.subr.bf16.mxu1 %v10547_v62  ;;  %v10647_v62 = vld [vmem:[%s16089_s5 + $0x80] ss:$16 sps:$4 sm:$0xff]  }
 0x38c   :  { %5466 = vmatpush1.bf16.msra.mxu1 %v10545_v44  ;;  %v10652_v44 = vld [vmem:[%s16089_s5 + $0xa4] ss:$16 sps:$4 sm:$0xff]  }
 0x38d   :  { %5492 = vmatprep.subr.bf16.mxu1 %v10550_v13  ;;  %v10650_v13 = vld [vmem:[%s16089_s5 + $0xa0] ss:$16 sps:$4 sm:$0xff]  }
 0x38f   :  { %5484 = vmatmul.mubr.bf16.vlgmr.msra.gmra.mrb[64].mxu1 %v14544_v20 }
 0x390   :  { %5493 = vmatpush1.bf16.msra.mxu1 %v10548_v16  ;;  %5524 = vmatprep.mubr.bf16.mxu1 %v12282_v17  ;;  %v10658_v16 = vld [vmem:[%s16089_s5 + $0xc4] ss:$16 sps:$4 sm:$0xff]  }
 0x391   :  { %5494 = vmatprep.subr.bf16.mxu1 %v10553_v46  ;;  %v10656_v46 = vld [vmem:[%s16089_s5 + $0xc0] ss:$16 sps:$4 sm:$0xff]  }
 0x394   :  { %5495 = vmatpush1.bf16.msra.mxu1 %v10551_v2  ;;  %v10661_v2 = vld [vmem:[%s16089_s5 + $0xe4] ss:$16 sps:$4 sm:$0xff]  }
 0x395   :  { %5496 = vmatprep.subr.bf16.mxu1 %v10556_v40  ;;  %v10659_v40 = vld [vmem:[%s16089_s5 + $0xe0] ss:$16 sps:$4 sm:$0xff]  }
 0x398   :  { %5497 = vmatpush1.bf16.msra.mxu1 %v10554_v38  ;;  %v10664_v38 = vld [vmem:[%s16089_s5 + $0x104] ss:$16 sps:$4 sm:$0xff]  }
 0x399   :  { %5498 = vmatprep.subr.bf16.mxu1 %v10559_v57  ;;  %v10662_v57 = vld [vmem:[%s16089_s5 + $0x100] ss:$16 sps:$4 sm:$0xff]  }
 0x39c   :  { %5499 = vmatpush1.bf16.msra.mxu1 %v10557_v33  ;;  %v10667_v33 = vld [vmem:[%s16089_s5 + $0x124] ss:$16 sps:$4 sm:$0xff]  }
 0x39d   :  { %5500 = vmatprep.subr.bf16.mxu1 %v10565_v6  ;;  %v10665_v6 = vld [vmem:[%s16089_s5 + $0x120] ss:$16 sps:$4 sm:$0xff]  }
 0x3a0   :  { %5501 = vmatpush1.bf16.msra.mxu1 %v10563_v61  ;;  %v10670_v61 = vld [vmem:[%s16089_s5 + $0x144] ss:$16 sps:$4 sm:$0xff]  }
 0x3a1   :  { %5502 = vmatprep.subr.bf16.mxu1 %v10568_v1  ;;  %v4829_v1 = vlaneseq }
 0x3a4   :  { %5503 = vmatpush1.bf16.msra.mxu1 %v10566_v56  ;;  %v10668_v56 = vld [vmem:[%s16089_s5 + $0x140] ss:$16 sps:$4 sm:$0xff]  }
 0x3a5   :  { %5504 = vmatprep.subr.bf16.mxu1 %v10571_v12  ;;  %v10673_v12 = vld [vmem:[%s16089_s5 + $0x164] ss:$16 sps:$4 sm:$0xff]  }
 0x3a8   :  { %5505 = vmatpush1.bf16.msra.mxu1 %v10569_v0  ;;  %v14893_v0 = vshrl.u32 %v4829_v1, 7  ;;  %v10719_v1 = vld [vmem:[%s16089_s5 + $0x288] ss:$16 sps:$4 sm:$0xff]  }
 0x3a9   :  { %5506 = vmatprep.subr.bf16.mxu1 %v10574_v35  ;;  %v10671_v35 = vld [vmem:[%s16089_s5 + $0x160] ss:$16 sps:$4 sm:$0xff]  }
 0x3ac   :  { %5507 = vmatpush1.bf16.msra.mxu1 %v10572_v60  ;;  %v10679_v60 = vld [vmem:[%s16089_s5 + $0x184] ss:$16 sps:$4 sm:$0xff]  }
 0x3ad   :  { %5533 = vmatprep.subr.bf16.mxu1 %v10577_v26  ;;  %v14902_v26 = vsub.s32 0, %v14893_v0 }
 0x3af   :  { %5525 = vmatmul.mubr.bf16.vlgmr.msra.gmra.mrb[68].mxu1 %v14544_v20 }
 0x3b0   :  { %5534 = vmatpush1.bf16.msra.mxu1 %v10575_v55  ;;  %5565 = vmatprep.mubr.bf16.mxu1 %v12282_v17  ;;  %v14907_v55 = vld [vmem:[%s16091_s4] sm:$0xff] }
 0x3b1   :  { %5535 = vmatprep.subr.bf16.mxu1 %v10580_v7  ;;  %v14910_v7 = vsub.s32 1, %v14893_v0 }
 0x3b4   :  { %5536 = vmatpush1.bf16.msra.mxu1 %v10578_v32  ;;  %v10677_v32 = vld [vmem:[%s16089_s5 + $0x180] ss:$16 sps:$4 sm:$0xff]  }
 0x3b5   :  { %5537 = vmatprep.subr.bf16.mxu1 %v10586_v36  ;;  %v10682_v36 = vld [vmem:[%s16089_s5 + $0x1a4] ss:$16 sps:$4 sm:$0xff]  }
 0x3b8   :  { %5538 = vmatpush1.bf16.msra.mxu1 %v10584_v37  ;;  %v4832_v37 = vrot.slane %v14907_v55, %v14902_v26 }
 0x3b9   :  { %5539 = vmatprep.subr.bf16.mxu1 %v10589_v24  ;;  %v4836_v24 = vrot.slane %v14907_v55, %v14910_v7 }
 0x3bc   :  { %5540 = vmatpush1.bf16.msra.mxu1 %v10587_v3  ;;  %v10680_v3 = vld [vmem:[%s16089_s5 + $0x1a0] ss:$16 sps:$4 sm:$0xff]  }
 0x3bd   :  { %5541 = vmatprep.subr.bf16.mxu1 %v10592_v25  ;;  %v10685_v25 = vld [vmem:[%s16089_s5 + $0x1c4] ss:$16 sps:$4 sm:$0xff]  }
 0x3c0   :  { %5542 = vmatpush1.bf16.msra.mxu1 %v10590_v42 }
 0x3c1   :  { %5543 = vmatprep.subr.bf16.mxu1 %v10595_v54 }
 0x3c4   :  { %5544 = vmatpush1.bf16.msra.mxu1 %v10593_v14  ;;  %v10683_v14 = vld [vmem:[%s16089_s5 + $0x1c0] ss:$16 sps:$4 sm:$0xff]  }
 0x3c5   :  { %5545 = vmatprep.subr.bf16.mxu1 %v10598_v4 }
 0x3c8   :  { %5546 = vmatpush1.bf16.msra.mxu1 %v10596_v8 }
 0x3c9   :  { %5547 = vmatprep.subr.bf16.mxu1 %v10601_v5  ;;  %v10686_v5 = vld [vmem:[%s16089_s5 + $0x1e0] ss:$16 sps:$4 sm:$0xff]  }
 0x3cc   :  { %5548 = vmatpush1.bf16.msra.mxu1 %v10599_v41  ;;  %v10694_v41 = vld [vmem:[%s16089_s5 + $0x204] ss:$16 sps:$4 sm:$0xff]  }
 0x3cd   :  { %5574 = vmatprep.subr.bf16.mxu1 %v10607_v59 }
 0x3cf   :  { %5566 = vmatmul.mubr.bf16.vlgmr.msra.gmra.mrb[72].mxu1 %v14544_v20 }
 0x3d0   :  { %5575 = vmatpush1.bf16.msra.mxu1 %v10605_v47  ;;  %5606 = vmatprep.mubr.bf16.mxu1 %v12282_v17  ;;  %v10614_v17 = vld [vmem:[%s16090_s3 + $0x148] ss:$48 sps:$4 sm:$0xff]  }
 0x3d1   :  { %5576 = vmatprep.subr.bf16.mxu1 %v10610_v58 }
 0x3d4   :  { %5577 = vmatpush1.bf16.msra.mxu1 %v10608_v10 }
 0x3d5   :  { %5578 = vmatprep.subr.bf16.mxu1 %v10613_v9  ;;  %v14941_v9 = vsub.s32 3, %v14893_v0 }
 0x3d8   :  { %5579 = vmatpush1.bf16.msra.mxu1 %v10611_v31 }
 0x3d9   :  { %5580 = vmatprep.subr.bf16.mxu1 %v10616_v39 }
 0x3dc   :  { %5581 = vmatpush1.bf16.msra.mxu1 %v10614_v17 }
 0x3dd   :  { %5582 = vmatprep.subr.bf16.mxu1 %v10619_v30 }
 0x3e0   :  { %5583 = vmatpush1.bf16.msra.mxu1 %v10617_v18  ;;  %v4844_v18 = vrot.slane %v14907_v55, %v14941_v9 }
 0x3e1   :  { %5584 = vmatprep.subr.bf16.mxu1 %v10622_v48 }
 0x3e4   :  { %5585 = vmatpush1.bf16.msra.mxu1 %v10620_v21 }
 0x3e5   :  { %5586 = vmatprep.subr.bf16.mxu1 %v10625_v45  ;;  %v10692_v45 = vld [vmem:[%s16089_s5 + $0x200] ss:$16 sps:$4 sm:$0xff]  }
 0x3e8   :  { %5587 = vmatpush1.bf16.msra.mxu1 %v10623_v34  ;;  %v10695_v34 = vld [vmem:[%s16089_s5 + $0x208] ss:$16 sps:$4 sm:$0xff]  }
 0x3e9   :  { %5588 = vmatprep.subr.bf16.mxu1 %v10631_v52 }
 0x3ec   :  { %5589 = vmatpush1.bf16.msra.mxu1 %v10629_v22 }
 0x3ed   :  { %8037 = vmatprep.subr.bf16.mxu1 %v10637_v11  ;;  %v10700_v11 = vld [vmem:[%s16089_s5 + $0x224] ss:$16 sps:$4 sm:$0xff]  }
 0x3ef   :  { %5607 = vmatmul.mubr.bf16.vlgmr.msra.gmra.mrb[76].mxu1 %v14544_v20  ;;  %v10646_v20 = vld [vmem:[%s16089_s5 + $0x64] ss:$16 sps:$4 sm:$0xff]  }
 0x3f0   :  { %8038 = vmatpush1.bf16.msra.mxu1 %v10635_v63  ;;  %v10703_v63 = vld [vmem:[%s16089_s5 + $0x22c] ss:$16 sps:$4 sm:$0xff]  }
 0x3f1   :  { %8039 = vmatprep.subr.bf16.mxu1 %v10640_v27 }
 0x3f4   :  { %8040 = vmatpush1.bf16.msra.mxu1 %v10638_v43 }
 0x3f5   :  { %8041 = vmatprep.subr.bf16.mxu1 %v10643_v53 }
 0x3f8   :  { %8042 = vmatpush1.bf16.msra.mxu1 %v10641_v50 }
 0x3f9   :  { %8043 = vmatprep.subr.bf16.mxu1 %v10646_v20  ;;  %v10698_v20 = vld [vmem:[%s16089_s5 + $0x220] ss:$16 sps:$4 sm:$0xff]  }
 0x3fc   :  { %8044 = vmatpush1.bf16.msra.mxu1 %v10644_v15  ;;  %v10701_v15 = vld [vmem:[%s16089_s5 + $0x228] ss:$16 sps:$4 sm:$0xff]  }
 0x3fd   :  { %8045 = vmatprep.subr.bf16.mxu1 %v10649_v23  ;;  %v10706_v23 = vld [vmem:[%s16089_s5 + $0x244] ss:$16 sps:$4 sm:$0xff]  }
 0x400   :  { %8046 = vmatpush1.bf16.msra.mxu1 %v10647_v62  ;;  %v10709_v62 = vld [vmem:[%s16089_s5 + $0x24c] ss:$16 sps:$4 sm:$0xff]  }
 0x401   :  { %8047 = vmatprep.subr.bf16.mxu1 %v10652_v44  ;;  %v10704_v44 = vld [vmem:[%s16089_s5 + $0x240] ss:$16 sps:$4 sm:$0xff]  }
 0x404   :  { %8048 = vmatpush1.bf16.msra.mxu1 %v10650_v13  ;;  %v10707_v13 = vld [vmem:[%s16089_s5 + $0x248] ss:$16 sps:$4 sm:$0xff]  }
 0x405   :  { %8049 = vmatprep.subr.bf16.mxu1 %v10658_v16  ;;  %v10712_v16 = vld [vmem:[%s16089_s5 + $0x264] ss:$16 sps:$4 sm:$0xff]  }
 0x408   :  { %8050 = vmatpush1.bf16.msra.mxu1 %v10656_v46  ;;  %v10715_v46 = vld [vmem:[%s16089_s5 + $0x26c] ss:$16 sps:$4 sm:$0xff]  }
 0x409   :  { %8051 = vmatprep.subr.bf16.mxu1 %v10661_v2  ;;  %v10710_v2 = vld [vmem:[%s16089_s5 + $0x260] ss:$16 sps:$4 sm:$0xff]  }
 0x40c   :  { %8052 = vmatpush1.bf16.msra.mxu1 %v10659_v40  ;;  %v10713_v40 = vld [vmem:[%s16089_s5 + $0x268] ss:$16 sps:$4 sm:$0xff]  }
 0x40d   :  { %8053 = vmatprep.subr.bf16.mxu1 %v10664_v38  ;;  %v10718_v38 = vld [vmem:[%s16089_s5 + $0x284] ss:$16 sps:$4 sm:$0xff]  }
 0x410   :  { %8054 = vmatpush1.bf16.msra.mxu1 %v10662_v57  ;;  %v10721_v57 = vld [vmem:[%s16089_s5 + $0x28c] ss:$16 sps:$4 sm:$0xff]  }
 0x411   :  { %8055 = vmatprep.subr.bf16.mxu1 %v10667_v33  ;;  %v14997_v33 = vsub.s32 2, %v14893_v0 }
 0x414   :  { %8056 = vmatpush1.bf16.msra.mxu1 %v10665_v6 }
 0x415   :  { %8057 = vmatprep.subr.bf16.mxu1 %v10670_v61  ;;  %v10716_v61 = vld [vmem:[%s16089_s5 + $0x280] ss:$16 sps:$4 sm:$0xff]  }
 0x418   :  { %8058 = vmatpush1.bf16.msra.mxu1 %v10668_v56 }
 0x419   :  { %8059 = vmatprep.subr.bf16.mxu1 %v10673_v12  ;;  %v10724_v12 = vld [vmem:[%s16089_s5 + $0x2a4] ss:$16 sps:$4 sm:$0xff]  }
 0x41c   :  { %8060 = vmatpush1.bf16.msra.mxu1 %v10671_v35  ;;  %v10727_v35 = vld [vmem:[%s16089_s5 + $0x2ac] ss:$16 sps:$4 sm:$0xff]  }
 0x41d   :  { %8061 = vmatprep.subr.bf16.mxu1 %v10679_v60  ;;  %v4840_v60 = vrot.slane %v14907_v55, %v14997_v33 }
 0x420   :  { %8062 = vmatpush1.bf16.msra.mxu1 %v10677_v32  ;;  %v10722_v32 = vld [vmem:[%s16089_s5 + $0x2a0] ss:$16 sps:$4 sm:$0xff]  }
 0x421   :  { %8063 = vmatprep.subr.bf16.mxu1 %v10682_v36  ;;  %v10725_v36 = vld [vmem:[%s16089_s5 + $0x2a8] ss:$16 sps:$4 sm:$0xff]  }
 0x422   :  { %v5403_v51 = vpop.f32.mrb[56].mxu1 }
 0x423   :  { %v5404_v42 = vadd.f32 %v5403_v51, %v4832_v37  ;;  %v5405_v28 = vpop.f32.mrb[57].mxu1  ;;  %v10730_v37 = vld [vmem:[%s16089_s5 + $0x2c4] ss:$16 sps:$4 sm:$0xff]   ;;  %v10731_v51 = vld [vmem:[%s16089_s5 + $0x2c8] ss:$16 sps:$4 sm:$0xff]  }
 0x424   :  { %v5406_v54 = vadd.f32 %v5405_v28, %v4836_v24  ;;  %v5407_v49 = vpop.f32.mrb[58].mxu1  ;;  %8064 = vmatpush1.bf16.msra.mxu1 %v10680_v3  ;;  %v10733_v24 = vld [vmem:[%s16089_s5 + $0x2cc] ss:$16 sps:$4 sm:$0xff]  }
 0x425   :  { %v9374_v19 = vmul.f32 -1.442695, %v5404_v42  ;;  %v5408_v4 = vpop.f32.mrb[59].mxu1  ;;  %8065 = vmatprep.subr.bf16.mxu1 %v10685_v25  ;;  %v10728_v25 = vld [vmem:[%s16089_s5 + $0x2c0] ss:$16 sps:$4 sm:$0xff]  }
 0x426   :  { %v9375_v8 = vmul.f32 -1.442695, %v5406_v54  ;;  %v10739_v28 = vld [vmem:[%s16089_s5 + $0x2ec] ss:$16 sps:$4 sm:$0xff]  }
 0x427   :  { %12228 = vpow2.f32 %v9374_v19  ;;  %v10737_v19 = vld [vmem:[%s16089_s5 + $0x2e8] ss:$16 sps:$4 sm:$0xff]  }
 0x428   :  { %12230 = vpow2.f32 %v9375_v8  ;;  %8066 = vmatpush1.bf16.msra.mxu1 %v10683_v14  ;;  %v10734_v14 = vld [vmem:[%s16089_s5 + $0x2e0] ss:$16 sps:$4 sm:$0xff]   ;;  %v10745_v8 = vld [vmem:[%s16089_s5 + $0x30c] ss:$16 sps:$4 sm:$0xff]  }
 0x429   :  { %8067 = vmatprep.subr.bf16.mxu1 %v10688_v29  ;;  %v10742_v29 = vld [vmem:[%s16089_s5 + $0x304] ss:$16 sps:$4 sm:$0xff]  }
 0x42c   :  { %8068 = vmatpush1.bf16.msra.mxu1 %v10686_v5 }
 0x42d   :  { %8078 = vmatprep.subr.bf16.mxu1 %v10694_v41 }
 0x431   :  { %v12229_v59 = vpop.eup %12228 }
 0x432   :  { %v12231_v47 = vpop.eup %12230  ;;  %v5651_v58 = vadd.f32 1.0, %v12229_v59 }
 0x433   :  { %v5652_v10 = vadd.f32 1.0, %v12231_v47 }
 0x434   :  { %12232 = vrcp.f32 %v5651_v58  ;;  %v10740_v58 = vld [vmem:[%s16089_s5 + $0x300] ss:$16 sps:$4 sm:$0xff]  }
 0x435   :  { %12234 = vrcp.f32 %v5652_v10  ;;  %v10743_v10 = vld [vmem:[%s16089_s5 + $0x308] ss:$16 sps:$4 sm:$0xff]  }
 0x43e   :  { %v12233_v31 = vpop.eup %12232 }
 0x43f   :  { %v12235_v39 = vpop.eup %12234  ;;  %v5687_v17 = vmul.f32 %v12233_v31, %v5404_v42  ;;  %v10736_v42 = vld [vmem:[%s16089_s5 + $0x2e4] ss:$16 sps:$4 sm:$0xff]  }
 0x440   :  { %v5688_v30 = vmul.f32 %v12235_v39, %v5406_v54  ;;  %v4851_v54 = vsub.s32 5, %v14893_v0  ;;  %v10748_v39 = vld [vmem:[%s16089_s5 + $0x324] ss:$16 sps:$4 sm:$0xff]  }
 0x441   :  { %v5699_v52 = vpack.c.bf16 %v5687_v17, %v5687_v17  ;;  %v10751_v17 = vld [vmem:[%s16089_s5 + $0x32c] ss:$16 sps:$4 sm:$0xff]  }
 0x442   :  { %v5700_v48 = vpack.c.bf16 %v5688_v30, %v5688_v30  ;;  %v5444_v21 = vpop.f32.mrb[60].mxu1  ;;  %v4852_v41 = vrot.slane %v14907_v55, %v4851_v54 }
 0x443   :  { %v5446_v22 = vpop.f32.mrb[61].mxu1  ;;  %v15025_v3 = vadd.f32 %v5444_v21, %v4840_v60 }
 0x444   :  { %v14957_v27 = vadd.f32 %v5446_v22, %v4844_v18  ;;  %v5448_v43 = vpop.f32.mrb[62].mxu1  ;;  %8069 = vmatprep.mubr.bf16.mxu1 %v5700_v48  ;;  %8315 = vmatprep.mubr.bf16.mxu0 %v5700_v48  ;;  %v10757_v22 = vld [vmem:[%s16089_s5 + $0x34c] ss:$16 sps:$4 sm:$0xff]  }
 0x445   :  { %v5449_v53 = vpop.f32.mrb[63].mxu1  ;;  %8070 = vmatmul.mubr.bf16.vlgmr.msra.gmra.mrb[80].mxu1 %v5699_v52  ;;  %8316 = vmatmul.mubr.bf16.vlgmr.msra.gmra.mrb[200].mxu0 %v5699_v52  ;;  %v9376_v49 = vmul.f32 -1.442695, %v15025_v3  ;;  %v10754_v52 = vld [vmem:[%s16089_s5 + $0x344] ss:$16 sps:$4 sm:$0xff]  }
 0x446   :  { %v9377_v50 = vmul.f32 -1.442695, %v14957_v27  ;;  %8079 = vmatpush1.bf16.msra.mxu1 %v10692_v45  ;;  %8325 = vmatpush1.bf16.msra.mxu0 %v10695_v34  ;;  %v10746_v45 = vld [vmem:[%s16089_s5 + $0x320] ss:$16 sps:$4 sm:$0xff]   ;;  %v10749_v34 = vld [vmem:[%s16089_s5 + $0x328] ss:$16 sps:$4 sm:$0xff]  }
 0x447   :  { %8080 = vmatprep.subr.bf16.mxu1 %v10700_v11  ;;  %8326 = vmatprep.subr.bf16.mxu0 %v10703_v63  ;;  %v10752_v11 = vld [vmem:[%s16089_s5 + $0x340] ss:$16 sps:$4 sm:$0xff]   ;;  %v10755_v63 = vld [vmem:[%s16089_s5 + $0x348] ss:$16 sps:$4 sm:$0xff]   ;;  %v10760_v43 = vld [vmem:[%s16089_s5 + $0x364] ss:$16 sps:$4 sm:$0xff]  }
 0x448   :  { %12236 = vpow2.f32 %v9377_v50  ;;  %v10763_v53 = vld [vmem:[%s16089_s5 + $0x36c] ss:$16 sps:$4 sm:$0xff]  }
 0x44a   :  { %8081 = vmatpush1.bf16.msra.mxu1 %v10698_v20  ;;  %8327 = vmatpush1.bf16.msra.mxu0 %v10701_v15  ;;  %v10758_v20 = vld [vmem:[%s16089_s5 + $0x360] ss:$16 sps:$4 sm:$0xff]   ;;  %v10761_v15 = vld [vmem:[%s16089_s5 + $0x368] ss:$16 sps:$4 sm:$0xff]  }
 0x44b   :  { %8082 = vmatprep.subr.bf16.mxu1 %v10706_v23  ;;  %8328 = vmatprep.subr.bf16.mxu0 %v10709_v62  ;;  %v10766_v23 = vld [vmem:[%s16089_s5 + $0x384] ss:$16 sps:$4 sm:$0xff]   ;;  %v10769_v62 = vld [vmem:[%s16089_s5 + $0x38c] ss:$16 sps:$4 sm:$0xff]  }
 0x44e   :  { %8083 = vmatpush1.bf16.msra.mxu1 %v10704_v44  ;;  %8329 = vmatpush1.bf16.msra.mxu0 %v10707_v13  ;;  %v10764_v13 = vld [vmem:[%s16089_s5 + $0x380] ss:$16 sps:$4 sm:$0xff]  }
 0x44f   :  { %8084 = vmatprep.subr.bf16.mxu1 %v10712_v16  ;;  %8330 = vmatprep.subr.bf16.mxu0 %v10715_v46  ;;  %v10767_v16 = vld [vmem:[%s16089_s5 + $0x388] ss:$16 sps:$4 sm:$0xff]  }
 0x452   :  { %v12237_v6 = vpop.eup %12236  ;;  %8085 = vmatpush1.bf16.msra.mxu1 %v10710_v2  ;;  %8331 = vmatpush1.bf16.msra.mxu0 %v10713_v40  ;;  %v10772_v2 = vld [vmem:[%s16089_s5 + $0x3a4] ss:$16 sps:$4 sm:$0xff]   ;;  %v10775_v40 = vld [vmem:[%s16089_s5 + $0x3ac] ss:$16 sps:$4 sm:$0xff]  }
 0x453   :  { %v5654_v56 = vadd.f32 1.0, %v12237_v6  ;;  %8086 = vmatprep.subr.bf16.mxu1 %v10718_v38  ;;  %8332 = vmatprep.subr.bf16.mxu0 %v10721_v57  ;;  %v10770_v38 = vld [vmem:[%s16089_s5 + $0x3a0] ss:$16 sps:$4 sm:$0xff]   ;;  %v10773_v57 = vld [vmem:[%s16089_s5 + $0x3a8] ss:$16 sps:$4 sm:$0xff]  }
 0x454   :  { %v10778_v6 = vld [vmem:[%s16089_s5 + $0x3c4] ss:$16 sps:$4 sm:$0xff]  }
 0x455   :  { %12238 = vrcp.f32 %v5654_v56  ;;  %v10779_v56 = vld [vmem:[%s16089_s5 + $0x3c8] ss:$16 sps:$4 sm:$0xff]  }
 0x456   :  { %8087 = vmatpush1.bf16.msra.mxu1 %v10716_v61  ;;  %8333 = vmatpush1.bf16.msra.mxu0 %v10719_v1  ;;  %12240 = vpow2.f32 %v9376_v49  ;;  %v10781_v61 = vld [vmem:[%s16089_s5 + $0x3cc] ss:$16 sps:$4 sm:$0xff]   ;;  %v10776_v1 = vld [vmem:[%s16089_s5 + $0x3c0] ss:$16 sps:$4 sm:$0xff]  }
 0x457   :  { %8088 = vmatprep.subr.bf16.mxu1 %v10724_v12  ;;  %8334 = vmatprep.subr.bf16.mxu0 %v10727_v35  ;;  %v10784_v12 = vld [vmem:[%s16089_s5 + $0x3e4] ss:$16 sps:$4 sm:$0xff]   ;;  %v10787_v35 = vld [vmem:[%s16089_s5 + $0x3ec] ss:$16 sps:$4 sm:$0xff]  }
 0x45a   :  { %8089 = vmatpush1.bf16.msra.mxu1 %v10722_v32  ;;  %8335 = vmatpush1.bf16.msra.mxu0 %v10725_v36  ;;  %v10782_v32 = vld [vmem:[%s16089_s5 + $0x3e0] ss:$16 sps:$4 sm:$0xff]   ;;  %v10785_v36 = vld [vmem:[%s16089_s5 + $0x3e8] ss:$16 sps:$4 sm:$0xff]  }
 0x45b   :  { %8090 = vmatprep.subr.bf16.mxu1 %v10730_v37  ;;  %8336 = vmatprep.subr.bf16.mxu0 %v10733_v24 }
 0x45e   :  { %8091 = vmatpush1.bf16.msra.mxu1 %v10728_v25  ;;  %8337 = vmatpush1.bf16.msra.mxu0 %v10731_v51  ;;  %v10790_v25 = vld [vmem:[%s16089_s5 + $0x404] ss:$16 sps:$4 sm:$0xff]   ;;  %v10793_v51 = vld [vmem:[%s16089_s5 + $0x40c] ss:$16 sps:$4 sm:$0xff]  }
 0x45f   :  { %v12239_v4 = vpop.eup %12238  ;;  %8092 = vmatprep.subr.bf16.mxu1 %v10736_v42  ;;  %8338 = vmatprep.subr.bf16.mxu0 %v10739_v28 }
 0x460   :  { %v5690_v5 = vmul.f32 %v12239_v4, %v14957_v27  ;;  %v12241_v27 = vpop.eup %12240 }
 0x461   :  { %v5653_v50 = vadd.f32 1.0, %v12241_v27  ;;  %v10823_v27 = vld [vmem:[%s16089_s5 + $0x4ac] ss:$16 sps:$4 sm:$0xff]  }
 0x462   :  { %v5702_v59 = vpack.c.bf16 %v5690_v5, %v5690_v5  ;;  %v15055_v47 = vpop.f32.mrb[64].mxu1  ;;  %8093 = vmatpush1.bf16.msra.mxu1 %v10734_v14  ;;  %8339 = vmatpush1.bf16.msra.mxu0 %v10737_v19  ;;  %v10791_v14 = vld [vmem:[%s16089_s5 + $0x408] ss:$16 sps:$4 sm:$0xff]  }
 0x463   :  { %v5487_v31 = vpop.f32.mrb[65].mxu1  ;;  %8094 = vmatprep.subr.bf16.mxu1 %v10742_v29  ;;  %8340 = vmatprep.subr.bf16.mxu0 %v10745_v8  ;;  %v10796_v29 = vld [vmem:[%s16089_s5 + $0x424] ss:$16 sps:$4 sm:$0xff]   ;;  %v10799_v8 = vld [vmem:[%s16089_s5 + $0x42c] ss:$16 sps:$4 sm:$0xff]  }
 0x464   :  { %v15069_v30 = vadd.f32 %v5487_v31, %v4852_v41  ;;  %v5489_v18 = vpop.f32.mrb[66].mxu1  ;;  %8110 = vmatprep.mubr.bf16.mxu1 %v5702_v59  ;;  %8356 = vmatprep.mubr.bf16.mxu0 %v5702_v59  ;;  %v10794_v41 = vld [vmem:[%s16089_s5 + $0x420] ss:$16 sps:$4 sm:$0xff]   ;;  %v10797_v59 = vld [vmem:[%s16089_s5 + $0x428] ss:$16 sps:$4 sm:$0xff]  }
 0x465   :  { %v5490_v48 = vpop.f32.mrb[67].mxu1  ;;  %v10800_v31 = vld [vmem:[%s16089_s5 + $0x440] ss:$16 sps:$4 sm:$0xff]  }
 0x466   :  { %v9379_v21 = vmul.f32 -1.442695, %v15069_v30  ;;  %8095 = vmatpush1.bf16.msra.mxu1 %v10740_v58  ;;  %8341 = vmatpush1.bf16.msra.mxu0 %v10743_v10  ;;  %v10802_v58 = vld [vmem:[%s16089_s5 + $0x444] ss:$16 sps:$4 sm:$0xff]   ;;  %v10805_v10 = vld [vmem:[%s16089_s5 + $0x44c] ss:$16 sps:$4 sm:$0xff]  }
 0x467   :  { %8096 = vmatprep.subr.bf16.mxu1 %v10748_v39  ;;  %8342 = vmatprep.subr.bf16.mxu0 %v10751_v17  ;;  %v10803_v39 = vld [vmem:[%s16089_s5 + $0x448] ss:$16 sps:$4 sm:$0xff]   ;;  %v10808_v17 = vld [vmem:[%s16089_s5 + $0x464] ss:$16 sps:$4 sm:$0xff]   ;;  %v10806_v18 = vld [vmem:[%s16089_s5 + $0x460] ss:$16 sps:$4 sm:$0xff]  }
 0x468   :  { %12242 = vpow2.f32 %v9379_v21  ;;  %v10809_v48 = vld [vmem:[%s16089_s5 + $0x468] ss:$16 sps:$4 sm:$0xff]   ;;  %v10814_v21 = vld [vmem:[%s16089_s5 + $0x484] ss:$16 sps:$4 sm:$0xff]  }
 0x469   :  { %12244 = vrcp.f32 %v5653_v50 }
 0x46a   :  { %8097 = vmatpush1.bf16.msra.mxu1 %v10746_v45  ;;  %8343 = vmatpush1.bf16.msra.mxu0 %v10749_v34  ;;  %v10817_v45 = vld [vmem:[%s16089_s5 + $0x48c] ss:$16 sps:$4 sm:$0xff]   ;;  %v4847_v34 = vsub.s32 4, %v14893_v0 }
 0x46b   :  { %8098 = vmatprep.subr.bf16.mxu1 %v10754_v52  ;;  %8344 = vmatprep.subr.bf16.mxu0 %v10757_v22  ;;  %v10812_v52 = vld [vmem:[%s16089_s5 + $0x480] ss:$16 sps:$4 sm:$0xff]   ;;  %v4859_v22 = vsub.s32 7, %v14893_v0 }
 0x46d   :  { %v4860_v50 = vrot.slane %v14907_v55, %v4859_v22 }
 0x46e   :  { %8099 = vmatpush1.bf16.msra.mxu1 %v10752_v11  ;;  %8345 = vmatpush1.bf16.msra.mxu0 %v10755_v63  ;;  %v10815_v11 = vld [vmem:[%s16089_s5 + $0x488] ss:$16 sps:$4 sm:$0xff]   ;;  %v10820_v63 = vld [vmem:[%s16089_s5 + $0x4a4] ss:$16 sps:$4 sm:$0xff]  }
 0x46f   :  { %8100 = vmatprep.subr.bf16.mxu1 %v10760_v43  ;;  %8346 = vmatprep.subr.bf16.mxu0 %v10763_v53  ;;  %v4848_v43 = vrot.slane %v14907_v55, %v4847_v34  ;;  %v10818_v53 = vld [vmem:[%s16089_s5 + $0x4a0] ss:$16 sps:$4 sm:$0xff]   ;;  %v10875_v34 = vld [vmem:[%s16089_s5 + $0x5c8] ss:$16 sps:$4 sm:$0xff]  }
 0x472   :  { %v12243_v44 = vpop.eup %12242  ;;  %8101 = vmatpush1.bf16.msra.mxu1 %v10758_v20  ;;  %8347 = vmatpush1.bf16.msra.mxu0 %v10761_v15  ;;  %v10821_v20 = vld [vmem:[%s16089_s5 + $0x4a8] ss:$16 sps:$4 sm:$0xff]   ;;  %v10826_v15 = vld [vmem:[%s16089_s5 + $0x4c4] ss:$16 sps:$4 sm:$0xff]  }
 0x473   :  { %v5656_v46 = vadd.f32 1.0, %v12243_v44  ;;  %8102 = vmatprep.subr.bf16.mxu1 %v10766_v23  ;;  %8348 = vmatprep.subr.bf16.mxu0 %v10769_v62  ;;  %v12245_v60 = vpop.eup %12244  ;;  %v10829_v23 = vld [vmem:[%s16089_s5 + $0x4cc] ss:$16 sps:$4 sm:$0xff]   ;;  %v15237_v62 = vadd.f32 %v15055_v47, %v4848_v43  ;;  %v10824_v44 = vld [vmem:[%s16089_s5 + $0x4c0] ss:$16 sps:$4 sm:$0xff]  }
 0x474   :  { %v5689_v24 = vmul.f32 %v12245_v60, %v15025_v3  ;;  %v10788_v3 = vld [vmem:[%s16089_s5 + $0x400] ss:$16 sps:$4 sm:$0xff]   ;;  %v10835_v47 = vld [vmem:[%s16089_s5 + $0x4ec] ss:$16 sps:$4 sm:$0xff]   ;;  %v10844_v60 = vld [vmem:[%s16089_s5 + $0x524] ss:$16 sps:$4 sm:$0xff]  }
 0x475   :  { %12246 = vrcp.f32 %v5656_v46  ;;  %v10832_v46 = vld [vmem:[%s16089_s5 + $0x4e4] ss:$16 sps:$4 sm:$0xff]   ;;  %v10878_v43 = vld [vmem:[%s16089_s5 + $0x5e0] ss:$16 sps:$4 sm:$0xff]  }
 0x476   :  { %8103 = vmatpush1.bf16.msra.mxu1 %v10764_v13  ;;  %8349 = vmatpush1.bf16.msra.mxu0 %v10767_v16  ;;  %v5701_v54 = vpack.c.bf16 %v5689_v24, %v5689_v24  ;;  %v10827_v16 = vld [vmem:[%s16089_s5 + $0x4c8] ss:$16 sps:$4 sm:$0xff]   ;;  %v10842_v24 = vld [vmem:[%s16089_s5 + $0x520] ss:$16 sps:$4 sm:$0xff]  }
 0x477   :  { %8104 = vmatprep.subr.bf16.mxu1 %v10772_v2  ;;  %8350 = vmatprep.subr.bf16.mxu0 %v10775_v40  ;;  %v9378_v2 = vmul.f32 -1.442695, %v15237_v62  ;;  %v10830_v40 = vld [vmem:[%s16089_s5 + $0x4e0] ss:$16 sps:$4 sm:$0xff]  }
 0x479   :  { %12248 = vpow2.f32 %v9378_v2 }
 0x47a   :  { %8105 = vmatpush1.bf16.msra.mxu1 %v10770_v38  ;;  %8351 = vmatpush1.bf16.msra.mxu0 %v10773_v57  ;;  %v10833_v57 = vld [vmem:[%s16089_s5 + $0x4e8] ss:$16 sps:$4 sm:$0xff]  }
 0x47b   :  { %8106 = vmatprep.subr.bf16.mxu1 %v10778_v6  ;;  %8352 = vmatprep.subr.bf16.mxu0 %v10781_v61  ;;  %v10838_v6 = vld [vmem:[%s16089_s5 + $0x504] ss:$16 sps:$4 sm:$0xff]   ;;  %v10841_v61 = vld [vmem:[%s16089_s5 + $0x50c] ss:$16 sps:$4 sm:$0xff]  }
 0x47e   :  { %8107 = vmatpush1.bf16.msra.mxu1 %v10776_v1  ;;  %8353 = vmatpush1.bf16.msra.mxu0 %v10779_v56  ;;  %v10836_v56 = vld [vmem:[%s16089_s5 + $0x500] ss:$16 sps:$4 sm:$0xff]  }
 0x47f   :  { %v12247_v37 = vpop.eup %12246  ;;  %8108 = vmatprep.subr.bf16.mxu1 %v10784_v12  ;;  %8354 = vmatprep.subr.bf16.mxu0 %v10787_v35  ;;  %v10839_v35 = vld [vmem:[%s16089_s5 + $0x508] ss:$16 sps:$4 sm:$0xff]  }
 0x480   :  { %v5692_v42 = vmul.f32 %v12247_v37, %v15069_v30  ;;  %v10811_v30 = vld [vmem:[%s16089_s5 + $0x46c] ss:$16 sps:$4 sm:$0xff]  }
 0x482   :  { %v15158_v28 = vpop.f32.mrb[68].mxu1  ;;  %8109 = vmatpush1.bf16.msra.mxu1 %v10782_v32  ;;  %8355 = vmatpush1.bf16.msra.mxu0 %v10785_v36  ;;  %v5704_v19 = vpack.c.bf16 %v5692_v42, %v5692_v42  ;;  %v10847_v36 = vld [vmem:[%s16089_s5 + $0x52c] ss:$16 sps:$4 sm:$0xff]  }
 0x483   :  { %v5528_v49 = vpop.f32.mrb[69].mxu1  ;;  %8119 = vmatprep.subr.bf16.mxu1 %v10790_v25  ;;  %8365 = vmatprep.subr.bf16.mxu0 %v10793_v51  ;;  %v10845_v25 = vld [vmem:[%s16089_s5 + $0x528] ss:$16 sps:$4 sm:$0xff]   ;;  %v10850_v51 = vld [vmem:[%s16089_s5 + $0x544] ss:$16 sps:$4 sm:$0xff]  }
 0x484   :  { %v5530_v4 = vpop.f32.mrb[70].mxu1  ;;  %v15242_v13 = vadd.f32 %v5528_v49, %v4860_v50  ;;  %v10853_v42 = vld [vmem:[%s16089_s5 + $0x54c] ss:$16 sps:$4 sm:$0xff]   ;;  %v10851_v49 = vld [vmem:[%s16089_s5 + $0x548] ss:$16 sps:$4 sm:$0xff]  }
 0x485   :  { %v5531_v5 = vpop.f32.mrb[71].mxu1  ;;  %8111 = vmatmul.mubr.bf16.vlgmr.msra.gmra.mrb[80].mxu1 %v5701_v54  ;;  %8357 = vmatmul.mubr.bf16.vlgmr.msra.gmra.mrb[200].mxu0 %v5701_v54  ;;  %v12249_v54 = vpop.eup %12248  ;;  %v10881_v50 = vld [vmem:[%s16089_s5 + $0x5e8] ss:$16 sps:$4 sm:$0xff]  }
 0x486   :  { %8120 = vmatpush1.bf16.msra.mxu1 %v10788_v3  ;;  %8151 = vmatprep.mubr.bf16.mxu1 %v5704_v19  ;;  %v9381_v38 = vmul.f32 -1.442695, %v15242_v13  ;;  %v10848_v3 = vld [vmem:[%s16089_s5 + $0x540] ss:$16 sps:$4 sm:$0xff]   ;;  %v10857_v5 = vld [vmem:[%s16089_s5 + $0x568] ss:$16 sps:$4 sm:$0xff]  }
 0x487   :  { %8366 = vmatpush1.bf16.msra.mxu0 %v10791_v14  ;;  %8397 = vmatprep.mubr.bf16.mxu0 %v5704_v19  ;;  %v10856_v14 = vld [vmem:[%s16089_s5 + $0x564] ss:$16 sps:$4 sm:$0xff]   ;;  %v10859_v19 = vld [vmem:[%s16089_s5 + $0x56c] ss:$16 sps:$4 sm:$0xff]  }
 0x488   :  { %8121 = vmatprep.subr.bf16.mxu1 %v10796_v29  ;;  %8367 = vmatprep.subr.bf16.mxu0 %v10799_v8  ;;  %12250 = vpow2.f32 %v9381_v38  ;;  %v5655_v29 = vadd.f32 1.0, %v12249_v54  ;;  %v10854_v8 = vld [vmem:[%s16089_s5 + $0x560] ss:$16 sps:$4 sm:$0xff]   ;;  %v10887_v38 = vld [vmem:[%s16089_s5 + $0x608] ss:$16 sps:$4 sm:$0xff]  }
 0x489   :  { %v10905_v54 = vld [vmem:[%s16089_s5 + $0x668] ss:$16 sps:$4 sm:$0xff]  }
 0x48a   :  { %8122 = vmatpush1.bf16.msra.mxu1 %v10794_v41  ;;  %v10862_v41 = vld [vmem:[%s16089_s5 + $0x584] ss:$16 sps:$4 sm:$0xff]   ;;  %12252 = vrcp.f32 %v5655_v29  ;;  %v10911_v29 = vld [vmem:[%s16089_s5 + $0x688] ss:$16 sps:$4 sm:$0xff]  }
 0x48b   :  { %8368 = vmatpush1.bf16.msra.mxu0 %v10797_v59  ;;  %8123 = vmatprep.subr.bf16.mxu1 %v10802_v58  ;;  %v10865_v58 = vld [vmem:[%s16089_s5 + $0x58c] ss:$16 sps:$4 sm:$0xff]  }
 0x48c   :  { %8369 = vmatprep.subr.bf16.mxu0 %v10805_v10  ;;  %v10860_v10 = vld [vmem:[%s16089_s5 + $0x580] ss:$16 sps:$4 sm:$0xff]  }
 0x48e   :  { %8124 = vmatpush1.bf16.msra.mxu1 %v10800_v31  ;;  %v10863_v31 = vld [vmem:[%s16089_s5 + $0x588] ss:$16 sps:$4 sm:$0xff]  }
 0x48f   :  { %8370 = vmatpush1.bf16.msra.mxu0 %v10803_v39  ;;  %8125 = vmatprep.subr.bf16.mxu1 %v10808_v17  ;;  %v10868_v39 = vld [vmem:[%s16089_s5 + $0x5a4] ss:$16 sps:$4 sm:$0xff]   ;;  %v10871_v17 = vld [vmem:[%s16089_s5 + $0x5ac] ss:$16 sps:$4 sm:$0xff]  }
 0x490   :  { %8371 = vmatprep.subr.bf16.mxu0 %v10811_v30  ;;  %v10866_v30 = vld [vmem:[%s16089_s5 + $0x5a0] ss:$16 sps:$4 sm:$0xff]  }
 0x492   :  { %8126 = vmatpush1.bf16.msra.mxu1 %v10806_v18  ;;  %v12251_v4 = vpop.eup %12250  ;;  %v10869_v18 = vld [vmem:[%s16089_s5 + $0x5a8] ss:$16 sps:$4 sm:$0xff]  }
 0x493   :  { %8372 = vmatpush1.bf16.msra.mxu0 %v10809_v48  ;;  %8127 = vmatprep.subr.bf16.mxu1 %v10814_v21  ;;  %v5658_v59 = vadd.f32 1.0, %v12251_v4  ;;  %v10874_v48 = vld [vmem:[%s16089_s5 + $0x5c4] ss:$16 sps:$4 sm:$0xff]   ;;  %v10877_v21 = vld [vmem:[%s16089_s5 + $0x5cc] ss:$16 sps:$4 sm:$0xff]  }
 0x494   :  { %8373 = vmatprep.subr.bf16.mxu0 %v10817_v45  ;;  %v10872_v45 = vld [vmem:[%s16089_s5 + $0x5c0] ss:$16 sps:$4 sm:$0xff]   ;;  %v12253_v22 = vpop.eup %12252 }
 0x495   :  { %12254 = vrcp.f32 %v5658_v59  ;;  %v10908_v4 = vld [vmem:[%s16089_s5 + $0x680] ss:$16 sps:$4 sm:$0xff]  }
 0x496   :  { %8128 = vmatpush1.bf16.msra.mxu1 %v10812_v52  ;;  %v10880_v52 = vld [vmem:[%s16089_s5 + $0x5e4] ss:$16 sps:$4 sm:$0xff]  }
 0x497   :  { %8374 = vmatpush1.bf16.msra.mxu0 %v10815_v11  ;;  %8129 = vmatprep.subr.bf16.mxu1 %v10820_v63  ;;  %v10883_v11 = vld [vmem:[%s16089_s5 + $0x5ec] ss:$16 sps:$4 sm:$0xff]  }
 0x498   :  { %8375 = vmatprep.subr.bf16.mxu0 %v10823_v27  ;;  %v15358_v27 = vld [vmem:[%s16091_s4 + $0x8] sm:$0xf] }
 0x499   :  { %v4868_v59 = vrot.slane %v15358_v27, %v14910_v7 }
 0x49a   :  { %8130 = vmatpush1.bf16.msra.mxu1 %v10818_v53  ;;  %v5691_v53 = vmul.f32 %v12253_v22, %v15237_v62  ;;  %v10889_v62 = vld [vmem:[%s16089_s5 + $0x60c] ss:$16 sps:$4 sm:$0xff]   ;;  %v10932_v22 = vld [vmem:[%s16089_s5 + $0x700] ss:$16 sps:$4 sm:$0xff]  }
 0x49b   :  { %8376 = vmatpush1.bf16.msra.mxu0 %v10821_v20  ;;  %8131 = vmatprep.subr.bf16.mxu1 %v10826_v15  ;;  %v4872_v20 = vrot.slane %v15358_v27, %v14997_v33  ;;  %v10886_v15 = vld [vmem:[%s16089_s5 + $0x604] ss:$16 sps:$4 sm:$0xff]  }
 0x49c   :  { %8377 = vmatprep.subr.bf16.mxu0 %v10829_v23  ;;  %v4876_v23 = vrot.slane %v15358_v27, %v14941_v9 }
 0x49e   :  { %8132 = vmatpush1.bf16.msra.mxu1 %v10824_v44 }
 0x49f   :  { %8378 = vmatpush1.bf16.msra.mxu0 %v10827_v16  ;;  %8133 = vmatprep.subr.bf16.mxu1 %v10832_v46  ;;  %v12255_v63 = vpop.eup %12254  ;;  %v10884_v46 = vld [vmem:[%s16089_s5 + $0x600] ss:$16 sps:$4 sm:$0xff]  }
 0x4a0   :  { %8379 = vmatprep.subr.bf16.mxu0 %v10835_v47  ;;  %v5694_v44 = vmul.f32 %v12255_v63, %v15242_v13  ;;  %v5703_v47 = vpack.c.bf16 %v5691_v53, %v5691_v53  ;;  %v10892_v13 = vld [vmem:[%s16089_s5 + $0x624] ss:$16 sps:$4 sm:$0xff]   ;;  %v10938_v53 = vld [vmem:[%s16089_s5 + $0x720] ss:$16 sps:$4 sm:$0xff]  }
 0x4a1   :  { %v10940_v63 = vld [vmem:[%s16089_s5 + $0x724] ss:$16 sps:$4 sm:$0xff]  }
 0x4a2   :  { %v15267_v1 = vpop.f32.mrb[72].mxu1  ;;  %8134 = vmatpush1.bf16.msra.mxu1 %v10830_v40 }
 0x4a3   :  { %8380 = vmatpush1.bf16.msra.mxu0 %v10833_v57  ;;  %v15272_v12 = vpop.f32.mrb[73].mxu1  ;;  %8135 = vmatprep.subr.bf16.mxu1 %v10838_v6 }
 0x4a4   :  { %v5571_v32 = vpop.f32.mrb[74].mxu1  ;;  %8381 = vmatprep.subr.bf16.mxu0 %v10841_v61  ;;  %v5706_v61 = vpack.c.bf16 %v5694_v44, %v5694_v44  ;;  %v10947_v44 = vld [vmem:[%s16089_s5 + $0x748] ss:$16 sps:$4 sm:$0xff]  }
 0x4a5   :  { %v5572_v37 = vpop.f32.mrb[75].mxu1  ;;  %v10893_v32 = vld [vmem:[%s16089_s5 + $0x628] ss:$16 sps:$4 sm:$0xff]  }
 0x4a6   :  { %8136 = vmatpush1.bf16.msra.mxu1 %v10836_v56  ;;  %v10901_v37 = vld [vmem:[%s16089_s5 + $0x64c] ss:$16 sps:$4 sm:$0xff]  }
 0x4a7   :  { %8382 = vmatpush1.bf16.msra.mxu0 %v10839_v35  ;;  %8137 = vmatprep.subr.bf16.mxu1 %v10844_v60  ;;  %v10895_v35 = vld [vmem:[%s16089_s5 + $0x62c] ss:$16 sps:$4 sm:$0xff]   ;;  %v10890_v60 = vld [vmem:[%s16089_s5 + $0x620] ss:$16 sps:$4 sm:$0xff]  }
 0x4a8   :  { %8383 = vmatprep.subr.bf16.mxu0 %v10847_v36  ;;  %v10898_v36 = vld [vmem:[%s16089_s5 + $0x644] ss:$16 sps:$4 sm:$0xff]  }
 0x4aa   :  { %8138 = vmatpush1.bf16.msra.mxu1 %v10842_v24  ;;  %v10896_v24 = vld [vmem:[%s16089_s5 + $0x640] ss:$16 sps:$4 sm:$0xff]  }
 0x4ab   :  { %8384 = vmatpush1.bf16.msra.mxu0 %v10845_v25  ;;  %8139 = vmatprep.subr.bf16.mxu1 %v10850_v51  ;;  %v10899_v25 = vld [vmem:[%s16089_s5 + $0x648] ss:$16 sps:$4 sm:$0xff]   ;;  %v10904_v51 = vld [vmem:[%s16089_s5 + $0x664] ss:$16 sps:$4 sm:$0xff]  }
 0x4ac   :  { %8385 = vmatprep.subr.bf16.mxu0 %v10853_v42  ;;  %v10907_v42 = vld [vmem:[%s16089_s5 + $0x66c] ss:$16 sps:$4 sm:$0xff]  }
 0x4ae   :  { %8140 = vmatpush1.bf16.msra.mxu1 %v10848_v3  ;;  %v10902_v3 = vld [vmem:[%s16089_s5 + $0x660] ss:$16 sps:$4 sm:$0xff]  }
 0x4af   :  { %8386 = vmatpush1.bf16.msra.mxu0 %v10851_v49  ;;  %8141 = vmatprep.subr.bf16.mxu1 %v10856_v14  ;;  %v10910_v49 = vld [vmem:[%s16089_s5 + $0x684] ss:$16 sps:$4 sm:$0xff]   ;;  %v10913_v14 = vld [vmem:[%s16089_s5 + $0x68c] ss:$16 sps:$4 sm:$0xff]  }
 0x4b0   :  { %8387 = vmatprep.subr.bf16.mxu0 %v10859_v19  ;;  %v4855_v19 = vsub.s32 6, %v14893_v0  ;;  %v10919_v0 = vld [vmem:[%s16089_s5 + $0x6ac] ss:$16 sps:$4 sm:$0xff]  }
 0x4b2   :  { %8142 = vmatpush1.bf16.msra.mxu1 %v10854_v8  ;;  %v10916_v8 = vld [vmem:[%s16089_s5 + $0x6a4] ss:$16 sps:$4 sm:$0xff]  }
 0x4b3   :  { %8388 = vmatpush1.bf16.msra.mxu0 %v10857_v5  ;;  %8143 = vmatprep.subr.bf16.mxu1 %v10862_v41  ;;  %v4856_v5 = vrot.slane %v14907_v55, %v4855_v19  ;;  %v10914_v41 = vld [vmem:[%s16089_s5 + $0x6a0] ss:$16 sps:$4 sm:$0xff]   ;;  %v10925_v55 = vld [vmem:[%s16089_s5 + $0x6cc] ss:$16 sps:$4 sm:$0xff]  }
 0x4b4   :  { %8389 = vmatprep.subr.bf16.mxu0 %v10865_v58  ;;  %v10917_v58 = vld [vmem:[%s16089_s5 + $0x6a8] ss:$16 sps:$4 sm:$0xff]  }
 0x4b6   :  { %8144 = vmatpush1.bf16.msra.mxu1 %v10860_v10  ;;  %v10922_v10 = vld [vmem:[%s16089_s5 + $0x6c4] ss:$16 sps:$4 sm:$0xff]  }
 0x4b7   :  { %8390 = vmatpush1.bf16.msra.mxu0 %v10863_v31  ;;  %8145 = vmatprep.subr.bf16.mxu1 %v10868_v39  ;;  %v15459_v31 = vadd.f32 %v15158_v28, %v4856_v5  ;;  %v10920_v39 = vld [vmem:[%s16089_s5 + $0x6c0] ss:$16 sps:$4 sm:$0xff]   ;;  %v10931_v28 = vld [vmem:[%s16089_s5 + $0x6ec] ss:$16 sps:$4 sm:$0xff]  }
 0x4b8   :  { %8391 = vmatprep.subr.bf16.mxu0 %v10871_v17  ;;  %v15465_v17 = vadd.f32 %v15272_v12, %v4868_v59  ;;  %v10926_v12 = vld [vmem:[%s16089_s5 + $0x6e0] ss:$16 sps:$4 sm:$0xff]   ;;  %v10985_v5 = vld [vmem:[%s16089_s5 + $0x80c] ss:$16 sps:$4 sm:$0xff]  }
 0x4b9   :  { %v10980_v59 = vld [vmem:[%s16089_s5 + $0x800] ss:$16 sps:$4 sm:$0xff]  }
 0x4ba   :  { %8146 = vmatpush1.bf16.msra.mxu1 %v10866_v30  ;;  %v10923_v30 = vld [vmem:[%s16089_s5 + $0x6c8] ss:$16 sps:$4 sm:$0xff]  }
 0x4bb   :  { %8392 = vmatpush1.bf16.msra.mxu0 %v10869_v18  ;;  %8147 = vmatprep.subr.bf16.mxu1 %v10874_v48  ;;  %v10928_v18 = vld [vmem:[%s16089_s5 + $0x6e4] ss:$16 sps:$4 sm:$0xff]   ;;  %v9380_v48 = vmul.f32 -1.442695, %v15459_v31 }
 0x4bc   :  { %8393 = vmatprep.subr.bf16.mxu0 %v10877_v21  ;;  %v9383_v21 = vmul.f32 -1.442695, %v15465_v17 }
 0x4bd   :  { %12256 = vpow2.f32 %v9380_v48  ;;  %v10992_v48 = vld [vmem:[%s16089_s5 + $0x840] ss:$16 sps:$4 sm:$0xff]  }
 0x4be   :  { %8148 = vmatpush1.bf16.msra.mxu1 %v10872_v45  ;;  %v10929_v45 = vld [vmem:[%s16089_s5 + $0x6e8] ss:$16 sps:$4 sm:$0xff]   ;;  %12258 = vpow2.f32 %v9383_v21  ;;  %v11000_v21 = vld [vmem:[%s16089_s5 + $0x864] ss:$16 sps:$4 sm:$0xff]  }
 0x4bf   :  { %8394 = vmatpush1.bf16.msra.mxu0 %v10875_v34  ;;  %8149 = vmatprep.subr.bf16.mxu1 %v10880_v52  ;;  %v10934_v34 = vld [vmem:[%s16089_s5 + $0x704] ss:$16 sps:$4 sm:$0xff]   ;;  %v10937_v52 = vld [vmem:[%s16089_s5 + $0x70c] ss:$16 sps:$4 sm:$0xff]  }
 0x4c0   :  { %8395 = vmatprep.subr.bf16.mxu0 %v10883_v11  ;;  %v10935_v11 = vld [vmem:[%s16089_s5 + $0x708] ss:$16 sps:$4 sm:$0xff]  }
 0x4c2   :  { %v5608_v16 = vpop.f32.mrb[76].mxu1  ;;  %8150 = vmatpush1.bf16.msra.mxu1 %v10878_v43  ;;  %v10943_v43 = vld [vmem:[%s16089_s5 + $0x72c] ss:$16 sps:$4 sm:$0xff]  }
 0x4c3   :  { %v15381_v2 = vadd.f32 %v5608_v16, %v4872_v20  ;;  %8396 = vmatpush1.bf16.msra.mxu0 %v10881_v50  ;;  %v5610_v40 = vpop.f32.mrb[77].mxu1  ;;  %8160 = vmatprep.subr.bf16.mxu1 %v10886_v15  ;;  %v10941_v50 = vld [vmem:[%s16089_s5 + $0x728] ss:$16 sps:$4 sm:$0xff]   ;;  %v10946_v20 = vld [vmem:[%s16089_s5 + $0x744] ss:$16 sps:$4 sm:$0xff]  }
 0x4c4   :  { %v15386_v57 = vadd.f32 %v5610_v40, %v4876_v23  ;;  %v5612_v6 = vpop.f32.mrb[78].mxu1  ;;  %8406 = vmatprep.subr.bf16.mxu0 %v10889_v62  ;;  %v10949_v15 = vld [vmem:[%s16089_s5 + $0x74c] ss:$16 sps:$4 sm:$0xff]   ;;  %v10944_v23 = vld [vmem:[%s16089_s5 + $0x740] ss:$16 sps:$4 sm:$0xff]  }
 0x4c5   :  { %v5613_v56 = vpop.f32.mrb[79].mxu1  ;;  %8152 = vmatmul.mubr.bf16.vlgmr.msra.gmra.mrb[80].mxu1 %v5703_v47  ;;  %v10952_v16 = vld [vmem:[%s16089_s5 + $0x764] ss:$16 sps:$4 sm:$0xff]   ;;  %v10953_v6 = vld [vmem:[%s16089_s5 + $0x768] ss:$16 sps:$4 sm:$0xff]  }
 0x4c6   :  { %8398 = vmatmul.mubr.bf16.vlgmr.msra.gmra.mrb[200].mxu0 %v5703_v47  ;;  %8161 = vmatpush1.bf16.msra.mxu1 %v10884_v46  ;;  %v10955_v46 = vld [vmem:[%s16089_s5 + $0x76c] ss:$16 sps:$4 sm:$0xff]  }
 0x4c7   :  { %8192 = vmatprep.mubr.bf16.mxu1 %v5706_v61  ;;  %8407 = vmatpush1.bf16.msra.mxu0 %v10887_v38  ;;  %v12257_v62 = vpop.eup %12256  ;;  %v10950_v38 = vld [vmem:[%s16089_s5 + $0x760] ss:$16 sps:$4 sm:$0xff]   ;;  %v10961_v56 = vld [vmem:[%s16089_s5 + $0x78c] ss:$16 sps:$4 sm:$0xff]  }
 0x4c8   :  { %8438 = vmatprep.mubr.bf16.mxu0 %v5706_v61  ;;  %8162 = vmatprep.subr.bf16.mxu1 %v10892_v13  ;;  %v12259_v47 = vpop.eup %12258  ;;  %v5657_v40 = vadd.f32 1.0, %v12257_v62  ;;  %v10958_v13 = vld [vmem:[%s16089_s5 + $0x784] ss:$16 sps:$4 sm:$0xff]   ;;  %v11021_v62 = vld [vmem:[%s16089_s5 + $0x8cc] ss:$16 sps:$4 sm:$0xff]  }
 0x4c9   :  { %8408 = vmatprep.subr.bf16.mxu0 %v10895_v35  ;;  %v5660_v61 = vadd.f32 1.0, %v12259_v47  ;;  %v10956_v35 = vld [vmem:[%s16089_s5 + $0x780] ss:$16 sps:$4 sm:$0xff]   ;;  %v11024_v47 = vld [vmem:[%s16089_s5 + $0x8e4] ss:$16 sps:$4 sm:$0xff]  }
 0x4ca   :  { %8163 = vmatpush1.bf16.msra.mxu1 %v10890_v60  ;;  %12260 = vrcp.f32 %v5657_v40  ;;  %v10959_v60 = vld [vmem:[%s16089_s5 + $0x788] ss:$16 sps:$4 sm:$0xff]   ;;  %v11027_v40 = vld [vmem:[%s16089_s5 + $0x8ec] ss:$16 sps:$4 sm:$0xff]  }
 0x4cb   :  { %8409 = vmatpush1.bf16.msra.mxu0 %v10893_v32  ;;  %8164 = vmatprep.subr.bf16.mxu1 %v10898_v36  ;;  %v10964_v32 = vld [vmem:[%s16089_s5 + $0x7a4] ss:$16 sps:$4 sm:$0xff]   ;;  %12262 = vrcp.f32 %v5660_v61  ;;  %v10967_v36 = vld [vmem:[%s16089_s5 + $0x7ac] ss:$16 sps:$4 sm:$0xff]  }
 0x4cc   :  { %8410 = vmatprep.subr.bf16.mxu0 %v10901_v37  ;;  %v10962_v37 = vld [vmem:[%s16089_s5 + $0x7a0] ss:$16 sps:$4 sm:$0xff]   ;;  %v11030_v61 = vld [vmem:[%s16089_s5 + $0x904] ss:$16 sps:$4 sm:$0xff]  }
 0x4ce   :  { %8165 = vmatpush1.bf16.msra.mxu1 %v10896_v24  ;;  %v10965_v24 = vld [vmem:[%s16089_s5 + $0x7a8] ss:$16 sps:$4 sm:$0xff]  }
 0x4cf   :  { %8411 = vmatpush1.bf16.msra.mxu0 %v10899_v25  ;;  %8166 = vmatprep.subr.bf16.mxu1 %v10904_v51  ;;  %v10970_v25 = vld [vmem:[%s16089_s5 + $0x7c4] ss:$16 sps:$4 sm:$0xff]   ;;  %v10973_v51 = vld [vmem:[%s16089_s5 + $0x7cc] ss:$16 sps:$4 sm:$0xff]  }
 0x4d0   :  { %8412 = vmatprep.subr.bf16.mxu0 %v10907_v42  ;;  %v10968_v42 = vld [vmem:[%s16089_s5 + $0x7c0] ss:$16 sps:$4 sm:$0xff]  }
 0x4d2   :  { %8167 = vmatpush1.bf16.msra.mxu1 %v10902_v3  ;;  %v10971_v3 = vld [vmem:[%s16089_s5 + $0x7c8] ss:$16 sps:$4 sm:$0xff]  }
 0x4d3   :  { %8413 = vmatpush1.bf16.msra.mxu0 %v10905_v54  ;;  %8168 = vmatprep.subr.bf16.mxu1 %v10910_v49  ;;  %v10976_v54 = vld [vmem:[%s16089_s5 + $0x7e4] ss:$16 sps:$4 sm:$0xff]  }
 0x4d4   :  { %8414 = vmatprep.subr.bf16.mxu0 %v10913_v14  ;;  %v12261_v49 = vpop.eup %12260  ;;  %v10979_v14 = vld [vmem:[%s16089_s5 + $0x7ec] ss:$16 sps:$4 sm:$0xff]  }
 0x4d5   :  { %v12263_v19 = vpop.eup %12262 }
 0x4d6   :  { %8169 = vmatpush1.bf16.msra.mxu1 %v10908_v4  ;;  %v10974_v4 = vld [vmem:[%s16089_s5 + $0x7e0] ss:$16 sps:$4 sm:$0xff]  }
 0x4d7   :  { %8415 = vmatpush1.bf16.msra.mxu0 %v10911_v29  ;;  %8170 = vmatprep.subr.bf16.mxu1 %v10916_v8  ;;  %v5693_v29 = vmul.f32 %v12261_v49, %v15459_v31  ;;  %v10977_v8 = vld [vmem:[%s16089_s5 + $0x7e8] ss:$16 sps:$4 sm:$0xff]   ;;  %v11048_v49 = vld [vmem:[%s16089_s5 + $0x964] ss:$16 sps:$4 sm:$0xff]  }
 0x4d8   :  { %8416 = vmatprep.subr.bf16.mxu0 %v10919_v0  ;;  %v10982_v0 = vld [vmem:[%s16089_s5 + $0x804] ss:$16 sps:$4 sm:$0xff]  }
 0x4da   :  { %8171 = vmatpush1.bf16.msra.mxu1 %v10914_v41  ;;  %v5696_v41 = vmul.f32 %v12263_v19, %v15465_v17  ;;  %v10986_v17 = vld [vmem:[%s16089_s5 + $0x820] ss:$16 sps:$4 sm:$0xff]  }
 0x4db   :  { %8417 = vmatpush1.bf16.msra.mxu0 %v10917_v58  ;;  %8172 = vmatprep.subr.bf16.mxu1 %v10922_v10  ;;  %v5705_v58 = vpack.c.bf16 %v5693_v29, %v5693_v29  ;;  %v10983_v10 = vld [vmem:[%s16089_s5 + $0x808] ss:$16 sps:$4 sm:$0xff]   ;;  %v11046_v29 = vld [vmem:[%s16089_s5 + $0x960] ss:$16 sps:$4 sm:$0xff]  }
 0x4dc   :  { %8418 = vmatprep.subr.bf16.mxu0 %v10925_v55  ;;  %v10988_v55 = vld [vmem:[%s16089_s5 + $0x824] ss:$16 sps:$4 sm:$0xff]   ;;  %v5708_v31 = vpack.c.bf16 %v5696_v41, %v5696_v41  ;;  %v11057_v41 = vld [vmem:[%s16089_s5 + $0x98c] ss:$16 sps:$4 sm:$0xff]  }
 0x4de   :  { %8173 = vmatpush1.bf16.msra.mxu1 %v10920_v39  ;;  %v10991_v39 = vld [vmem:[%s16089_s5 + $0x82c] ss:$16 sps:$4 sm:$0xff]  }
 0x4df   :  { %8419 = vmatpush1.bf16.msra.mxu0 %v10923_v30  ;;  %8174 = vmatprep.subr.bf16.mxu1 %v10928_v18  ;;  %v10989_v30 = vld [vmem:[%s16089_s5 + $0x828] ss:$16 sps:$4 sm:$0xff]   ;;  %v10994_v18 = vld [vmem:[%s16089_s5 + $0x844] ss:$16 sps:$4 sm:$0xff]  }
 0x4e0   :  { %8420 = vmatprep.subr.bf16.mxu0 %v10931_v28  ;;  %v10997_v28 = vld [vmem:[%s16089_s5 + $0x84c] ss:$16 sps:$4 sm:$0xff]  }
 0x4e2   :  { %8175 = vmatpush1.bf16.msra.mxu1 %v10926_v12  ;;  %v10995_v12 = vld [vmem:[%s16089_s5 + $0x848] ss:$16 sps:$4 sm:$0xff]  }
 0x4e3   :  { %8421 = vmatpush1.bf16.msra.mxu0 %v10929_v45  ;;  %8176 = vmatprep.subr.bf16.mxu1 %v10934_v34  ;;  %v10998_v45 = vld [vmem:[%s16089_s5 + $0x860] ss:$16 sps:$4 sm:$0xff]   ;;  %v11003_v34 = vld [vmem:[%s16089_s5 + $0x86c] ss:$16 sps:$4 sm:$0xff]  }
 0x4e4   :  { %8422 = vmatprep.subr.bf16.mxu0 %v10937_v52  ;;  %v11001_v52 = vld [vmem:[%s16089_s5 + $0x868] ss:$16 sps:$4 sm:$0xff]  }
 0x4e6   :  { %8177 = vmatpush1.bf16.msra.mxu1 %v10932_v22  ;;  %v11006_v22 = vld [vmem:[%s16089_s5 + $0x884] ss:$16 sps:$4 sm:$0xff]  }
 0x4e7   :  { %8423 = vmatpush1.bf16.msra.mxu0 %v10935_v11  ;;  %8178 = vmatprep.subr.bf16.mxu1 %v10940_v63  ;;  %v4864_v11 = vrot.slane %v15358_v27, %v14902_v26  ;;  %v11009_v63 = vld [vmem:[%s16089_s5 + $0x88c] ss:$16 sps:$4 sm:$0xff]   ;;  %v11012_v27 = vld [vmem:[%s16089_s5 + $0x8a4] ss:$16 sps:$4 sm:$0xff]  }
 0x4e8   :  { %8424 = vmatprep.subr.bf16.mxu0 %v10943_v43  ;;  %v11004_v43 = vld [vmem:[%s16089_s5 + $0x880] ss:$16 sps:$4 sm:$0xff]  }
 0x4ea   :  { %8179 = vmatpush1.bf16.msra.mxu1 %v10938_v53  ;;  %v11007_v53 = vld [vmem:[%s16089_s5 + $0x888] ss:$16 sps:$4 sm:$0xff]  }
 0x4eb   :  { %8425 = vmatpush1.bf16.msra.mxu0 %v10941_v50  ;;  %8180 = vmatprep.subr.bf16.mxu1 %v10946_v20  ;;  %v15648_v50 = vadd.f32 %v15267_v1, %v4864_v11  ;;  %v11015_v20 = vld [vmem:[%s16089_s5 + $0x8ac] ss:$16 sps:$4 sm:$0xff]   ;;  %v11018_v1 = vld [vmem:[%s16089_s5 + $0x8c4] ss:$16 sps:$4 sm:$0xff]  }
 0x4ec   :  { %8426 = vmatprep.subr.bf16.mxu0 %v10949_v15  ;;  %v11010_v15 = vld [vmem:[%s16089_s5 + $0x8a0] ss:$16 sps:$4 sm:$0xff]   ;;  %v11078_v11 = vld [vmem:[%s16089_s5 + $0xa04] ss:$16 sps:$4 sm:$0xff]  }
 0x4ee   :  { %8181 = vmatpush1.bf16.msra.mxu1 %v10944_v23  ;;  %v11013_v23 = vld [vmem:[%s16089_s5 + $0x8a8] ss:$16 sps:$4 sm:$0xff]  }
 0x4ef   :  { %8427 = vmatpush1.bf16.msra.mxu0 %v10947_v44  ;;  %8182 = vmatprep.subr.bf16.mxu1 %v10952_v16  ;;  %v9382_v44 = vmul.f32 -1.442695, %v15648_v50  ;;  %v11016_v16 = vld [vmem:[%s16089_s5 + $0x8c0] ss:$16 sps:$4 sm:$0xff]  }
 0x4f0   :  { %8428 = vmatprep.subr.bf16.mxu0 %v10955_v46  ;;  %v11019_v46 = vld [vmem:[%s16089_s5 + $0x8c8] ss:$16 sps:$4 sm:$0xff]  }
 0x4f1   :  { %12264 = vpow2.f32 %v9382_v44  ;;  %v11093_v44 = vld [vmem:[%s16089_s5 + $0xa4c] ss:$16 sps:$4 sm:$0xff]  }
 0x4f2   :  { %8183 = vmatpush1.bf16.msra.mxu1 %v10950_v38  ;;  %v9385_v38 = vmul.f32 -1.442695, %v15386_v57 }
 0x4f3   :  { %8429 = vmatpush1.bf16.msra.mxu0 %v10953_v6  ;;  %8184 = vmatprep.subr.bf16.mxu1 %v10958_v13  ;;  %v11022_v6 = vld [vmem:[%s16089_s5 + $0x8e0] ss:$16 sps:$4 sm:$0xff]   ;;  %v11025_v13 = vld [vmem:[%s16089_s5 + $0x8e8] ss:$16 sps:$4 sm:$0xff]  }
 0x4f4   :  { %8430 = vmatprep.subr.bf16.mxu0 %v10961_v56  ;;  %v11033_v56 = vld [vmem:[%s16089_s5 + $0x90c] ss:$16 sps:$4 sm:$0xff]   ;;  %12266 = vpow2.f32 %v9385_v38  ;;  %v11094_v38 = vld [vmem:[%s16089_s5 + $0xa60] ss:$16 sps:$4 sm:$0xff]  }
 0x4f6   :  { %8185 = vmatpush1.bf16.msra.mxu1 %v10956_v35  ;;  %v11028_v35 = vld [vmem:[%s16089_s5 + $0x900] ss:$16 sps:$4 sm:$0xff]  }
 0x4f7   :  { %8431 = vmatpush1.bf16.msra.mxu0 %v10959_v60  ;;  %8186 = vmatprep.subr.bf16.mxu1 %v10964_v32  ;;  %v11031_v60 = vld [vmem:[%s16089_s5 + $0x908] ss:$16 sps:$4 sm:$0xff]   ;;  %v11036_v32 = vld [vmem:[%s16089_s5 + $0x924] ss:$16 sps:$4 sm:$0xff]  }
 0x4f8   :  { %8432 = vmatprep.subr.bf16.mxu0 %v10967_v36  ;;  %v11039_v36 = vld [vmem:[%s16089_s5 + $0x92c] ss:$16 sps:$4 sm:$0xff]  }
 0x4fa   :  { %8187 = vmatpush1.bf16.msra.mxu1 %v10962_v37  ;;  %v11034_v37 = vld [vmem:[%s16089_s5 + $0x920] ss:$16 sps:$4 sm:$0xff]  }
 0x4fb   :  { %8433 = vmatpush1.bf16.msra.mxu0 %v10965_v24  ;;  %8188 = vmatprep.subr.bf16.mxu1 %v10970_v25  ;;  %v11037_v24 = vld [vmem:[%s16089_s5 + $0x928] ss:$16 sps:$4 sm:$0xff]   ;;  %v11042_v25 = vld [vmem:[%s16089_s5 + $0x944] ss:$16 sps:$4 sm:$0xff]  }
 0x4fc   :  { %8434 = vmatprep.subr.bf16.mxu0 %v10973_v51  ;;  %v11045_v51 = vld [vmem:[%s16089_s5 + $0x94c] ss:$16 sps:$4 sm:$0xff]  }
 0x4fe   :  { %8189 = vmatpush1.bf16.msra.mxu1 %v10968_v42  ;;  %v11040_v42 = vld [vmem:[%s16089_s5 + $0x940] ss:$16 sps:$4 sm:$0xff]  }
 0x4ff   :  { %8435 = vmatpush1.bf16.msra.mxu0 %v10971_v3  ;;  %8190 = vmatprep.subr.bf16.mxu1 %v10976_v54  ;;  %v12265_v3 = vpop.eup %12264  ;;  %v11043_v54 = vld [vmem:[%s16089_s5 + $0x948] ss:$16 sps:$4 sm:$0xff]  }
 0x500   :  { %8436 = vmatprep.subr.bf16.mxu0 %v10979_v14  ;;  %v11051_v14 = vld [vmem:[%s16089_s5 + $0x96c] ss:$16 sps:$4 sm:$0xff]   ;;  %v12267_v19 = vpop.eup %12266 }
 0x502   :  { %8191 = vmatpush1.bf16.msra.mxu1 %v10974_v4  ;;  %v5659_v4 = vadd.f32 1.0, %v12265_v3  ;;  %v11120_v3 = vld [vmem:[%s16089_s5 + $0xae4] ss:$16 sps:$4 sm:$0xff]  }
 0x503   :  { %8437 = vmatpush1.bf16.msra.mxu0 %v10977_v8  ;;  %8201 = vmatprep.subr.bf16.mxu1 %v10982_v0  ;;  %v11049_v8 = vld [vmem:[%s16089_s5 + $0x968] ss:$16 sps:$4 sm:$0xff]   ;;  %v11054_v0 = vld [vmem:[%s16089_s5 + $0x984] ss:$16 sps:$4 sm:$0xff]  }
 0x504   :  { %8447 = vmatprep.subr.bf16.mxu0 %v10985_v5  ;;  %v5662_v5 = vadd.f32 1.0, %v12267_v19  ;;  %12268 = vrcp.f32 %v5659_v4  ;;  %v11121_v19 = vld [vmem:[%s16089_s5 + $0xae8] ss:$16 sps:$4 sm:$0xff]   ;;  %v11126_v4 = vld [vmem:[%s16089_s5 + $0xb04] ss:$16 sps:$4 sm:$0xff]  }
 0x505   :  { %8193 = vmatmul.mubr.bf16.vlgmr.msra.gmra.mrb[80].mxu1 %v5705_v58 }
 0x506   :  { %8439 = vmatmul.mubr.bf16.vlgmr.msra.gmra.mrb[200].mxu0 %v5705_v58  ;;  %8202 = vmatpush1.bf16.msra.mxu1 %v10980_v59  ;;  %v11052_v59 = vld [vmem:[%s16089_s5 + $0x980] ss:$16 sps:$4 sm:$0xff]   ;;  %v11055_v58 = vld [vmem:[%s16089_s5 + $0x988] ss:$16 sps:$4 sm:$0xff]   ;;  %12270 = vrcp.f32 %v5662_v5  ;;  %v11132_v5 = vld [vmem:[%s16089_s5 + $0xb24] ss:$16 sps:$4 sm:$0xff]  }
 0x507   :  { %8233 = vmatprep.mubr.bf16.mxu1 %v5708_v31  ;;  %8448 = vmatpush1.bf16.msra.mxu0 %v10983_v10  ;;  %v11060_v10 = vld [vmem:[%s16089_s5 + $0x9a4] ss:$16 sps:$4 sm:$0xff]  }
 0x508   :  { %8479 = vmatprep.mubr.bf16.mxu0 %v5708_v31  ;;  %8203 = vmatprep.subr.bf16.mxu1 %v10988_v55  ;;  %v11063_v55 = vld [vmem:[%s16089_s5 + $0x9ac] ss:$16 sps:$4 sm:$0xff]   ;;  %v11058_v31 = vld [vmem:[%s16089_s5 + $0x9a0] ss:$16 sps:$4 sm:$0xff]  }
 0x509   :  { %8449 = vmatprep.subr.bf16.mxu0 %v10991_v39  ;;  %v11061_v39 = vld [vmem:[%s16089_s5 + $0x9a8] ss:$16 sps:$4 sm:$0xff]  }
 0x50a   :  { %8204 = vmatpush1.bf16.msra.mxu1 %v10986_v17  ;;  %v11066_v17 = vld [vmem:[%s16089_s5 + $0x9c4] ss:$16 sps:$4 sm:$0xff]  }
 0x50b   :  { %8450 = vmatpush1.bf16.msra.mxu0 %v10989_v30  ;;  %8205 = vmatprep.subr.bf16.mxu1 %v10994_v18  ;;  %v11069_v30 = vld [vmem:[%s16089_s5 + $0x9cc] ss:$16 sps:$4 sm:$0xff]   ;;  %v11064_v18 = vld [vmem:[%s16089_s5 + $0x9c0] ss:$16 sps:$4 sm:$0xff]  }
 0x50c   :  { %8451 = vmatprep.subr.bf16.mxu0 %v10997_v28  ;;  %v11067_v28 = vld [vmem:[%s16089_s5 + $0x9c8] ss:$16 sps:$4 sm:$0xff]  }
 0x50e   :  { %8206 = vmatpush1.bf16.msra.mxu1 %v10992_v48  ;;  %v11072_v48 = vld [vmem:[%s16089_s5 + $0x9e4] ss:$16 sps:$4 sm:$0xff]  }
 0x50f   :  { %8452 = vmatpush1.bf16.msra.mxu0 %v10995_v12  ;;  %8207 = vmatprep.subr.bf16.mxu1 %v11000_v21  ;;  %v12269_v12 = vpop.eup %12268  ;;  %v11075_v21 = vld [vmem:[%s16089_s5 + $0x9ec] ss:$16 sps:$4 sm:$0xff]  }
 0x510   :  { %8453 = vmatprep.subr.bf16.mxu0 %v11003_v34  ;;  %v11070_v34 = vld [vmem:[%s16089_s5 + $0x9e0] ss:$16 sps:$4 sm:$0xff]  }
 0x512   :  { %8208 = vmatpush1.bf16.msra.mxu1 %v10998_v45  ;;  %v12271_v45 = vpop.eup %12270 }
 0x513   :  { %8454 = vmatpush1.bf16.msra.mxu0 %v11001_v52  ;;  %8209 = vmatprep.subr.bf16.mxu1 %v11006_v22  ;;  %v5695_v52 = vmul.f32 %v12269_v12, %v15648_v50  ;;  %v11073_v22 = vld [vmem:[%s16089_s5 + $0x9e8] ss:$16 sps:$4 sm:$0xff]  }
 0x514   :  { %8455 = vmatprep.subr.bf16.mxu0 %v11009_v63  ;;  %v11081_v63 = vld [vmem:[%s16089_s5 + $0xa0c] ss:$16 sps:$4 sm:$0xff]   ;;  %v11079_v50 = vld [vmem:[%s16089_s5 + $0xa08] ss:$16 sps:$4 sm:$0xff]  }
 0x515   :  { %v11145_v12 = vld [vmem:[%s16089_s5 + $0xb68] ss:$16 sps:$4 sm:$0xff]  }
 0x516   :  { %8210 = vmatpush1.bf16.msra.mxu1 %v11004_v43  ;;  %v5698_v43 = vmul.f32 %v12271_v45, %v15386_v57  ;;  %v11087_v57 = vld [vmem:[%s16089_s5 + $0xa2c] ss:$16 sps:$4 sm:$0xff]  }
 0x517   :  { %8456 = vmatpush1.bf16.msra.mxu0 %v11007_v53  ;;  %8211 = vmatprep.subr.bf16.mxu1 %v11012_v27  ;;  %v11076_v53 = vld [vmem:[%s16089_s5 + $0xa00] ss:$16 sps:$4 sm:$0xff]   ;;  %v5707_v27 = vpack.c.bf16 %v5695_v52, %v5695_v52  ;;  %v11153_v45 = vld [vmem:[%s16089_s5 + $0xb8c] ss:$16 sps:$4 sm:$0xff]   ;;  %v11151_v52 = vld [vmem:[%s16089_s5 + $0xb88] ss:$16 sps:$4 sm:$0xff]  }
 0x518   :  { %8457 = vmatprep.subr.bf16.mxu0 %v11015_v20  ;;  %v11084_v20 = vld [vmem:[%s16089_s5 + $0xa24] ss:$16 sps:$4 sm:$0xff]  }
 0x51a   :  { %8212 = vmatpush1.bf16.msra.mxu1 %v11010_v15  ;;  %v5710_v15 = vpack.c.bf16 %v5698_v43, %v5698_v43  ;;  %v11157_v43 = vld [vmem:[%s16089_s5 + $0xba8] ss:$16 sps:$4 sm:$0xff]  }
 0x51b   :  { %8458 = vmatpush1.bf16.msra.mxu0 %v11013_v23  ;;  %8213 = vmatprep.subr.bf16.mxu1 %v11018_v1  ;;  %v11082_v23 = vld [vmem:[%s16089_s5 + $0xa20] ss:$16 sps:$4 sm:$0xff]   ;;  %v11085_v1 = vld [vmem:[%s16089_s5 + $0xa28] ss:$16 sps:$4 sm:$0xff]  }
 0x51c   :  { %8459 = vmatprep.subr.bf16.mxu0 %v11021_v62  ;;  %v11090_v62 = vld [vmem:[%s16089_s5 + $0xa44] ss:$16 sps:$4 sm:$0xff]  }
 0x51e   :  { %8214 = vmatpush1.bf16.msra.mxu1 %v11016_v16  ;;  %v11088_v16 = vld [vmem:[%s16089_s5 + $0xa40] ss:$16 sps:$4 sm:$0xff]  }
 0x51f   :  { %8460 = vmatpush1.bf16.msra.mxu0 %v11019_v46  ;;  %8215 = vmatprep.subr.bf16.mxu1 %v11024_v47  ;;  %v11091_v46 = vld [vmem:[%s16089_s5 + $0xa48] ss:$16 sps:$4 sm:$0xff]   ;;  %v11096_v47 = vld [vmem:[%s16089_s5 + $0xa64] ss:$16 sps:$4 sm:$0xff]  }
 0x520   :  { %8461 = vmatprep.subr.bf16.mxu0 %v11027_v40  ;;  %v11099_v40 = vld [vmem:[%s16089_s5 + $0xa6c] ss:$16 sps:$4 sm:$0xff]  }
 0x522   :  { %8216 = vmatpush1.bf16.msra.mxu1 %v11022_v6  ;;  %v11097_v6 = vld [vmem:[%s16089_s5 + $0xa68] ss:$16 sps:$4 sm:$0xff]  }
 0x523   :  { %8462 = vmatpush1.bf16.msra.mxu0 %v11025_v13  ;;  %8217 = vmatprep.subr.bf16.mxu1 %v11030_v61  ;;  %v11102_v13 = vld [vmem:[%s16089_s5 + $0xa84] ss:$16 sps:$4 sm:$0xff]   ;;  %v11105_v61 = vld [vmem:[%s16089_s5 + $0xa8c] ss:$16 sps:$4 sm:$0xff]  }
 0x524   :  { %8463 = vmatprep.subr.bf16.mxu0 %v11033_v56  ;;  %v11100_v56 = vld [vmem:[%s16089_s5 + $0xa80] ss:$16 sps:$4 sm:$0xff]  }
 0x526   :  { %8218 = vmatpush1.bf16.msra.mxu1 %v11028_v35  ;;  %v11103_v35 = vld [vmem:[%s16089_s5 + $0xa88] ss:$16 sps:$4 sm:$0xff]  }
 0x527   :  { %8464 = vmatpush1.bf16.msra.mxu0 %v11031_v60  ;;  %8219 = vmatprep.subr.bf16.mxu1 %v11036_v32  ;;  %v11108_v60 = vld [vmem:[%s16089_s5 + $0xaa4] ss:$16 sps:$4 sm:$0xff]   ;;  %v11111_v32 = vld [vmem:[%s16089_s5 + $0xaac] ss:$16 sps:$4 sm:$0xff]  }
 0x528   :  { %8465 = vmatprep.subr.bf16.mxu0 %v11039_v36  ;;  %v11106_v36 = vld [vmem:[%s16089_s5 + $0xaa0] ss:$16 sps:$4 sm:$0xff]  }
 0x52a   :  { %8220 = vmatpush1.bf16.msra.mxu1 %v11034_v37  ;;  %v11109_v37 = vld [vmem:[%s16089_s5 + $0xaa8] ss:$16 sps:$4 sm:$0xff]  }
 0x52b   :  { %8466 = vmatpush1.bf16.msra.mxu0 %v11037_v24  ;;  %8221 = vmatprep.subr.bf16.mxu1 %v11042_v25  ;;  %v11114_v24 = vld [vmem:[%s16089_s5 + $0xac4] ss:$16 sps:$4 sm:$0xff]   ;;  %v11117_v25 = vld [vmem:[%s16089_s5 + $0xacc] ss:$16 sps:$4 sm:$0xff]  }
 0x52c   :  { %8467 = vmatprep.subr.bf16.mxu0 %v11045_v51  ;;  %v11112_v51 = vld [vmem:[%s16089_s5 + $0xac0] ss:$16 sps:$4 sm:$0xff]  }
 0x52e   :  { %8222 = vmatpush1.bf16.msra.mxu1 %v11040_v42  ;;  %v11115_v42 = vld [vmem:[%s16089_s5 + $0xac8] ss:$16 sps:$4 sm:$0xff]  }
 0x52f   :  { %8468 = vmatpush1.bf16.msra.mxu0 %v11043_v54  ;;  %8223 = vmatprep.subr.bf16.mxu1 %v11048_v49  ;;  %v11123_v54 = vld [vmem:[%s16089_s5 + $0xaec] ss:$16 sps:$4 sm:$0xff]   ;;  %v9384_v49 = vmul.f32 -1.442695, %v15381_v2 }
 0x530   :  { %8469 = vmatprep.subr.bf16.mxu0 %v11051_v14  ;;  %v11118_v14 = vld [vmem:[%s16089_s5 + $0xae0] ss:$16 sps:$4 sm:$0xff]  }
 0x531   :  { %12272 = vpow2.f32 %v9384_v49 }
 0x532   :  { %8224 = vmatpush1.bf16.msra.mxu1 %v11046_v29  ;;  %v11129_v29 = vld [vmem:[%s16089_s5 + $0xb0c] ss:$16 sps:$4 sm:$0xff]  }
 0x533   :  { %8470 = vmatpush1.bf16.msra.mxu0 %v11049_v8  ;;  %8225 = vmatprep.subr.bf16.mxu1 %v11054_v0  ;;  %v11124_v8 = vld [vmem:[%s16089_s5 + $0xb00] ss:$16 sps:$4 sm:$0xff]   ;;  %v11127_v0 = vld [vmem:[%s16089_s5 + $0xb08] ss:$16 sps:$4 sm:$0xff]  }
 0x534   :  { %8471 = vmatprep.subr.bf16.mxu0 %v11057_v41  ;;  %v11135_v41 = vld [vmem:[%s16089_s5 + $0xb2c] ss:$16 sps:$4 sm:$0xff]  }
 0x536   :  { %8226 = vmatpush1.bf16.msra.mxu1 %v11052_v59  ;;  %v11130_v59 = vld [vmem:[%s16089_s5 + $0xb20] ss:$16 sps:$4 sm:$0xff]  }
 0x537   :  { %8472 = vmatpush1.bf16.msra.mxu0 %v11055_v58  ;;  %8227 = vmatprep.subr.bf16.mxu1 %v11060_v10  ;;  %v11133_v58 = vld [vmem:[%s16089_s5 + $0xb28] ss:$16 sps:$4 sm:$0xff]   ;;  %v11138_v10 = vld [vmem:[%s16089_s5 + $0xb44] ss:$16 sps:$4 sm:$0xff]  }
 0x538   :  { %8473 = vmatprep.subr.bf16.mxu0 %v11063_v55  ;;  %v11141_v55 = vld [vmem:[%s16089_s5 + $0xb4c] ss:$16 sps:$4 sm:$0xff]  }
 0x53a   :  { %8228 = vmatpush1.bf16.msra.mxu1 %v11058_v31  ;;  %v11136_v31 = vld [vmem:[%s16089_s5 + $0xb40] ss:$16 sps:$4 sm:$0xff]  }
 0x53b   :  { %8474 = vmatpush1.bf16.msra.mxu0 %v11061_v39  ;;  %8229 = vmatprep.subr.bf16.mxu1 %v11066_v17  ;;  %v12273_v39 = vpop.eup %12272  ;;  %v11139_v17 = vld [vmem:[%s16089_s5 + $0xb48] ss:$16 sps:$4 sm:$0xff]  }
 0x53c   :  { %8475 = vmatprep.subr.bf16.mxu0 %v11069_v30  ;;  %v11144_v30 = vld [vmem:[%s16089_s5 + $0xb64] ss:$16 sps:$4 sm:$0xff]  }
 0x53e   :  { %8230 = vmatpush1.bf16.msra.mxu1 %v11064_v18  ;;  %v11147_v18 = vld [vmem:[%s16089_s5 + $0xb6c] ss:$16 sps:$4 sm:$0xff]  }
 0x53f   :  { %8476 = vmatpush1.bf16.msra.mxu0 %v11067_v28  ;;  %8231 = vmatprep.subr.bf16.mxu1 %v11072_v48  ;;  %v5661_v28 = vadd.f32 1.0, %v12273_v39  ;;  %v11142_v48 = vld [vmem:[%s16089_s5 + $0xb60] ss:$16 sps:$4 sm:$0xff]  }
 0x540   :  { %8477 = vmatprep.subr.bf16.mxu0 %v11075_v21  ;;  %v11150_v21 = vld [vmem:[%s16089_s5 + $0xb84] ss:$16 sps:$4 sm:$0xff]  }
 0x541   :  { %12274 = vrcp.f32 %v5661_v28  ;;  %v11192_v28 = vld [vmem:[%s16092_s7 + $0xd0] sm:$0xff]  }
 0x542   :  { %8232 = vmatpush1.bf16.msra.mxu1 %v11070_v34  ;;  %v11148_v34 = vld [vmem:[%s16089_s5 + $0xb80] ss:$16 sps:$4 sm:$0xff]  }
 0x543   :  { %8478 = vmatpush1.bf16.msra.mxu0 %v11073_v22  ;;  %8242 = vmatprep.subr.bf16.mxu1 %v11078_v11  ;;  %v11156_v22 = vld [vmem:[%s16089_s5 + $0xba4] ss:$16 sps:$4 sm:$0xff]   ;;  %v11159_v11 = vld [vmem:[%s16089_s5 + $0xbac] ss:$16 sps:$4 sm:$0xff]  }
 0x544   :  { %8488 = vmatprep.subr.bf16.mxu0 %v11081_v63  ;;  %v11154_v63 = vld [vmem:[%s16089_s5 + $0xba0] ss:$16 sps:$4 sm:$0xff]  }
 0x545   :  { %8234 = vmatmul.mubr.bf16.vlgmr.msra.gmra.mrb[80].mxu1 %v5707_v27 }
 0x546   :  { %8480 = vmatmul.mubr.bf16.vlgmr.msra.gmra.mrb[200].mxu0 %v5707_v27  ;;  %8243 = vmatpush1.bf16.msra.mxu1 %v11076_v53  ;;  %v11162_v53 = vld [vmem:[%s16089_s5 + $0xbc4] ss:$16 sps:$4 sm:$0xff]   ;;  %v11165_v27 = vld [vmem:[%s16089_s5 + $0xbcc] ss:$16 sps:$4 sm:$0xff]  }
 0x547   :  { %8274 = vmatprep.mubr.bf16.mxu1 %v5710_v15  ;;  %8489 = vmatpush1.bf16.msra.mxu0 %v11079_v50  ;;  %v11160_v50 = vld [vmem:[%s16089_s5 + $0xbc0] ss:$16 sps:$4 sm:$0xff]  }
 0x548   :  { %8520 = vmatprep.mubr.bf16.mxu0 %v5710_v15  ;;  %8244 = vmatprep.subr.bf16.mxu1 %v11084_v20  ;;  %v11163_v20 = vld [vmem:[%s16089_s5 + $0xbc8] ss:$16 sps:$4 sm:$0xff]   ;;  %v11168_v15 = vld [vmem:[%s16089_s5 + $0xbe4] ss:$16 sps:$4 sm:$0xff]  }
 0x549   :  { %8490 = vmatprep.subr.bf16.mxu0 %v11087_v57 }
 0x54a   :  { %8245 = vmatpush1.bf16.msra.mxu1 %v11082_v23  ;;  %v11171_v23 = vld [vmem:[%s16089_s5 + $0xbec] ss:$16 sps:$4 sm:$0xff]  }
 0x54b   :  { %8491 = vmatpush1.bf16.msra.mxu0 %v11085_v1  ;;  %8246 = vmatprep.subr.bf16.mxu1 %v11090_v62  ;;  %v12275_v57 = vpop.eup %12274  ;;  %v11166_v1 = vld [vmem:[%s16089_s5 + $0xbe0] ss:$16 sps:$4 sm:$0xff]  }
 0x54c   :  { %8492 = vmatprep.subr.bf16.mxu0 %v11093_v44  ;;  %v5697_v62 = vmul.f32 %v12275_v57, %v15381_v2  ;;  %v11169_v44 = vld [vmem:[%s16089_s5 + $0xbe8] ss:$16 sps:$4 sm:$0xff]  }
 0x54d   :  { %v11174_v2 = vld [vmem:[%s16092_s7 + $0x48] sm:$0xff]  }
 0x54e   :  { %8247 = vmatpush1.bf16.msra.mxu1 %v11088_v16  ;;  %v11172_v16 = vld [vmem:[%s16092_s7 + $0x40] sm:$0xff]  }
 0x54f   :  { %8493 = vmatpush1.bf16.msra.mxu0 %v11091_v46  ;;  %8248 = vmatprep.subr.bf16.mxu1 %v11096_v47  ;;  %v11173_v46 = vld [vmem:[%s16092_s7] sm:$0xff]   ;;  %v5709_v47 = vpack.c.bf16 %v5697_v62, %v5697_v62 }
 0x550   :  { %8494 = vmatprep.subr.bf16.mxu0 %v11099_v40  ;;  %v11175_v40 = vld [vmem:[%s16092_s7 + $0x8] sm:$0xff]  }
 0x552   :  { %8249 = vmatpush1.bf16.msra.mxu1 %v11094_v38  ;;  %v11176_v38 = vld [vmem:[%s16092_s7 + $0x50] sm:$0xff]  }
 0x553   :  { %8495 = vmatpush1.bf16.msra.mxu0 %v11097_v6  ;;  %8250 = vmatprep.subr.bf16.mxu1 %v11102_v13  ;;  %v11177_v6 = vld [vmem:[%s16092_s7 + $0x10] sm:$0xff]   ;;  %v11178_v13 = vld [vmem:[%s16092_s7 + $0x58] sm:$0xff]  }
 0x554   :  { %8496 = vmatprep.subr.bf16.mxu0 %v11105_v61  ;;  %v11179_v61 = vld [vmem:[%s16092_s7 + $0x18] sm:$0xff]  }
 0x556   :  { %8251 = vmatpush1.bf16.msra.mxu1 %v11100_v56  ;;  %v11180_v56 = vld [vmem:[%s16092_s7 + $0x60] sm:$0xff]  }
 0x557   :  { %8497 = vmatpush1.bf16.msra.mxu0 %v11103_v35  ;;  %8252 = vmatprep.subr.bf16.mxu1 %v11108_v60  ;;  %v11181_v35 = vld [vmem:[%s16092_s7 + $0x20] sm:$0xff]   ;;  %v11182_v60 = vld [vmem:[%s16092_s7 + $0x68] sm:$0xff]  }
 0x558   :  { %8498 = vmatprep.subr.bf16.mxu0 %v11111_v32  ;;  %v11183_v32 = vld [vmem:[%s16092_s7 + $0x28] sm:$0xff]  }
 0x55a   :  { %8253 = vmatpush1.bf16.msra.mxu1 %v11106_v36  ;;  %v11184_v36 = vld [vmem:[%s16092_s7 + $0x70] sm:$0xff]  }
 0x55b   :  { %8499 = vmatpush1.bf16.msra.mxu0 %v11109_v37  ;;  %8254 = vmatprep.subr.bf16.mxu1 %v11114_v24  ;;  %v11185_v37 = vld [vmem:[%s16092_s7 + $0x30] sm:$0xff]   ;;  %v11186_v24 = vld [vmem:[%s16092_s7 + $0x78] sm:$0xff]  }
 0x55c   :  { %8500 = vmatprep.subr.bf16.mxu0 %v11117_v25  ;;  %v11187_v25 = vld [vmem:[%s16092_s7 + $0x38] sm:$0xff]  }
 0x55e   :  { %8255 = vmatpush1.bf16.msra.mxu1 %v11112_v51  ;;  %v11188_v51 = vld [vmem:[%s16092_s7 + $0xc0] sm:$0xff]  }
 0x55f   :  { %8501 = vmatpush1.bf16.msra.mxu0 %v11115_v42  ;;  %8256 = vmatprep.subr.bf16.mxu1 %v11120_v3  ;;  %v6095_v42 = vld [vmem:[%s16093_s6] sm:$0xf] }
 0x560   :  { %8502 = vmatprep.subr.bf16.mxu0 %v11123_v54  ;;  %v6100_v3 = vrot.slane %v6095_v42, %v14902_v26  ;;  %v6104_v54 = vrot.slane %v6095_v42, %v14910_v7  ;;  %v6112_v49 = vrot.slane %v6095_v42, %v14941_v9  ;;  %v11189_v26 = vld [vmem:[%s16092_s7 + $0x80] sm:$0xff]   ;;  %v11190_v9 = vld [vmem:[%s16092_s7 + $0xc8] sm:$0xff]  }
 0x562   :  { %8257 = vmatpush1.bf16.msra.mxu1 %v11118_v14 }
 0x563   :  { %8503 = vmatpush1.bf16.msra.mxu0 %v11121_v19  ;;  %8258 = vmatprep.subr.bf16.mxu1 %v11126_v4 }
 0x564   :  { %8504 = vmatprep.subr.bf16.mxu0 %v11129_v29 }
 0x566   :  { %8259 = vmatpush1.bf16.msra.mxu1 %v11124_v8 }
 0x567   :  { %8505 = vmatpush1.bf16.msra.mxu0 %v11127_v0  ;;  %8260 = vmatprep.subr.bf16.mxu1 %v11132_v5 }
 0x568   :  { %8506 = vmatprep.subr.bf16.mxu0 %v11135_v41 }
 0x56a   :  { %8261 = vmatpush1.bf16.msra.mxu1 %v11130_v59 }
 0x56b   :  { %8507 = vmatpush1.bf16.msra.mxu0 %v11133_v58  ;;  %8262 = vmatprep.subr.bf16.mxu1 %v11138_v10 }
 0x56c   :  { %8508 = vmatprep.subr.bf16.mxu0 %v11141_v55 }
 0x56e   :  { %8263 = vmatpush1.bf16.msra.mxu1 %v11136_v31 }
 0x56f   :  { %8509 = vmatpush1.bf16.msra.mxu0 %v11139_v17  ;;  %8264 = vmatprep.subr.bf16.mxu1 %v11144_v30 }
 0x570   :  { %8510 = vmatprep.subr.bf16.mxu0 %v11147_v18  ;;  %v11191_v18 = vld [vmem:[%s16092_s7 + $0x88] sm:$0xff]  }
 0x572   :  { %8265 = vmatpush1.bf16.msra.mxu1 %v11142_v48  ;;  %v11193_v48 = vld [vmem:[%s16092_s7 + $0x90] sm:$0xff]  }
 0x573   :  { %8511 = vmatpush1.bf16.msra.mxu0 %v11145_v12  ;;  %8266 = vmatprep.subr.bf16.mxu1 %v11150_v21  ;;  %v11194_v12 = vld [vmem:[%s16092_s7 + $0xd8] sm:$0xff]  }
 0x574   :  { %8512 = vmatprep.subr.bf16.mxu0 %v11153_v45  ;;  %v11195_v21 = vld [vmem:[%s16092_s7 + $0x98] sm:$0xff]   ;;  %v11196_v45 = vld [vmem:[%s16092_s7 + $0xe0] sm:$0xff]  }
 0x576   :  { %8267 = vmatpush1.bf16.msra.mxu1 %v11148_v34  ;;  %v11197_v34 = vld [vmem:[%s16092_s7 + $0xa0] sm:$0xff]  }
 0x577   :  { %8513 = vmatpush1.bf16.msra.mxu0 %v11151_v52  ;;  %8268 = vmatprep.subr.bf16.mxu1 %v11156_v22  ;;  %v11198_v52 = vld [vmem:[%s16092_s7 + $0xe8] sm:$0xff]  }
 0x578   :  { %8514 = vmatprep.subr.bf16.mxu0 %v11159_v11  ;;  %v11199_v22 = vld [vmem:[%s16092_s7 + $0xa8] sm:$0xff]   ;;  %v6108_v11 = vrot.slane %v6095_v42, %v14997_v33  ;;  %v11203_v33 = vld [vmem:[%s16092_s7 + $0xb8] sm:$0xff]  }
 0x57a   :  { %8269 = vmatpush1.bf16.msra.mxu1 %v11154_v63  ;;  %v11200_v63 = vld [vmem:[%s16092_s7 + $0xf0] sm:$0xff]  }
 0x57b   :  { %8515 = vmatpush1.bf16.msra.mxu0 %v11157_v43  ;;  %8270 = vmatprep.subr.bf16.mxu1 %v11162_v53  ;;  %v11201_v43 = vld [vmem:[%s16092_s7 + $0xb0] sm:$0xff]  }
 0x57c   :  { %8516 = vmatprep.subr.bf16.mxu0 %v11165_v27  ;;  %v11202_v27 = vld [vmem:[%s16092_s7 + $0xf8] sm:$0xff]  }
 0x57e   :  { %8271 = vmatpush1.bf16.msra.mxu1 %v11160_v50 }
 0x57f   :  { %8517 = vmatpush1.bf16.msra.mxu0 %v11163_v20  ;;  %8272 = vmatprep.subr.bf16.mxu1 %v11168_v15 }
 0x580   :  { %8518 = vmatprep.subr.bf16.mxu0 %v11171_v23 }
 0x582   :  { %8273 = vmatpush1.bf16.msra.mxu1 %v11166_v1 }
 0x583   :  { %8519 = vmatpush1.bf16.msra.mxu0 %v11169_v44  ;;  %9939 = vmatprep.subr.bf16.mxu1 %v11172_v16  ;;  %v9770_v44 = vld [vmem:[%s16094_s8] ss:$0 sm:$0xff] }
 0x585   :  { %8275 = vmatmul.mubr.bf16.vlgmr.msra.gmra.mrb[80].mxu1 %v5709_v47 }
 0x586   :  { %8521 = vmatmul.mubr.bf16.vlgmr.msra.gmra.mrb[200].mxu0 %v5709_v47  ;;  %9940 = vmatpush3.bf16.msra.mxu1 %v11173_v46 }
 0x587   :  { %9941 = vmatprep.subr.bf16.mxu1 %v11174_v2 }
 0x58a   :  { %9942 = vmatpush3.bf16.msra.mxu1 %v11175_v40 }
 0x58b   :  { %9943 = vmatprep.subr.bf16.mxu1 %v11176_v38 }
 0x58e   :  { %9944 = vmatpush3.bf16.msra.mxu1 %v11177_v6 }
 0x58f   :  { %9945 = vmatprep.subr.bf16.mxu1 %v11178_v13 }
 0x592   :  { %9946 = vmatpush3.bf16.msra.mxu1 %v11179_v61 }
 0x593   :  { %9947 = vmatprep.subr.bf16.mxu1 %v11180_v56 }
 0x596   :  { %9948 = vmatpush3.bf16.msra.mxu1 %v11181_v35 }
 0x597   :  { %9949 = vmatprep.subr.bf16.mxu1 %v11182_v60 }
 0x59a   :  { %9950 = vmatpush3.bf16.msra.mxu1 %v11183_v32 }
 0x59b   :  { %9951 = vmatprep.subr.bf16.mxu1 %v11184_v36 }
 0x59e   :  { %9952 = vmatpush3.bf16.msra.mxu1 %v11185_v37 }
 0x59f   :  { %9953 = vmatprep.subr.bf16.mxu1 %v11186_v24 }
 0x5a2   :  { %9954 = vmatpush3.bf16.msra.mxu1 %v11187_v25 }
 0x5a3   :  { %9961 = vmatprep.subr.bf16.mxu1 %v11188_v51 }
 0x658   :  { %v8276_v14 = vpop.f32.mrb[80].mxu1 }
 0x659   :  { %v10271_v19 = vadd.f32 %v8276_v14, %v6100_v3  ;;  %v8522_v4 = vpop.f32.mrb[200].mxu0  ;;  %v8278_v29 = vpop.f32.mrb[81].mxu1 }
 0x65a   :  { %v10272_v8 = vadd.f32 %v8278_v29, %v6104_v54  ;;  %v8524_v0 = vpop.f32.mrb[201].mxu0  ;;  %v8280_v5 = vpop.f32.mrb[82].mxu1  ;;  %v10273_v53 = vadd.f32 %v8522_v4, %v6108_v11 }
 0x65b   :  { %v8529_v41 = vmax.f32 %v10271_v19, 0.0  ;;  %v10274_v59 = vadd.f32 %v8524_v0, %v6112_v49  ;;  %v8526_v58 = vpop.f32.mrb[202].mxu0  ;;  %v8281_v10 = vpop.f32.mrb[83].mxu1 }
 0x65c   :  { %v8530_v55 = vmax.f32 %v10272_v8, 0.0  ;;  %v8527_v31 = vpop.f32.mrb[203].mxu0  ;;  %v8531_v50 = vmax.f32 %v10273_v53, 0.0 }
 0x65d   :  { %v8532_v39 = vmax.f32 %v10274_v59, 0.0  ;;  %v8533_v7 = vpack.c.bf16 %v8529_v41, %v8529_v41 }
 0x65e   :  { %v8534_v17 = vpack.c.bf16 %v8530_v55, %v8530_v55  ;;  %v8535_v20 = vpack.c.bf16 %v8531_v50, %v8531_v50 }
 0x65f   :  { %v8536_v30 = vpack.c.bf16 %v8532_v39, %v8532_v39 }
 0x660   :  { %8832 = vmatprep.mubr.bf16.mxu1 %v8534_v17 }
 0x661   :  { %8833 = vmatmul.mubr.bf16.vlgmr.msra.gmra.mrb[84].mxu1 %v8533_v7 }
 0x662   :  { %9962 = vmatpush3.bf16.msra.mxu1 %v11189_v26  ;;  %8872 = vmatprep.mubr.bf16.mxu1 %v8536_v30 }
 0x663   :  { %9963 = vmatprep.subr.bf16.mxu1 %v11190_v9 }
 0x666   :  { %9964 = vmatpush3.bf16.msra.mxu1 %v11191_v18 }
 0x667   :  { %9965 = vmatprep.subr.bf16.mxu1 %v11192_v28 }
 0x66a   :  { %9966 = vmatpush3.bf16.msra.mxu1 %v11193_v48 }
 0x66b   :  { %9967 = vmatprep.subr.bf16.mxu1 %v11194_v12 }
 0x66e   :  { %9968 = vmatpush3.bf16.msra.mxu1 %v11195_v21 }
 0x66f   :  { %9969 = vmatprep.subr.bf16.mxu1 %v11196_v45 }
 0x672   :  { %9970 = vmatpush3.bf16.msra.mxu1 %v11197_v34 }
 0x673   :  { %9971 = vmatprep.subr.bf16.mxu1 %v11198_v52 }
 0x676   :  { %9972 = vmatpush3.bf16.msra.mxu1 %v11199_v22 }
 0x677   :  { %9973 = vmatprep.subr.bf16.mxu1 %v11200_v63 }
 0x67a   :  { %9974 = vmatpush3.bf16.msra.mxu1 %v11201_v43 }
 0x67b   :  { %9975 = vmatprep.subr.bf16.mxu1 %v11202_v27 }
 0x67e   :  { %9976 = vmatpush3.bf16.msra.mxu1 %v11203_v33 }
 0x681   :  { %8873 = vmatmul.mubr.bf16.vlgmr.msra.gmra.mrb[88].mxu1 %v8535_v20 }
 0x734   :  { %v9955_v15 = vpop.f32.mrb[84].mxu1 }
 0x735   :  { %v9956_v57 = vpop.f32.mrb[85].mxu1 }
 0x736   :  { %v9957_v23 = vadd.f32 %v9956_v57, %v9955_v15  ;;  %v9958_v1 = vpop.f32.mrb[86].mxu1 }
 0x737   :  { %v9959_v62 = vpop.f32.mrb[87].mxu1 }
 0x738   :  { %v8835_v47 = vadd.f32 %v9957_v23, %v9770_v44 }
 0x754   :  { %v9977_v16 = vpop.f32.mrb[88].mxu1 }
 0x755   :  { %v9978_v46 = vpop.f32.mrb[89].mxu1 }
 0x756   :  { %v9979_v2 = vadd.f32 %v9978_v46, %v9977_v16  ;;  %v9980_v40 = vpop.f32.mrb[90].mxu1 }
 0x757   :  { %v9981_v38 = vpop.f32.mrb[91].mxu1 }
 0x758   :  { %v8875_v6 = vadd.f32 %v9979_v2, %v8835_v47 }
 0x75a   :  { %8880 = vst [vmem:[%s16095_s9] sm:$0xff] %v8875_v6 }

</bundles_post_ra>
